<compile_context>
chip_gen: v7x
topology: tpu7x:2x2x1
jax: 0.10.0
libtpu: 0.0.40
codegen_flags: <defaults>
</compile_context>

<pallas_src>
import functools

import jax
import jax.numpy as jnp
from jax.experimental import pallas as pl
from jax.experimental.pallas import tpu as pltpu


def _round_up(x, m):
    return ((x + m - 1) // m) * m


# --------------------------------------------------------------------------- #
# Kernel
# --------------------------------------------------------------------------- #
def char_rnn_kernel(ids_ref,      # (Sp, 1)  int32 token ids (padded rows = 0)
                    emb_ref,      # (Vp, Hp) embedding table, VMEM-resident
                    wg0_ref,      # (Hp, 3Hp) layer-0 W_ih^T by gate (r,z,n)
                    bg0_ref,      # (1, 3Hp)  [b_ih_r+b_hh_r, b_ih_z+b_hh_z, b_ih_n] (layer 0)
                    whh0_ref,     # (Hp, 3Hp) layer-0 W_hh^T by gate
                    bhn0_ref,     # (1, Hp)   layer-0 b_hh_n
                    wk_ref,       # (max(L-1,1), 2Hp, 4Hp) K-fused weights, layers>=1
                    bk_ref,       # (max(L-1,1), 1, 4Hp)   folded biases, layers>=1
                    h0_ref,       # (L, Hp)   initial hidden
                    wd_ref,       # (Hp, Tp)  dense head
                    bd_ref,       # (1, Tp)
                    logits_ref,   # (Sp, Tp)  out
                    hout_ref,     # (L, Hp)   out — doubles as the carried state
                    gi0_scr,      # (Sp, 3Hp) scratch: precomputed layer-0 input gates
                    hx_scr,       # (Sp, Hp)  scratch: last-layer hidden per step
                    lhs_scr,      # (1, 2Hp)  scratch: K-fused matmul LHS
                    *, seq_len, n_layers):
    Hp = hout_ref.shape[1]
    Sp = gi0_scr.shape[0]
    Vp = emb_ref.shape[0]

    # ---- prologue: everything that is NOT recurrent, batched over all steps ----
    ids = ids_ref[...]                                                   # (Sp, 1)
    one_hot = (jax.lax.broadcasted_iota(jnp.int32, (Sp, Vp), 1) == ids)
    x_all = jnp.dot(one_hot.astype(jnp.float32), emb_ref[...],
                    preferred_element_type=jnp.float32)                  # (Sp, Hp)
    gi0_scr[...] = jnp.dot(x_all, wg0_ref[...],
                           preferred_element_type=jnp.float32) + bg0_ref[...]

    hx_scr[...] = jnp.zeros_like(hx_scr)
    hout_ref[...] = h0_ref[...]          # carried hidden state stays in VMEM

    # ---- recurrence over time, entirely in VMEM ----
    def step(t, carry):
        # Layer 0: input gates precomputed; only h-side matmul on the serial chain.
        h_prev = hout_ref[pl.ds(0, 1), :]                                # (1, Hp)
        gh = jnp.dot(h_prev, whh0_ref[...],
                     preferred_element_type=jnp.float32)                 # (1, 3Hp)
        gi = gi0_scr[pl.ds(t, 1), :]                                     # (1, 3Hp)
        r = jax.nn.sigmoid(gi[:, 0:Hp] + gh[:, 0:Hp])
        z = jax.nn.sigmoid(gi[:, Hp:2 * Hp] + gh[:, Hp:2 * Hp])
        n = jnp.tanh(gi[:, 2 * Hp:3 * Hp]
                     + r * (gh[:, 2 * Hp:3 * Hp] + bhn0_ref[...]))
        x = (1.0 - z) * n + z * h_prev
        hout_ref[pl.ds(0, 1), :] = x

        # Layers >= 1: one K-fused (1,2Hp)@(2Hp,4Hp) matmul, zero wasted MACs,
        # biases pre-folded into a single (1,4Hp) add.
        for l in range(1, n_layers):                                     # static
            h_prev = hout_ref[pl.ds(l, 1), :]
            lhs_scr[:, 0:Hp] = x
            lhs_scr[:, Hp:2 * Hp] = h_prev
            fused = jnp.dot(lhs_scr[...], wk_ref[l - 1],
                            preferred_element_type=jnp.float32) + bk_ref[l - 1]
            r = jax.nn.sigmoid(fused[:, 0:Hp])
            z = jax.nn.sigmoid(fused[:, Hp:2 * Hp])
            n = jnp.tanh(fused[:, 2 * Hp:3 * Hp] + r * fused[:, 3 * Hp:4 * Hp])
            x = (1.0 - z) * n + z * h_prev
            hout_ref[pl.ds(l, 1), :] = x

        hx_scr[pl.ds(t, 1), :] = x                 # last-layer hidden of step t
        return carry

    jax.lax.fori_loop(0, seq_len, step, 0, unroll=(seq_len <= 32))

    # ---- epilogue: dense head for all steps in one lane/sublane-dense matmul ----
    logits_ref[...] = (jnp.dot(hx_scr[...], wd_ref[...],
                               preferred_element_type=jnp.float32) + bd_ref[...])


# --------------------------------------------------------------------------- #
# Wrapper
# --------------------------------------------------------------------------- #
@functools.partial(jax.jit, static_argnames=("n_hidden", "n_target"))
def char_rnn_forward(token_ids, emb_p, wg0, bg0, whh0, bhn0, wk, bk,
                     h0_p, wd_p, bd_p, *, n_hidden, n_target):
    S = token_ids.shape[0]
    Sp = _round_up(S, 8)
    L, Hp = h0_p.shape
    Tp = bd_p.shape[1]

    ids_p = jnp.zeros((Sp, 1), jnp.int32).at[:S, 0].set(token_ids.astype(jnp.int32))

    kernel = functools.partial(char_rnn_kernel, seq_len=S, n_layers=L)

    grid_spec = pltpu.PrefetchScalarGridSpec(
        num_scalar_prefetch=0,
        grid=(1,),                                     # single launch; time loop is in-kernel
        in_specs=[
            pl.BlockSpec(ids_p.shape, lambda i: (0, 0)),
            pl.BlockSpec(emb_p.shape, lambda i: (0, 0)),
            pl.BlockSpec(wg0.shape,   lambda i: (0, 0)),
            pl.BlockSpec(bg0.shape,   lambda i: (0, 0)),
            pl.BlockSpec(whh0.shape,  lambda i: (0, 0)),
            pl.BlockSpec(bhn0.shape,  lambda i: (0, 0)),
            pl.BlockSpec(wk.shape,    lambda i: (0, 0, 0)),
            pl.BlockSpec(bk.shape,    lambda i: (0, 0, 0)),
            pl.BlockSpec(h0_p.shape,  lambda i: (0, 0)),
            pl.BlockSpec(wd_p.shape,  lambda i: (0, 0)),
            pl.BlockSpec(bd_p.shape,  lambda i: (0, 0)),
        ],
        out_specs=[
            pl.BlockSpec((Sp, Tp), lambda i: (0, 0)),
            pl.BlockSpec((L, Hp),  lambda i: (0, 0)),
        ],
        scratch_shapes=[
            pltpu.VMEM((Sp, 3 * Hp), jnp.float32),     # precomputed layer-0 input gates
            pltpu.VMEM((Sp, Hp), jnp.float32),         # last-layer hidden per step
            pltpu.VMEM((1, 2 * Hp), jnp.float32),      # K-fused matmul LHS
        ],
    )

    logits_p, h_p = pl.pallas_call(
        kernel,
        out_shape=(jax.ShapeDtypeStruct((Sp, Tp), jnp.float32),
                   jax.ShapeDtypeStruct((L, Hp), jnp.float32)),
        grid_spec=grid_spec,
        compiler_params=pltpu.CompilerParams(
            dimension_semantics=("arbitrary",)),       # default VMEM limit is plenty (~1 MiB used)
    )(ids_p, emb_p, wg0, bg0, whh0, bhn0, wk, bk, h0_p, wd_p, bd_p)

    # strip lane/sublane padding; hidden returned in torch layout (L, 1, H)
    return logits_p[:S, :n_target], h_p[:, None, :n_hidden]


# --------------------------------------------------------------------------- #
# Host-side packing of PyTorch-layout parameters into the kernel layout
# --------------------------------------------------------------------------- #
def pack_params(emb, w_ih, w_hh, b_ih, b_hh, wd, bd, h0):
    # emb:(V,H)  w_ih/w_hh:(L,3H,H)  b_ih/b_hh:(L,3H)  wd:(T,H)  bd:(T,)  h0:(L,1,H)
    V, H = emb.shape
    L = w_ih.shape[0]
    T = wd.shape[0]
    Hp = _round_up(H, 128)
    Tp = _round_up(T, 128)
    Vp = _round_up(V, 128)       # keeps the one-hot gather matmul fully tile-aligned

    def gate_T(w, l, g):         # (H, H) = transposed gate block, gate order r,z,n
        return w[l, g * H:(g + 1) * H, :].T

    emb_p = jnp.zeros((Vp, Hp), jnp.float32).at[:V, :H].set(emb)

    # ---- layer 0: batched input-gate weights + per-step h-side weights ----
    wg0 = jnp.zeros((Hp, 3 * Hp), jnp.float32)
    whh0 = jnp.zeros((Hp, 3 * Hp), jnp.float32)
    bg0 = jnp.zeros((1, 3 * Hp), jnp.float32)
    for g in range(3):
        wg0 = wg0.at[:H, g * Hp:g * Hp + H].set(gate_T(w_ih, 0, g))
        whh0 = whh0.at[:H, g * Hp:g * Hp + H].set(gate_T(w_hh, 0, g))
    bg0 = bg0.at[0, 0 * Hp:0 * Hp + H].set(b_ih[0, 0:H] + b_hh[0, 0:H])          # r
    bg0 = bg0.at[0, 1 * Hp:1 * Hp + H].set(b_ih[0, H:2 * H] + b_hh[0, H:2 * H])  # z
    bg0 = bg0.at[0, 2 * Hp:2 * Hp + H].set(b_ih[0, 2 * H:3 * H])                 # n (input side)
    bhn0 = jnp.zeros((1, Hp), jnp.float32).at[0, :H].set(b_hh[0, 2 * H:3 * H])   # n (hidden side)

    # ---- layers >= 1: K-fused (2Hp, 4Hp) block matrix per layer ----
    #   col block 0: gi_r+gh_r   block 1: gi_z+gh_z   block 2: gi_n   block 3: gh_n
    Lk = max(L - 1, 1)
    wk = jnp.zeros((Lk, 2 * Hp, 4 * Hp), jnp.float32)
    bk = jnp.zeros((Lk, 1, 4 * Hp), jnp.float32)
    for l in range(1, L):
        j = l - 1
        for g in range(2):       # r, z: both x and h parts share a column block
            wk = wk.at[j, :H, g * Hp:g * Hp + H].set(gate_T(w_ih, l, g))
            wk = wk.at[j, Hp:Hp + H, g * Hp:g * Hp + H].set(gate_T(w_hh, l, g))
            bk = bk.at[j, 0, g * Hp:g * Hp + H].set(
                b_ih[l, g * H:(g + 1) * H] + b_hh[l, g * H:(g + 1) * H])
        wk = wk.at[j, :H, 2 * Hp:2 * Hp + H].set(gate_T(w_ih, l, 2))             # gi_n
        wk = wk.at[j, Hp:Hp + H, 3 * Hp:3 * Hp + H].set(gate_T(w_hh, l, 2))      # gh_n
        bk = bk.at[j, 0, 2 * Hp:2 * Hp + H].set(b_ih[l, 2 * H:3 * H])
        bk = bk.at[j, 0, 3 * Hp:3 * Hp + H].set(b_hh[l, 2 * H:3 * H])

    h0_p = jnp.zeros((L, Hp), jnp.float32).at[:, :H].set(h0[:, 0, :])
    wd_p = jnp.zeros((Hp, Tp), jnp.float32).at[:H, :T].set(wd.T)
    bd_p = jnp.zeros((1, Tp), jnp.float32).at[0, :T].set(bd)
    return emb_p, wg0, bg0, whh0, bhn0, wk, bk, h0_p, wd_p, bd_p


# --------------------------------------------------------------------------- #
# Pure-JAX reference (mirrors torch.nn.GRU, one forward() per token)
# --------------------------------------------------------------------------- #
def reference_forward(token_ids, emb, w_ih, w_hh, b_ih, b_hh, h0, wd, bd):
    H = emb.shape[1]
    L = w_ih.shape[0]
    h = [h0[l] for l in range(L)]
    logits_all = []
    for tok in list(token_ids):
        x = emb[int(tok)][None, :]
        for l in range(L):
            gi = x @ w_ih[l].T + b_ih[l][None, :]
            gh = h[l] @ w_hh[l].T + b_hh[l][None, :]
            r = jax.nn.sigmoid(gi[:, :H] + gh[:, :H])
            z = jax.nn.sigmoid(gi[:, H:2 * H] + gh[:, H:2 * H])
            n = jnp.tanh(gi[:, 2 * H:] + r * gh[:, 2 * H:])
            h_new = (1.0 - z) * n + z * h[l]
            h[l] = h_new
            x = h_new
        logits_all.append(x @ wd.T + bd[None, :])
    return jnp.concatenate(logits_all, axis=0), jnp.stack(h, axis=0)


if __name__ == "__main__":
    # Small shapes implied by the module: batch=1, one token per forward() call.
    n_feature, n_hidden, n_layers, n_target = 16, 32, 2, 16
    seq_len = 8                       # number of successive forward() calls
    H, L, T = n_hidden, n_layers, n_target

    key = jax.random.PRNGKey(0)
    ks = jax.random.split(key, 8)
    k = 1.0 / jnp.sqrt(jnp.float32(H))   # PyTorch-style uniform(-1/sqrt(H), 1/sqrt(H))

    emb  = jax.random.normal(ks[0], (n_feature, H), jnp.float32)
    w_ih = jax.random.uniform(ks[1], (L, 3 * H, H), jnp.float32, -k, k)
    w_hh = jax.random.uniform(ks[2], (L, 3 * H, H), jnp.float32, -k, k)
    b_ih = jax.random.uniform(ks[3], (L, 3 * H), jnp.float32, -k, k)
    b_hh = jax.random.uniform(ks[4], (L, 3 * H), jnp.float32, -k, k)
    wd   = jax.random.uniform(ks[5], (T, H), jnp.float32, -k, k)
    bd   = jax.random.uniform(ks[6], (T,), jnp.float32, -k, k)
    h0   = jnp.zeros((L, 1, H), jnp.float32)     # hidden_state starts as None

    tokens = jax.random.randint(ks[7], (seq_len,), 0, n_feature, jnp.int32)

    # TODO(synk): dropout between GRU layers is omitted (module default dropout=0,
    # and it is inactive at inference anyway).

    packed = pack_params(emb, w_ih, w_hh, b_ih, b_hh, wd, bd, h0)
    logits, h_new = char_rnn_forward(tokens, *packed, n_hidden=H, n_target=T)
    jax.block_until_ready((logits, h_new))

    ref_logits, ref_h = reference_forward(tokens, emb, w_ih, w_hh,
                                          b_ih, b_hh, h0, wd, bd)

    assert logits.shape == (seq_len, n_target)
    assert h_new.shape == (L, 1, H)
    assert jnp.allclose(logits, ref_logits, atol=1e-3, rtol=1e-3)
    assert jnp.allclose(h_new, ref_h, atol=1e-3, rtol=1e-3)

    print("KERNEL_OK")
</pallas_src>

<mosaic_0001>
module attributes {stable_mosaic.version = 11 : i64} {
  func.func @char_rnn_kernel(%arg0: i32, %arg1: memref<8x1xi32, #tpu.memory_space<vmem>>, %arg2: memref<128x128xf32, #tpu.memory_space<vmem>>, %arg3: memref<128x384xf32, #tpu.memory_space<vmem>>, %arg4: memref<1x384xf32, #tpu.memory_space<vmem>>, %arg5: memref<128x384xf32, #tpu.memory_space<vmem>>, %arg6: memref<1x128xf32, #tpu.memory_space<vmem>>, %arg7: memref<1x256x512xf32, #tpu.memory_space<vmem>>, %arg8: memref<1x1x512xf32, #tpu.memory_space<vmem>>, %arg9: memref<2x128xf32, #tpu.memory_space<vmem>>, %arg10: memref<128x128xf32, #tpu.memory_space<vmem>>, %arg11: memref<1x128xf32, #tpu.memory_space<vmem>>, %arg12: memref<8x128xf32, #tpu.memory_space<vmem>>, %arg13: memref<2x128xf32, #tpu.memory_space<vmem>>, %arg14: memref<8x384xf32, #tpu.memory_space<vmem>>, %arg15: memref<8x128xf32, #tpu.memory_space<vmem>>, %arg16: memref<1x256xf32, #tpu.memory_space<vmem>>) attributes {dimension_semantics = [#tpu.dimension_semantics<arbitrary>], iteration_bounds = array<i64: 1>, scalar_prefetch = 0 : i64, scratch_operands = 3 : i64, tpu.core_type = #tpu.core_type<tc>, window_params = [{pipeline_mode = #tpu.pipeline_mode<synchronous>, transform_indices = @transform_0, window_bounds = array<i64: 8, 1>}, {pipeline_mode = #tpu.pipeline_mode<synchronous>, transform_indices = @transform_1, window_bounds = array<i64: 128, 128>}, {pipeline_mode = #tpu.pipeline_mode<synchronous>, transform_indices = @transform_2, window_bounds = array<i64: 128, 384>}, {pipeline_mode = #tpu.pipeline_mode<synchronous>, transform_indices = @transform_3, window_bounds = array<i64: 1, 384>}, {pipeline_mode = #tpu.pipeline_mode<synchronous>, transform_indices = @transform_4, window_bounds = array<i64: 128, 384>}, {pipeline_mode = #tpu.pipeline_mode<synchronous>, transform_indices = @transform_5, window_bounds = array<i64: 1, 128>}, {pipeline_mode = #tpu.pipeline_mode<synchronous>, transform_indices = @transform_6, window_bounds = array<i64: 1, 256, 512>}, {pipeline_mode = #tpu.pipeline_mode<synchronous>, transform_indices = @transform_7, window_bounds = array<i64: 1, 1, 512>}, {pipeline_mode = #tpu.pipeline_mode<synchronous>, transform_indices = @transform_8, window_bounds = array<i64: 2, 128>}, {pipeline_mode = #tpu.pipeline_mode<synchronous>, transform_indices = @transform_9, window_bounds = array<i64: 128, 128>}, {pipeline_mode = #tpu.pipeline_mode<synchronous>, transform_indices = @transform_10, window_bounds = array<i64: 1, 128>}, {pipeline_mode = #tpu.pipeline_mode<synchronous>, transform_indices = @transform_11, window_bounds = array<i64: 8, 128>}, {pipeline_mode = #tpu.pipeline_mode<synchronous>, transform_indices = @transform_12, window_bounds = array<i64: 2, 128>}]} {
    %c0 = arith.constant 0 : index
    %c0_0 = arith.constant 0 : index
    %0 = vector.load %arg1[%c0, %c0_0] : memref<8x1xi32, #tpu.memory_space<vmem>>, vector<8x1xi32>
    %1 = tpu.iota {dimensions = array<i32: 1>} : vector<8x128xi32>
    %2 = vector.broadcast %0 : vector<8x1xi32> to vector<8x128xi32>
    %3 = arith.cmpi eq, %1, %2 : vector<8x128xi32>
    %4 = arith.extui %3 : vector<8x128xi1> to vector<8x128xi32>
    %5 = arith.sitofp %4 : vector<8x128xi32> to vector<8x128xf32>
    %c0_1 = arith.constant 0 : index
    %c0_2 = arith.constant 0 : index
    %6 = vector.load %arg2[%c0_1, %c0_2] : memref<128x128xf32, #tpu.memory_space<vmem>>, vector<128x128xf32>
    %cst = arith.constant dense<0.000000e+00> : vector<8x128xf32>
    %7 = tpu.matmul %5, %6, %cst {dimension_numbers = #tpu.dot_dimension_numbers<[1], [0], [0], [1], [0, 0, 1, 1], [], []>} : vector<8x128xf32>, vector<128x128xf32>, vector<8x128xf32> -> vector<8x128xf32>
    %c0_3 = arith.constant 0 : index
    %c0_4 = arith.constant 0 : index
    %8 = vector.load %arg3[%c0_3, %c0_4] : memref<128x384xf32, #tpu.memory_space<vmem>>, vector<128x384xf32>
    %cst_5 = arith.constant dense<0.000000e+00> : vector<8x384xf32>
    %9 = tpu.matmul %7, %8, %cst_5 {dimension_numbers = #tpu.dot_dimension_numbers<[1], [0], [0], [1], [0, 0, 1, 1], [], []>} : vector<8x128xf32>, vector<128x384xf32>, vector<8x384xf32> -> vector<8x384xf32>
    %c0_6 = arith.constant 0 : index
    %c0_7 = arith.constant 0 : index
    %10 = vector.load %arg4[%c0_6, %c0_7] : memref<1x384xf32, #tpu.memory_space<vmem>>, vector<1x384xf32>
    %11 = vector.broadcast %10 : vector<1x384xf32> to vector<8x384xf32>
    %12 = arith.addf %9, %11 : vector<8x384xf32>
    %c0_8 = arith.constant 0 : index
    %c0_9 = arith.constant 0 : index
    %13 = vector.load %arg14[%c0_8, %c0_9] : memref<8x384xf32, #tpu.memory_space<vmem>>, vector<8x384xf32>
    tpu.vector_store %arg14[%c0_8, %c0_9], %12 {strides = array<i32>} : memref<8x384xf32, #tpu.memory_space<vmem>>, vector<8x384xf32>,
    %cst_10 = arith.constant 0.000000e+00 : f32
    %14 = vector.broadcast %cst_10 : f32 to vector<8x128xf32>
    %c0_11 = arith.constant 0 : index
    %c0_12 = arith.constant 0 : index
    %15 = vector.load %arg15[%c0_11, %c0_12] : memref<8x128xf32, #tpu.memory_space<vmem>>, vector<8x128xf32>
    tpu.vector_store %arg15[%c0_11, %c0_12], %14 {strides = array<i32>} : memref<8x128xf32, #tpu.memory_space<vmem>>, vector<8x128xf32>,
    %c0_13 = arith.constant 0 : index
    %c0_14 = arith.constant 0 : index
    %16 = vector.load %arg9[%c0_13, %c0_14] : memref<2x128xf32, #tpu.memory_space<vmem>>, vector<2x128xf32>
    %c0_15 = arith.constant 0 : index
    %c0_16 = arith.constant 0 : index
    %17 = vector.load %arg13[%c0_15, %c0_16] : memref<2x128xf32, #tpu.memory_space<vmem>>, vector<2x128xf32>
    tpu.vector_store %arg13[%c0_15, %c0_16], %16 {strides = array<i32>} : memref<2x128xf32, #tpu.memory_space<vmem>>, vector<2x128xf32>,
    %c0_i32 = arith.constant 0 : i32
    %c0_17 = arith.constant 0 : index
    %c0_18 = arith.constant 0 : index
    %18 = vector.load %arg13[%c0_17, %c0_18] : memref<2x128xf32, #tpu.memory_space<vmem>>, vector<1x128xf32>
    %c0_19 = arith.constant 0 : index
    %c0_20 = arith.constant 0 : index
    %19 = vector.load %arg5[%c0_19, %c0_20] : memref<128x384xf32, #tpu.memory_space<vmem>>, vector<128x384xf32>
    %cst_21 = arith.constant dense<0.000000e+00> : vector<1x384xf32>
    %20 = tpu.matmul %18, %19, %cst_21 {dimension_numbers = #tpu.dot_dimension_numbers<[1], [0], [0], [1], [0, 0, 1, 1], [], []>} : vector<1x128xf32>, vector<128x384xf32>, vector<1x384xf32> -> vector<1x384xf32>
    %21 = arith.index_cast %c0_i32 : i32 to index
    %c0_22 = arith.constant 0 : index
    %22 = vector.load %arg14[%21, %c0_22] : memref<8x384xf32, #tpu.memory_space<vmem>>, vector<1x384xf32>
    %23 = vector.extract_strided_slice %22 {offsets = [0, 0], sizes = [1, 128], strides = [1, 1]} : vector<1x384xf32> to vector<1x128xf32>
    %24 = vector.extract_strided_slice %20 {offsets = [0, 0], sizes = [1, 128], strides = [1, 1]} : vector<1x384xf32> to vector<1x128xf32>
    %25 = arith.addf %23, %24 : vector<1x128xf32>
    %26 = arith.negf %25 : vector<1x128xf32>
    %27 = math.exp %26 : vector<1x128xf32>
    %cst_23 = arith.constant 1.000000e+00 : f32
    %28 = vector.broadcast %cst_23 : f32 to vector<1x128xf32>
    %29 = arith.addf %28, %27 : vector<1x128xf32>
    %30 = arith.divf %28, %29 : vector<1x128xf32>
    %31 = vector.extract_strided_slice %22 {offsets = [0, 128], sizes = [1, 128], strides = [1, 1]} : vector<1x384xf32> to vector<1x128xf32>
    %32 = vector.extract_strided_slice %20 {offsets = [0, 128], sizes = [1, 128], strides = [1, 1]} : vector<1x384xf32> to vector<1x128xf32>
    %33 = arith.addf %31, %32 : vector<1x128xf32>
    %34 = arith.negf %33 : vector<1x128xf32>
    %35 = math.exp %34 : vector<1x128xf32>
    %cst_24 = arith.constant 1.000000e+00 : f32
    %36 = vector.broadcast %cst_24 : f32 to vector<1x128xf32>
    %37 = arith.addf %36, %35 : vector<1x128xf32>
    %38 = arith.divf %36, %37 : vector<1x128xf32>
    %39 = vector.extract_strided_slice %22 {offsets = [0, 256], sizes = [1, 128], strides = [1, 1]} : vector<1x384xf32> to vector<1x128xf32>
    %40 = vector.extract_strided_slice %20 {offsets = [0, 256], sizes = [1, 128], strides = [1, 1]} : vector<1x384xf32> to vector<1x128xf32>
    %c0_25 = arith.constant 0 : index
    %c0_26 = arith.constant 0 : index
    %41 = vector.load %arg6[%c0_25, %c0_26] : memref<1x128xf32, #tpu.memory_space<vmem>>, vector<1x128xf32>
    %42 = arith.addf %40, %41 : vector<1x128xf32>
    %43 = arith.mulf %30, %42 : vector<1x128xf32>
    %44 = arith.addf %39, %43 : vector<1x128xf32>
    %45 = math.tanh %44 : vector<1x128xf32>
    %cst_27 = arith.constant 1.000000e+00 : f32
    %46 = vector.broadcast %cst_27 : f32 to vector<1x128xf32>
    %47 = arith.subf %46, %38 : vector<1x128xf32>
    %48 = arith.mulf %47, %45 : vector<1x128xf32>
    %49 = arith.mulf %38, %18 : vector<1x128xf32>
    %50 = arith.addf %48, %49 : vector<1x128xf32>
    %c0_28 = arith.constant 0 : index
    %c0_29 = arith.constant 0 : index
    %51 = vector.load %arg13[%c0_28, %c0_29] : memref<2x128xf32, #tpu.memory_space<vmem>>, vector<1x128xf32>
    tpu.vector_store %arg13[%c0_28, %c0_29], %50 {strides = array<i32>} : memref<2x128xf32, #tpu.memory_space<vmem>>, vector<1x128xf32>,
    %c1 = arith.constant 1 : index
    %c0_30 = arith.constant 0 : index
    %52 = vector.load %arg13[%c1, %c0_30] : memref<2x128xf32, #tpu.memory_space<vmem>>, vector<1x128xf32>
    %c0_31 = arith.constant 0 : index
    %c0_32 = arith.constant 0 : index
    %53 = vector.load %arg16[%c0_31, %c0_32] : memref<1x256xf32, #tpu.memory_space<vmem>>, vector<1x128xf32>
    tpu.vector_store %arg16[%c0_31, %c0_32], %50 {strides = array<i32>} : memref<1x256xf32, #tpu.memory_space<vmem>>, vector<1x128xf32>,
    %c0_33 = arith.constant 0 : index
    %c128 = arith.constant 128 : index
    %54 = vector.load %arg16[%c0_33, %c128] : memref<1x256xf32, #tpu.memory_space<vmem>>, vector<1x128xf32>
    tpu.vector_store %arg16[%c0_33, %c128], %52 {strides = array<i32>} : memref<1x256xf32, #tpu.memory_space<vmem>>, vector<1x128xf32>,
    %c0_34 = arith.constant 0 : index
    %c0_35 = arith.constant 0 : index
    %55 = vector.load %arg16[%c0_34, %c0_35] : memref<1x256xf32, #tpu.memory_space<vmem>>, vector<1x256xf32>
    %c0_36 = arith.constant 0 : index
    %c0_37 = arith.constant 0 : index
    %c0_38 = arith.constant 0 : index
    %56 = vector.load %arg7[%c0_36, %c0_37, %c0_38] : memref<1x256x512xf32, #tpu.memory_space<vmem>>, vector<1x256x512xf32>
    %57 = vector.shape_cast %56 : vector<1x256x512xf32> to vector<256x512xf32>
    %cst_39 = arith.constant dense<0.000000e+00> : vector<1x512xf32>
    %58 = tpu.matmul %55, %57, %cst_39 {dimension_numbers = #tpu.dot_dimension_numbers<[1], [0], [0], [1], [0, 0, 1, 1], [], []>} : vector<1x256xf32>, vector<256x512xf32>, vector<1x512xf32> -> vector<1x512xf32>
    %c0_40 = arith.constant 0 : index
    %c0_41 = arith.constant 0 : index
    %c0_42 = arith.constant 0 : index
    %59 = vector.load %arg8[%c0_40, %c0_41, %c0_42] : memref<1x1x512xf32, #tpu.memory_space<vmem>>, vector<1x1x512xf32>
    %60 = vector.shape_cast %59 : vector<1x1x512xf32> to vector<1x512xf32>
    %61 = arith.addf %58, %60 : vector<1x512xf32>
    %62 = vector.extract_strided_slice %61 {offsets = [0, 0], sizes = [1, 128], strides = [1, 1]} : vector<1x512xf32> to vector<1x128xf32>
    %63 = arith.negf %62 : vector<1x128xf32>
    %64 = math.exp %63 : vector<1x128xf32>
    %cst_43 = arith.constant 1.000000e+00 : f32
    %65 = vector.broadcast %cst_43 : f32 to vector<1x128xf32>
    %66 = arith.addf %65, %64 : vector<1x128xf32>
    %67 = arith.divf %65, %66 : vector<1x128xf32>
    %68 = vector.extract_strided_slice %61 {offsets = [0, 128], sizes = [1, 128], strides = [1, 1]} : vector<1x512xf32> to vector<1x128xf32>
    %69 = arith.negf %68 : vector<1x128xf32>
    %70 = math.exp %69 : vector<1x128xf32>
    %cst_44 = arith.constant 1.000000e+00 : f32
    %71 = vector.broadcast %cst_44 : f32 to vector<1x128xf32>
    %72 = arith.addf %71, %70 : vector<1x128xf32>
    %73 = arith.divf %71, %72 : vector<1x128xf32>
    %74 = vector.extract_strided_slice %61 {offsets = [0, 256], sizes = [1, 128], strides = [1, 1]} : vector<1x512xf32> to vector<1x128xf32>
    %75 = vector.extract_strided_slice %61 {offsets = [0, 384], sizes = [1, 128], strides = [1, 1]} : vector<1x512xf32> to vector<1x128xf32>
    %76 = arith.mulf %67, %75 : vector<1x128xf32>
    %77 = arith.addf %74, %76 : vector<1x128xf32>
    %78 = math.tanh %77 : vector<1x128xf32>
    %cst_45 = arith.constant 1.000000e+00 : f32
    %79 = vector.broadcast %cst_45 : f32 to vector<1x128xf32>
    %80 = arith.subf %79, %73 : vector<1x128xf32>
    %81 = arith.mulf %80, %78 : vector<1x128xf32>
    %82 = arith.mulf %73, %52 : vector<1x128xf32>
    %83 = arith.addf %81, %82 : vector<1x128xf32>
    %c1_46 = arith.constant 1 : index
    %c0_47 = arith.constant 0 : index
    %84 = vector.load %arg13[%c1_46, %c0_47] : memref<2x128xf32, #tpu.memory_space<vmem>>, vector<1x128xf32>
    tpu.vector_store %arg13[%c1_46, %c0_47], %83 {strides = array<i32>} : memref<2x128xf32, #tpu.memory_space<vmem>>, vector<1x128xf32>,
    %85 = arith.index_cast %c0_i32 : i32 to index
    %c0_48 = arith.constant 0 : index
    %86 = vector.load %arg15[%85, %c0_48] : memref<8x128xf32, #tpu.memory_space<vmem>>, vector<1x128xf32>
    tpu.vector_store %arg15[%85, %c0_48], %83 {strides = array<i32>} : memref<8x128xf32, #tpu.memory_space<vmem>>, vector<1x128xf32>,
    %c1_i32 = arith.constant 1 : i32
    %c0_49 = arith.constant 0 : index
    %c0_50 = arith.constant 0 : index
    %87 = vector.load %arg13[%c0_49, %c0_50] : memref<2x128xf32, #tpu.memory_space<vmem>>, vector<1x128xf32>
    %c0_51 = arith.constant 0 : index
    %c0_52 = arith.constant 0 : index
    %88 = vector.load %arg5[%c0_51, %c0_52] : memref<128x384xf32, #tpu.memory_space<vmem>>, vector<128x384xf32>
    %cst_53 = arith.constant dense<0.000000e+00> : vector<1x384xf32>
    %89 = tpu.matmul %87, %88, %cst_53 {dimension_numbers = #tpu.dot_dimension_numbers<[1], [0], [0], [1], [0, 0, 1, 1], [], []>} : vector<1x128xf32>, vector<128x384xf32>, vector<1x384xf32> -> vector<1x384xf32>
    %90 = arith.index_cast %c1_i32 : i32 to index
    %c0_54 = arith.constant 0 : index
    %91 = vector.load %arg14[%90, %c0_54] : memref<8x384xf32, #tpu.memory_space<vmem>>, vector<1x384xf32>
    %92 = vector.extract_strided_slice %91 {offsets = [0, 0], sizes = [1, 128], strides = [1, 1]} : vector<1x384xf32> to vector<1x128xf32>
    %93 = vector.extract_strided_slice %89 {offsets = [0, 0], sizes = [1, 128], strides = [1, 1]} : vector<1x384xf32> to vector<1x128xf32>
    %94 = arith.addf %92, %93 : vector<1x128xf32>
    %95 = arith.negf %94 : vector<1x128xf32>
    %96 = math.exp %95 : vector<1x128xf32>
    %cst_55 = arith.constant 1.000000e+00 : f32
    %97 = vector.broadcast %cst_55 : f32 to vector<1x128xf32>
    %98 = arith.addf %97, %96 : vector<1x128xf32>
    %99 = arith.divf %97, %98 : vector<1x128xf32>
    %100 = vector.extract_strided_slice %91 {offsets = [0, 128], sizes = [1, 128], strides = [1, 1]} : vector<1x384xf32> to vector<1x128xf32>
    %101 = vector.extract_strided_slice %89 {offsets = [0, 128], sizes = [1, 128], strides = [1, 1]} : vector<1x384xf32> to vector<1x128xf32>
    %102 = arith.addf %100, %101 : vector<1x128xf32>
    %103 = arith.negf %102 : vector<1x128xf32>
    %104 = math.exp %103 : vector<1x128xf32>
    %cst_56 = arith.constant 1.000000e+00 : f32
    %105 = vector.broadcast %cst_56 : f32 to vector<1x128xf32>
    %106 = arith.addf %105, %104 : vector<1x128xf32>
    %107 = arith.divf %105, %106 : vector<1x128xf32>
    %108 = vector.extract_strided_slice %91 {offsets = [0, 256], sizes = [1, 128], strides = [1, 1]} : vector<1x384xf32> to vector<1x128xf32>
    %109 = vector.extract_strided_slice %89 {offsets = [0, 256], sizes = [1, 128], strides = [1, 1]} : vector<1x384xf32> to vector<1x128xf32>
    %c0_57 = arith.constant 0 : index
    %c0_58 = arith.constant 0 : index
    %110 = vector.load %arg6[%c0_57, %c0_58] : memref<1x128xf32, #tpu.memory_space<vmem>>, vector<1x128xf32>
    %111 = arith.addf %109, %110 : vector<1x128xf32>
    %112 = arith.mulf %99, %111 : vector<1x128xf32>
    %113 = arith.addf %108, %112 : vector<1x128xf32>
    %114 = math.tanh %113 : vector<1x128xf32>
    %cst_59 = arith.constant 1.000000e+00 : f32
    %115 = vector.broadcast %cst_59 : f32 to vector<1x128xf32>
    %116 = arith.subf %115, %107 : vector<1x128xf32>
    %117 = arith.mulf %116, %114 : vector<1x128xf32>
    %118 = arith.mulf %107, %87 : vector<1x128xf32>
    %119 = arith.addf %117, %118 : vector<1x128xf32>
    %c0_60 = arith.constant 0 : index
    %c0_61 = arith.constant 0 : index
    %120 = vector.load %arg13[%c0_60, %c0_61] : memref<2x128xf32, #tpu.memory_space<vmem>>, vector<1x128xf32>
    tpu.vector_store %arg13[%c0_60, %c0_61], %119 {strides = array<i32>} : memref<2x128xf32, #tpu.memory_space<vmem>>, vector<1x128xf32>,
    %c1_62 = arith.constant 1 : index
    %c0_63 = arith.constant 0 : index
    %121 = vector.load %arg13[%c1_62, %c0_63] : memref<2x128xf32, #tpu.memory_space<vmem>>, vector<1x128xf32>
    %c0_64 = arith.constant 0 : index
    %c0_65 = arith.constant 0 : index
    %122 = vector.load %arg16[%c0_64, %c0_65] : memref<1x256xf32, #tpu.memory_space<vmem>>, vector<1x128xf32>
    tpu.vector_store %arg16[%c0_64, %c0_65], %119 {strides = array<i32>} : memref<1x256xf32, #tpu.memory_space<vmem>>, vector<1x128xf32>,
    %c0_66 = arith.constant 0 : index
    %c128_67 = arith.constant 128 : index
    %123 = vector.load %arg16[%c0_66, %c128_67] : memref<1x256xf32, #tpu.memory_space<vmem>>, vector<1x128xf32>
    tpu.vector_store %arg16[%c0_66, %c128_67], %121 {strides = array<i32>} : memref<1x256xf32, #tpu.memory_space<vmem>>, vector<1x128xf32>,
    %c0_68 = arith.constant 0 : index
    %c0_69 = arith.constant 0 : index
    %124 = vector.load %arg16[%c0_68, %c0_69] : memref<1x256xf32, #tpu.memory_space<vmem>>, vector<1x256xf32>
    %c0_70 = arith.constant 0 : index
    %c0_71 = arith.constant 0 : index
    %c0_72 = arith.constant 0 : index
    %125 = vector.load %arg7[%c0_70, %c0_71, %c0_72] : memref<1x256x512xf32, #tpu.memory_space<vmem>>, vector<1x256x512xf32>
    %126 = vector.shape_cast %125 : vector<1x256x512xf32> to vector<256x512xf32>
    %cst_73 = arith.constant dense<0.000000e+00> : vector<1x512xf32>
    %127 = tpu.matmul %124, %126, %cst_73 {dimension_numbers = #tpu.dot_dimension_numbers<[1], [0], [0], [1], [0, 0, 1, 1], [], []>} : vector<1x256xf32>, vector<256x512xf32>, vector<1x512xf32> -> vector<1x512xf32>
    %c0_74 = arith.constant 0 : index
    %c0_75 = arith.constant 0 : index
    %c0_76 = arith.constant 0 : index
    %128 = vector.load %arg8[%c0_74, %c0_75, %c0_76] : memref<1x1x512xf32, #tpu.memory_space<vmem>>, vector<1x1x512xf32>
    %129 = vector.shape_cast %128 : vector<1x1x512xf32> to vector<1x512xf32>
    %130 = arith.addf %127, %129 : vector<1x512xf32>
    %131 = vector.extract_strided_slice %130 {offsets = [0, 0], sizes = [1, 128], strides = [1, 1]} : vector<1x512xf32> to vector<1x128xf32>
    %132 = arith.negf %131 : vector<1x128xf32>
    %133 = math.exp %132 : vector<1x128xf32>
    %cst_77 = arith.constant 1.000000e+00 : f32
    %134 = vector.broadcast %cst_77 : f32 to vector<1x128xf32>
    %135 = arith.addf %134, %133 : vector<1x128xf32>
    %136 = arith.divf %134, %135 : vector<1x128xf32>
    %137 = vector.extract_strided_slice %130 {offsets = [0, 128], sizes = [1, 128], strides = [1, 1]} : vector<1x512xf32> to vector<1x128xf32>
    %138 = arith.negf %137 : vector<1x128xf32>
    %139 = math.exp %138 : vector<1x128xf32>
    %cst_78 = arith.constant 1.000000e+00 : f32
    %140 = vector.broadcast %cst_78 : f32 to vector<1x128xf32>
    %141 = arith.addf %140, %139 : vector<1x128xf32>
    %142 = arith.divf %140, %141 : vector<1x128xf32>
    %143 = vector.extract_strided_slice %130 {offsets = [0, 256], sizes = [1, 128], strides = [1, 1]} : vector<1x512xf32> to vector<1x128xf32>
    %144 = vector.extract_strided_slice %130 {offsets = [0, 384], sizes = [1, 128], strides = [1, 1]} : vector<1x512xf32> to vector<1x128xf32>
    %145 = arith.mulf %136, %144 : vector<1x128xf32>
    %146 = arith.addf %143, %145 : vector<1x128xf32>
    %147 = math.tanh %146 : vector<1x128xf32>
    %cst_79 = arith.constant 1.000000e+00 : f32
    %148 = vector.broadcast %cst_79 : f32 to vector<1x128xf32>
    %149 = arith.subf %148, %142 : vector<1x128xf32>
    %150 = arith.mulf %149, %147 : vector<1x128xf32>
    %151 = arith.mulf %142, %121 : vector<1x128xf32>
    %152 = arith.addf %150, %151 : vector<1x128xf32>
    %c1_80 = arith.constant 1 : index
    %c0_81 = arith.constant 0 : index
    %153 = vector.load %arg13[%c1_80, %c0_81] : memref<2x128xf32, #tpu.memory_space<vmem>>, vector<1x128xf32>
    tpu.vector_store %arg13[%c1_80, %c0_81], %152 {strides = array<i32>} : memref<2x128xf32, #tpu.memory_space<vmem>>, vector<1x128xf32>,
    %154 = arith.index_cast %c1_i32 : i32 to index
    %c0_82 = arith.constant 0 : index
    %155 = vector.load %arg15[%154, %c0_82] : memref<8x128xf32, #tpu.memory_space<vmem>>, vector<1x128xf32>
    tpu.vector_store %arg15[%154, %c0_82], %152 {strides = array<i32>} : memref<8x128xf32, #tpu.memory_space<vmem>>, vector<1x128xf32>,
    %c2_i32 = arith.constant 2 : i32
    %c0_83 = arith.constant 0 : index
    %c0_84 = arith.constant 0 : index
    %156 = vector.load %arg13[%c0_83, %c0_84] : memref<2x128xf32, #tpu.memory_space<vmem>>, vector<1x128xf32>
    %c0_85 = arith.constant 0 : index
    %c0_86 = arith.constant 0 : index
    %157 = vector.load %arg5[%c0_85, %c0_86] : memref<128x384xf32, #tpu.memory_space<vmem>>, vector<128x384xf32>
    %cst_87 = arith.constant dense<0.000000e+00> : vector<1x384xf32>
    %158 = tpu.matmul %156, %157, %cst_87 {dimension_numbers = #tpu.dot_dimension_numbers<[1], [0], [0], [1], [0, 0, 1, 1], [], []>} : vector<1x128xf32>, vector<128x384xf32>, vector<1x384xf32> -> vector<1x384xf32>
    %159 = arith.index_cast %c2_i32 : i32 to index
    %c0_88 = arith.constant 0 : index
    %160 = vector.load %arg14[%159, %c0_88] : memref<8x384xf32, #tpu.memory_space<vmem>>, vector<1x384xf32>
    %161 = vector.extract_strided_slice %160 {offsets = [0, 0], sizes = [1, 128], strides = [1, 1]} : vector<1x384xf32> to vector<1x128xf32>
    %162 = vector.extract_strided_slice %158 {offsets = [0, 0], sizes = [1, 128], strides = [1, 1]} : vector<1x384xf32> to vector<1x128xf32>
    %163 = arith.addf %161, %162 : vector<1x128xf32>
    %164 = arith.negf %163 : vector<1x128xf32>
    %165 = math.exp %164 : vector<1x128xf32>
    %cst_89 = arith.constant 1.000000e+00 : f32
    %166 = vector.broadcast %cst_89 : f32 to vector<1x128xf32>
    %167 = arith.addf %166, %165 : vector<1x128xf32>
    %168 = arith.divf %166, %167 : vector<1x128xf32>
    %169 = vector.extract_strided_slice %160 {offsets = [0, 128], sizes = [1, 128], strides = [1, 1]} : vector<1x384xf32> to vector<1x128xf32>
    %170 = vector.extract_strided_slice %158 {offsets = [0, 128], sizes = [1, 128], strides = [1, 1]} : vector<1x384xf32> to vector<1x128xf32>
    %171 = arith.addf %169, %170 : vector<1x128xf32>
    %172 = arith.negf %171 : vector<1x128xf32>
    %173 = math.exp %172 : vector<1x128xf32>
    %cst_90 = arith.constant 1.000000e+00 : f32
    %174 = vector.broadcast %cst_90 : f32 to vector<1x128xf32>
    %175 = arith.addf %174, %173 : vector<1x128xf32>
    %176 = arith.divf %174, %175 : vector<1x128xf32>
    %177 = vector.extract_strided_slice %160 {offsets = [0, 256], sizes = [1, 128], strides = [1, 1]} : vector<1x384xf32> to vector<1x128xf32>
    %178 = vector.extract_strided_slice %158 {offsets = [0, 256], sizes = [1, 128], strides = [1, 1]} : vector<1x384xf32> to vector<1x128xf32>
    %c0_91 = arith.constant 0 : index
    %c0_92 = arith.constant 0 : index
    %179 = vector.load %arg6[%c0_91, %c0_92] : memref<1x128xf32, #tpu.memory_space<vmem>>, vector<1x128xf32>
    %180 = arith.addf %178, %179 : vector<1x128xf32>
    %181 = arith.mulf %168, %180 : vector<1x128xf32>
    %182 = arith.addf %177, %181 : vector<1x128xf32>
    %183 = math.tanh %182 : vector<1x128xf32>
    %cst_93 = arith.constant 1.000000e+00 : f32
    %184 = vector.broadcast %cst_93 : f32 to vector<1x128xf32>
    %185 = arith.subf %184, %176 : vector<1x128xf32>
    %186 = arith.mulf %185, %183 : vector<1x128xf32>
    %187 = arith.mulf %176, %156 : vector<1x128xf32>
    %188 = arith.addf %186, %187 : vector<1x128xf32>
    %c0_94 = arith.constant 0 : index
    %c0_95 = arith.constant 0 : index
    %189 = vector.load %arg13[%c0_94, %c0_95] : memref<2x128xf32, #tpu.memory_space<vmem>>, vector<1x128xf32>
    tpu.vector_store %arg13[%c0_94, %c0_95], %188 {strides = array<i32>} : memref<2x128xf32, #tpu.memory_space<vmem>>, vector<1x128xf32>,
    %c1_96 = arith.constant 1 : index
    %c0_97 = arith.constant 0 : index
    %190 = vector.load %arg13[%c1_96, %c0_97] : memref<2x128xf32, #tpu.memory_space<vmem>>, vector<1x128xf32>
    %c0_98 = arith.constant 0 : index
    %c0_99 = arith.constant 0 : index
    %191 = vector.load %arg16[%c0_98, %c0_99] : memref<1x256xf32, #tpu.memory_space<vmem>>, vector<1x128xf32>
    tpu.vector_store %arg16[%c0_98, %c0_99], %188 {strides = array<i32>} : memref<1x256xf32, #tpu.memory_space<vmem>>, vector<1x128xf32>,
    %c0_100 = arith.constant 0 : index
    %c128_101 = arith.constant 128 : index
    %192 = vector.load %arg16[%c0_100, %c128_101] : memref<1x256xf32, #tpu.memory_space<vmem>>, vector<1x128xf32>
    tpu.vector_store %arg16[%c0_100, %c128_101], %190 {strides = array<i32>} : memref<1x256xf32, #tpu.memory_space<vmem>>, vector<1x128xf32>,
    %c0_102 = arith.constant 0 : index
    %c0_103 = arith.constant 0 : index
    %193 = vector.load %arg16[%c0_102, %c0_103] : memref<1x256xf32, #tpu.memory_space<vmem>>, vector<1x256xf32>
    %c0_104 = arith.constant 0 : index
    %c0_105 = arith.constant 0 : index
    %c0_106 = arith.constant 0 : index
    %194 = vector.load %arg7[%c0_104, %c0_105, %c0_106] : memref<1x256x512xf32, #tpu.memory_space<vmem>>, vector<1x256x512xf32>
    %195 = vector.shape_cast %194 : vector<1x256x512xf32> to vector<256x512xf32>
    %cst_107 = arith.constant dense<0.000000e+00> : vector<1x512xf32>
    %196 = tpu.matmul %193, %195, %cst_107 {dimension_numbers = #tpu.dot_dimension_numbers<[1], [0], [0], [1], [0, 0, 1, 1], [], []>} : vector<1x256xf32>, vector<256x512xf32>, vector<1x512xf32> -> vector<1x512xf32>
    %c0_108 = arith.constant 0 : index
    %c0_109 = arith.constant 0 : index
    %c0_110 = arith.constant 0 : index
    %197 = vector.load %arg8[%c0_108, %c0_109, %c0_110] : memref<1x1x512xf32, #tpu.memory_space<vmem>>, vector<1x1x512xf32>
    %198 = vector.shape_cast %197 : vector<1x1x512xf32> to vector<1x512xf32>
    %199 = arith.addf %196, %198 : vector<1x512xf32>
    %200 = vector.extract_strided_slice %199 {offsets = [0, 0], sizes = [1, 128], strides = [1, 1]} : vector<1x512xf32> to vector<1x128xf32>
    %201 = arith.negf %200 : vector<1x128xf32>
    %202 = math.exp %201 : vector<1x128xf32>
    %cst_111 = arith.constant 1.000000e+00 : f32
    %203 = vector.broadcast %cst_111 : f32 to vector<1x128xf32>
    %204 = arith.addf %203, %202 : vector<1x128xf32>
    %205 = arith.divf %203, %204 : vector<1x128xf32>
    %206 = vector.extract_strided_slice %199 {offsets = [0, 128], sizes = [1, 128], strides = [1, 1]} : vector<1x512xf32> to vector<1x128xf32>
    %207 = arith.negf %206 : vector<1x128xf32>
    %208 = math.exp %207 : vector<1x128xf32>
    %cst_112 = arith.constant 1.000000e+00 : f32
    %209 = vector.broadcast %cst_112 : f32 to vector<1x128xf32>
    %210 = arith.addf %209, %208 : vector<1x128xf32>
    %211 = arith.divf %209, %210 : vector<1x128xf32>
    %212 = vector.extract_strided_slice %199 {offsets = [0, 256], sizes = [1, 128], strides = [1, 1]} : vector<1x512xf32> to vector<1x128xf32>
    %213 = vector.extract_strided_slice %199 {offsets = [0, 384], sizes = [1, 128], strides = [1, 1]} : vector<1x512xf32> to vector<1x128xf32>
    %214 = arith.mulf %205, %213 : vector<1x128xf32>
    %215 = arith.addf %212, %214 : vector<1x128xf32>
    %216 = math.tanh %215 : vector<1x128xf32>
    %cst_113 = arith.constant 1.000000e+00 : f32
    %217 = vector.broadcast %cst_113 : f32 to vector<1x128xf32>
    %218 = arith.subf %217, %211 : vector<1x128xf32>
    %219 = arith.mulf %218, %216 : vector<1x128xf32>
    %220 = arith.mulf %211, %190 : vector<1x128xf32>
    %221 = arith.addf %219, %220 : vector<1x128xf32>
    %c1_114 = arith.constant 1 : index
    %c0_115 = arith.constant 0 : index
    %222 = vector.load %arg13[%c1_114, %c0_115] : memref<2x128xf32, #tpu.memory_space<vmem>>, vector<1x128xf32>
    tpu.vector_store %arg13[%c1_114, %c0_115], %221 {strides = array<i32>} : memref<2x128xf32, #tpu.memory_space<vmem>>, vector<1x128xf32>,
    %223 = arith.index_cast %c2_i32 : i32 to index
    %c0_116 = arith.constant 0 : index
    %224 = vector.load %arg15[%223, %c0_116] : memref<8x128xf32, #tpu.memory_space<vmem>>, vector<1x128xf32>
    tpu.vector_store %arg15[%223, %c0_116], %221 {strides = array<i32>} : memref<8x128xf32, #tpu.memory_space<vmem>>, vector<1x128xf32>,
    %c3_i32 = arith.constant 3 : i32
    %c0_117 = arith.constant 0 : index
    %c0_118 = arith.constant 0 : index
    %225 = vector.load %arg13[%c0_117, %c0_118] : memref<2x128xf32, #tpu.memory_space<vmem>>, vector<1x128xf32>
    %c0_119 = arith.constant 0 : index
    %c0_120 = arith.constant 0 : index
    %226 = vector.load %arg5[%c0_119, %c0_120] : memref<128x384xf32, #tpu.memory_space<vmem>>, vector<128x384xf32>
    %cst_121 = arith.constant dense<0.000000e+00> : vector<1x384xf32>
    %227 = tpu.matmul %225, %226, %cst_121 {dimension_numbers = #tpu.dot_dimension_numbers<[1], [0], [0], [1], [0, 0, 1, 1], [], []>} : vector<1x128xf32>, vector<128x384xf32>, vector<1x384xf32> -> vector<1x384xf32>
    %228 = arith.index_cast %c3_i32 : i32 to index
    %c0_122 = arith.constant 0 : index
    %229 = vector.load %arg14[%228, %c0_122] : memref<8x384xf32, #tpu.memory_space<vmem>>, vector<1x384xf32>
    %230 = vector.extract_strided_slice %229 {offsets = [0, 0], sizes = [1, 128], strides = [1, 1]} : vector<1x384xf32> to vector<1x128xf32>
    %231 = vector.extract_strided_slice %227 {offsets = [0, 0], sizes = [1, 128], strides = [1, 1]} : vector<1x384xf32> to vector<1x128xf32>
    %232 = arith.addf %230, %231 : vector<1x128xf32>
    %233 = arith.negf %232 : vector<1x128xf32>
    %234 = math.exp %233 : vector<1x128xf32>
    %cst_123 = arith.constant 1.000000e+00 : f32
    %235 = vector.broadcast %cst_123 : f32 to vector<1x128xf32>
    %236 = arith.addf %235, %234 : vector<1x128xf32>
    %237 = arith.divf %235, %236 : vector<1x128xf32>
    %238 = vector.extract_strided_slice %229 {offsets = [0, 128], sizes = [1, 128], strides = [1, 1]} : vector<1x384xf32> to vector<1x128xf32>
    %239 = vector.extract_strided_slice %227 {offsets = [0, 128], sizes = [1, 128], strides = [1, 1]} : vector<1x384xf32> to vector<1x128xf32>
    %240 = arith.addf %238, %239 : vector<1x128xf32>
    %241 = arith.negf %240 : vector<1x128xf32>
    %242 = math.exp %241 : vector<1x128xf32>
    %cst_124 = arith.constant 1.000000e+00 : f32
    %243 = vector.broadcast %cst_124 : f32 to vector<1x128xf32>
    %244 = arith.addf %243, %242 : vector<1x128xf32>
    %245 = arith.divf %243, %244 : vector<1x128xf32>
    %246 = vector.extract_strided_slice %229 {offsets = [0, 256], sizes = [1, 128], strides = [1, 1]} : vector<1x384xf32> to vector<1x128xf32>
    %247 = vector.extract_strided_slice %227 {offsets = [0, 256], sizes = [1, 128], strides = [1, 1]} : vector<1x384xf32> to vector<1x128xf32>
    %c0_125 = arith.constant 0 : index
    %c0_126 = arith.constant 0 : index
    %248 = vector.load %arg6[%c0_125, %c0_126] : memref<1x128xf32, #tpu.memory_space<vmem>>, vector<1x128xf32>
    %249 = arith.addf %247, %248 : vector<1x128xf32>
    %250 = arith.mulf %237, %249 : vector<1x128xf32>
    %251 = arith.addf %246, %250 : vector<1x128xf32>
    %252 = math.tanh %251 : vector<1x128xf32>
    %cst_127 = arith.constant 1.000000e+00 : f32
    %253 = vector.broadcast %cst_127 : f32 to vector<1x128xf32>
    %254 = arith.subf %253, %245 : vector<1x128xf32>
    %255 = arith.mulf %254, %252 : vector<1x128xf32>
    %256 = arith.mulf %245, %225 : vector<1x128xf32>
    %257 = arith.addf %255, %256 : vector<1x128xf32>
    %c0_128 = arith.constant 0 : index
    %c0_129 = arith.constant 0 : index
    %258 = vector.load %arg13[%c0_128, %c0_129] : memref<2x128xf32, #tpu.memory_space<vmem>>, vector<1x128xf32>
    tpu.vector_store %arg13[%c0_128, %c0_129], %257 {strides = array<i32>} : memref<2x128xf32, #tpu.memory_space<vmem>>, vector<1x128xf32>,
    %c1_130 = arith.constant 1 : index
    %c0_131 = arith.constant 0 : index
    %259 = vector.load %arg13[%c1_130, %c0_131] : memref<2x128xf32, #tpu.memory_space<vmem>>, vector<1x128xf32>
    %c0_132 = arith.constant 0 : index
    %c0_133 = arith.constant 0 : index
    %260 = vector.load %arg16[%c0_132, %c0_133] : memref<1x256xf32, #tpu.memory_space<vmem>>, vector<1x128xf32>
    tpu.vector_store %arg16[%c0_132, %c0_133], %257 {strides = array<i32>} : memref<1x256xf32, #tpu.memory_space<vmem>>, vector<1x128xf32>,
    %c0_134 = arith.constant 0 : index
    %c128_135 = arith.constant 128 : index
    %261 = vector.load %arg16[%c0_134, %c128_135] : memref<1x256xf32, #tpu.memory_space<vmem>>, vector<1x128xf32>
    tpu.vector_store %arg16[%c0_134, %c128_135], %259 {strides = array<i32>} : memref<1x256xf32, #tpu.memory_space<vmem>>, vector<1x128xf32>,
    %c0_136 = arith.constant 0 : index
    %c0_137 = arith.constant 0 : index
    %262 = vector.load %arg16[%c0_136, %c0_137] : memref<1x256xf32, #tpu.memory_space<vmem>>, vector<1x256xf32>
    %c0_138 = arith.constant 0 : index
    %c0_139 = arith.constant 0 : index
    %c0_140 = arith.constant 0 : index
    %263 = vector.load %arg7[%c0_138, %c0_139, %c0_140] : memref<1x256x512xf32, #tpu.memory_space<vmem>>, vector<1x256x512xf32>
    %264 = vector.shape_cast %263 : vector<1x256x512xf32> to vector<256x512xf32>
    %cst_141 = arith.constant dense<0.000000e+00> : vector<1x512xf32>
    %265 = tpu.matmul %262, %264, %cst_141 {dimension_numbers = #tpu.dot_dimension_numbers<[1], [0], [0], [1], [0, 0, 1, 1], [], []>} : vector<1x256xf32>, vector<256x512xf32>, vector<1x512xf32> -> vector<1x512xf32>
    %c0_142 = arith.constant 0 : index
    %c0_143 = arith.constant 0 : index
    %c0_144 = arith.constant 0 : index
    %266 = vector.load %arg8[%c0_142, %c0_143, %c0_144] : memref<1x1x512xf32, #tpu.memory_space<vmem>>, vector<1x1x512xf32>
    %267 = vector.shape_cast %266 : vector<1x1x512xf32> to vector<1x512xf32>
    %268 = arith.addf %265, %267 : vector<1x512xf32>
    %269 = vector.extract_strided_slice %268 {offsets = [0, 0], sizes = [1, 128], strides = [1, 1]} : vector<1x512xf32> to vector<1x128xf32>
    %270 = arith.negf %269 : vector<1x128xf32>
    %271 = math.exp %270 : vector<1x128xf32>
    %cst_145 = arith.constant 1.000000e+00 : f32
    %272 = vector.broadcast %cst_145 : f32 to vector<1x128xf32>
    %273 = arith.addf %272, %271 : vector<1x128xf32>
    %274 = arith.divf %272, %273 : vector<1x128xf32>
    %275 = vector.extract_strided_slice %268 {offsets = [0, 128], sizes = [1, 128], strides = [1, 1]} : vector<1x512xf32> to vector<1x128xf32>
    %276 = arith.negf %275 : vector<1x128xf32>
    %277 = math.exp %276 : vector<1x128xf32>
    %cst_146 = arith.constant 1.000000e+00 : f32
    %278 = vector.broadcast %cst_146 : f32 to vector<1x128xf32>
    %279 = arith.addf %278, %277 : vector<1x128xf32>
    %280 = arith.divf %278, %279 : vector<1x128xf32>
    %281 = vector.extract_strided_slice %268 {offsets = [0, 256], sizes = [1, 128], strides = [1, 1]} : vector<1x512xf32> to vector<1x128xf32>
    %282 = vector.extract_strided_slice %268 {offsets = [0, 384], sizes = [1, 128], strides = [1, 1]} : vector<1x512xf32> to vector<1x128xf32>
    %283 = arith.mulf %274, %282 : vector<1x128xf32>
    %284 = arith.addf %281, %283 : vector<1x128xf32>
    %285 = math.tanh %284 : vector<1x128xf32>
    %cst_147 = arith.constant 1.000000e+00 : f32
    %286 = vector.broadcast %cst_147 : f32 to vector<1x128xf32>
    %287 = arith.subf %286, %280 : vector<1x128xf32>
    %288 = arith.mulf %287, %285 : vector<1x128xf32>
    %289 = arith.mulf %280, %259 : vector<1x128xf32>
    %290 = arith.addf %288, %289 : vector<1x128xf32>
    %c1_148 = arith.constant 1 : index
    %c0_149 = arith.constant 0 : index
    %291 = vector.load %arg13[%c1_148, %c0_149] : memref<2x128xf32, #tpu.memory_space<vmem>>, vector<1x128xf32>
    tpu.vector_store %arg13[%c1_148, %c0_149], %290 {strides = array<i32>} : memref<2x128xf32, #tpu.memory_space<vmem>>, vector<1x128xf32>,
    %292 = arith.index_cast %c3_i32 : i32 to index
    %c0_150 = arith.constant 0 : index
    %293 = vector.load %arg15[%292, %c0_150] : memref<8x128xf32, #tpu.memory_space<vmem>>, vector<1x128xf32>
    tpu.vector_store %arg15[%292, %c0_150], %290 {strides = array<i32>} : memref<8x128xf32, #tpu.memory_space<vmem>>, vector<1x128xf32>,
    %c4_i32 = arith.constant 4 : i32
    %c0_151 = arith.constant 0 : index
    %c0_152 = arith.constant 0 : index
    %294 = vector.load %arg13[%c0_151, %c0_152] : memref<2x128xf32, #tpu.memory_space<vmem>>, vector<1x128xf32>
    %c0_153 = arith.constant 0 : index
    %c0_154 = arith.constant 0 : index
    %295 = vector.load %arg5[%c0_153, %c0_154] : memref<128x384xf32, #tpu.memory_space<vmem>>, vector<128x384xf32>
    %cst_155 = arith.constant dense<0.000000e+00> : vector<1x384xf32>
    %296 = tpu.matmul %294, %295, %cst_155 {dimension_numbers = #tpu.dot_dimension_numbers<[1], [0], [0], [1], [0, 0, 1, 1], [], []>} : vector<1x128xf32>, vector<128x384xf32>, vector<1x384xf32> -> vector<1x384xf32>
    %297 = arith.index_cast %c4_i32 : i32 to index
    %c0_156 = arith.constant 0 : index
    %298 = vector.load %arg14[%297, %c0_156] : memref<8x384xf32, #tpu.memory_space<vmem>>, vector<1x384xf32>
    %299 = vector.extract_strided_slice %298 {offsets = [0, 0], sizes = [1, 128], strides = [1, 1]} : vector<1x384xf32> to vector<1x128xf32>
    %300 = vector.extract_strided_slice %296 {offsets = [0, 0], sizes = [1, 128], strides = [1, 1]} : vector<1x384xf32> to vector<1x128xf32>
    %301 = arith.addf %299, %300 : vector<1x128xf32>
    %302 = arith.negf %301 : vector<1x128xf32>
    %303 = math.exp %302 : vector<1x128xf32>
    %cst_157 = arith.constant 1.000000e+00 : f32
    %304 = vector.broadcast %cst_157 : f32 to vector<1x128xf32>
    %305 = arith.addf %304, %303 : vector<1x128xf32>
    %306 = arith.divf %304, %305 : vector<1x128xf32>
    %307 = vector.extract_strided_slice %298 {offsets = [0, 128], sizes = [1, 128], strides = [1, 1]} : vector<1x384xf32> to vector<1x128xf32>
    %308 = vector.extract_strided_slice %296 {offsets = [0, 128], sizes = [1, 128], strides = [1, 1]} : vector<1x384xf32> to vector<1x128xf32>
    %309 = arith.addf %307, %308 : vector<1x128xf32>
    %310 = arith.negf %309 : vector<1x128xf32>
    %311 = math.exp %310 : vector<1x128xf32>
    %cst_158 = arith.constant 1.000000e+00 : f32
    %312 = vector.broadcast %cst_158 : f32 to vector<1x128xf32>
    %313 = arith.addf %312, %311 : vector<1x128xf32>
    %314 = arith.divf %312, %313 : vector<1x128xf32>
    %315 = vector.extract_strided_slice %298 {offsets = [0, 256], sizes = [1, 128], strides = [1, 1]} : vector<1x384xf32> to vector<1x128xf32>
    %316 = vector.extract_strided_slice %296 {offsets = [0, 256], sizes = [1, 128], strides = [1, 1]} : vector<1x384xf32> to vector<1x128xf32>
    %c0_159 = arith.constant 0 : index
    %c0_160 = arith.constant 0 : index
    %317 = vector.load %arg6[%c0_159, %c0_160] : memref<1x128xf32, #tpu.memory_space<vmem>>, vector<1x128xf32>
    %318 = arith.addf %316, %317 : vector<1x128xf32>
    %319 = arith.mulf %306, %318 : vector<1x128xf32>
    %320 = arith.addf %315, %319 : vector<1x128xf32>
    %321 = math.tanh %320 : vector<1x128xf32>
    %cst_161 = arith.constant 1.000000e+00 : f32
    %322 = vector.broadcast %cst_161 : f32 to vector<1x128xf32>
    %323 = arith.subf %322, %314 : vector<1x128xf32>
    %324 = arith.mulf %323, %321 : vector<1x128xf32>
    %325 = arith.mulf %314, %294 : vector<1x128xf32>
    %326 = arith.addf %324, %325 : vector<1x128xf32>
    %c0_162 = arith.constant 0 : index
    %c0_163 = arith.constant 0 : index
    %327 = vector.load %arg13[%c0_162, %c0_163] : memref<2x128xf32, #tpu.memory_space<vmem>>, vector<1x128xf32>
    tpu.vector_store %arg13[%c0_162, %c0_163], %326 {strides = array<i32>} : memref<2x128xf32, #tpu.memory_space<vmem>>, vector<1x128xf32>,
    %c1_164 = arith.constant 1 : index
    %c0_165 = arith.constant 0 : index
    %328 = vector.load %arg13[%c1_164, %c0_165] : memref<2x128xf32, #tpu.memory_space<vmem>>, vector<1x128xf32>
    %c0_166 = arith.constant 0 : index
    %c0_167 = arith.constant 0 : index
    %329 = vector.load %arg16[%c0_166, %c0_167] : memref<1x256xf32, #tpu.memory_space<vmem>>, vector<1x128xf32>
    tpu.vector_store %arg16[%c0_166, %c0_167], %326 {strides = array<i32>} : memref<1x256xf32, #tpu.memory_space<vmem>>, vector<1x128xf32>,
    %c0_168 = arith.constant 0 : index
    %c128_169 = arith.constant 128 : index
    %330 = vector.load %arg16[%c0_168, %c128_169] : memref<1x256xf32, #tpu.memory_space<vmem>>, vector<1x128xf32>
    tpu.vector_store %arg16[%c0_168, %c128_169], %328 {strides = array<i32>} : memref<1x256xf32, #tpu.memory_space<vmem>>, vector<1x128xf32>,
    %c0_170 = arith.constant 0 : index
    %c0_171 = arith.constant 0 : index
    %331 = vector.load %arg16[%c0_170, %c0_171] : memref<1x256xf32, #tpu.memory_space<vmem>>, vector<1x256xf32>
    %c0_172 = arith.constant 0 : index
    %c0_173 = arith.constant 0 : index
    %c0_174 = arith.constant 0 : index
    %332 = vector.load %arg7[%c0_172, %c0_173, %c0_174] : memref<1x256x512xf32, #tpu.memory_space<vmem>>, vector<1x256x512xf32>
    %333 = vector.shape_cast %332 : vector<1x256x512xf32> to vector<256x512xf32>
    %cst_175 = arith.constant dense<0.000000e+00> : vector<1x512xf32>
    %334 = tpu.matmul %331, %333, %cst_175 {dimension_numbers = #tpu.dot_dimension_numbers<[1], [0], [0], [1], [0, 0, 1, 1], [], []>} : vector<1x256xf32>, vector<256x512xf32>, vector<1x512xf32> -> vector<1x512xf32>
    %c0_176 = arith.constant 0 : index
    %c0_177 = arith.constant 0 : index
    %c0_178 = arith.constant 0 : index
    %335 = vector.load %arg8[%c0_176, %c0_177, %c0_178] : memref<1x1x512xf32, #tpu.memory_space<vmem>>, vector<1x1x512xf32>
    %336 = vector.shape_cast %335 : vector<1x1x512xf32> to vector<1x512xf32>
    %337 = arith.addf %334, %336 : vector<1x512xf32>
    %338 = vector.extract_strided_slice %337 {offsets = [0, 0], sizes = [1, 128], strides = [1, 1]} : vector<1x512xf32> to vector<1x128xf32>
    %339 = arith.negf %338 : vector<1x128xf32>
    %340 = math.exp %339 : vector<1x128xf32>
    %cst_179 = arith.constant 1.000000e+00 : f32
    %341 = vector.broadcast %cst_179 : f32 to vector<1x128xf32>
    %342 = arith.addf %341, %340 : vector<1x128xf32>
    %343 = arith.divf %341, %342 : vector<1x128xf32>
    %344 = vector.extract_strided_slice %337 {offsets = [0, 128], sizes = [1, 128], strides = [1, 1]} : vector<1x512xf32> to vector<1x128xf32>
    %345 = arith.negf %344 : vector<1x128xf32>
    %346 = math.exp %345 : vector<1x128xf32>
    %cst_180 = arith.constant 1.000000e+00 : f32
    %347 = vector.broadcast %cst_180 : f32 to vector<1x128xf32>
    %348 = arith.addf %347, %346 : vector<1x128xf32>
    %349 = arith.divf %347, %348 : vector<1x128xf32>
    %350 = vector.extract_strided_slice %337 {offsets = [0, 256], sizes = [1, 128], strides = [1, 1]} : vector<1x512xf32> to vector<1x128xf32>
    %351 = vector.extract_strided_slice %337 {offsets = [0, 384], sizes = [1, 128], strides = [1, 1]} : vector<1x512xf32> to vector<1x128xf32>
    %352 = arith.mulf %343, %351 : vector<1x128xf32>
    %353 = arith.addf %350, %352 : vector<1x128xf32>
    %354 = math.tanh %353 : vector<1x128xf32>
    %cst_181 = arith.constant 1.000000e+00 : f32
    %355 = vector.broadcast %cst_181 : f32 to vector<1x128xf32>
    %356 = arith.subf %355, %349 : vector<1x128xf32>
    %357 = arith.mulf %356, %354 : vector<1x128xf32>
    %358 = arith.mulf %349, %328 : vector<1x128xf32>
    %359 = arith.addf %357, %358 : vector<1x128xf32>
    %c1_182 = arith.constant 1 : index
    %c0_183 = arith.constant 0 : index
    %360 = vector.load %arg13[%c1_182, %c0_183] : memref<2x128xf32, #tpu.memory_space<vmem>>, vector<1x128xf32>
    tpu.vector_store %arg13[%c1_182, %c0_183], %359 {strides = array<i32>} : memref<2x128xf32, #tpu.memory_space<vmem>>, vector<1x128xf32>,
    %361 = arith.index_cast %c4_i32 : i32 to index
    %c0_184 = arith.constant 0 : index
    %362 = vector.load %arg15[%361, %c0_184] : memref<8x128xf32, #tpu.memory_space<vmem>>, vector<1x128xf32>
    tpu.vector_store %arg15[%361, %c0_184], %359 {strides = array<i32>} : memref<8x128xf32, #tpu.memory_space<vmem>>, vector<1x128xf32>,
    %c5_i32 = arith.constant 5 : i32
    %c0_185 = arith.constant 0 : index
    %c0_186 = arith.constant 0 : index
    %363 = vector.load %arg13[%c0_185, %c0_186] : memref<2x128xf32, #tpu.memory_space<vmem>>, vector<1x128xf32>
    %c0_187 = arith.constant 0 : index
    %c0_188 = arith.constant 0 : index
    %364 = vector.load %arg5[%c0_187, %c0_188] : memref<128x384xf32, #tpu.memory_space<vmem>>, vector<128x384xf32>
    %cst_189 = arith.constant dense<0.000000e+00> : vector<1x384xf32>
    %365 = tpu.matmul %363, %364, %cst_189 {dimension_numbers = #tpu.dot_dimension_numbers<[1], [0], [0], [1], [0, 0, 1, 1], [], []>} : vector<1x128xf32>, vector<128x384xf32>, vector<1x384xf32> -> vector<1x384xf32>
    %366 = arith.index_cast %c5_i32 : i32 to index
    %c0_190 = arith.constant 0 : index
    %367 = vector.load %arg14[%366, %c0_190] : memref<8x384xf32, #tpu.memory_space<vmem>>, vector<1x384xf32>
    %368 = vector.extract_strided_slice %367 {offsets = [0, 0], sizes = [1, 128], strides = [1, 1]} : vector<1x384xf32> to vector<1x128xf32>
    %369 = vector.extract_strided_slice %365 {offsets = [0, 0], sizes = [1, 128], strides = [1, 1]} : vector<1x384xf32> to vector<1x128xf32>
    %370 = arith.addf %368, %369 : vector<1x128xf32>
    %371 = arith.negf %370 : vector<1x128xf32>
    %372 = math.exp %371 : vector<1x128xf32>
    %cst_191 = arith.constant 1.000000e+00 : f32
    %373 = vector.broadcast %cst_191 : f32 to vector<1x128xf32>
    %374 = arith.addf %373, %372 : vector<1x128xf32>
    %375 = arith.divf %373, %374 : vector<1x128xf32>
    %376 = vector.extract_strided_slice %367 {offsets = [0, 128], sizes = [1, 128], strides = [1, 1]} : vector<1x384xf32> to vector<1x128xf32>
    %377 = vector.extract_strided_slice %365 {offsets = [0, 128], sizes = [1, 128], strides = [1, 1]} : vector<1x384xf32> to vector<1x128xf32>
    %378 = arith.addf %376, %377 : vector<1x128xf32>
    %379 = arith.negf %378 : vector<1x128xf32>
    %380 = math.exp %379 : vector<1x128xf32>
    %cst_192 = arith.constant 1.000000e+00 : f32
    %381 = vector.broadcast %cst_192 : f32 to vector<1x128xf32>
    %382 = arith.addf %381, %380 : vector<1x128xf32>
    %383 = arith.divf %381, %382 : vector<1x128xf32>
    %384 = vector.extract_strided_slice %367 {offsets = [0, 256], sizes = [1, 128], strides = [1, 1]} : vector<1x384xf32> to vector<1x128xf32>
    %385 = vector.extract_strided_slice %365 {offsets = [0, 256], sizes = [1, 128], strides = [1, 1]} : vector<1x384xf32> to vector<1x128xf32>
    %c0_193 = arith.constant 0 : index
    %c0_194 = arith.constant 0 : index
    %386 = vector.load %arg6[%c0_193, %c0_194] : memref<1x128xf32, #tpu.memory_space<vmem>>, vector<1x128xf32>
    %387 = arith.addf %385, %386 : vector<1x128xf32>
    %388 = arith.mulf %375, %387 : vector<1x128xf32>
    %389 = arith.addf %384, %388 : vector<1x128xf32>
    %390 = math.tanh %389 : vector<1x128xf32>
    %cst_195 = arith.constant 1.000000e+00 : f32
    %391 = vector.broadcast %cst_195 : f32 to vector<1x128xf32>
    %392 = arith.subf %391, %383 : vector<1x128xf32>
    %393 = arith.mulf %392, %390 : vector<1x128xf32>
    %394 = arith.mulf %383, %363 : vector<1x128xf32>
    %395 = arith.addf %393, %394 : vector<1x128xf32>
    %c0_196 = arith.constant 0 : index
    %c0_197 = arith.constant 0 : index
    %396 = vector.load %arg13[%c0_196, %c0_197] : memref<2x128xf32, #tpu.memory_space<vmem>>, vector<1x128xf32>
    tpu.vector_store %arg13[%c0_196, %c0_197], %395 {strides = array<i32>} : memref<2x128xf32, #tpu.memory_space<vmem>>, vector<1x128xf32>,
    %c1_198 = arith.constant 1 : index
    %c0_199 = arith.constant 0 : index
    %397 = vector.load %arg13[%c1_198, %c0_199] : memref<2x128xf32, #tpu.memory_space<vmem>>, vector<1x128xf32>
    %c0_200 = arith.constant 0 : index
    %c0_201 = arith.constant 0 : index
    %398 = vector.load %arg16[%c0_200, %c0_201] : memref<1x256xf32, #tpu.memory_space<vmem>>, vector<1x128xf32>
    tpu.vector_store %arg16[%c0_200, %c0_201], %395 {strides = array<i32>} : memref<1x256xf32, #tpu.memory_space<vmem>>, vector<1x128xf32>,
    %c0_202 = arith.constant 0 : index
    %c128_203 = arith.constant 128 : index
    %399 = vector.load %arg16[%c0_202, %c128_203] : memref<1x256xf32, #tpu.memory_space<vmem>>, vector<1x128xf32>
    tpu.vector_store %arg16[%c0_202, %c128_203], %397 {strides = array<i32>} : memref<1x256xf32, #tpu.memory_space<vmem>>, vector<1x128xf32>,
    %c0_204 = arith.constant 0 : index
    %c0_205 = arith.constant 0 : index
    %400 = vector.load %arg16[%c0_204, %c0_205] : memref<1x256xf32, #tpu.memory_space<vmem>>, vector<1x256xf32>
    %c0_206 = arith.constant 0 : index
    %c0_207 = arith.constant 0 : index
    %c0_208 = arith.constant 0 : index
    %401 = vector.load %arg7[%c0_206, %c0_207, %c0_208] : memref<1x256x512xf32, #tpu.memory_space<vmem>>, vector<1x256x512xf32>
    %402 = vector.shape_cast %401 : vector<1x256x512xf32> to vector<256x512xf32>
    %cst_209 = arith.constant dense<0.000000e+00> : vector<1x512xf32>
    %403 = tpu.matmul %400, %402, %cst_209 {dimension_numbers = #tpu.dot_dimension_numbers<[1], [0], [0], [1], [0, 0, 1, 1], [], []>} : vector<1x256xf32>, vector<256x512xf32>, vector<1x512xf32> -> vector<1x512xf32>
    %c0_210 = arith.constant 0 : index
    %c0_211 = arith.constant 0 : index
    %c0_212 = arith.constant 0 : index
    %404 = vector.load %arg8[%c0_210, %c0_211, %c0_212] : memref<1x1x512xf32, #tpu.memory_space<vmem>>, vector<1x1x512xf32>
    %405 = vector.shape_cast %404 : vector<1x1x512xf32> to vector<1x512xf32>
    %406 = arith.addf %403, %405 : vector<1x512xf32>
    %407 = vector.extract_strided_slice %406 {offsets = [0, 0], sizes = [1, 128], strides = [1, 1]} : vector<1x512xf32> to vector<1x128xf32>
    %408 = arith.negf %407 : vector<1x128xf32>
    %409 = math.exp %408 : vector<1x128xf32>
    %cst_213 = arith.constant 1.000000e+00 : f32
    %410 = vector.broadcast %cst_213 : f32 to vector<1x128xf32>
    %411 = arith.addf %410, %409 : vector<1x128xf32>
    %412 = arith.divf %410, %411 : vector<1x128xf32>
    %413 = vector.extract_strided_slice %406 {offsets = [0, 128], sizes = [1, 128], strides = [1, 1]} : vector<1x512xf32> to vector<1x128xf32>
    %414 = arith.negf %413 : vector<1x128xf32>
    %415 = math.exp %414 : vector<1x128xf32>
    %cst_214 = arith.constant 1.000000e+00 : f32
    %416 = vector.broadcast %cst_214 : f32 to vector<1x128xf32>
    %417 = arith.addf %416, %415 : vector<1x128xf32>
    %418 = arith.divf %416, %417 : vector<1x128xf32>
    %419 = vector.extract_strided_slice %406 {offsets = [0, 256], sizes = [1, 128], strides = [1, 1]} : vector<1x512xf32> to vector<1x128xf32>
    %420 = vector.extract_strided_slice %406 {offsets = [0, 384], sizes = [1, 128], strides = [1, 1]} : vector<1x512xf32> to vector<1x128xf32>
    %421 = arith.mulf %412, %420 : vector<1x128xf32>
    %422 = arith.addf %419, %421 : vector<1x128xf32>
    %423 = math.tanh %422 : vector<1x128xf32>
    %cst_215 = arith.constant 1.000000e+00 : f32
    %424 = vector.broadcast %cst_215 : f32 to vector<1x128xf32>
    %425 = arith.subf %424, %418 : vector<1x128xf32>
    %426 = arith.mulf %425, %423 : vector<1x128xf32>
    %427 = arith.mulf %418, %397 : vector<1x128xf32>
    %428 = arith.addf %426, %427 : vector<1x128xf32>
    %c1_216 = arith.constant 1 : index
    %c0_217 = arith.constant 0 : index
    %429 = vector.load %arg13[%c1_216, %c0_217] : memref<2x128xf32, #tpu.memory_space<vmem>>, vector<1x128xf32>
    tpu.vector_store %arg13[%c1_216, %c0_217], %428 {strides = array<i32>} : memref<2x128xf32, #tpu.memory_space<vmem>>, vector<1x128xf32>,
    %430 = arith.index_cast %c5_i32 : i32 to index
    %c0_218 = arith.constant 0 : index
    %431 = vector.load %arg15[%430, %c0_218] : memref<8x128xf32, #tpu.memory_space<vmem>>, vector<1x128xf32>
    tpu.vector_store %arg15[%430, %c0_218], %428 {strides = array<i32>} : memref<8x128xf32, #tpu.memory_space<vmem>>, vector<1x128xf32>,
    %c6_i32 = arith.constant 6 : i32
    %c0_219 = arith.constant 0 : index
    %c0_220 = arith.constant 0 : index
    %432 = vector.load %arg13[%c0_219, %c0_220] : memref<2x128xf32, #tpu.memory_space<vmem>>, vector<1x128xf32>
    %c0_221 = arith.constant 0 : index
    %c0_222 = arith.constant 0 : index
    %433 = vector.load %arg5[%c0_221, %c0_222] : memref<128x384xf32, #tpu.memory_space<vmem>>, vector<128x384xf32>
    %cst_223 = arith.constant dense<0.000000e+00> : vector<1x384xf32>
    %434 = tpu.matmul %432, %433, %cst_223 {dimension_numbers = #tpu.dot_dimension_numbers<[1], [0], [0], [1], [0, 0, 1, 1], [], []>} : vector<1x128xf32>, vector<128x384xf32>, vector<1x384xf32> -> vector<1x384xf32>
    %435 = arith.index_cast %c6_i32 : i32 to index
    %c0_224 = arith.constant 0 : index
    %436 = vector.load %arg14[%435, %c0_224] : memref<8x384xf32, #tpu.memory_space<vmem>>, vector<1x384xf32>
    %437 = vector.extract_strided_slice %436 {offsets = [0, 0], sizes = [1, 128], strides = [1, 1]} : vector<1x384xf32> to vector<1x128xf32>
    %438 = vector.extract_strided_slice %434 {offsets = [0, 0], sizes = [1, 128], strides = [1, 1]} : vector<1x384xf32> to vector<1x128xf32>
    %439 = arith.addf %437, %438 : vector<1x128xf32>
    %440 = arith.negf %439 : vector<1x128xf32>
    %441 = math.exp %440 : vector<1x128xf32>
    %cst_225 = arith.constant 1.000000e+00 : f32
    %442 = vector.broadcast %cst_225 : f32 to vector<1x128xf32>
    %443 = arith.addf %442, %441 : vector<1x128xf32>
    %444 = arith.divf %442, %443 : vector<1x128xf32>
    %445 = vector.extract_strided_slice %436 {offsets = [0, 128], sizes = [1, 128], strides = [1, 1]} : vector<1x384xf32> to vector<1x128xf32>
    %446 = vector.extract_strided_slice %434 {offsets = [0, 128], sizes = [1, 128], strides = [1, 1]} : vector<1x384xf32> to vector<1x128xf32>
    %447 = arith.addf %445, %446 : vector<1x128xf32>
    %448 = arith.negf %447 : vector<1x128xf32>
    %449 = math.exp %448 : vector<1x128xf32>
    %cst_226 = arith.constant 1.000000e+00 : f32
    %450 = vector.broadcast %cst_226 : f32 to vector<1x128xf32>
    %451 = arith.addf %450, %449 : vector<1x128xf32>
    %452 = arith.divf %450, %451 : vector<1x128xf32>
    %453 = vector.extract_strided_slice %436 {offsets = [0, 256], sizes = [1, 128], strides = [1, 1]} : vector<1x384xf32> to vector<1x128xf32>
    %454 = vector.extract_strided_slice %434 {offsets = [0, 256], sizes = [1, 128], strides = [1, 1]} : vector<1x384xf32> to vector<1x128xf32>
    %c0_227 = arith.constant 0 : index
    %c0_228 = arith.constant 0 : index
    %455 = vector.load %arg6[%c0_227, %c0_228] : memref<1x128xf32, #tpu.memory_space<vmem>>, vector<1x128xf32>
    %456 = arith.addf %454, %455 : vector<1x128xf32>
    %457 = arith.mulf %444, %456 : vector<1x128xf32>
    %458 = arith.addf %453, %457 : vector<1x128xf32>
    %459 = math.tanh %458 : vector<1x128xf32>
    %cst_229 = arith.constant 1.000000e+00 : f32
    %460 = vector.broadcast %cst_229 : f32 to vector<1x128xf32>
    %461 = arith.subf %460, %452 : vector<1x128xf32>
    %462 = arith.mulf %461, %459 : vector<1x128xf32>
    %463 = arith.mulf %452, %432 : vector<1x128xf32>
    %464 = arith.addf %462, %463 : vector<1x128xf32>
    %c0_230 = arith.constant 0 : index
    %c0_231 = arith.constant 0 : index
    %465 = vector.load %arg13[%c0_230, %c0_231] : memref<2x128xf32, #tpu.memory_space<vmem>>, vector<1x128xf32>
    tpu.vector_store %arg13[%c0_230, %c0_231], %464 {strides = array<i32>} : memref<2x128xf32, #tpu.memory_space<vmem>>, vector<1x128xf32>,
    %c1_232 = arith.constant 1 : index
    %c0_233 = arith.constant 0 : index
    %466 = vector.load %arg13[%c1_232, %c0_233] : memref<2x128xf32, #tpu.memory_space<vmem>>, vector<1x128xf32>
    %c0_234 = arith.constant 0 : index
    %c0_235 = arith.constant 0 : index
    %467 = vector.load %arg16[%c0_234, %c0_235] : memref<1x256xf32, #tpu.memory_space<vmem>>, vector<1x128xf32>
    tpu.vector_store %arg16[%c0_234, %c0_235], %464 {strides = array<i32>} : memref<1x256xf32, #tpu.memory_space<vmem>>, vector<1x128xf32>,
    %c0_236 = arith.constant 0 : index
    %c128_237 = arith.constant 128 : index
    %468 = vector.load %arg16[%c0_236, %c128_237] : memref<1x256xf32, #tpu.memory_space<vmem>>, vector<1x128xf32>
    tpu.vector_store %arg16[%c0_236, %c128_237], %466 {strides = array<i32>} : memref<1x256xf32, #tpu.memory_space<vmem>>, vector<1x128xf32>,
    %c0_238 = arith.constant 0 : index
    %c0_239 = arith.constant 0 : index
    %469 = vector.load %arg16[%c0_238, %c0_239] : memref<1x256xf32, #tpu.memory_space<vmem>>, vector<1x256xf32>
    %c0_240 = arith.constant 0 : index
    %c0_241 = arith.constant 0 : index
    %c0_242 = arith.constant 0 : index
    %470 = vector.load %arg7[%c0_240, %c0_241, %c0_242] : memref<1x256x512xf32, #tpu.memory_space<vmem>>, vector<1x256x512xf32>
    %471 = vector.shape_cast %470 : vector<1x256x512xf32> to vector<256x512xf32>
    %cst_243 = arith.constant dense<0.000000e+00> : vector<1x512xf32>
    %472 = tpu.matmul %469, %471, %cst_243 {dimension_numbers = #tpu.dot_dimension_numbers<[1], [0], [0], [1], [0, 0, 1, 1], [], []>} : vector<1x256xf32>, vector<256x512xf32>, vector<1x512xf32> -> vector<1x512xf32>
    %c0_244 = arith.constant 0 : index
    %c0_245 = arith.constant 0 : index
    %c0_246 = arith.constant 0 : index
    %473 = vector.load %arg8[%c0_244, %c0_245, %c0_246] : memref<1x1x512xf32, #tpu.memory_space<vmem>>, vector<1x1x512xf32>
    %474 = vector.shape_cast %473 : vector<1x1x512xf32> to vector<1x512xf32>
    %475 = arith.addf %472, %474 : vector<1x512xf32>
    %476 = vector.extract_strided_slice %475 {offsets = [0, 0], sizes = [1, 128], strides = [1, 1]} : vector<1x512xf32> to vector<1x128xf32>
    %477 = arith.negf %476 : vector<1x128xf32>
    %478 = math.exp %477 : vector<1x128xf32>
    %cst_247 = arith.constant 1.000000e+00 : f32
    %479 = vector.broadcast %cst_247 : f32 to vector<1x128xf32>
    %480 = arith.addf %479, %478 : vector<1x128xf32>
    %481 = arith.divf %479, %480 : vector<1x128xf32>
    %482 = vector.extract_strided_slice %475 {offsets = [0, 128], sizes = [1, 128], strides = [1, 1]} : vector<1x512xf32> to vector<1x128xf32>
    %483 = arith.negf %482 : vector<1x128xf32>
    %484 = math.exp %483 : vector<1x128xf32>
    %cst_248 = arith.constant 1.000000e+00 : f32
    %485 = vector.broadcast %cst_248 : f32 to vector<1x128xf32>
    %486 = arith.addf %485, %484 : vector<1x128xf32>
    %487 = arith.divf %485, %486 : vector<1x128xf32>
    %488 = vector.extract_strided_slice %475 {offsets = [0, 256], sizes = [1, 128], strides = [1, 1]} : vector<1x512xf32> to vector<1x128xf32>
    %489 = vector.extract_strided_slice %475 {offsets = [0, 384], sizes = [1, 128], strides = [1, 1]} : vector<1x512xf32> to vector<1x128xf32>
    %490 = arith.mulf %481, %489 : vector<1x128xf32>
    %491 = arith.addf %488, %490 : vector<1x128xf32>
    %492 = math.tanh %491 : vector<1x128xf32>
    %cst_249 = arith.constant 1.000000e+00 : f32
    %493 = vector.broadcast %cst_249 : f32 to vector<1x128xf32>
    %494 = arith.subf %493, %487 : vector<1x128xf32>
    %495 = arith.mulf %494, %492 : vector<1x128xf32>
    %496 = arith.mulf %487, %466 : vector<1x128xf32>
    %497 = arith.addf %495, %496 : vector<1x128xf32>
    %c1_250 = arith.constant 1 : index
    %c0_251 = arith.constant 0 : index
    %498 = vector.load %arg13[%c1_250, %c0_251] : memref<2x128xf32, #tpu.memory_space<vmem>>, vector<1x128xf32>
    tpu.vector_store %arg13[%c1_250, %c0_251], %497 {strides = array<i32>} : memref<2x128xf32, #tpu.memory_space<vmem>>, vector<1x128xf32>,
    %499 = arith.index_cast %c6_i32 : i32 to index
    %c0_252 = arith.constant 0 : index
    %500 = vector.load %arg15[%499, %c0_252] : memref<8x128xf32, #tpu.memory_space<vmem>>, vector<1x128xf32>
    tpu.vector_store %arg15[%499, %c0_252], %497 {strides = array<i32>} : memref<8x128xf32, #tpu.memory_space<vmem>>, vector<1x128xf32>,
    %c7_i32 = arith.constant 7 : i32
    %c0_253 = arith.constant 0 : index
    %c0_254 = arith.constant 0 : index
    %501 = vector.load %arg13[%c0_253, %c0_254] : memref<2x128xf32, #tpu.memory_space<vmem>>, vector<1x128xf32>
    %c0_255 = arith.constant 0 : index
    %c0_256 = arith.constant 0 : index
    %502 = vector.load %arg5[%c0_255, %c0_256] : memref<128x384xf32, #tpu.memory_space<vmem>>, vector<128x384xf32>
    %cst_257 = arith.constant dense<0.000000e+00> : vector<1x384xf32>
    %503 = tpu.matmul %501, %502, %cst_257 {dimension_numbers = #tpu.dot_dimension_numbers<[1], [0], [0], [1], [0, 0, 1, 1], [], []>} : vector<1x128xf32>, vector<128x384xf32>, vector<1x384xf32> -> vector<1x384xf32>
    %504 = arith.index_cast %c7_i32 : i32 to index
    %c0_258 = arith.constant 0 : index
    %505 = vector.load %arg14[%504, %c0_258] : memref<8x384xf32, #tpu.memory_space<vmem>>, vector<1x384xf32>
    %506 = vector.extract_strided_slice %505 {offsets = [0, 0], sizes = [1, 128], strides = [1, 1]} : vector<1x384xf32> to vector<1x128xf32>
    %507 = vector.extract_strided_slice %503 {offsets = [0, 0], sizes = [1, 128], strides = [1, 1]} : vector<1x384xf32> to vector<1x128xf32>
    %508 = arith.addf %506, %507 : vector<1x128xf32>
    %509 = arith.negf %508 : vector<1x128xf32>
    %510 = math.exp %509 : vector<1x128xf32>
    %cst_259 = arith.constant 1.000000e+00 : f32
    %511 = vector.broadcast %cst_259 : f32 to vector<1x128xf32>
    %512 = arith.addf %511, %510 : vector<1x128xf32>
    %513 = arith.divf %511, %512 : vector<1x128xf32>
    %514 = vector.extract_strided_slice %505 {offsets = [0, 128], sizes = [1, 128], strides = [1, 1]} : vector<1x384xf32> to vector<1x128xf32>
    %515 = vector.extract_strided_slice %503 {offsets = [0, 128], sizes = [1, 128], strides = [1, 1]} : vector<1x384xf32> to vector<1x128xf32>
    %516 = arith.addf %514, %515 : vector<1x128xf32>
    %517 = arith.negf %516 : vector<1x128xf32>
    %518 = math.exp %517 : vector<1x128xf32>
    %cst_260 = arith.constant 1.000000e+00 : f32
    %519 = vector.broadcast %cst_260 : f32 to vector<1x128xf32>
    %520 = arith.addf %519, %518 : vector<1x128xf32>
    %521 = arith.divf %519, %520 : vector<1x128xf32>
    %522 = vector.extract_strided_slice %505 {offsets = [0, 256], sizes = [1, 128], strides = [1, 1]} : vector<1x384xf32> to vector<1x128xf32>
    %523 = vector.extract_strided_slice %503 {offsets = [0, 256], sizes = [1, 128], strides = [1, 1]} : vector<1x384xf32> to vector<1x128xf32>
    %c0_261 = arith.constant 0 : index
    %c0_262 = arith.constant 0 : index
    %524 = vector.load %arg6[%c0_261, %c0_262] : memref<1x128xf32, #tpu.memory_space<vmem>>, vector<1x128xf32>
    %525 = arith.addf %523, %524 : vector<1x128xf32>
    %526 = arith.mulf %513, %525 : vector<1x128xf32>
    %527 = arith.addf %522, %526 : vector<1x128xf32>
    %528 = math.tanh %527 : vector<1x128xf32>
    %cst_263 = arith.constant 1.000000e+00 : f32
    %529 = vector.broadcast %cst_263 : f32 to vector<1x128xf32>
    %530 = arith.subf %529, %521 : vector<1x128xf32>
    %531 = arith.mulf %530, %528 : vector<1x128xf32>
    %532 = arith.mulf %521, %501 : vector<1x128xf32>
    %533 = arith.addf %531, %532 : vector<1x128xf32>
    %c0_264 = arith.constant 0 : index
    %c0_265 = arith.constant 0 : index
    %534 = vector.load %arg13[%c0_264, %c0_265] : memref<2x128xf32, #tpu.memory_space<vmem>>, vector<1x128xf32>
    tpu.vector_store %arg13[%c0_264, %c0_265], %533 {strides = array<i32>} : memref<2x128xf32, #tpu.memory_space<vmem>>, vector<1x128xf32>,
    %c1_266 = arith.constant 1 : index
    %c0_267 = arith.constant 0 : index
    %535 = vector.load %arg13[%c1_266, %c0_267] : memref<2x128xf32, #tpu.memory_space<vmem>>, vector<1x128xf32>
    %c0_268 = arith.constant 0 : index
    %c0_269 = arith.constant 0 : index
    %536 = vector.load %arg16[%c0_268, %c0_269] : memref<1x256xf32, #tpu.memory_space<vmem>>, vector<1x128xf32>
    tpu.vector_store %arg16[%c0_268, %c0_269], %533 {strides = array<i32>} : memref<1x256xf32, #tpu.memory_space<vmem>>, vector<1x128xf32>,
    %c0_270 = arith.constant 0 : index
    %c128_271 = arith.constant 128 : index
    %537 = vector.load %arg16[%c0_270, %c128_271] : memref<1x256xf32, #tpu.memory_space<vmem>>, vector<1x128xf32>
    tpu.vector_store %arg16[%c0_270, %c128_271], %535 {strides = array<i32>} : memref<1x256xf32, #tpu.memory_space<vmem>>, vector<1x128xf32>,
    %c0_272 = arith.constant 0 : index
    %c0_273 = arith.constant 0 : index
    %538 = vector.load %arg16[%c0_272, %c0_273] : memref<1x256xf32, #tpu.memory_space<vmem>>, vector<1x256xf32>
    %c0_274 = arith.constant 0 : index
    %c0_275 = arith.constant 0 : index
    %c0_276 = arith.constant 0 : index
    %539 = vector.load %arg7[%c0_274, %c0_275, %c0_276] : memref<1x256x512xf32, #tpu.memory_space<vmem>>, vector<1x256x512xf32>
    %540 = vector.shape_cast %539 : vector<1x256x512xf32> to vector<256x512xf32>
    %cst_277 = arith.constant dense<0.000000e+00> : vector<1x512xf32>
    %541 = tpu.matmul %538, %540, %cst_277 {dimension_numbers = #tpu.dot_dimension_numbers<[1], [0], [0], [1], [0, 0, 1, 1], [], []>} : vector<1x256xf32>, vector<256x512xf32>, vector<1x512xf32> -> vector<1x512xf32>
    %c0_278 = arith.constant 0 : index
    %c0_279 = arith.constant 0 : index
    %c0_280 = arith.constant 0 : index
    %542 = vector.load %arg8[%c0_278, %c0_279, %c0_280] : memref<1x1x512xf32, #tpu.memory_space<vmem>>, vector<1x1x512xf32>
    %543 = vector.shape_cast %542 : vector<1x1x512xf32> to vector<1x512xf32>
    %544 = arith.addf %541, %543 : vector<1x512xf32>
    %545 = vector.extract_strided_slice %544 {offsets = [0, 0], sizes = [1, 128], strides = [1, 1]} : vector<1x512xf32> to vector<1x128xf32>
    %546 = arith.negf %545 : vector<1x128xf32>
    %547 = math.exp %546 : vector<1x128xf32>
    %cst_281 = arith.constant 1.000000e+00 : f32
    %548 = vector.broadcast %cst_281 : f32 to vector<1x128xf32>
    %549 = arith.addf %548, %547 : vector<1x128xf32>
    %550 = arith.divf %548, %549 : vector<1x128xf32>
    %551 = vector.extract_strided_slice %544 {offsets = [0, 128], sizes = [1, 128], strides = [1, 1]} : vector<1x512xf32> to vector<1x128xf32>
    %552 = arith.negf %551 : vector<1x128xf32>
    %553 = math.exp %552 : vector<1x128xf32>
    %cst_282 = arith.constant 1.000000e+00 : f32
    %554 = vector.broadcast %cst_282 : f32 to vector<1x128xf32>
    %555 = arith.addf %554, %553 : vector<1x128xf32>
    %556 = arith.divf %554, %555 : vector<1x128xf32>
    %557 = vector.extract_strided_slice %544 {offsets = [0, 256], sizes = [1, 128], strides = [1, 1]} : vector<1x512xf32> to vector<1x128xf32>
    %558 = vector.extract_strided_slice %544 {offsets = [0, 384], sizes = [1, 128], strides = [1, 1]} : vector<1x512xf32> to vector<1x128xf32>
    %559 = arith.mulf %550, %558 : vector<1x128xf32>
    %560 = arith.addf %557, %559 : vector<1x128xf32>
    %561 = math.tanh %560 : vector<1x128xf32>
    %cst_283 = arith.constant 1.000000e+00 : f32
    %562 = vector.broadcast %cst_283 : f32 to vector<1x128xf32>
    %563 = arith.subf %562, %556 : vector<1x128xf32>
    %564 = arith.mulf %563, %561 : vector<1x128xf32>
    %565 = arith.mulf %556, %535 : vector<1x128xf32>
    %566 = arith.addf %564, %565 : vector<1x128xf32>
    %c1_284 = arith.constant 1 : index
    %c0_285 = arith.constant 0 : index
    %567 = vector.load %arg13[%c1_284, %c0_285] : memref<2x128xf32, #tpu.memory_space<vmem>>, vector<1x128xf32>
    tpu.vector_store %arg13[%c1_284, %c0_285], %566 {strides = array<i32>} : memref<2x128xf32, #tpu.memory_space<vmem>>, vector<1x128xf32>,
    %568 = arith.index_cast %c7_i32 : i32 to index
    %c0_286 = arith.constant 0 : index
    %569 = vector.load %arg15[%568, %c0_286] : memref<8x128xf32, #tpu.memory_space<vmem>>, vector<1x128xf32>
    tpu.vector_store %arg15[%568, %c0_286], %566 {strides = array<i32>} : memref<8x128xf32, #tpu.memory_space<vmem>>, vector<1x128xf32>,
    %c8_i32 = arith.constant 8 : i32
    %c0_287 = arith.constant 0 : index
    %c0_288 = arith.constant 0 : index
    %570 = vector.load %arg15[%c0_287, %c0_288] : memref<8x128xf32, #tpu.memory_space<vmem>>, vector<8x128xf32>
    %c0_289 = arith.constant 0 : index
    %c0_290 = arith.constant 0 : index
    %571 = vector.load %arg10[%c0_289, %c0_290] : memref<128x128xf32, #tpu.memory_space<vmem>>, vector<128x128xf32>
    %cst_291 = arith.constant dense<0.000000e+00> : vector<8x128xf32>
    %572 = tpu.matmul %570, %571, %cst_291 {dimension_numbers = #tpu.dot_dimension_numbers<[1], [0], [0], [1], [0, 0, 1, 1], [], []>} : vector<8x128xf32>, vector<128x128xf32>, vector<8x128xf32> -> vector<8x128xf32>
    %c0_292 = arith.constant 0 : index
    %c0_293 = arith.constant 0 : index
    %573 = vector.load %arg11[%c0_292, %c0_293] : memref<1x128xf32, #tpu.memory_space<vmem>>, vector<1x128xf32>
    %574 = vector.broadcast %573 : vector<1x128xf32> to vector<8x128xf32>
    %575 = arith.addf %572, %574 : vector<8x128xf32>
    %c0_294 = arith.constant 0 : index
    %c0_295 = arith.constant 0 : index
    %576 = vector.load %arg12[%c0_294, %c0_295] : memref<8x128xf32, #tpu.memory_space<vmem>>, vector<8x128xf32>
    tpu.vector_store %arg12[%c0_294, %c0_295], %575 {strides = array<i32>} : memref<8x128xf32, #tpu.memory_space<vmem>>, vector<8x128xf32>,
    return
  }
  func.func @transform_0(%arg0: i32) -> (i32, i32) {
    %c0_i32 = arith.constant 0 : i32
    %c0_i32_0 = arith.constant 0 : i32
    %c0_i32_1 = arith.constant 0 : i32
    return %c0_i32, %c0_i32_0 : i32, i32
  }
  func.func @transform_1(%arg0: i32) -> (i32, i32) {
    %c0_i32 = arith.constant 0 : i32
    %c0_i32_0 = arith.constant 0 : i32
    %c0_i32_1 = arith.constant 0 : i32
    return %c0_i32, %c0_i32_0 : i32, i32
  }
  func.func @transform_2(%arg0: i32) -> (i32, i32) {
    %c0_i32 = arith.constant 0 : i32
    %c0_i32_0 = arith.constant 0 : i32
    %c0_i32_1 = arith.constant 0 : i32
    return %c0_i32, %c0_i32_0 : i32, i32
  }
  func.func @transform_3(%arg0: i32) -> (i32, i32) {
    %c0_i32 = arith.constant 0 : i32
    %c0_i32_0 = arith.constant 0 : i32
    %c0_i32_1 = arith.constant 0 : i32
    return %c0_i32, %c0_i32_0 : i32, i32
  }
  func.func @transform_4(%arg0: i32) -> (i32, i32) {
    %c0_i32 = arith.constant 0 : i32
    %c0_i32_0 = arith.constant 0 : i32
    %c0_i32_1 = arith.constant 0 : i32
    return %c0_i32, %c0_i32_0 : i32, i32
  }
  func.func @transform_5(%arg0: i32) -> (i32, i32) {
    %c0_i32 = arith.constant 0 : i32
    %c0_i32_0 = arith.constant 0 : i32
    %c0_i32_1 = arith.constant 0 : i32
    return %c0_i32, %c0_i32_0 : i32, i32
  }
  func.func @transform_6(%arg0: i32) -> (i32, i32, i32) {
    %c0_i32 = arith.constant 0 : i32
    %c0_i32_0 = arith.constant 0 : i32
    %c0_i32_1 = arith.constant 0 : i32
    %c0_i32_2 = arith.constant 0 : i32
    return %c0_i32, %c0_i32_0, %c0_i32_1 : i32, i32, i32
  }
  func.func @transform_7(%arg0: i32) -> (i32, i32, i32) {
    %c0_i32 = arith.constant 0 : i32
    %c0_i32_0 = arith.constant 0 : i32
    %c0_i32_1 = arith.constant 0 : i32
    %c0_i32_2 = arith.constant 0 : i32
    return %c0_i32, %c0_i32_0, %c0_i32_1 : i32, i32, i32
  }
  func.func @transform_8(%arg0: i32) -> (i32, i32) {
    %c0_i32 = arith.constant 0 : i32
    %c0_i32_0 = arith.constant 0 : i32
    %c0_i32_1 = arith.constant 0 : i32
    return %c0_i32, %c0_i32_0 : i32, i32
  }
  func.func @transform_9(%arg0: i32) -> (i32, i32) {
    %c0_i32 = arith.constant 0 : i32
    %c0_i32_0 = arith.constant 0 : i32
    %c0_i32_1 = arith.constant 0 : i32
    return %c0_i32, %c0_i32_0 : i32, i32
  }
  func.func @transform_10(%arg0: i32) -> (i32, i32) {
    %c0_i32 = arith.constant 0 : i32
    %c0_i32_0 = arith.constant 0 : i32
    %c0_i32_1 = arith.constant 0 : i32
    return %c0_i32, %c0_i32_0 : i32, i32
  }
  func.func @transform_11(%arg0: i32) -> (i32, i32) {
    %c0_i32 = arith.constant 0 : i32
    %c0_i32_0 = arith.constant 0 : i32
    %c0_i32_1 = arith.constant 0 : i32
    return %c0_i32, %c0_i32_0 : i32, i32
  }
  func.func @transform_12(%arg0: i32) -> (i32, i32) {
    %c0_i32 = arith.constant 0 : i32
    %c0_i32_0 = arith.constant 0 : i32
    %c0_i32_1 = arith.constant 0 : i32
    return %c0_i32, %c0_i32_0 : i32, i32
  }
}

</mosaic_0001>

<bundles_post_ra>
// kernel: char_rnn_forward.1
= control target key start
LH: loop header
LB: loop body
LE: loop exit
PB: predicated region body
PF: predicated region fallthrough
CT: control target
= control target key end

     0   :  { %18 = vsyncpa [#allocation6], 0  ;;  %s9410_s0 = inlined_call_operand.vmem [shape: s32[8,1], index: 0, kind: input, shape index: {}]   ;;  %s9411_s1 = inlined_call_operand.hbm [shape: f32[128,128], index: 1, kind: input, shape index: {}]   ;;  %s9412_s2 = inlined_call_operand.hbm [shape: f32[128,384], index: 2, kind: input, shape index: {}]   ;;  %s9413_s3 = inlined_call_operand.vmem [shape: f32[1,384], index: 3, kind: input, shape index: {}]   ;;  %s9414_s4 = inlined_call_operand.hbm [shape: f32[128,384], index: 4, kind: input, shape index: {}]   ;;  %s9415_s5 = inlined_call_operand.vmem [shape: f32[1,128], index: 5, kind: input, shape index: {}]   ;;  %s9416_s6 = inlined_call_operand.hbm [shape: f32[1,256,512], index: 6, kind: input, shape index: {}]   ;;  %s9417_s7 = inlined_call_operand.vmem [shape: f32[1,1,512], index: 7, kind: input, shape index: {}]   ;;  %s9418_s8 = inlined_call_operand.vmem [shape: f32[2,128], index: 8, kind: input, shape index: {}]   ;;  %s9419_s9 = inlined_call_operand.hbm [shape: f32[128,128], index: 9, kind: input, shape index: {}]   ;;  %s9420_s10 = inlined_call_operand.vmem [shape: f32[1,128], index: 10, kind: input, shape index: {}]   ;;  %s9421_s11 = inlined_call_operand.hbm [shape: f32[8,128], index: 11, kind: output, shape index: {0}]   ;;  %s9422_s12 = inlined_call_operand.hbm [shape: f32[2,128], index: 12, kind: output, shape index: {1}]  }
   0x1   :  { %19 = vsyncpa [#allocation9], 0 }
   0x2   :  { %20 = vsyncpa [#allocation12], 0 }
   0x3   :  { %21 = vsyncpa [#allocation7], 0 }
   0x4   :  { %22 = vsyncpa [#allocation16], 0  ;;  %s7465_s21 = smov [#allocation8]   ;;  %s7301_s25 = scalar_lea.hbm %s9412_s2, 6144 }
   0x5   :  { %s42_s22 = sshll.u32 %s7465_s21, 4  ;;  %p7302_p0 = scmp.ne.s32.totalorder %s9412_s2, %s7301_s25  ;;  %s43_s22 = int_to_ptr.vmem [resolvable:$true] %s42_s22 }
   0x6   :  { %p7305_p1 = scmp.lt.u32.totalorder %s7301_s25, %s9412_s2 }
   0x8   :  { %p7307_p2 = pnand %p7305_p1, %p7302_p0 }
   0xa   :  { %7310 = shalt.err (!%p7307_p2)
}
   0xb   :  { %s7311_s30 = scalar_lea.vmem %s43_s22, 6144  ;;  %p7316_p4 = scmp.lt.s32.totalorder %s43_s22, %s43_s22 }
   0xc   :  { %p7312_p3 = scmp.ne.s32.totalorder %s43_s22, %s7311_s30  ;;  %p7317_p5 = scmp.lt.s32.totalorder %s7311_s30, %s7311_s30 }
   0xe   :  { %p7318_p6 = por %p7317_p5, %p7316_p4 }
  0x10   :  { %p7319_p7 = pnand %p7318_p6, %p7312_p3 }
  0x12   :  { %7322 = shalt.err (!%p7319_p7)
}
  0x13   :  { %s7466_s13 = smov 384   ;;  %s7467_s14 = smov 24  }
  0x14   :  { %48 = dma.hbm_to_vmem [thread:$0]  %s9412_s2, 6144, %s43_s22, [#allocation9], %s7466_s13, %s7466_s13, %s7467_s14  }
  0x15   :  { %s7468_s17 = smov [#allocation11]   ;;  %s7323_s21 = scalar_lea.hbm %s9416_s6, 16384 }
  0x16   :  { %s70_s18 = sshll.u32 %s7468_s17, 4  ;;  %p7324_p8 = scmp.ne.s32.totalorder %s9416_s6, %s7323_s21  ;;  %s71_s18 = int_to_ptr.vmem [resolvable:$true] %s70_s18 }
  0x17   :  { %p7327_p9 = scmp.lt.u32.totalorder %s7323_s21, %s9416_s6 }
  0x19   :  { %p7329_p10 = pnand %p7327_p9, %p7324_p8 }
  0x1b   :  { %7332 = shalt.err (!%p7329_p10)
}
  0x1c   :  { %s7333_s27 = scalar_lea.vmem %s71_s18, 16384  ;;  %p7338_p12 = scmp.lt.s32.totalorder %s71_s18, %s71_s18 }
  0x1d   :  { %p7334_p11 = scmp.ne.s32.totalorder %s71_s18, %s7333_s27  ;;  %p7339_p13 = scmp.lt.s32.totalorder %s7333_s27, %s7333_s27 }
  0x1f   :  { %p7340_p0 = por %p7339_p13, %p7338_p12 }
  0x21   :  { %p7341_p1 = pnand %p7340_p0, %p7334_p11 }
  0x23   :  { %7344 = shalt.err (!%p7341_p1)
}
  0x24   :  { %s7469_s2 = smov 512   ;;  %s7470_s22 = smov 32  }
  0x25   :  { %76 = dma.hbm_to_vmem [thread:$0]  %s9416_s6, 16384, %s71_s18, [#allocation12], %s7469_s2, %s7469_s2, %s7470_s22  }
  0x26   :  { %s7471_s30 = smov [#allocation5]   ;;  %s7345_s19 = scalar_lea.hbm %s9411_s1, 2048 }
  0x27   :  { %s30_s15 = sshll.u32 %s7471_s30, 4  ;;  %p7346_p2 = scmp.ne.s32.totalorder %s9411_s1, %s7345_s19  ;;  %s31_s15 = int_to_ptr.vmem [resolvable:$true] %s30_s15 }
  0x28   :  { %p7349_p3 = scmp.lt.u32.totalorder %s7345_s19, %s9411_s1 }
  0x2a   :  { %p7351_p4 = pnand %p7349_p3, %p7346_p2 }
  0x2c   :  { %7354 = shalt.err (!%p7351_p4)
}
  0x2d   :  { %s7355_s25 = scalar_lea.vmem %s31_s15, 2048  ;;  %p7360_p6 = scmp.lt.s32.totalorder %s31_s15, %s31_s15 }
  0x2e   :  { %p7356_p5 = scmp.ne.s32.totalorder %s31_s15, %s7355_s25  ;;  %p7361_p7 = scmp.lt.s32.totalorder %s7355_s25, %s7355_s25 }
  0x30   :  { %p7362_p8 = por %p7361_p7, %p7360_p6 }
  0x32   :  { %p7363_p9 = pnand %p7362_p8, %p7356_p5 }
  0x34   :  { %7366 = shalt.err (!%p7363_p9)
}
  0x35   :  { %s7472_s6 = smov 128   ;;  %s7473_s18 = smov 8  }
  0x36   :  { %36 = dma.hbm_to_vmem [thread:$0]  %s9411_s1, 2048, %s31_s15, [#allocation6], %s7472_s6, %s7472_s6, %s7473_s18  }
  0x37   :  { %s7474_s2 = smov [#allocation10]   ;;  %s7475_s28 = smov [#allocation13]  }
  0x38   :  { %s56_s22 = sshll.u32 %s7474_s2, 4  ;;  %s86_s29 = sshll.u32 %s7475_s28, 4  ;;  %s57_s22 = int_to_ptr.vmem [resolvable:$true] %s56_s22  ;;  %s87_s29 = int_to_ptr.vmem [resolvable:$true] %s86_s29 }
  0x39   :  { %s7367_s17 = scalar_lea.hbm %s9414_s4, 6144 }
  0x3a   :  { %p7368_p10 = scmp.ne.s32.totalorder %s9414_s4, %s7367_s17  ;;  %p7371_p11 = scmp.lt.u32.totalorder %s7367_s17, %s9414_s4 }
  0x3c   :  { %p7373_p12 = pnand %p7371_p11, %p7368_p10 }
  0x3e   :  { %7376 = shalt.err (!%p7373_p12)
}
  0x3f   :  { %s7377_s1 = scalar_lea.vmem %s57_s22, 6144  ;;  %p7382_p0 = scmp.lt.s32.totalorder %s57_s22, %s57_s22 }
  0x40   :  { %p7378_p13 = scmp.ne.s32.totalorder %s57_s22, %s7377_s1  ;;  %p7383_p1 = scmp.lt.s32.totalorder %s7377_s1, %s7377_s1 }
  0x42   :  { %p7384_p2 = por %p7383_p1, %p7382_p0 }
  0x44   :  { %p7385_p3 = pnand %p7384_p2, %p7378_p13 }
  0x46   :  { %7388 = shalt.err (!%p7385_p3)
}
  0x47   :  { %62 = dma.hbm_to_vmem [thread:$0]  %s9414_s4, 6144, %s57_s22, [#allocation9], %s7466_s13, %s7466_s13, %s7467_s14  }
  0x48   :  { %s7389_s27 = scalar_lea.hbm %s9419_s9, 2048 }
  0x49   :  { %p7390_p4 = scmp.ne.s32.totalorder %s9419_s9, %s7389_s27  ;;  %p7393_p5 = scmp.lt.u32.totalorder %s7389_s27, %s9419_s9 }
  0x4b   :  { %p7395_p6 = pnand %p7393_p5, %p7390_p4 }
  0x4d   :  { %7398 = shalt.err (!%p7395_p6)
}
  0x4e   :  { %s7399_s17 = scalar_lea.vmem %s87_s29, 2048  ;;  %p7404_p8 = scmp.lt.s32.totalorder %s87_s29, %s87_s29 }
  0x4f   :  { %p7400_p7 = scmp.ne.s32.totalorder %s87_s29, %s7399_s17  ;;  %p7405_p9 = scmp.lt.s32.totalorder %s7399_s17, %s7399_s17 }
  0x51   :  { %p7406_p10 = por %p7405_p9, %p7404_p8 }
  0x53   :  { %p7407_p11 = pnand %p7406_p10, %p7400_p7 }
  0x55   :  { %7410 = shalt.err (!%p7407_p11)
}
  0x56   :  { %92 = dma.hbm_to_vmem [thread:$0]  %s9419_s9, 2048, %s87_s29, [#allocation12], %s7472_s6, %s7472_s6, %s7473_s18  }
  0x57   :  { %7455 = dma.done.wait [#allocation6], 2048  }
  0x58   :  { %7456 = vsyncadd [#allocation6], 4294965248 }
  0x59   :  { %7457 = dma.done.wait [#allocation9], 12288  }
  0x5a   :  { %7458 = vsyncadd [#allocation9], 4294955008 }
  0x5b   :  { %7459 = dma.done.wait [#allocation12], 18432  }
  0x5c   :  { %7460 = vsyncadd [#allocation12], 4294948864  ;;  %v7476_v0 = vmov 0   ;;  %v9424_v1 = vmov 0.0|0.0   ;;  %v110_v2 = vld [vmem:[%s9410_s0] sm:$0xff]  ;;  %v120_v4 = vld [vmem:[#allocation5 + $0x8] sm:$0xff] }
  0x5d   :  { %7139 = vset.pattern.permute.xlu0 %v7476_v0  ;;  %5545 = vmatprep.subr.bf16.mxu0 %v9424_v1  ;;  %v119_v3 = vld [vmem:[#allocation5] sm:$0xff]  ;;  %v121_v6 = vld [vmem:[#allocation5 + $0x10] sm:$0xff]  ;;  %v122_v7 = vld [vmem:[#allocation5 + $0x18] sm:$0xff]  ;;  %vm7478_vm0 = vmmov 0   ;;  %v7479_v8 = vmov 0.0  }
  0x5e   :  { %114 = vperm.xlu0 %7139, %v110_v2   ;;  %v5546_v5 = vpack.c.bf16 %v120_v4, %v119_v3  ;;  %5192 = vmatprep.mubr.msk.f32.mxu0 %vm7478_vm0, %v7479_v8  ;;  %414 = vst [vmem:[#allocation3] sm:$0xff] %v7479_v8  ;;  %v5549_v9 = vpack.c.bf16 %v122_v7, %v121_v6  ;;  %v123_v10 = vld [vmem:[#allocation5 + $0x20] sm:$0xff]  ;;  %v124_v11 = vld [vmem:[#allocation5 + $0x28] sm:$0xff]  ;;  %v208_v15 = vld [vmem:[#allocation8 + $0x18] sm:$0xff] }
  0x5f   :  { %334 = vmatprep.mubr.f32.mxu1 %v7479_v8  ;;  %v206_v12 = vld [vmem:[#allocation8 + $0x8] sm:$0xff]  ;;  %v209_v13 = vld [vmem:[#allocation8 + $0x20] sm:$0xff]  ;;  %v5552_v16 = vpack.c.bf16 %v124_v11, %v123_v10  ;;  %v125_v17 = vld [vmem:[#allocation5 + $0x30] sm:$0xff] }
  0x60   :  { %5547 = vmatpush3.bf16.msra.mxu0 %v5546_v5  ;;  %v205_v14 = vld [vmem:[#allocation8] sm:$0xff]  ;;  %v126_v18 = vld [vmem:[#allocation5 + $0x38] sm:$0xff]  ;;  %v5569_v19 = vpack.c.bf16 %v209_v13, %v206_v12  ;;  %v215_v22 = vld [vmem:[#allocation8 + $0x50] sm:$0xff] }
  0x61   :  { %5548 = vmatprep.subr.bf16.mxu0 %v9424_v1  ;;  %v5571_v20 = vpack.c.bf16 %v208_v15, %v205_v14  ;;  %v212_v21 = vld [vmem:[#allocation8 + $0x38] sm:$0xff]  ;;  %v211_v23 = vld [vmem:[#allocation8 + $0x30] sm:$0xff]  ;;  %v214_v24 = vld [vmem:[#allocation8 + $0x48] sm:$0xff]  ;;  %v5555_v29 = vpack.c.bf16 %v126_v18, %v125_v17  ;;  %v9423_v14 = vlaneseq }
  0x62   :  { %5570 = vmatprep.subr.bf16.mxu1 %v5569_v19  ;;  %v5573_v25 = vpack.c.bf16 %v215_v22, %v212_v21  ;;  %v218_v26 = vld [vmem:[#allocation8 + $0x68] sm:$0xff]  ;;  %v5575_v27 = vpack.c.bf16 %v214_v24, %v211_v23  ;;  %v221_v28 = vld [vmem:[#allocation8 + $0x80] sm:$0xff]  ;;  %v220_v33 = vld [vmem:[#allocation8 + $0x78] sm:$0xff]  ;;  %v7480_v22 = vmov 1.0  }
  0x63   :  { %5572 = vmatpush1.bf16.msra.mxu1 %v5571_v20  ;;  %v127_v30 = vld [vmem:[#allocation5 + $0x40] sm:$0xff]  ;;  %v5577_v31 = vpack.c.bf16 %v221_v28, %v218_v26  ;;  %v128_v34 = vld [vmem:[#allocation5 + $0x48] sm:$0xff]  ;;  %v224_v35 = vld [vmem:[#allocation8 + $0x98] sm:$0xff]  ;;  %v112_v17 = vand.u32 127, %v9423_v14  ;;  %vm7654_vm2 = vcmp.lt.s32.totalorder %v9423_v14, 128 }
  0x64   :  { %5550 = vmatpush3.bf16.msra.mxu0 %v5549_v9  ;;  %5574 = vmatprep.subr.bf16.mxu1 %v5573_v25  ;;  %v217_v32 = vld [vmem:[#allocation8 + $0x60] sm:$0xff]  ;;  %v227_v36 = vld [vmem:[#allocation8 + $0xb0] sm:$0xff]  ;;  %v5558_v38 = vpack.c.bf16 %v128_v34, %v127_v30  ;;  %v226_v42 = vld [vmem:[#allocation8 + $0xa8] sm:$0xff] }
  0x65   :  { %5551 = vmatprep.subr.bf16.mxu0 %v9424_v1  ;;  %v5579_v37 = vpack.c.bf16 %v220_v33, %v217_v32  ;;  %v129_v39 = vld [vmem:[#allocation5 + $0x50] sm:$0xff]  ;;  %v5581_v40 = vpack.c.bf16 %v227_v36, %v224_v35  ;;  %v130_v43 = vld [vmem:[#allocation5 + $0x58] sm:$0xff]  ;;  %v230_v44 = vld [vmem:[#allocation8 + $0xc8] sm:$0xff] }
  0x66   :  { %v223_v41 = vld [vmem:[#allocation8 + $0x90] sm:$0xff]  ;;  %v233_v45 = vld [vmem:[#allocation8 + $0xe0] sm:$0xff]  ;;  %v5561_v47 = vpack.c.bf16 %v130_v43, %v129_v39  ;;  %v232_v51 = vld [vmem:[#allocation8 + $0xd8] sm:$0xff] }
  0x67   :  { %5576 = vmatpush1.bf16.msra.mxu1 %v5575_v27  ;;  %v5583_v46 = vpack.c.bf16 %v226_v42, %v223_v41  ;;  %v131_v48 = vld [vmem:[#allocation5 + $0x60] sm:$0xff]  ;;  %v5585_v49 = vpack.c.bf16 %v233_v45, %v230_v44  ;;  %v132_v52 = vld [vmem:[#allocation5 + $0x68] sm:$0xff]  ;;  %v236_v53 = vld [vmem:[#allocation8 + $0xf8] sm:$0xff] }
  0x68   :  { %5553 = vmatpush3.bf16.msra.mxu0 %v5552_v16  ;;  %5578 = vmatprep.subr.bf16.mxu1 %v5577_v31  ;;  %v229_v50 = vld [vmem:[#allocation8 + $0xc0] sm:$0xff]  ;;  %v239_v54 = vld [vmem:[#allocation8 + $0x110] sm:$0xff]  ;;  %v5564_v56 = vpack.c.bf16 %v132_v52, %v131_v48  ;;  %v238_v60 = vld [vmem:[#allocation8 + $0x108] sm:$0xff] }
  0x69   :  { %5554 = vmatprep.subr.bf16.mxu0 %v9424_v1  ;;  %v5587_v55 = vpack.c.bf16 %v232_v51, %v229_v50  ;;  %v133_v57 = vld [vmem:[#allocation5 + $0x70] sm:$0xff]  ;;  %v5589_v58 = vpack.c.bf16 %v239_v54, %v236_v53  ;;  %v134_v61 = vld [vmem:[#allocation5 + $0x78] sm:$0xff]  ;;  %v242_v62 = vld [vmem:[#allocation8 + $0x128] sm:$0xff] }
  0x6a   :  { %v235_v59 = vld [vmem:[#allocation8 + $0xf0] sm:$0xff]  ;;  %v245_v63 = vld [vmem:[#allocation8 + $0x140] sm:$0xff]  ;;  %v5567_v2 = vpack.c.bf16 %v134_v61, %v133_v57  ;;  %v244_v5 = vld [vmem:[#allocation8 + $0x138] sm:$0xff] }
  0x6b   :  { %5580 = vmatpush1.bf16.msra.mxu1 %v5579_v37  ;;  %v5591_v0 = vpack.c.bf16 %v238_v60, %v235_v59  ;;  %v5593_v3 = vpack.c.bf16 %v245_v63, %v242_v62  ;;  %v241_v4 = vld [vmem:[#allocation8 + $0x120] sm:$0xff]  ;;  %v248_v6 = vld [vmem:[#allocation8 + $0x158] sm:$0xff]  ;;  %v251_v7 = vld [vmem:[#allocation8 + $0x170] sm:$0xff] }
  0x6c   :  { %5556 = vmatpush3.bf16.msra.mxu0 %v5555_v29  ;;  %5582 = vmatprep.subr.bf16.mxu1 %v5581_v40  ;;  %v5595_v9 = vpack.c.bf16 %v244_v5, %v241_v4  ;;  %v5597_v10 = vpack.c.bf16 %v251_v7, %v248_v6  ;;  %v247_v11 = vld [vmem:[#allocation8 + $0x150] sm:$0xff]  ;;  %v250_v12 = vld [vmem:[#allocation8 + $0x168] sm:$0xff]  ;;  %v213_v20 = vld [vmem:[#allocation8 + $0x40] sm:$0xff] }
  0x6d   :  { %5557 = vmatprep.subr.bf16.mxu0 %v9424_v1  ;;  %v5599_v13 = vpack.c.bf16 %v250_v12, %v247_v11  ;;  %v207_v15 = vld [vmem:[#allocation8 + $0x10] sm:$0xff]  ;;  %v210_v16 = vld [vmem:[#allocation8 + $0x28] sm:$0xff]  ;;  %v216_v21 = vld [vmem:[#allocation8 + $0x58] sm:$0xff] }
  0x6e   :  { %v5602_v18 = vpack.c.bf16 %v210_v16, %v207_v15  ;;  %v5605_v23 = vpack.c.bf16 %v216_v21, %v213_v20  ;;  %v219_v24 = vld [vmem:[#allocation8 + $0x70] sm:$0xff]  ;;  %v222_v25 = vld [vmem:[#allocation8 + $0x88] sm:$0xff]  ;;  %v225_v27 = vld [vmem:[#allocation8 + $0xa0] sm:$0xff] }
  0x6f   :  { %5584 = vmatpush1.bf16.msra.mxu1 %v5583_v46  ;;  %v5608_v26 = vpack.c.bf16 %v222_v25, %v219_v24  ;;  %v228_v28 = vld [vmem:[#allocation8 + $0xb8] sm:$0xff]  ;;  %v231_v30 = vld [vmem:[#allocation8 + $0xd0] sm:$0xff]  ;;  %v234_v31 = vld [vmem:[#allocation8 + $0xe8] sm:$0xff] }
  0x70   :  { %5559 = vmatpush3.bf16.msra.mxu0 %v5558_v38  ;;  %5586 = vmatprep.subr.bf16.mxu1 %v5585_v49  ;;  %v5611_v29 = vpack.c.bf16 %v228_v28, %v225_v27  ;;  %v5614_v32 = vpack.c.bf16 %v234_v31, %v231_v30  ;;  %v237_v33 = vld [vmem:[#allocation8 + $0x100] sm:$0xff]  ;;  %v240_v34 = vld [vmem:[#allocation8 + $0x118] sm:$0xff]  ;;  %v243_v36 = vld [vmem:[#allocation8 + $0x130] sm:$0xff] }
  0x71   :  { %5560 = vmatprep.subr.bf16.mxu0 %v9424_v1  ;;  %v5617_v35 = vpack.c.bf16 %v240_v34, %v237_v33  ;;  %v246_v37 = vld [vmem:[#allocation8 + $0x148] sm:$0xff]  ;;  %v249_v39 = vld [vmem:[#allocation8 + $0x160] sm:$0xff]  ;;  %v252_v40 = vld [vmem:[#allocation8 + $0x178] sm:$0xff] }
  0x72   :  { %v5620_v38 = vpack.c.bf16 %v246_v37, %v243_v36  ;;  %v5623_v41 = vpack.c.bf16 %v252_v40, %v249_v39  ;;  %v419_v42 = vld [vmem:[#allocation10 + $0x8] sm:$0xff]  ;;  %v422_v43 = vld [vmem:[#allocation10 + $0x20] sm:$0xff]  ;;  %v415_v45 = vld [vmem:[%s9418_s8] sm:$0x3] }
  0x73   :  { %5588 = vmatpush1.bf16.msra.mxu1 %v5587_v55  ;;  %v7647_v44 = vpack.c.bf16 %v422_v43, %v419_v42  ;;  %416 = vst [vmem:[#allocation15] sm:$0x3] %v415_v45  ;;  %v418_v48 = vld [vmem:[#allocation10] sm:$0xff]  ;;  %v421_v49 = vld [vmem:[#allocation10 + $0x18] sm:$0xff]  ;;  %v420_v50 = vld [vmem:[#allocation10 + $0x10] sm:$0xff] }
  0x74   :  { %5562 = vmatpush3.bf16.msra.mxu0 %v5561_v47  ;;  %5590 = vmatprep.subr.bf16.mxu1 %v5589_v58  ;;  %v423_v51 = vld [vmem:[#allocation10 + $0x28] sm:$0xff]  ;;  %v425_v52 = vld [vmem:[#allocation10 + $0x38] sm:$0xff]  ;;  %v428_v53 = vld [vmem:[#allocation10 + $0x50] sm:$0xff]  ;;  %v7663_v54 = vpack.c.bf16 %v421_v49, %v418_v48 }
  0x75   :  { %5563 = vmatprep.subr.bf16.mxu0 %v9424_v1  ;;  %v424_v55 = vld [vmem:[#allocation10 + $0x30] sm:$0xff]  ;;  %v7667_v57 = vpack.c.bf16 %v428_v53, %v425_v52  ;;  %v427_v58 = vld [vmem:[#allocation10 + $0x48] sm:$0xff]  ;;  %v426_v59 = vld [vmem:[#allocation10 + $0x40] sm:$0xff] }
  0x76   :  { %v429_v60 = vld [vmem:[#allocation10 + $0x58] sm:$0xff]  ;;  %v431_v62 = vld [vmem:[#allocation10 + $0x68] sm:$0xff]  ;;  %v434_v63 = vld [vmem:[#allocation10 + $0x80] sm:$0xff] }
  0x77   :  { %5592 = vmatpush1.bf16.msra.mxu1 %v5591_v0  ;;  %v7673_v4 = vpack.c.bf16 %v429_v60, %v426_v59  ;;  %v7676_v5 = vpack.c.bf16 %v434_v63, %v431_v62  ;;  %v433_v6 = vld [vmem:[#allocation10 + $0x78] sm:$0xff]  ;;  %v432_v7 = vld [vmem:[#allocation10 + $0x70] sm:$0xff]  ;;  %v443_v20 = vld [vmem:[#allocation10 + $0xc8] sm:$0xff] }
  0x78   :  { %5565 = vmatpush3.bf16.msra.mxu0 %v5564_v56  ;;  %5594 = vmatprep.subr.bf16.mxu1 %v5593_v3  ;;  %v7665_v56 = vpack.c.bf16 %v423_v51, %v420_v50  ;;  %v430_v3 = vld [vmem:[#allocation10 + $0x60] sm:$0xff]  ;;  %v440_v11 = vld [vmem:[#allocation10 + $0xb0] sm:$0xff]  ;;  %v445_v25 = vld [vmem:[#allocation10 + $0xd8] sm:$0xff] }
  0x79   :  { %5566 = vmatprep.subr.bf16.mxu0 %v9424_v1  ;;  %v7683_v12 = vpack.c.bf16 %v433_v6, %v430_v3  ;;  %v447_v27 = vld [vmem:[#allocation10 + $0xe8] sm:$0xff]  ;;  %v449_v28 = vld [vmem:[#allocation10 + $0xf8] sm:$0xff]  ;;  %v448_v31 = vld [vmem:[#allocation10 + $0xf0] sm:$0xff] }
  0x7a   :  { %v7658_v47 = vld [vmem:[#allocation15 + $0x1] sm:$0x1]  ;;  %v453_v36 = vld [vmem:[#allocation10 + $0x118] sm:$0xff]  ;;  %v454_v40 = vld [vmem:[#allocation10 + $0x120] sm:$0xff] }
  0x7b   :  { %5596 = vmatpush1.bf16.msra.mxu1 %v5595_v9  ;;  %9643 = vst [vmem:[#allocation22_spill] sm:$0xff] %v7658_v47  ;;  %643 = vst.msk [vmem:[#allocation4 + $0x1] sm:$0x1] %vm7654_vm2, %v7658_v47  ;;  %v435_v9 = vld [vmem:[#allocation10 + $0x88] sm:$0xff]  ;;  %v457_v43 = vld [vmem:[#allocation10 + $0x138] sm:$0xff] }
  0x7c   :  { %5568 = vmatpush3.bf16.msra.mxu0 %v5567_v2  ;;  %5598 = vmatprep.subr.bf16.mxu1 %v5597_v10  ;;  %v7670_v2 = vpack.c.bf16 %v427_v58, %v424_v55  ;;  %v437_v10 = vld [vmem:[#allocation10 + $0x98] sm:$0xff]  ;;  %v7686_v15 = vpack.c.bf16 %v435_v9, %v432_v7  ;;  %v451_v34 = vld [vmem:[#allocation10 + $0x108] sm:$0xff]  ;;  %v456_v45 = vld [vmem:[#allocation10 + $0x130] sm:$0xff]  ;;  %v7723_v51 = vpack.c.bf16 %v457_v43, %v454_v40 }
  0x7d   :  { %5601 = vmatprep.subr.bf16.mxu0 %v9424_v1  ;;  %v7689_v16 = vpack.c.bf16 %v440_v11, %v437_v10  ;;  %v455_v37 = vld [vmem:[#allocation10 + $0x128] sm:$0xff]  ;;  %v7713_v39 = vpack.c.bf16 %v451_v34, %v448_v31  ;;  %v461_v49 = vld [vmem:[#allocation10 + $0x158] sm:$0xff]  ;;  %v464_v50 = vld [vmem:[#allocation10 + $0x170] sm:$0xff] }
  0x7e   :  { %v459_v48 = vld [vmem:[#allocation10 + $0x148] sm:$0xff]  ;;  %v460_v52 = vld [vmem:[#allocation10 + $0x150] sm:$0xff]  ;;  %v7729_v55 = vpack.c.bf16 %v464_v50, %v461_v49  ;;  %v462_v59 = vld [vmem:[#allocation10 + $0x160] sm:$0xff] }
  0x7f   :  { %5600 = vmatpush1.bf16.msra.mxu1 %v5599_v13  ;;  %v436_v13 = vld [vmem:[#allocation10 + $0x90] sm:$0xff]  ;;  %v7726_v53 = vpack.c.bf16 %v459_v48, %v456_v45  ;;  %v463_v58 = vld [vmem:[#allocation10 + $0x168] sm:$0xff]  ;;  %v465_v60 = vld [vmem:[#allocation10 + $0x178] sm:$0xff] }
  0x80   :  { %5626 = vmatprep.subr.bf16.mxu1 %v7647_v44  ;;  %v7736_v62 = vpack.c.bf16 %v465_v60, %v462_v59  ;;  %v7741_v63 = vld [vmem:[#allocation15] sm:$0x1]  ;;  %v648_v6 = vld [vmem:[#allocation11 + $0x18] sm:$0xff]  ;;  %v645_v10 = vld [vmem:[#allocation11] sm:$0xff] }
  0x81   :  { %v650_v3 = vld [vmem:[#allocation11 + $0x28] sm:$0xff]  ;;  %v652_v9 = vld [vmem:[#allocation11 + $0x38] sm:$0xff]  ;;  %v649_v11 = vld [vmem:[#allocation11 + $0x20] sm:$0xff] }
  0x82   :  { %v657_v31 = vld [vmem:[#allocation11 + $0x60] sm:$0xff]  ;;  %v655_v34 = vld [vmem:[#allocation11 + $0x50] sm:$0xff]  ;;  %v666_v40 = vld [vmem:[#allocation11 + $0xa8] sm:$0xff] }
  0x83   :  { %v664_v43 = vld [vmem:[#allocation11 + $0x98] sm:$0xff]  ;;  %v661_v49 = vld [vmem:[#allocation11 + $0x80] sm:$0xff]  ;;  %v663_v59 = vld [vmem:[#allocation11 + $0x90] sm:$0xff] }
  0x84   :  { %v668_v48 = vld [vmem:[#allocation11 + $0xb8] sm:$0xff]  ;;  %v665_v50 = vld [vmem:[#allocation11 + $0xa0] sm:$0xff]  ;;  %v667_v60 = vld [vmem:[#allocation11 + $0xb0] sm:$0xff] }
  0x85   :  { %v4815_v46 = vld [vmem:[#allocation13 + $0x10] sm:$0xff] }
  0xdd   :  { %v115_v19 = vpop.permute.xlu0 %114 }
  0xde   :  { %vm116_vm1 = vcmp.eq.s32.totalorder %v112_v17, %v115_v19  ;;  %v439_v17 = vld [vmem:[#allocation10 + $0xa8] sm:$0xff]  ;;  %v441_v19 = vld [vmem:[#allocation10 + $0xb8] sm:$0xff] }
  0xdf   :  { %5193 = vmatmul.mubr.msk.f32.vlgmr.msra.gmra.mrb[0].mxu0 %vm116_vm1, %v7480_v22  ;;  %v7693_v21 = vpack.c.bf16 %v439_v17, %v436_v13  ;;  %v442_v22 = vld [vmem:[#allocation10 + $0xc0] sm:$0xff]  ;;  %v7748_v13 = vpack.c.bf16 %v652_v9, %v648_v6  ;;  %v7750_v17 = vpack.c.bf16 %v649_v11, %v645_v10  ;;  %v674_v6 = vld [vmem:[#allocation11 + $0xe8] sm:$0xff]  ;;  %v672_v9 = vld [vmem:[#allocation11 + $0xd8] sm:$0xff] }
  0xe0   :  { %5603 = vmatpush3.bf16.msra.mxu0 %v5602_v18  ;;  %5227 = vmatprep.mubr.msk.f32.mxu0 %vm7478_vm0, %v7479_v8  ;;  %v438_v18 = vld [vmem:[#allocation10 + $0xa0] sm:$0xff]  ;;  %v7703_v30 = vpack.c.bf16 %v445_v25, %v442_v22  ;;  %v658_v22 = vld [vmem:[#allocation11 + $0x68] sm:$0xff]  ;;  %v656_v25 = vld [vmem:[#allocation11 + $0x58] sm:$0xff] }
  0xe1   :  { %5604 = vmatprep.subr.bf16.mxu0 %v9424_v1  ;;  %v676_v11 = vld [vmem:[#allocation11 + $0xf8] sm:$0xff] }
  0xe4   :  { %5606 = vmatpush3.bf16.msra.mxu0 %v5605_v23  ;;  %v7696_v23 = vpack.c.bf16 %v441_v19, %v438_v18  ;;  %v647_v18 = vld [vmem:[#allocation11 + $0x10] sm:$0xff] }
  0xe5   :  { %5607 = vmatprep.subr.bf16.mxu0 %v9424_v1  ;;  %v651_v19 = vld [vmem:[#allocation11 + $0x30] sm:$0xff] }
  0xe8   :  { %5609 = vmatpush3.bf16.msra.mxu0 %v5608_v26  ;;  %v444_v26 = vld [vmem:[#allocation10 + $0xd0] sm:$0xff] }
  0xe9   :  { %5610 = vmatprep.subr.bf16.mxu0 %v9424_v1 }
  0xec   :  { %5612 = vmatpush3.bf16.msra.mxu0 %v5611_v29  ;;  %v452_v29 = vld [vmem:[#allocation10 + $0x110] sm:$0xff] }
  0xed   :  { %5613 = vmatprep.subr.bf16.mxu0 %v9424_v1  ;;  %v7709_v33 = vpack.c.bf16 %v452_v29, %v449_v28  ;;  %v653_v29 = vld [vmem:[#allocation11 + $0x40] sm:$0xff] }
  0xf0   :  { %5615 = vmatpush3.bf16.msra.mxu0 %v5614_v32  ;;  %v7706_v32 = vpack.c.bf16 %v447_v27, %v444_v26  ;;  %v660_v26 = vld [vmem:[#allocation11 + $0x78] sm:$0xff] }
  0xf1   :  { %5616 = vmatprep.subr.bf16.mxu0 %v9424_v1  ;;  %v7759_v28 = vpack.c.bf16 %v660_v26, %v656_v25  ;;  %v671_v25 = vld [vmem:[#allocation11 + $0xd0] sm:$0xff] }
  0xf2   :  { %v675_v26 = vld [vmem:[#allocation11 + $0xf0] sm:$0xff] }
  0xf4   :  { %5618 = vmatpush3.bf16.msra.mxu0 %v5617_v35  ;;  %v450_v35 = vld [vmem:[#allocation10 + $0x100] sm:$0xff] }
  0xf5   :  { %5619 = vmatprep.subr.bf16.mxu0 %v9424_v1 }
  0xf8   :  { %5621 = vmatpush3.bf16.msra.mxu0 %v5620_v38  ;;  %v458_v38 = vld [vmem:[#allocation10 + $0x140] sm:$0xff] }
  0xf9   :  { %5622 = vmatprep.subr.bf16.mxu0 %v9424_v1  ;;  %v7719_v42 = vpack.c.bf16 %v458_v38, %v455_v37  ;;  %v662_v38 = vld [vmem:[#allocation11 + $0x88] sm:$0xff] }
  0xfa   :  { %v7770_v45 = vpack.c.bf16 %v666_v40, %v662_v38  ;;  %v684_v40 = vld [vmem:[#allocation11 + $0x138] sm:$0xff] }
  0xfc   :  { %5624 = vmatpush3.bf16.msra.mxu0 %v5623_v41  ;;  %v7716_v41 = vpack.c.bf16 %v453_v36, %v450_v35  ;;  %v7762_v35 = vpack.c.bf16 %v657_v31, %v653_v29  ;;  %v659_v36 = vld [vmem:[#allocation11 + $0x70] sm:$0xff]  ;;  %v7789_v29 = vpack.c.bf16 %v675_v26, %v671_v25  ;;  %v678_v31 = vld [vmem:[#allocation11 + $0x108] sm:$0xff]  ;;  %v685_v25 = vld [vmem:[#allocation11 + $0x140] sm:$0xff] }
  0xfd   :  { %5657 = vmatprep.subr.bf16.mxu0 %v9424_v1  ;;  %v7766_v37 = vpack.c.bf16 %v659_v36, %v655_v34  ;;  %v682_v34 = vld [vmem:[#allocation11 + $0x128] sm:$0xff]  ;;  %v680_v36 = vld [vmem:[#allocation11 + $0x118] sm:$0xff]  ;;  %v689_v26 = vld [vmem:[#allocation11 + $0x160] sm:$0xff] }
  0xfe   :  { %v7794_v38 = vpack.c.bf16 %v682_v34, %v678_v31  ;;  %v7810_v34 = vpack.c.bf16 %v689_v26, %v685_v25 }
 0x100   :  { %9644 = vst [vmem:[#allocation23_spill] sm:$0xff] %v7794_v38  ;;  %9650 = vst [vmem:[#allocation29_spill] sm:$0xff] %v7810_v34 }
 0x1b2   :  { %v201_v61 = vpop.f32.mrb[0].mxu0 }
 0x1b3   :  { %v5194_v0 = vpop.f32.mrb[1].mxu0  ;;  %335 = vmatmul.mubr.f32.vlgmr.msra.gmra.mrb[0].mxu1 %v201_v61  ;;  %5228 = vmatmul.mubr.f32.vlgmr.msra.gmra.mrb[2].mxu0 %v201_v61  ;;  %v7733_v61 = vpack.c.bf16 %v463_v58, %v460_v52  ;;  %v7772_v52 = vpack.c.bf16 %v668_v48, %v664_v43  ;;  %v7774_v58 = vpack.c.bf16 %v665_v50, %v661_v49  ;;  %v677_v43 = vld [vmem:[#allocation11 + $0x100] sm:$0xff] }
 0x1b4   :  { %5628 = vmatpush1.bf16.msra.mxu1 %v7663_v54  ;;  %5659 = vmatpush3.bf16.msra.mxu0 %v7665_v56  ;;  %v646_v0 = vld [vmem:[#allocation11 + $0x8] sm:$0xff]  ;;  %v681_v48 = vld [vmem:[#allocation11 + $0x120] sm:$0xff]  ;;  %v7796_v49 = vpack.c.bf16 %v684_v40, %v680_v36  ;;  %v687_v36 = vld [vmem:[#allocation11 + $0x150] sm:$0xff] }
 0x1b5   :  { %5630 = vmatprep.subr.bf16.mxu1 %v7667_v57  ;;  %5660 = vmatprep.subr.bf16.mxu0 %v9424_v1  ;;  %v7746_v7 = vpack.c.bf16 %v650_v3, %v646_v0  ;;  %v7777_v0 = vpack.c.bf16 %v667_v60, %v663_v59  ;;  %v670_v3 = vld [vmem:[#allocation11 + $0xc8] sm:$0xff]  ;;  %v7798_v50 = vpack.c.bf16 %v681_v48, %v677_v43  ;;  %v679_v59 = vld [vmem:[#allocation11 + $0x110] sm:$0xff] }
 0x1b6   :  { %530 = vmatprep.mubr.f32.mxu1 %v7479_v8  ;;  %5262 = vmatprep.mubr.msk.f32.mxu0 %vm7478_vm0, %v7479_v8  ;;  %v446_v8 = vld [vmem:[#allocation10 + $0xe0] sm:$0xff]  ;;  %v7782_v10 = vpack.c.bf16 %v674_v6, %v670_v3  ;;  %9645 = vst [vmem:[#allocation24_spill] sm:$0xff] %v7796_v49  ;;  %v683_v60 = vld [vmem:[#allocation11 + $0x130] sm:$0xff]  ;;  %v686_v6 = vld [vmem:[#allocation11 + $0x148] sm:$0xff] }
 0x1b7   :  { %v7699_v24 = vpack.c.bf16 %v446_v8, %v443_v20  ;;  %v654_v20 = vld [vmem:[#allocation11 + $0x48] sm:$0xff]  ;;  %v7753_v8 = vpack.c.bf16 %v651_v19, %v647_v18  ;;  %v669_v18 = vld [vmem:[#allocation11 + $0xc0] sm:$0xff]  ;;  %9646 = vst [vmem:[#allocation25_spill] sm:$0xff] %v7798_v50  ;;  %v7801_v3 = vpack.c.bf16 %v683_v60, %v679_v59  ;;  %v691_v40 = vld [vmem:[#allocation11 + $0x170] sm:$0xff] }
 0x1b8   :  { %5632 = vmatpush1.bf16.msra.mxu1 %v7670_v2  ;;  %5662 = vmatpush3.bf16.msra.mxu0 %v7673_v4  ;;  %v7757_v27 = vpack.c.bf16 %v658_v22, %v654_v20  ;;  %v673_v19 = vld [vmem:[#allocation11 + $0xe0] sm:$0xff]  ;;  %v7784_v20 = vpack.c.bf16 %v676_v11, %v672_v9  ;;  %v690_v9 = vld [vmem:[#allocation11 + $0x168] sm:$0xff]  ;;  %v688_v11 = vld [vmem:[#allocation11 + $0x158] sm:$0xff]  ;;  %v7813_v43 = vpack.c.bf16 %v691_v40, %v687_v36 }
 0x1b9   :  { %5634 = vmatprep.subr.bf16.mxu1 %v7676_v5  ;;  %5663 = vmatprep.subr.bf16.mxu0 %v9424_v1  ;;  %v7786_v22 = vpack.c.bf16 %v673_v19, %v669_v18  ;;  %9647 = vst [vmem:[#allocation26_spill] sm:$0xff] %v7801_v3  ;;  %v7806_v18 = vpack.c.bf16 %v690_v9, %v686_v6  ;;  %v692_v19 = vld [vmem:[#allocation11 + $0x178] sm:$0xff]  ;;  %v694_v48 = vld [vmem:[#allocation11 + $0x188] sm:$0xff]  ;;  %v695_v36 = vld [vmem:[#allocation11 + $0x190] sm:$0xff] }
 0x1ba   :  { %v7808_v31 = vpack.c.bf16 %v692_v19, %v688_v11  ;;  %9651 = vst [vmem:[#allocation30_spill] sm:$0xff] %v7813_v43  ;;  %v698_v59 = vld [vmem:[#allocation11 + $0x1a8] sm:$0xff]  ;;  %v696_v60 = vld [vmem:[#allocation11 + $0x198] sm:$0xff]  ;;  %v693_v11 = vld [vmem:[#allocation11 + $0x180] sm:$0xff] }
 0x1bb   :  { %9648 = vst [vmem:[#allocation27_spill] sm:$0xff] %v7806_v18  ;;  %v7818_v6 = vpack.c.bf16 %v698_v59, %v694_v48  ;;  %v700_v9 = vld [vmem:[#allocation11 + $0x1b8] sm:$0xff]  ;;  %v697_v19 = vld [vmem:[#allocation11 + $0x1a0] sm:$0xff]  ;;  %v699_v40 = vld [vmem:[#allocation11 + $0x1b0] sm:$0xff] }
 0x1bc   :  { %5636 = vmatpush1.bf16.msra.mxu1 %v7683_v12  ;;  %5665 = vmatpush3.bf16.msra.mxu0 %v7686_v15  ;;  %9649 = vst [vmem:[#allocation28_spill] sm:$0xff] %v7808_v31  ;;  %v7820_v25 = vpack.c.bf16 %v700_v9, %v696_v60  ;;  %v7822_v26 = vpack.c.bf16 %v697_v19, %v693_v11  ;;  %v706_v48 = vld [vmem:[#allocation11 + $0x1e8] sm:$0xff]  ;;  %v704_v59 = vld [vmem:[#allocation11 + $0x1d8] sm:$0xff]  ;;  %v701_v9 = vld [vmem:[#allocation11 + $0x1c0] sm:$0xff] }
 0x1bd   :  { %5638 = vmatprep.subr.bf16.mxu1 %v7689_v16  ;;  %5666 = vmatprep.subr.bf16.mxu0 %v9424_v1  ;;  %9652 = vst [vmem:[#allocation31_spill] sm:$0xff] %v7818_v6  ;;  %v7825_v14 = vpack.c.bf16 %v699_v40, %v695_v36  ;;  %v708_v60 = vld [vmem:[#allocation11 + $0x1f8] sm:$0xff]  ;;  %v705_v11 = vld [vmem:[#allocation11 + $0x1e0] sm:$0xff]  ;;  %v703_v36 = vld [vmem:[#allocation11 + $0x1d0] sm:$0xff] }
 0x1be   :  { %9653 = vst [vmem:[#allocation32_spill] sm:$0xff] %v7820_v25  ;;  %9654 = vst [vmem:[#allocation33_spill] sm:$0xff] %v7822_v26  ;;  %v7832_v19 = vpack.c.bf16 %v708_v60, %v704_v59  ;;  %v707_v40 = vld [vmem:[#allocation11 + $0x1f0] sm:$0xff]  ;;  %v716_v59 = vld [vmem:[#allocation11 + $0x238] sm:$0xff] }
 0x1bf   :  { %9655 = vst [vmem:[#allocation34_spill] sm:$0xff] %v7825_v14  ;;  %v709_v60 = vld [vmem:[#allocation11 + $0x200] sm:$0xff] }
 0x1c0   :  { %5640 = vmatpush1.bf16.msra.mxu1 %v7693_v21  ;;  %5668 = vmatpush3.bf16.msra.mxu0 %v7696_v23  ;;  %9657 = vst [vmem:[#allocation36_spill] sm:$0xff] %v7832_v19 }
 0x1c1   :  { %5642 = vmatprep.subr.bf16.mxu1 %v7699_v24  ;;  %5669 = vmatprep.subr.bf16.mxu0 %v9424_v1 }
 0x1c4   :  { %5644 = vmatpush1.bf16.msra.mxu1 %v7703_v30  ;;  %5671 = vmatpush3.bf16.msra.mxu0 %v7706_v32 }
 0x1c5   :  { %5646 = vmatprep.subr.bf16.mxu1 %v7709_v33  ;;  %5672 = vmatprep.subr.bf16.mxu0 %v9424_v1 }
 0x1c8   :  { %5648 = vmatpush1.bf16.msra.mxu1 %v7713_v39  ;;  %5674 = vmatpush3.bf16.msra.mxu0 %v7716_v41 }
 0x1c9   :  { %5650 = vmatprep.subr.bf16.mxu1 %v7719_v42  ;;  %5675 = vmatprep.subr.bf16.mxu0 %v9424_v1 }
 0x1cc   :  { %5652 = vmatpush1.bf16.msra.mxu1 %v7723_v51  ;;  %5677 = vmatpush3.bf16.msra.mxu0 %v7726_v53 }
 0x1cd   :  { %5654 = vmatprep.subr.bf16.mxu1 %v7729_v55  ;;  %5678 = vmatprep.subr.bf16.mxu0 %v9424_v1  ;;  %v702_v1 = vld [vmem:[#allocation11 + $0x1c8] sm:$0xff] }
 0x1ce   :  { %v7830_v47 = vpack.c.bf16 %v706_v48, %v702_v1  ;;  %v714_v1 = vld [vmem:[#allocation11 + $0x228] sm:$0xff]  ;;  %v712_v48 = vld [vmem:[#allocation11 + $0x218] sm:$0xff] }
 0x1d0   :  { %5656 = vmatpush1.bf16.msra.mxu1 %v7733_v61  ;;  %5680 = vmatpush3.bf16.msra.mxu0 %v7736_v62  ;;  %9656 = vst [vmem:[#allocation35_spill] sm:$0xff] %v7830_v47 }
 0x1d1   :  { %5682 = vmatprep.subr.bf16.mxu1 %v7746_v7  ;;  %5746 = vmatprep.subr.bf16.mxu0 %v7748_v13 }
 0x1d3   :  { %531 = vmatmul.mubr.f32.vlgmr.msra.gmra.mrb[2].mxu1 %v7741_v63  ;;  %5263 = vmatmul.mubr.f32.vlgmr.msra.gmra.mrb[4].mxu0 %v7741_v63 }
 0x1d4   :  { %5684 = vmatpush1.bf16.msra.mxu1 %v7750_v17  ;;  %5748 = vmatpush1.bf16.msra.mxu0 %v7753_v8 }
 0x1d5   :  { %5686 = vmatprep.subr.bf16.mxu1 %v7757_v27  ;;  %5750 = vmatprep.subr.bf16.mxu0 %v7759_v28 }
 0x1d8   :  { %5688 = vmatpush1.bf16.msra.mxu1 %v7762_v35  ;;  %5752 = vmatpush1.bf16.msra.mxu0 %v7766_v37 }
 0x1d9   :  { %5690 = vmatprep.subr.bf16.mxu1 %v7770_v45  ;;  %5754 = vmatprep.subr.bf16.mxu0 %v7772_v52 }
 0x1dc   :  { %5692 = vmatpush1.bf16.msra.mxu1 %v7774_v58  ;;  %5756 = vmatpush1.bf16.msra.mxu0 %v7777_v0 }
 0x1dd   :  { %5694 = vmatprep.subr.bf16.mxu1 %v7782_v10  ;;  %5758 = vmatprep.subr.bf16.mxu0 %v7784_v20 }
 0x1e0   :  { %5696 = vmatpush1.bf16.msra.mxu1 %v7786_v22  ;;  %5760 = vmatpush1.bf16.msra.mxu0 %v7789_v29 }
 0x1e1   :  { %5698 = vmatprep.subr.bf16.mxu1 %v7794_v38  ;;  %5762 = vmatprep.subr.bf16.mxu0 %v7796_v49 }
 0x1e4   :  { %5700 = vmatpush1.bf16.msra.mxu1 %v7798_v50  ;;  %5764 = vmatpush1.bf16.msra.mxu0 %v7801_v3 }
 0x1e5   :  { %5702 = vmatprep.subr.bf16.mxu1 %v7806_v18  ;;  %5766 = vmatprep.subr.bf16.mxu0 %v7808_v31 }
 0x1e8   :  { %5704 = vmatpush1.bf16.msra.mxu1 %v7810_v34  ;;  %5768 = vmatpush1.bf16.msra.mxu0 %v7813_v43  ;;  %v7834_v43 = vpack.c.bf16 %v705_v11, %v701_v9  ;;  %v713_v9 = vld [vmem:[#allocation11 + $0x220] sm:$0xff]  ;;  %v7844_v11 = vpack.c.bf16 %v716_v59, %v712_v48  ;;  %v724_v48 = vld [vmem:[#allocation11 + $0x278] sm:$0xff] }
 0x1e9   :  { %5706 = vmatprep.subr.bf16.mxu1 %v7818_v6  ;;  %5770 = vmatprep.subr.bf16.mxu0 %v7820_v25  ;;  %v7837_v25 = vpack.c.bf16 %v707_v40, %v703_v36  ;;  %v7846_v6 = vpack.c.bf16 %v713_v9, %v709_v60  ;;  %v711_v36 = vld [vmem:[#allocation11 + $0x210] sm:$0xff]  ;;  %v717_v59 = vld [vmem:[#allocation11 + $0x240] sm:$0xff] }
 0x1ea   :  { %9658 = vst [vmem:[#allocation37_spill] sm:$0xff] %v7834_v43  ;;  %9661 = vst [vmem:[#allocation40_spill] sm:$0xff] %v7844_v11  ;;  %v715_v40 = vld [vmem:[#allocation11 + $0x230] sm:$0xff]  ;;  %v721_v60 = vld [vmem:[#allocation11 + $0x260] sm:$0xff] }
 0x1eb   :  { %9659 = vst [vmem:[#allocation38_spill] sm:$0xff] %v7837_v25  ;;  %9662 = vst [vmem:[#allocation41_spill] sm:$0xff] %v7846_v6 }
 0x1ec   :  { %5708 = vmatpush1.bf16.msra.mxu1 %v7822_v26  ;;  %5772 = vmatpush1.bf16.msra.mxu0 %v7825_v14  ;;  %v710_v14 = vld [vmem:[#allocation11 + $0x208] sm:$0xff] }
 0x1ed   :  { %5710 = vmatprep.subr.bf16.mxu1 %v7830_v47  ;;  %5774 = vmatprep.subr.bf16.mxu0 %v7832_v19  ;;  %v7842_v26 = vpack.c.bf16 %v714_v1, %v710_v14  ;;  %v7849_v19 = vpack.c.bf16 %v715_v40, %v711_v36  ;;  %v722_v14 = vld [vmem:[#allocation11 + $0x268] sm:$0xff]  ;;  %v720_v1 = vld [vmem:[#allocation11 + $0x258] sm:$0xff]  ;;  %v7858_v47 = vpack.c.bf16 %v721_v60, %v717_v59  ;;  %v719_v36 = vld [vmem:[#allocation11 + $0x250] sm:$0xff] }
 0x1ee   :  { %v7856_v9 = vpack.c.bf16 %v724_v48, %v720_v1  ;;  %v723_v40 = vld [vmem:[#allocation11 + $0x270] sm:$0xff]  ;;  %v732_v1 = vld [vmem:[#allocation11 + $0x2b8] sm:$0xff]  ;;  %v725_v48 = vld [vmem:[#allocation11 + $0x280] sm:$0xff] }
 0x1ef   :  { %9660 = vst [vmem:[#allocation39_spill] sm:$0xff] %v7842_v26  ;;  %9663 = vst [vmem:[#allocation42_spill] sm:$0xff] %v7849_v19  ;;  %v729_v59 = vld [vmem:[#allocation11 + $0x2a0] sm:$0xff] }
 0x1f0   :  { %5712 = vmatpush1.bf16.msra.mxu1 %v7834_v43  ;;  %5776 = vmatpush1.bf16.msra.mxu0 %v7837_v25  ;;  %v718_v25 = vld [vmem:[#allocation11 + $0x248] sm:$0xff]  ;;  %9665 = vst [vmem:[#allocation44_spill] sm:$0xff] %v7856_v9  ;;  %9666 = vst [vmem:[#allocation45_spill] sm:$0xff] %v7858_v47 }
 0x1f1   :  { %5714 = vmatprep.subr.bf16.mxu1 %v7842_v26  ;;  %5778 = vmatprep.subr.bf16.mxu0 %v7844_v11  ;;  %v7854_v43 = vpack.c.bf16 %v722_v14, %v718_v25  ;;  %v7861_v11 = vpack.c.bf16 %v723_v40, %v719_v36  ;;  %v730_v25 = vld [vmem:[#allocation11 + $0x2a8] sm:$0xff]  ;;  %v728_v14 = vld [vmem:[#allocation11 + $0x298] sm:$0xff]  ;;  %v7870_v26 = vpack.c.bf16 %v729_v59, %v725_v48  ;;  %v727_v36 = vld [vmem:[#allocation11 + $0x290] sm:$0xff] }
 0x1f2   :  { %v7868_v60 = vpack.c.bf16 %v732_v1, %v728_v14  ;;  %v731_v40 = vld [vmem:[#allocation11 + $0x2b0] sm:$0xff]  ;;  %v740_v14 = vld [vmem:[#allocation11 + $0x2f8] sm:$0xff]  ;;  %v733_v1 = vld [vmem:[#allocation11 + $0x2c0] sm:$0xff] }
 0x1f3   :  { %9664 = vst [vmem:[#allocation43_spill] sm:$0xff] %v7854_v43  ;;  %9667 = vst [vmem:[#allocation46_spill] sm:$0xff] %v7861_v11  ;;  %v737_v48 = vld [vmem:[#allocation11 + $0x2e0] sm:$0xff] }
 0x1f4   :  { %5716 = vmatpush1.bf16.msra.mxu1 %v7846_v6  ;;  %5780 = vmatpush1.bf16.msra.mxu0 %v7849_v19  ;;  %v726_v19 = vld [vmem:[#allocation11 + $0x288] sm:$0xff]  ;;  %9669 = vst [vmem:[#allocation48_spill] sm:$0xff] %v7868_v60  ;;  %9670 = vst [vmem:[#allocation49_spill] sm:$0xff] %v7870_v26 }
 0x1f5   :  { %5718 = vmatprep.subr.bf16.mxu1 %v7854_v43  ;;  %5782 = vmatprep.subr.bf16.mxu0 %v7856_v9  ;;  %v7866_v6 = vpack.c.bf16 %v730_v25, %v726_v19  ;;  %v7873_v9 = vpack.c.bf16 %v731_v40, %v727_v36  ;;  %v738_v19 = vld [vmem:[#allocation11 + $0x2e8] sm:$0xff]  ;;  %v736_v25 = vld [vmem:[#allocation11 + $0x2d8] sm:$0xff]  ;;  %v7882_v43 = vpack.c.bf16 %v737_v48, %v733_v1  ;;  %v735_v36 = vld [vmem:[#allocation11 + $0x2d0] sm:$0xff] }
 0x1f6   :  { %v7880_v59 = vpack.c.bf16 %v740_v14, %v736_v25  ;;  %v739_v40 = vld [vmem:[#allocation11 + $0x2f0] sm:$0xff]  ;;  %v748_v25 = vld [vmem:[#allocation11 + $0x338] sm:$0xff]  ;;  %v741_v14 = vld [vmem:[#allocation11 + $0x300] sm:$0xff] }
 0x1f7   :  { %9668 = vst [vmem:[#allocation47_spill] sm:$0xff] %v7866_v6  ;;  %9671 = vst [vmem:[#allocation50_spill] sm:$0xff] %v7873_v9  ;;  %v745_v1 = vld [vmem:[#allocation11 + $0x320] sm:$0xff] }
 0x1f8   :  { %5720 = vmatpush1.bf16.msra.mxu1 %v7858_v47  ;;  %5784 = vmatpush1.bf16.msra.mxu0 %v7861_v11  ;;  %v734_v11 = vld [vmem:[#allocation11 + $0x2c8] sm:$0xff]  ;;  %9673 = vst [vmem:[#allocation52_spill] sm:$0xff] %v7880_v59  ;;  %9674 = vst [vmem:[#allocation53_spill] sm:$0xff] %v7882_v43 }
 0x1f9   :  { %5722 = vmatprep.subr.bf16.mxu1 %v7866_v6  ;;  %5786 = vmatprep.subr.bf16.mxu0 %v7868_v60  ;;  %v7878_v47 = vpack.c.bf16 %v738_v19, %v734_v11  ;;  %v7885_v60 = vpack.c.bf16 %v739_v40, %v735_v36  ;;  %v746_v11 = vld [vmem:[#allocation11 + $0x328] sm:$0xff]  ;;  %v744_v19 = vld [vmem:[#allocation11 + $0x318] sm:$0xff]  ;;  %v7894_v6 = vpack.c.bf16 %v745_v1, %v741_v14  ;;  %v743_v36 = vld [vmem:[#allocation11 + $0x310] sm:$0xff] }
 0x1fa   :  { %v7892_v48 = vpack.c.bf16 %v748_v25, %v744_v19  ;;  %v747_v40 = vld [vmem:[#allocation11 + $0x330] sm:$0xff]  ;;  %v756_v19 = vld [vmem:[#allocation11 + $0x378] sm:$0xff]  ;;  %v749_v25 = vld [vmem:[#allocation11 + $0x340] sm:$0xff] }
 0x1fb   :  { %9672 = vst [vmem:[#allocation51_spill] sm:$0xff] %v7878_v47  ;;  %9675 = vst [vmem:[#allocation54_spill] sm:$0xff] %v7885_v60  ;;  %v753_v14 = vld [vmem:[#allocation11 + $0x360] sm:$0xff] }
 0x1fc   :  { %5724 = vmatpush1.bf16.msra.mxu1 %v7870_v26  ;;  %5788 = vmatpush1.bf16.msra.mxu0 %v7873_v9  ;;  %v742_v9 = vld [vmem:[#allocation11 + $0x308] sm:$0xff]  ;;  %9677 = vst [vmem:[#allocation56_spill] sm:$0xff] %v7892_v48  ;;  %9678 = vst [vmem:[#allocation57_spill] sm:$0xff] %v7894_v6 }
 0x1fd   :  { %5726 = vmatprep.subr.bf16.mxu1 %v7878_v47  ;;  %5790 = vmatprep.subr.bf16.mxu0 %v7880_v59  ;;  %v7890_v26 = vpack.c.bf16 %v746_v11, %v742_v9  ;;  %v7897_v59 = vpack.c.bf16 %v747_v40, %v743_v36  ;;  %v754_v9 = vld [vmem:[#allocation11 + $0x368] sm:$0xff]  ;;  %v752_v11 = vld [vmem:[#allocation11 + $0x358] sm:$0xff]  ;;  %v7906_v47 = vpack.c.bf16 %v753_v14, %v749_v25  ;;  %v751_v36 = vld [vmem:[#allocation11 + $0x350] sm:$0xff] }
 0x1fe   :  { %v7904_v1 = vpack.c.bf16 %v756_v19, %v752_v11  ;;  %v755_v40 = vld [vmem:[#allocation11 + $0x370] sm:$0xff]  ;;  %v764_v11 = vld [vmem:[#allocation11 + $0x3b8] sm:$0xff]  ;;  %v757_v19 = vld [vmem:[#allocation11 + $0x380] sm:$0xff] }
 0x1ff   :  { %9676 = vst [vmem:[#allocation55_spill] sm:$0xff] %v7890_v26  ;;  %9679 = vst [vmem:[#allocation58_spill] sm:$0xff] %v7897_v59  ;;  %v761_v25 = vld [vmem:[#allocation11 + $0x3a0] sm:$0xff] }
 0x200   :  { %5728 = vmatpush1.bf16.msra.mxu1 %v7882_v43  ;;  %5792 = vmatpush1.bf16.msra.mxu0 %v7885_v60  ;;  %v750_v60 = vld [vmem:[#allocation11 + $0x348] sm:$0xff]  ;;  %9681 = vst [vmem:[#allocation60_spill] sm:$0xff] %v7904_v1  ;;  %9682 = vst [vmem:[#allocation61_spill] sm:$0xff] %v7906_v47 }
 0x201   :  { %5730 = vmatprep.subr.bf16.mxu1 %v7890_v26  ;;  %5794 = vmatprep.subr.bf16.mxu0 %v7892_v48  ;;  %v7902_v43 = vpack.c.bf16 %v754_v9, %v750_v60  ;;  %v7909_v48 = vpack.c.bf16 %v755_v40, %v751_v36  ;;  %v762_v60 = vld [vmem:[#allocation11 + $0x3a8] sm:$0xff]  ;;  %v760_v9 = vld [vmem:[#allocation11 + $0x398] sm:$0xff]  ;;  %v7918_v26 = vpack.c.bf16 %v761_v25, %v757_v19  ;;  %v759_v36 = vld [vmem:[#allocation11 + $0x390] sm:$0xff] }
 0x202   :  { %v7916_v14 = vpack.c.bf16 %v764_v11, %v760_v9  ;;  %v763_v40 = vld [vmem:[#allocation11 + $0x3b0] sm:$0xff]  ;;  %v772_v9 = vld [vmem:[#allocation11 + $0x3f8] sm:$0xff]  ;;  %v765_v11 = vld [vmem:[#allocation11 + $0x3c0] sm:$0xff] }
 0x203   :  { %9680 = vst [vmem:[#allocation59_spill] sm:$0xff] %v7902_v43  ;;  %9683 = vst [vmem:[#allocation62_spill] sm:$0xff] %v7909_v48  ;;  %v769_v19 = vld [vmem:[#allocation11 + $0x3e0] sm:$0xff] }
 0x204   :  { %5732 = vmatpush1.bf16.msra.mxu1 %v7894_v6  ;;  %5796 = vmatpush1.bf16.msra.mxu0 %v7897_v59  ;;  %v758_v59 = vld [vmem:[#allocation11 + $0x388] sm:$0xff]  ;;  %9685 = vst [vmem:[#allocation64_spill] sm:$0xff] %v7916_v14  ;;  %9686 = vst [vmem:[#allocation65_spill] sm:$0xff] %v7918_v26 }
 0x205   :  { %5734 = vmatprep.subr.bf16.mxu1 %v7902_v43  ;;  %5798 = vmatprep.subr.bf16.mxu0 %v7904_v1  ;;  %v7914_v6 = vpack.c.bf16 %v762_v60, %v758_v59  ;;  %v7921_v1 = vpack.c.bf16 %v763_v40, %v759_v36  ;;  %v770_v59 = vld [vmem:[#allocation11 + $0x3e8] sm:$0xff]  ;;  %v768_v60 = vld [vmem:[#allocation11 + $0x3d8] sm:$0xff]  ;;  %v7930_v43 = vpack.c.bf16 %v769_v19, %v765_v11  ;;  %v767_v36 = vld [vmem:[#allocation11 + $0x3d0] sm:$0xff] }
 0x206   :  { %v7928_v25 = vpack.c.bf16 %v772_v9, %v768_v60  ;;  %v771_v40 = vld [vmem:[#allocation11 + $0x3f0] sm:$0xff] }
 0x207   :  { %9684 = vst [vmem:[#allocation63_spill] sm:$0xff] %v7914_v6  ;;  %9687 = vst [vmem:[#allocation66_spill] sm:$0xff] %v7921_v1 }
 0x208   :  { %5736 = vmatpush1.bf16.msra.mxu1 %v7906_v47  ;;  %5800 = vmatpush1.bf16.msra.mxu0 %v7909_v48  ;;  %v766_v48 = vld [vmem:[#allocation11 + $0x3c8] sm:$0xff]  ;;  %9689 = vst [vmem:[#allocation68_spill] sm:$0xff] %v7928_v25  ;;  %9690 = vst [vmem:[#allocation69_spill] sm:$0xff] %v7930_v43 }
 0x209   :  { %5738 = vmatprep.subr.bf16.mxu1 %v7914_v6  ;;  %5802 = vmatprep.subr.bf16.mxu0 %v7916_v14  ;;  %v7926_v47 = vpack.c.bf16 %v770_v59, %v766_v48  ;;  %v7933_v14 = vpack.c.bf16 %v771_v40, %v767_v36  ;;  %v9692_v48 = vmov 0.0|0.0   ;;  %v9693_v59 = vlaneseq  ;;  %v253_v36 = vld [vmem:[%s9413_s3] sm:$0x7] }
 0x20b   :  { %9688 = vst [vmem:[#allocation67_spill] sm:$0xff] %v7926_v47  ;;  %9691 = vst [vmem:[#allocation70_spill] sm:$0xff] %v7933_v14  ;;  %v7941_v60 = vshrl.u32 %v9693_v59, 7 }
 0x20c   :  { %5740 = vmatpush1.bf16.msra.mxu1 %v7918_v26  ;;  %5804 = vmatpush1.bf16.msra.mxu0 %v7921_v1 }
 0x20d   :  { %5742 = vmatprep.subr.bf16.mxu1 %v7926_v47  ;;  %5806 = vmatprep.subr.bf16.mxu0 %v7928_v25  ;;  %9694 = vst [vmem:[#allocation71_spill] sm:$0xff] %v7941_v60  ;;  %v7944_v9 = vsub.s32 0, %v7941_v60  ;;  %v7947_v11 = vsub.s32 2, %v7941_v60  ;;  %v7950_v19 = vsub.s32 1, %v7941_v60 }
 0x20f   :  { %9695 = vst [vmem:[#allocation72_spill] sm:$0xff] %v7947_v11  ;;  %v266_v40 = vrot.slane %v253_v36, %v7947_v11  ;;  %v262_v59 = vrot.slane %v253_v36, %v7950_v19 }
 0x210   :  { %5744 = vmatpush1.bf16.msra.mxu1 %v7930_v43  ;;  %5808 = vmatpush1.bf16.msra.mxu0 %v7933_v14 }
 0x211   :  { %5810 = vmatprep.subr.bf16.mxu1 %v7647_v44  ;;  %5841 = vmatprep.subr.bf16.mxu0 %v9692_v48  ;;  %v258_v44 = vrot.slane %v253_v36, %v7944_v9 }
 0x286   :  { %v336_v14 = vpop.f32.mrb[0].mxu1  ;;  %v407_v43 = vpop.f32.mrb[2].mxu0 }
 0x287   :  { %v337_v25 = vadd.f32 %v336_v14, %v258_v44  ;;  %v408_v47 = vadd.f32 %v407_v43, %v266_v40  ;;  %v338_v1 = vpop.f32.mrb[1].mxu1  ;;  %v5229_v26 = vpop.f32.mrb[3].mxu0 }
 0x288   :  { %v339_v6 = vadd.f32 %v338_v1, %v262_v59 }
 0x289   :  { %411 = vst [vmem:[#allocation2] sm:$0xff] %v337_v25  ;;  %413 = vst [vmem:[#allocation2 + $0x10] sm:$0xff] %v408_v47  ;;  %v625_v47 = vld [vmem:[%s9415_s5] sm:$0x1] }
 0x28a   :  { %412 = vst [vmem:[#allocation2 + $0x8] sm:$0xff] %v339_v6 }
 0x291   :  { %v607_v60 = vld [vmem:[#allocation2] ss:$8 sm:$0x7] }
 0x292   :  { %v616_v49 = vrot.slane %v607_v60, 1 }
 0x2a6   :  { %v532_v34 = vpop.f32.mrb[2].mxu1  ;;  %v603_v31 = vpop.f32.mrb[4].mxu0 }
 0x2a7   :  { %v608_v18 = vadd.f32 %v607_v60, %v532_v34  ;;  %v534_v3 = vpop.f32.mrb[3].mxu1  ;;  %v5264_v50 = vpop.f32.mrb[5].mxu0  ;;  %v626_v1 = vadd.f32 %v625_v47, %v603_v31  ;;  %v628_v34 = vrot.slane %v607_v60, 2  ;;  %v9738_v47 = vld [vmem:[#allocation65_spill] sm:$0xff] }
 0x2a8   :  { %v618_v38 = vadd.f32 %v616_v49, %v534_v3 }
 0x2a9   :  { %v4940_v11 = vmul.f32 -1.442695, %v608_v18 }
 0x2aa   :  { %v4941_v36 = vmul.f32 -1.442695, %v618_v38 }
 0x2ab   :  { %7140 = vpow2.f32 %v4940_v11 }
 0x2ac   :  { %7142 = vpow2.f32 %v4941_v36  ;;  %v9734_v36 = vld [vmem:[#allocation61_spill] sm:$0xff] }
 0x2b5   :  { %v7141_v14 = vpop.eup %7140 }
 0x2b6   :  { %v612_v43 = vadd.f32 1.0, %v7141_v14  ;;  %v7143_v26 = vpop.eup %7142  ;;  %v9735_v14 = vld [vmem:[#allocation62_spill] sm:$0xff] }
 0x2b7   :  { %v622_v6 = vadd.f32 1.0, %v7143_v26  ;;  %v9737_v26 = vld [vmem:[#allocation64_spill] sm:$0xff] }
 0x2b8   :  { %7144 = vrcp.f32 %v612_v43  ;;  %v9736_v43 = vld [vmem:[#allocation63_spill] sm:$0xff] }
 0x2b9   :  { %7146 = vrcp.f32 %v622_v6  ;;  %v9739_v6 = vld [vmem:[#allocation66_spill] sm:$0xff] }
 0x2c2   :  { %v7145_v25 = vpop.eup %7144 }
 0x2c3   :  { %v627_v50 = vmul.f32 %v7145_v25, %v626_v1  ;;  %v7147_v49 = vpop.eup %7146  ;;  %v9740_v1 = vld [vmem:[#allocation67_spill] sm:$0xff]  ;;  %v9741_v25 = vld [vmem:[#allocation68_spill] sm:$0xff] }
 0x2c4   :  { %v632_v3 = vsub.f32 1.0, %v7147_v49  ;;  %v634_v18 = vmul.f32 %v7147_v49, %v7741_v63  ;;  %v7970_v63 = vld [vmem:[#allocation3] sm:$0xff]  ;;  %v1523_v49 = vld [vmem:[#allocation10 + $0x20] sm:$0xff] }
 0x2c5   :  { %v630_v44 = vadd.f32 %v628_v34, %v627_v50  ;;  %v9742_v34 = vld [vmem:[#allocation69_spill] sm:$0xff]  ;;  %v9743_v50 = vld [vmem:[#allocation70_spill] sm:$0xff] }
 0x2c7   :  { %7148 = vtanh.f32 %v630_v44  ;;  %v1520_v44 = vld [vmem:[#allocation10 + $0x8] sm:$0xff] }
 0x2d1   :  { %v7149_v38 = vpop.eup %7148 }
 0x2d2   :  { %v633_v11 = vmul.f32 %v7149_v38, %v632_v3  ;;  %v8070_v3 = vpack.c.bf16 %v1523_v49, %v1520_v44  ;;  %v773_v38 = vld [vmem:[%s9417_s7] sm:$0xf] }
 0x2d4   :  { %v635_v40 = vadd.f32 %v634_v18, %v633_v11  ;;  %v789_v18 = vrot.slane %v773_v38, %v7944_v9 }
 0x2d6   :  { %636 = vst [vmem:[#allocation15] sm:$0x1] %v635_v40  ;;  %642 = vst.msk [vmem:[#allocation4] sm:$0x1] %vm7654_vm2, %v635_v40 }
 0x2dd   :  { %v644_v59 = vld [vmem:[#allocation4] sm:$0x3] }
 0x2de   :  { %v782_v31 = vrot.slane %v644_v59, %v7950_v19  ;;  %v778_v60 = vrot.slane %v644_v59, %v7944_v9  ;;  %v793_v59 = vrot.slane %v773_v38, %v7950_v19 }
 0x2e0   :  { %870 = vmatprep.mubr.f32.mxu1 %v782_v31  ;;  %941 = vmatprep.mubr.f32.mxu0 %v782_v31 }
 0x2e1   :  { %871 = vmatmul.mubr.f32.vlgmr.msra.gmra.mrb[4].mxu1 %v778_v60  ;;  %942 = vmatmul.mubr.f32.vlgmr.msra.gmra.mrb[6].mxu0 %v778_v60 }
 0x2e2   :  { %5812 = vmatpush1.bf16.msra.mxu1 %v7663_v54  ;;  %5843 = vmatpush3.bf16.msra.mxu0 %v7665_v56  ;;  %v8003_v54 = vld [vmem:[#allocation15] sm:$0x1]  ;;  %v9696_v56 = vld [vmem:[#allocation23_spill] sm:$0xff] }
 0x2e3   :  { %5814 = vmatprep.subr.bf16.mxu1 %v7667_v57  ;;  %5844 = vmatprep.subr.bf16.mxu0 %v9692_v48  ;;  %v9697_v57 = vld [vmem:[#allocation24_spill] sm:$0xff] }
 0x2e4   :  { %1082 = vmatprep.mubr.f32.mxu1 %v7970_v63  ;;  %5297 = vmatprep.mubr.msk.f32.mxu0 %vm7478_vm0, %v7970_v63 }
 0x2e6   :  { %5816 = vmatpush1.bf16.msra.mxu1 %v7670_v2  ;;  %5846 = vmatpush3.bf16.msra.mxu0 %v7673_v4  ;;  %v9698_v2 = vld [vmem:[#allocation25_spill] sm:$0xff]  ;;  %v9699_v4 = vld [vmem:[#allocation26_spill] sm:$0xff] }
 0x2e7   :  { %5818 = vmatprep.subr.bf16.mxu1 %v7676_v5  ;;  %5847 = vmatprep.subr.bf16.mxu0 %v9692_v48  ;;  %v9700_v5 = vld [vmem:[#allocation27_spill] sm:$0xff] }
 0x2ea   :  { %5820 = vmatpush1.bf16.msra.mxu1 %v7683_v12  ;;  %5849 = vmatpush3.bf16.msra.mxu0 %v7686_v15  ;;  %v9701_v12 = vld [vmem:[#allocation28_spill] sm:$0xff]  ;;  %v9702_v15 = vld [vmem:[#allocation29_spill] sm:$0xff] }
 0x2eb   :  { %5822 = vmatprep.subr.bf16.mxu1 %v7689_v16  ;;  %5850 = vmatprep.subr.bf16.mxu0 %v9692_v48  ;;  %v9703_v16 = vld [vmem:[#allocation30_spill] sm:$0xff] }
 0x2ee   :  { %5824 = vmatpush1.bf16.msra.mxu1 %v7693_v21  ;;  %5852 = vmatpush3.bf16.msra.mxu0 %v7696_v23  ;;  %v9704_v21 = vld [vmem:[#allocation31_spill] sm:$0xff]  ;;  %v9705_v23 = vld [vmem:[#allocation32_spill] sm:$0xff] }
 0x2ef   :  { %5826 = vmatprep.subr.bf16.mxu1 %v7699_v24  ;;  %5853 = vmatprep.subr.bf16.mxu0 %v9692_v48  ;;  %v9706_v24 = vld [vmem:[#allocation33_spill] sm:$0xff] }
 0x2f2   :  { %5828 = vmatpush1.bf16.msra.mxu1 %v7703_v30  ;;  %5855 = vmatpush3.bf16.msra.mxu0 %v7706_v32  ;;  %v9707_v30 = vld [vmem:[#allocation34_spill] sm:$0xff]  ;;  %v9708_v32 = vld [vmem:[#allocation35_spill] sm:$0xff] }
 0x2f3   :  { %5830 = vmatprep.subr.bf16.mxu1 %v7709_v33  ;;  %5856 = vmatprep.subr.bf16.mxu0 %v9692_v48  ;;  %v9709_v33 = vld [vmem:[#allocation36_spill] sm:$0xff] }
 0x2f6   :  { %5832 = vmatpush1.bf16.msra.mxu1 %v7713_v39  ;;  %5858 = vmatpush3.bf16.msra.mxu0 %v7716_v41  ;;  %v9710_v39 = vld [vmem:[#allocation37_spill] sm:$0xff]  ;;  %v9711_v41 = vld [vmem:[#allocation38_spill] sm:$0xff] }
 0x2f7   :  { %5834 = vmatprep.subr.bf16.mxu1 %v7719_v42  ;;  %5859 = vmatprep.subr.bf16.mxu0 %v9692_v48  ;;  %v9712_v42 = vld [vmem:[#allocation39_spill] sm:$0xff] }
 0x2fa   :  { %5836 = vmatpush1.bf16.msra.mxu1 %v7723_v51  ;;  %5861 = vmatpush3.bf16.msra.mxu0 %v7726_v53  ;;  %v9713_v51 = vld [vmem:[#allocation40_spill] sm:$0xff]  ;;  %v9714_v53 = vld [vmem:[#allocation41_spill] sm:$0xff] }
 0x2fb   :  { %5838 = vmatprep.subr.bf16.mxu1 %v7729_v55  ;;  %5862 = vmatprep.subr.bf16.mxu0 %v9692_v48  ;;  %v9715_v55 = vld [vmem:[#allocation42_spill] sm:$0xff] }
 0x2fe   :  { %5840 = vmatpush1.bf16.msra.mxu1 %v7733_v61  ;;  %5864 = vmatpush3.bf16.msra.mxu0 %v7736_v62  ;;  %v9716_v61 = vld [vmem:[#allocation43_spill] sm:$0xff]  ;;  %v9717_v62 = vld [vmem:[#allocation44_spill] sm:$0xff] }
 0x2ff   :  { %5866 = vmatprep.subr.bf16.mxu1 %v7746_v7  ;;  %5930 = vmatprep.subr.bf16.mxu0 %v7748_v13  ;;  %v9718_v7 = vld [vmem:[#allocation45_spill] sm:$0xff]  ;;  %v9719_v13 = vld [vmem:[#allocation46_spill] sm:$0xff] }
 0x301   :  { %1083 = vmatmul.mubr.f32.vlgmr.msra.gmra.mrb[6].mxu1 %v8003_v54  ;;  %5298 = vmatmul.mubr.f32.vlgmr.msra.gmra.mrb[8].mxu0 %v8003_v54 }
 0x302   :  { %5868 = vmatpush1.bf16.msra.mxu1 %v7750_v17  ;;  %5932 = vmatpush1.bf16.msra.mxu0 %v7753_v8  ;;  %v9720_v17 = vld [vmem:[#allocation47_spill] sm:$0xff]  ;;  %v9721_v8 = vld [vmem:[#allocation48_spill] sm:$0xff] }
 0x303   :  { %5870 = vmatprep.subr.bf16.mxu1 %v7757_v27  ;;  %5934 = vmatprep.subr.bf16.mxu0 %v7759_v28  ;;  %v9722_v27 = vld [vmem:[#allocation49_spill] sm:$0xff]  ;;  %v9723_v28 = vld [vmem:[#allocation50_spill] sm:$0xff] }
 0x306   :  { %5872 = vmatpush1.bf16.msra.mxu1 %v7762_v35  ;;  %5936 = vmatpush1.bf16.msra.mxu0 %v7766_v37  ;;  %v9724_v35 = vld [vmem:[#allocation51_spill] sm:$0xff]  ;;  %v9725_v37 = vld [vmem:[#allocation52_spill] sm:$0xff] }
 0x307   :  { %5874 = vmatprep.subr.bf16.mxu1 %v7770_v45  ;;  %5938 = vmatprep.subr.bf16.mxu0 %v7772_v52  ;;  %v9726_v45 = vld [vmem:[#allocation53_spill] sm:$0xff]  ;;  %v9727_v52 = vld [vmem:[#allocation54_spill] sm:$0xff] }
 0x30a   :  { %5876 = vmatpush1.bf16.msra.mxu1 %v7774_v58  ;;  %5940 = vmatpush1.bf16.msra.mxu0 %v7777_v0  ;;  %v9728_v58 = vld [vmem:[#allocation55_spill] sm:$0xff]  ;;  %v9729_v0 = vld [vmem:[#allocation56_spill] sm:$0xff] }
 0x30b   :  { %5878 = vmatprep.subr.bf16.mxu1 %v7782_v10  ;;  %5942 = vmatprep.subr.bf16.mxu0 %v7784_v20  ;;  %v9730_v10 = vld [vmem:[#allocation57_spill] sm:$0xff]  ;;  %v9731_v20 = vld [vmem:[#allocation58_spill] sm:$0xff] }
 0x30e   :  { %5880 = vmatpush1.bf16.msra.mxu1 %v7786_v22  ;;  %5944 = vmatpush1.bf16.msra.mxu0 %v7789_v29  ;;  %v9732_v22 = vld [vmem:[#allocation59_spill] sm:$0xff]  ;;  %v9733_v29 = vld [vmem:[#allocation60_spill] sm:$0xff] }
 0x30f   :  { %5882 = vmatprep.subr.bf16.mxu1 %v9696_v56  ;;  %5946 = vmatprep.subr.bf16.mxu0 %v9697_v57 }
 0x312   :  { %5884 = vmatpush1.bf16.msra.mxu1 %v9698_v2  ;;  %5948 = vmatpush1.bf16.msra.mxu0 %v9699_v4 }
 0x313   :  { %5886 = vmatprep.subr.bf16.mxu1 %v9700_v5  ;;  %5950 = vmatprep.subr.bf16.mxu0 %v9701_v12 }
 0x316   :  { %5888 = vmatpush1.bf16.msra.mxu1 %v9702_v15  ;;  %5952 = vmatpush1.bf16.msra.mxu0 %v9703_v16  ;;  %v9744_v15 = vld [vmem:[#allocation71_spill] sm:$0xff] }
 0x317   :  { %5890 = vmatprep.subr.bf16.mxu1 %v9704_v21  ;;  %5954 = vmatprep.subr.bf16.mxu0 %v9705_v23  ;;  %v8079_v16 = vsub.s32 3, %v9744_v15 }
 0x319   :  { %9745 = vst [vmem:[#allocation23_spill] sm:$0xff] %v8079_v16  ;;  %v801_v23 = vrot.slane %v773_v38, %v8079_v16 }
 0x31a   :  { %5892 = vmatpush1.bf16.msra.mxu1 %v9706_v24  ;;  %5956 = vmatpush1.bf16.msra.mxu0 %v9707_v30  ;;  %v9746_v24 = vld [vmem:[#allocation72_spill] sm:$0xff] }
 0x31b   :  { %5894 = vmatprep.subr.bf16.mxu1 %v9708_v32  ;;  %5958 = vmatprep.subr.bf16.mxu0 %v9709_v33  ;;  %v797_v30 = vrot.slane %v773_v38, %v9746_v24 }
 0x31e   :  { %5896 = vmatpush1.bf16.msra.mxu1 %v9710_v39  ;;  %5960 = vmatpush1.bf16.msra.mxu0 %v9711_v41 }
 0x31f   :  { %5898 = vmatprep.subr.bf16.mxu1 %v9712_v42  ;;  %5962 = vmatprep.subr.bf16.mxu0 %v9713_v51 }
 0x322   :  { %5900 = vmatpush1.bf16.msra.mxu1 %v9714_v53  ;;  %5964 = vmatpush1.bf16.msra.mxu0 %v9715_v55  ;;  %v1160_v53 = vld [vmem:[#allocation2 + $0x1] ss:$8 sm:$0x7] }
 0x323   :  { %5902 = vmatprep.subr.bf16.mxu1 %v9716_v61  ;;  %5966 = vmatprep.subr.bf16.mxu0 %v9717_v62 }
 0x326   :  { %5904 = vmatpush1.bf16.msra.mxu1 %v9718_v7  ;;  %5968 = vmatpush1.bf16.msra.mxu0 %v9719_v13 }
 0x327   :  { %5906 = vmatprep.subr.bf16.mxu1 %v9720_v17  ;;  %5970 = vmatprep.subr.bf16.mxu0 %v9721_v8  ;;  %v1169_v17 = vrot.slane %v1160_v53, 1 }
 0x32a   :  { %5908 = vmatpush1.bf16.msra.mxu1 %v9722_v27  ;;  %5972 = vmatpush1.bf16.msra.mxu0 %v9723_v28 }
 0x32b   :  { %5910 = vmatprep.subr.bf16.mxu1 %v9724_v35  ;;  %5974 = vmatprep.subr.bf16.mxu0 %v9725_v37 }
 0x32e   :  { %5912 = vmatpush1.bf16.msra.mxu1 %v9726_v45  ;;  %5976 = vmatpush1.bf16.msra.mxu0 %v9727_v52  ;;  %v9747_v52 = vld [vmem:[#allocation22_spill] sm:$0xff] }
 0x32f   :  { %5914 = vmatprep.subr.bf16.mxu1 %v9728_v58  ;;  %5978 = vmatprep.subr.bf16.mxu0 %v9729_v0 }
 0x332   :  { %5916 = vmatpush1.bf16.msra.mxu1 %v9730_v10  ;;  %5980 = vmatpush1.bf16.msra.mxu0 %v9731_v20 }
 0x333   :  { %5918 = vmatprep.subr.bf16.mxu1 %v9732_v22  ;;  %5982 = vmatprep.subr.bf16.mxu0 %v9733_v29 }
 0x336   :  { %5920 = vmatpush1.bf16.msra.mxu1 %v9734_v36  ;;  %5984 = vmatpush1.bf16.msra.mxu0 %v9735_v14  ;;  %v1178_v14 = vld [vmem:[%s9415_s5] sm:$0x1] }
 0x337   :  { %5922 = vmatprep.subr.bf16.mxu1 %v9736_v43  ;;  %5986 = vmatprep.subr.bf16.mxu0 %v9737_v26 }
 0x33a   :  { %5924 = vmatpush1.bf16.msra.mxu1 %v9738_v47  ;;  %5988 = vmatpush1.bf16.msra.mxu0 %v9739_v6  ;;  %v1181_v6 = vrot.slane %v1160_v53, 2 }
 0x33b   :  { %5926 = vmatprep.subr.bf16.mxu1 %v9740_v1  ;;  %5990 = vmatprep.subr.bf16.mxu0 %v9741_v25 }
 0x33e   :  { %5928 = vmatpush1.bf16.msra.mxu1 %v9742_v34  ;;  %5992 = vmatpush1.bf16.msra.mxu0 %v9743_v50 }
 0x33f   :  { %6025 = vmatprep.subr.bf16.mxu0 %v9692_v48  ;;  %5994 = vmatprep.subr.bf16.mxu1 %v8070_v3 }
 0x3b4   :  { %v872_v11 = vpop.f32.mrb[4].mxu1  ;;  %v943_v40 = vpop.f32.mrb[6].mxu0 }
 0x3b5   :  { %v873_v31 = vadd.f32 %v872_v11, %v789_v18  ;;  %v874_v60 = vpop.f32.mrb[5].mxu1  ;;  %v945_v56 = vpop.f32.mrb[7].mxu0  ;;  %v944_v41 = vadd.f32 %v943_v40, %v797_v30  ;;  %v1519_v11 = vld [vmem:[#allocation10] sm:$0xff]  ;;  %v1522_v40 = vld [vmem:[#allocation10 + $0x18] sm:$0xff] }
 0x3b6   :  { %v875_v2 = vadd.f32 %v874_v60, %v793_v59  ;;  %v946_v33 = vadd.f32 %v945_v56, %v801_v23  ;;  %v1521_v59 = vld [vmem:[#allocation10 + $0x10] sm:$0xff]  ;;  %v1526_v60 = vld [vmem:[#allocation10 + $0x38] sm:$0xff]  ;;  %v1527_v23 = vld [vmem:[#allocation10 + $0x40] sm:$0xff] }
 0x3b7   :  { %v4942_v57 = vmul.f32 -1.442695, %v873_v31  ;;  %v1524_v31 = vld [vmem:[#allocation10 + $0x28] sm:$0xff]  ;;  %v1529_v56 = vld [vmem:[#allocation10 + $0x50] sm:$0xff]  ;;  %v1530_v30 = vld [vmem:[#allocation10 + $0x58] sm:$0xff] }
 0x3b8   :  { %v4943_v4 = vmul.f32 -1.442695, %v875_v2  ;;  %v8101_v15 = vpack.c.bf16 %v1529_v56, %v1526_v60  ;;  %v1557_v60 = vld [vmem:[#allocation10 + $0x130] sm:$0xff]  ;;  %v1560_v56 = vld [vmem:[#allocation10 + $0x148] sm:$0xff] }
 0x3b9   :  { %7150 = vpow2.f32 %v4942_v57 }
 0x3ba   :  { %7152 = vpow2.f32 %v4943_v4 }
 0x3c3   :  { %v7151_v5 = vpop.eup %7150 }
 0x3c4   :  { %v951_v12 = vadd.f32 1.0, %v7151_v5  ;;  %v7153_v21 = vpop.eup %7152  ;;  %v8097_v5 = vpack.c.bf16 %v1522_v40, %v1519_v11  ;;  %v1555_v40 = vld [vmem:[#allocation10 + $0x120] sm:$0xff] }
 0x3c5   :  { %v957_v32 = vadd.f32 1.0, %v7153_v21  ;;  %v1528_v21 = vld [vmem:[#allocation10 + $0x48] sm:$0xff] }
 0x3c6   :  { %7154 = vrcp.f32 %v951_v12  ;;  %v8099_v12 = vpack.c.bf16 %v1524_v31, %v1521_v59  ;;  %v1558_v31 = vld [vmem:[#allocation10 + $0x138] sm:$0xff] }
 0x3c7   :  { %7156 = vrcp.f32 %v957_v32  ;;  %v1532_v32 = vld [vmem:[#allocation10 + $0x68] sm:$0xff] }
 0x3d0   :  { %v7155_v39 = vpop.eup %7154 }
 0x3d1   :  { %v960_v42 = vmul.f32 %v7155_v39, %v946_v33  ;;  %v7157_v28 = vpop.eup %7156  ;;  %v1535_v33 = vld [vmem:[#allocation10 + $0x80] sm:$0xff] }
 0x3d2   :  { %v963_v37 = vsub.f32 1.0, %v7157_v28  ;;  %v965_v58 = vmul.f32 %v7157_v28, %v9747_v52  ;;  %v1540_v28 = vld [vmem:[#allocation10 + $0xa8] sm:$0xff]  ;;  %v1547_v52 = vld [vmem:[#allocation10 + $0xe0] sm:$0xff] }
 0x3d3   :  { %v961_v51 = vadd.f32 %v960_v42, %v944_v41  ;;  %v8107_v41 = vpack.c.bf16 %v1530_v30, %v1527_v23  ;;  %v1531_v42 = vld [vmem:[#allocation10 + $0x60] sm:$0xff]  ;;  %v1564_v30 = vld [vmem:[#allocation10 + $0x168] sm:$0xff] }
 0x3d4   :  { %v1084_v55 = vpop.f32.mrb[6].mxu1  ;;  %v1155_v61 = vpop.f32.mrb[8].mxu0 }
 0x3d5   :  { %7158 = vtanh.f32 %v961_v51  ;;  %v1161_v62 = vadd.f32 %v1160_v53, %v1084_v55  ;;  %v1086_v7 = vpop.f32.mrb[7].mxu1  ;;  %v5299_v13 = vpop.f32.mrb[9].mxu0  ;;  %v1179_v26 = vadd.f32 %v1178_v14, %v1155_v61  ;;  %v8111_v51 = vpack.c.bf16 %v1535_v33, %v1532_v32  ;;  %v1534_v53 = vld [vmem:[#allocation10 + $0x78] sm:$0xff]  ;;  %v1533_v55 = vld [vmem:[#allocation10 + $0x70] sm:$0xff]  ;;  %v1536_v61 = vld [vmem:[#allocation10 + $0x88] sm:$0xff] }
 0x3d6   :  { %v1171_v27 = vadd.f32 %v1169_v17, %v1086_v7  ;;  %v1541_v7 = vld [vmem:[#allocation10 + $0xb0] sm:$0xff]  ;;  %v8118_v13 = vpack.c.bf16 %v1534_v53, %v1531_v42  ;;  %v8120_v17 = vpack.c.bf16 %v1536_v61, %v1533_v55  ;;  %v1548_v14 = vld [vmem:[#allocation10 + $0xe8] sm:$0xff]  ;;  %v1563_v32 = vld [vmem:[#allocation10 + $0x160] sm:$0xff] }
 0x3d7   :  { %v4944_v8 = vmul.f32 -1.442695, %v1161_v62  ;;  %v1538_v62 = vld [vmem:[#allocation10 + $0x98] sm:$0xff]  ;;  %v1744_v61 = vld [vmem:[#allocation11 + $0x8] sm:$0xff] }
 0x3d8   :  { %v4945_v35 = vmul.f32 -1.442695, %v1171_v27  ;;  %v8124_v27 = vpack.c.bf16 %v1541_v7, %v1538_v62  ;;  %v1566_v33 = vld [vmem:[#allocation10 + $0x178] sm:$0xff]  ;;  %v1748_v62 = vld [vmem:[#allocation11 + $0x28] sm:$0xff] }
 0x3d9   :  { %7160 = vpow2.f32 %v4944_v8  ;;  %v1537_v8 = vld [vmem:[#allocation10 + $0x90] sm:$0xff]  ;;  %v8170_v53 = vpack.c.bf16 %v1566_v33, %v1563_v32  ;;  %v1746_v7 = vld [vmem:[#allocation11 + $0x18] sm:$0xff]  ;;  %v1759_v32 = vld [vmem:[#allocation11 + $0x80] sm:$0xff] }
 0x3da   :  { %7162 = vpow2.f32 %v4945_v35  ;;  %v1539_v35 = vld [vmem:[#allocation10 + $0xa0] sm:$0xff] }
 0x3df   :  { %v7159_v45 = vpop.eup %7158 }
 0x3e0   :  { %v964_v0 = vmul.f32 %v7159_v45, %v963_v37  ;;  %v1542_v37 = vld [vmem:[#allocation10 + $0xb8] sm:$0xff]  ;;  %v1544_v45 = vld [vmem:[#allocation10 + $0xc8] sm:$0xff] }
 0x3e2   :  { %v966_v10 = vadd.f32 %v965_v58, %v964_v0  ;;  %v8128_v58 = vpack.c.bf16 %v1540_v28, %v1537_v8  ;;  %v8130_v0 = vpack.c.bf16 %v1542_v37, %v1539_v35  ;;  %v8180_v8 = vpack.c.bf16 %v1748_v62, %v1744_v61  ;;  %v1750_v28 = vld [vmem:[#allocation11 + $0x38] sm:$0xff]  ;;  %v1743_v35 = vld [vmem:[#allocation11] sm:$0xff]  ;;  %v1761_v62 = vld [vmem:[#allocation11 + $0x90] sm:$0xff] }
 0x3e3   :  { %v7161_v20 = vpop.eup %7160  ;;  %v1747_v37 = vld [vmem:[#allocation11 + $0x20] sm:$0xff] }
 0x3e4   :  { %967 = vst [vmem:[#allocation15 + $0x1] sm:$0x1] %v966_v10  ;;  %968 = vst [vmem:[#allocation3] sm:$0x1] %v966_v10  ;;  %v1165_v22 = vadd.f32 1.0, %v7161_v20  ;;  %v7163_v29 = vpop.eup %7162  ;;  %v1543_v10 = vld [vmem:[#allocation10 + $0xc0] sm:$0xff]  ;;  %v8134_v20 = vpack.c.bf16 %v1547_v52, %v1544_v45  ;;  %v8182_v45 = vpack.c.bf16 %v1750_v28, %v1746_v7  ;;  %v8184_v52 = vpack.c.bf16 %v1747_v37, %v1743_v35 }
 0x3e5   :  { %v1175_v43 = vadd.f32 1.0, %v7163_v29  ;;  %v1545_v29 = vld [vmem:[#allocation10 + $0xd0] sm:$0xff]  ;;  %v1763_v61 = vld [vmem:[#allocation11 + $0xa0] sm:$0xff]  ;;  %v1768_v37 = vld [vmem:[#allocation11 + $0xc8] sm:$0xff] }
 0x3e6   :  { %7164 = vrcp.f32 %v1165_v22  ;;  %v1546_v22 = vld [vmem:[#allocation10 + $0xd8] sm:$0xff]  ;;  %v1765_v7 = vld [vmem:[#allocation11 + $0xb0] sm:$0xff]  ;;  %v8209_v28 = vpack.c.bf16 %v1763_v61, %v1759_v32 }
 0x3e7   :  { %7166 = vrcp.f32 %v1175_v43  ;;  %v1550_v43 = vld [vmem:[#allocation10 + $0xf8] sm:$0xff]  ;;  %v8211_v35 = vpack.c.bf16 %v1765_v7, %v1761_v62  ;;  %v1775_v62 = vld [vmem:[#allocation11 + $0x100] sm:$0xff] }
 0x3e8   :  { %v1782_v61 = vld [vmem:[#allocation11 + $0x138] sm:$0xff]  ;;  %v1779_v7 = vld [vmem:[#allocation11 + $0x120] sm:$0xff] }
 0x3e9   :  { %9748 = vst [vmem:[#allocation24_spill] sm:$0xff] %v8211_v35 }
 0x3eb   :  { %v8084_v36 = vld [vmem:[#allocation15 + $0x1] sm:$0x1] }
 0x3ec   :  { %1192 = vst.msk [vmem:[#allocation4 + $0x1] sm:$0x1] %vm7654_vm2, %v8084_v36 }
 0x3f0   :  { %v7165_v47 = vpop.eup %7164 }
 0x3f1   :  { %v1180_v1 = vmul.f32 %v7165_v47, %v1179_v26  ;;  %v7167_v34 = vpop.eup %7166  ;;  %v1553_v26 = vld [vmem:[#allocation10 + $0x110] sm:$0xff]  ;;  %v8138_v47 = vpack.c.bf16 %v1546_v22, %v1543_v10 }
 0x3f2   :  { %v1185_v50 = vsub.f32 1.0, %v7167_v34  ;;  %v1187_v38 = vmul.f32 %v7167_v34, %v8003_v54  ;;  %v1525_v54 = vld [vmem:[#allocation10 + $0x30] sm:$0xff]  ;;  %v1552_v34 = vld [vmem:[#allocation10 + $0x108] sm:$0xff] }
 0x3f3   :  { %v1183_v25 = vadd.f32 %v1181_v6, %v1180_v1  ;;  %v8105_v39 = vpack.c.bf16 %v1528_v21, %v1525_v54  ;;  %v8140_v6 = vpack.c.bf16 %v1548_v14, %v1545_v29  ;;  %v1549_v1 = vld [vmem:[#allocation10 + $0xf0] sm:$0xff]  ;;  %v8160_v54 = vpack.c.bf16 %v1560_v56, %v1557_v60  ;;  %v1752_v14 = vld [vmem:[#allocation11 + $0x48] sm:$0xff] }
 0x3f4   :  { %v1561_v21 = vld [vmem:[#allocation10 + $0x150] sm:$0xff]  ;;  %v1760_v56 = vld [vmem:[#allocation11 + $0x88] sm:$0xff] }
 0x3f5   :  { %7168 = vtanh.f32 %v1183_v25  ;;  %v8144_v25 = vpack.c.bf16 %v1553_v26, %v1550_v43  ;;  %v8168_v42 = vpack.c.bf16 %v1564_v30, %v1561_v21  ;;  %v1745_v10 = vld [vmem:[#allocation11 + $0x10] sm:$0xff]  ;;  %v1756_v43 = vld [vmem:[#allocation11 + $0x68] sm:$0xff]  ;;  %v1754_v26 = vld [vmem:[#allocation11 + $0x58] sm:$0xff] }
 0x3f6   :  { %v1749_v22 = vld [vmem:[#allocation11 + $0x30] sm:$0xff]  ;;  %v1766_v30 = vld [vmem:[#allocation11 + $0xb8] sm:$0xff] }
 0x3f7   :  { %v8187_v29 = vpack.c.bf16 %v1749_v22, %v1745_v10  ;;  %v1772_v10 = vld [vmem:[#allocation11 + $0xe8] sm:$0xff]  ;;  %v1770_v22 = vld [vmem:[#allocation11 + $0xd8] sm:$0xff] }
 0x3ff   :  { %v7169_v44 = vpop.eup %7168 }
 0x400   :  { %v1186_v49 = vmul.f32 %v7169_v44, %v1185_v50  ;;  %v1551_v50 = vld [vmem:[#allocation10 + $0x100] sm:$0xff]  ;;  %v1554_v44 = vld [vmem:[#allocation10 + $0x118] sm:$0xff] }
 0x401   :  { %v8150_v11 = vpack.c.bf16 %v1554_v44, %v1551_v50  ;;  %v1751_v50 = vld [vmem:[#allocation11 + $0x40] sm:$0xff] }
 0x402   :  { %v1188_v18 = vadd.f32 %v1187_v38, %v1186_v49  ;;  %v1556_v49 = vld [vmem:[#allocation10 + $0x128] sm:$0xff]  ;;  %v1559_v38 = vld [vmem:[#allocation10 + $0x140] sm:$0xff] }
 0x403   :  { %v8154_v59 = vpack.c.bf16 %v1559_v38, %v1556_v49  ;;  %v1755_v44 = vld [vmem:[#allocation11 + $0x60] sm:$0xff] }
 0x404   :  { %1189 = vst [vmem:[#allocation15] sm:$0x1] %v1188_v18  ;;  %1191 = vst.msk [vmem:[#allocation4] sm:$0x1] %vm7654_vm2, %v1188_v18  ;;  %v8148_v18 = vpack.c.bf16 %v1552_v34, %v1549_v1  ;;  %v8192_v1 = vpack.c.bf16 %v1756_v43, %v1752_v14  ;;  %v1758_v34 = vld [vmem:[#allocation11 + $0x78] sm:$0xff]  ;;  %v8196_v38 = vpack.c.bf16 %v1755_v44, %v1751_v50 }
 0x405   :  { %v8194_v49 = vpack.c.bf16 %v1758_v34, %v1754_v26  ;;  %v8216_v14 = vpack.c.bf16 %v1772_v10, %v1768_v37  ;;  %v1774_v43 = vld [vmem:[#allocation11 + $0xf8] sm:$0xff]  ;;  %v1767_v26 = vld [vmem:[#allocation11 + $0xc0] sm:$0xff]  ;;  %v8232_v10 = vpack.c.bf16 %v1779_v7, %v1775_v62 }
 0x406   :  { %v1771_v34 = vld [vmem:[#allocation11 + $0xe0] sm:$0xff]  ;;  %v8218_v50 = vpack.c.bf16 %v1774_v43, %v1770_v22  ;;  %v1777_v22 = vld [vmem:[#allocation11 + $0x110] sm:$0xff] }
 0x407   :  { %9749 = vst [vmem:[#allocation25_spill] sm:$0xff] %v8216_v14  ;;  %v8220_v44 = vpack.c.bf16 %v1771_v34, %v1767_v26  ;;  %9755 = vst [vmem:[#allocation31_spill] sm:$0xff] %v8232_v10  ;;  %v1781_v43 = vld [vmem:[#allocation11 + $0x130] sm:$0xff]  ;;  %v1784_v34 = vld [vmem:[#allocation11 + $0x148] sm:$0xff] }
 0x408   :  { %9750 = vst [vmem:[#allocation26_spill] sm:$0xff] %v8218_v50  ;;  %v8235_v26 = vpack.c.bf16 %v1781_v43, %v1777_v22  ;;  %v1785_v22 = vld [vmem:[#allocation11 + $0x150] sm:$0xff] }
 0x409   :  { %9751 = vst [vmem:[#allocation27_spill] sm:$0xff] %v8220_v44  ;;  %v1789_v43 = vld [vmem:[#allocation11 + $0x170] sm:$0xff] }
 0x40a   :  { %9756 = vst [vmem:[#allocation32_spill] sm:$0xff] %v8235_v26 }
 0x40b   :  { %v1193_v57 = vld [vmem:[#allocation4] sm:$0x3]  ;;  %v8176_v55 = vld [vmem:[#allocation15] sm:$0x1] }
 0x40c   :  { %v1331_v2 = vrot.slane %v1193_v57, %v7950_v19  ;;  %v1327_v4 = vrot.slane %v1193_v57, %v7944_v9  ;;  %v1562_v57 = vld [vmem:[#allocation10 + $0x158] sm:$0xff] }
 0x40e   :  { %1419 = vmatprep.mubr.f32.mxu1 %v1331_v2  ;;  %1490 = vmatprep.mubr.f32.mxu0 %v1331_v2  ;;  %v1565_v2 = vld [vmem:[#allocation10 + $0x170] sm:$0xff] }
 0x40f   :  { %1420 = vmatmul.mubr.f32.vlgmr.msra.gmra.mrb[8].mxu1 %v1327_v4  ;;  %1491 = vmatmul.mubr.f32.vlgmr.msra.gmra.mrb[10].mxu0 %v1327_v4  ;;  %v8158_v4 = vpack.c.bf16 %v1558_v31, %v1555_v40  ;;  %v8164_v23 = vpack.c.bf16 %v1565_v2, %v1562_v57  ;;  %v1753_v40 = vld [vmem:[#allocation11 + $0x50] sm:$0xff]  ;;  %v1764_v57 = vld [vmem:[#allocation11 + $0xa8] sm:$0xff]  ;;  %v1762_v2 = vld [vmem:[#allocation11 + $0x98] sm:$0xff] }
 0x410   :  { %5996 = vmatpush1.bf16.msra.mxu1 %v8097_v5  ;;  %6027 = vmatpush3.bf16.msra.mxu0 %v8099_v12  ;;  %v1757_v31 = vld [vmem:[#allocation11 + $0x70] sm:$0xff]  ;;  %v8204_v21 = vpack.c.bf16 %v1764_v57, %v1760_v56  ;;  %v8206_v33 = vpack.c.bf16 %v1766_v30, %v1762_v2  ;;  %v1776_v57 = vld [vmem:[#allocation11 + $0x108] sm:$0xff]  ;;  %v1778_v30 = vld [vmem:[#allocation11 + $0x118] sm:$0xff] }
 0x411   :  { %5998 = vmatprep.subr.bf16.mxu1 %v8101_v15  ;;  %6028 = vmatprep.subr.bf16.mxu0 %v9692_v48  ;;  %v8199_v60 = vpack.c.bf16 %v1757_v31, %v1753_v40  ;;  %v1769_v40 = vld [vmem:[#allocation11 + $0xd0] sm:$0xff]  ;;  %v1780_v2 = vld [vmem:[#allocation11 + $0x128] sm:$0xff]  ;;  %v8230_v37 = vpack.c.bf16 %v1782_v61, %v1778_v30  ;;  %v1783_v30 = vld [vmem:[#allocation11 + $0x140] sm:$0xff] }
 0x412   :  { %1631 = vmatprep.mubr.f32.mxu1 %v7970_v63  ;;  %5332 = vmatprep.mubr.msk.f32.mxu0 %vm7478_vm0, %v7970_v63  ;;  %v1773_v31 = vld [vmem:[#allocation11 + $0xf0] sm:$0xff]  ;;  %v8228_v32 = vpack.c.bf16 %v1780_v2, %v1776_v57  ;;  %v1790_v2 = vld [vmem:[#allocation11 + $0x178] sm:$0xff]  ;;  %v1787_v61 = vld [vmem:[#allocation11 + $0x160] sm:$0xff] }
 0x413   :  { %v8223_v56 = vpack.c.bf16 %v1773_v31, %v1769_v40  ;;  %9754 = vst [vmem:[#allocation30_spill] sm:$0xff] %v8230_v37  ;;  %v1788_v40 = vld [vmem:[#allocation11 + $0x168] sm:$0xff]  ;;  %v1786_v31 = vld [vmem:[#allocation11 + $0x158] sm:$0xff]  ;;  %v8244_v7 = vpack.c.bf16 %v1787_v61, %v1783_v30 }
 0x414   :  { %6000 = vmatpush1.bf16.msra.mxu1 %v8105_v39  ;;  %6030 = vmatpush3.bf16.msra.mxu0 %v8107_v41  ;;  %9753 = vst [vmem:[#allocation29_spill] sm:$0xff] %v8228_v32  ;;  %v8240_v57 = vpack.c.bf16 %v1788_v40, %v1784_v34  ;;  %v8242_v62 = vpack.c.bf16 %v1790_v2, %v1786_v31  ;;  %v1798_v40 = vld [vmem:[#allocation11 + $0x1b8] sm:$0xff]  ;;  %v1791_v31 = vld [vmem:[#allocation11 + $0x180] sm:$0xff] }
 0x415   :  { %6002 = vmatprep.subr.bf16.mxu1 %v8111_v51  ;;  %6031 = vmatprep.subr.bf16.mxu0 %v9692_v48  ;;  %9752 = vst [vmem:[#allocation28_spill] sm:$0xff] %v8223_v56  ;;  %9759 = vst [vmem:[#allocation35_spill] sm:$0xff] %v8244_v7  ;;  %v1795_v2 = vld [vmem:[#allocation11 + $0x1a0] sm:$0xff] }
 0x416   :  { %9757 = vst [vmem:[#allocation33_spill] sm:$0xff] %v8240_v57  ;;  %9758 = vst [vmem:[#allocation34_spill] sm:$0xff] %v8242_v62  ;;  %v8256_v61 = vpack.c.bf16 %v1795_v2, %v1791_v31 }
 0x418   :  { %6004 = vmatpush1.bf16.msra.mxu1 %v8118_v13  ;;  %6033 = vmatpush3.bf16.msra.mxu0 %v8120_v17  ;;  %9763 = vst [vmem:[#allocation39_spill] sm:$0xff] %v8256_v61 }
 0x419   :  { %6006 = vmatprep.subr.bf16.mxu1 %v8124_v27  ;;  %6034 = vmatprep.subr.bf16.mxu0 %v9692_v48 }
 0x41c   :  { %6008 = vmatpush1.bf16.msra.mxu1 %v8128_v58  ;;  %6036 = vmatpush3.bf16.msra.mxu0 %v8130_v0 }
 0x41d   :  { %6010 = vmatprep.subr.bf16.mxu1 %v8134_v20  ;;  %6037 = vmatprep.subr.bf16.mxu0 %v9692_v48 }
 0x420   :  { %6012 = vmatpush1.bf16.msra.mxu1 %v8138_v47  ;;  %6039 = vmatpush3.bf16.msra.mxu0 %v8140_v6 }
 0x421   :  { %6014 = vmatprep.subr.bf16.mxu1 %v8144_v25  ;;  %6040 = vmatprep.subr.bf16.mxu0 %v9692_v48 }
 0x424   :  { %6016 = vmatpush1.bf16.msra.mxu1 %v8148_v18  ;;  %6042 = vmatpush3.bf16.msra.mxu0 %v8150_v11 }
 0x425   :  { %6018 = vmatprep.subr.bf16.mxu1 %v8154_v59  ;;  %6043 = vmatprep.subr.bf16.mxu0 %v9692_v48 }
 0x428   :  { %6020 = vmatpush1.bf16.msra.mxu1 %v8158_v4  ;;  %6045 = vmatpush3.bf16.msra.mxu0 %v8160_v54 }
 0x429   :  { %6022 = vmatprep.subr.bf16.mxu1 %v8164_v23  ;;  %6046 = vmatprep.subr.bf16.mxu0 %v9692_v48 }
 0x42c   :  { %6024 = vmatpush1.bf16.msra.mxu1 %v8168_v42  ;;  %6048 = vmatpush3.bf16.msra.mxu0 %v8170_v53 }
 0x42d   :  { %6050 = vmatprep.subr.bf16.mxu1 %v8180_v8  ;;  %6114 = vmatprep.subr.bf16.mxu0 %v8182_v45 }
 0x42f   :  { %1632 = vmatmul.mubr.f32.vlgmr.msra.gmra.mrb[10].mxu1 %v8176_v55  ;;  %5333 = vmatmul.mubr.f32.vlgmr.msra.gmra.mrb[12].mxu0 %v8176_v55 }
 0x430   :  { %6052 = vmatpush1.bf16.msra.mxu1 %v8184_v52  ;;  %6116 = vmatpush1.bf16.msra.mxu0 %v8187_v29 }
 0x431   :  { %6054 = vmatprep.subr.bf16.mxu1 %v8192_v1  ;;  %6118 = vmatprep.subr.bf16.mxu0 %v8194_v49 }
 0x434   :  { %6056 = vmatpush1.bf16.msra.mxu1 %v8196_v38  ;;  %6120 = vmatpush1.bf16.msra.mxu0 %v8199_v60 }
 0x435   :  { %6058 = vmatprep.subr.bf16.mxu1 %v8204_v21  ;;  %6122 = vmatprep.subr.bf16.mxu0 %v8206_v33 }
 0x438   :  { %6060 = vmatpush1.bf16.msra.mxu1 %v8209_v28  ;;  %6124 = vmatpush1.bf16.msra.mxu0 %v8211_v35 }
 0x439   :  { %6062 = vmatprep.subr.bf16.mxu1 %v8216_v14  ;;  %6126 = vmatprep.subr.bf16.mxu0 %v8218_v50 }
 0x43c   :  { %6064 = vmatpush1.bf16.msra.mxu1 %v8220_v44  ;;  %6128 = vmatpush1.bf16.msra.mxu0 %v8223_v56  ;;  %v1868_v56 = vld [vmem:[#allocation11 + $0x3e8] sm:$0xff]  ;;  %v1870_v44 = vld [vmem:[#allocation11 + $0x3f8] sm:$0xff] }
 0x43d   :  { %6066 = vmatprep.subr.bf16.mxu1 %v8228_v32  ;;  %6130 = vmatprep.subr.bf16.mxu0 %v8230_v37  ;;  %v8247_v37 = vpack.c.bf16 %v1789_v43, %v1785_v22  ;;  %v1796_v32 = vld [vmem:[#allocation11 + $0x1a8] sm:$0xff]  ;;  %v1793_v22 = vld [vmem:[#allocation11 + $0x190] sm:$0xff] }
 0x43e   :  { %v1797_v43 = vld [vmem:[#allocation11 + $0x1b0] sm:$0xff] }
 0x43f   :  { %9760 = vst [vmem:[#allocation36_spill] sm:$0xff] %v8247_v37 }
 0x440   :  { %6068 = vmatpush1.bf16.msra.mxu1 %v8232_v10  ;;  %6132 = vmatpush1.bf16.msra.mxu0 %v8235_v26  ;;  %v1792_v10 = vld [vmem:[#allocation11 + $0x188] sm:$0xff]  ;;  %v1794_v26 = vld [vmem:[#allocation11 + $0x198] sm:$0xff] }
 0x441   :  { %6070 = vmatprep.subr.bf16.mxu1 %v8240_v57  ;;  %6134 = vmatprep.subr.bf16.mxu0 %v8242_v62  ;;  %v8252_v34 = vpack.c.bf16 %v1796_v32, %v1792_v10  ;;  %v8254_v30 = vpack.c.bf16 %v1798_v40, %v1794_v26  ;;  %v8259_v62 = vpack.c.bf16 %v1797_v43, %v1793_v22  ;;  %v1804_v57 = vld [vmem:[#allocation11 + $0x1e8] sm:$0xff]  ;;  %v1806_v10 = vld [vmem:[#allocation11 + $0x1f8] sm:$0xff]  ;;  %v1799_v26 = vld [vmem:[#allocation11 + $0x1c0] sm:$0xff] }
 0x442   :  { %v1803_v40 = vld [vmem:[#allocation11 + $0x1e0] sm:$0xff]  ;;  %v1801_v22 = vld [vmem:[#allocation11 + $0x1d0] sm:$0xff] }
 0x443   :  { %9761 = vst [vmem:[#allocation37_spill] sm:$0xff] %v8252_v34  ;;  %9762 = vst [vmem:[#allocation38_spill] sm:$0xff] %v8254_v30  ;;  %v8268_v2 = vpack.c.bf16 %v1803_v40, %v1799_v26  ;;  %v1805_v43 = vld [vmem:[#allocation11 + $0x1f0] sm:$0xff] }
 0x444   :  { %6072 = vmatpush1.bf16.msra.mxu1 %v8244_v7  ;;  %6136 = vmatpush1.bf16.msra.mxu0 %v8247_v37  ;;  %9764 = vst [vmem:[#allocation40_spill] sm:$0xff] %v8259_v62  ;;  %v1800_v7 = vld [vmem:[#allocation11 + $0x1c8] sm:$0xff]  ;;  %v1802_v37 = vld [vmem:[#allocation11 + $0x1d8] sm:$0xff] }
 0x445   :  { %6074 = vmatprep.subr.bf16.mxu1 %v8252_v34  ;;  %6138 = vmatprep.subr.bf16.mxu0 %v8254_v30  ;;  %v8264_v32 = vpack.c.bf16 %v1804_v57, %v1800_v7  ;;  %v8266_v31 = vpack.c.bf16 %v1806_v10, %v1802_v37  ;;  %9767 = vst [vmem:[#allocation43_spill] sm:$0xff] %v8268_v2  ;;  %v1812_v34 = vld [vmem:[#allocation11 + $0x228] sm:$0xff]  ;;  %v1814_v37 = vld [vmem:[#allocation11 + $0x238] sm:$0xff]  ;;  %v1807_v7 = vld [vmem:[#allocation11 + $0x200] sm:$0xff] }
 0x446   :  { %v8271_v30 = vpack.c.bf16 %v1805_v43, %v1801_v22  ;;  %v1811_v10 = vld [vmem:[#allocation11 + $0x220] sm:$0xff]  ;;  %v1809_v22 = vld [vmem:[#allocation11 + $0x210] sm:$0xff] }
 0x447   :  { %9765 = vst [vmem:[#allocation41_spill] sm:$0xff] %v8264_v32  ;;  %9766 = vst [vmem:[#allocation42_spill] sm:$0xff] %v8266_v31  ;;  %v8280_v40 = vpack.c.bf16 %v1811_v10, %v1807_v7  ;;  %v1813_v43 = vld [vmem:[#allocation11 + $0x230] sm:$0xff] }
 0x448   :  { %6076 = vmatpush1.bf16.msra.mxu1 %v8256_v61  ;;  %6140 = vmatpush1.bf16.msra.mxu0 %v8259_v62  ;;  %9768 = vst [vmem:[#allocation44_spill] sm:$0xff] %v8271_v30  ;;  %v1808_v61 = vld [vmem:[#allocation11 + $0x208] sm:$0xff]  ;;  %v1810_v62 = vld [vmem:[#allocation11 + $0x218] sm:$0xff] }
 0x449   :  { %6078 = vmatprep.subr.bf16.mxu1 %v8264_v32  ;;  %6142 = vmatprep.subr.bf16.mxu0 %v8266_v31  ;;  %v8276_v57 = vpack.c.bf16 %v1812_v34, %v1808_v61  ;;  %v8278_v26 = vpack.c.bf16 %v1814_v37, %v1810_v62  ;;  %9771 = vst [vmem:[#allocation47_spill] sm:$0xff] %v8280_v40  ;;  %v1820_v32 = vld [vmem:[#allocation11 + $0x268] sm:$0xff]  ;;  %v1822_v62 = vld [vmem:[#allocation11 + $0x278] sm:$0xff]  ;;  %v1815_v61 = vld [vmem:[#allocation11 + $0x240] sm:$0xff] }
 0x44a   :  { %v8283_v31 = vpack.c.bf16 %v1813_v43, %v1809_v22  ;;  %v1819_v37 = vld [vmem:[#allocation11 + $0x260] sm:$0xff]  ;;  %v1817_v22 = vld [vmem:[#allocation11 + $0x250] sm:$0xff] }
 0x44b   :  { %9769 = vst [vmem:[#allocation45_spill] sm:$0xff] %v8276_v57  ;;  %9770 = vst [vmem:[#allocation46_spill] sm:$0xff] %v8278_v26  ;;  %v8292_v10 = vpack.c.bf16 %v1819_v37, %v1815_v61  ;;  %v1821_v43 = vld [vmem:[#allocation11 + $0x270] sm:$0xff] }
 0x44c   :  { %6080 = vmatpush1.bf16.msra.mxu1 %v8268_v2  ;;  %6144 = vmatpush1.bf16.msra.mxu0 %v8271_v30  ;;  %9772 = vst [vmem:[#allocation48_spill] sm:$0xff] %v8283_v31  ;;  %v1816_v2 = vld [vmem:[#allocation11 + $0x248] sm:$0xff]  ;;  %v1818_v30 = vld [vmem:[#allocation11 + $0x258] sm:$0xff] }
 0x44d   :  { %6082 = vmatprep.subr.bf16.mxu1 %v8276_v57  ;;  %6146 = vmatprep.subr.bf16.mxu0 %v8278_v26  ;;  %v8288_v34 = vpack.c.bf16 %v1820_v32, %v1816_v2  ;;  %v8290_v7 = vpack.c.bf16 %v1822_v62, %v1818_v30  ;;  %9775 = vst [vmem:[#allocation51_spill] sm:$0xff] %v8292_v10  ;;  %v1828_v57 = vld [vmem:[#allocation11 + $0x2a8] sm:$0xff]  ;;  %v1830_v30 = vld [vmem:[#allocation11 + $0x2b8] sm:$0xff]  ;;  %v1823_v2 = vld [vmem:[#allocation11 + $0x280] sm:$0xff] }
 0x44e   :  { %v8295_v26 = vpack.c.bf16 %v1821_v43, %v1817_v22  ;;  %v1827_v62 = vld [vmem:[#allocation11 + $0x2a0] sm:$0xff]  ;;  %v1825_v22 = vld [vmem:[#allocation11 + $0x290] sm:$0xff] }
 0x44f   :  { %9773 = vst [vmem:[#allocation49_spill] sm:$0xff] %v8288_v34  ;;  %9774 = vst [vmem:[#allocation50_spill] sm:$0xff] %v8290_v7  ;;  %v8304_v37 = vpack.c.bf16 %v1827_v62, %v1823_v2  ;;  %v1829_v43 = vld [vmem:[#allocation11 + $0x2b0] sm:$0xff] }
 0x450   :  { %6084 = vmatpush1.bf16.msra.mxu1 %v8280_v40  ;;  %6148 = vmatpush1.bf16.msra.mxu0 %v8283_v31  ;;  %9776 = vst [vmem:[#allocation52_spill] sm:$0xff] %v8295_v26  ;;  %v1824_v40 = vld [vmem:[#allocation11 + $0x288] sm:$0xff]  ;;  %v1826_v31 = vld [vmem:[#allocation11 + $0x298] sm:$0xff] }
 0x451   :  { %6086 = vmatprep.subr.bf16.mxu1 %v8288_v34  ;;  %6150 = vmatprep.subr.bf16.mxu0 %v8290_v7  ;;  %v8300_v32 = vpack.c.bf16 %v1828_v57, %v1824_v40  ;;  %v8302_v61 = vpack.c.bf16 %v1830_v30, %v1826_v31  ;;  %9779 = vst [vmem:[#allocation55_spill] sm:$0xff] %v8304_v37  ;;  %v1836_v34 = vld [vmem:[#allocation11 + $0x2e8] sm:$0xff]  ;;  %v1838_v31 = vld [vmem:[#allocation11 + $0x2f8] sm:$0xff]  ;;  %v1831_v40 = vld [vmem:[#allocation11 + $0x2c0] sm:$0xff] }
 0x452   :  { %v8307_v7 = vpack.c.bf16 %v1829_v43, %v1825_v22  ;;  %v1835_v30 = vld [vmem:[#allocation11 + $0x2e0] sm:$0xff]  ;;  %v1833_v22 = vld [vmem:[#allocation11 + $0x2d0] sm:$0xff] }
 0x453   :  { %9777 = vst [vmem:[#allocation53_spill] sm:$0xff] %v8300_v32  ;;  %9778 = vst [vmem:[#allocation54_spill] sm:$0xff] %v8302_v61  ;;  %v8316_v62 = vpack.c.bf16 %v1835_v30, %v1831_v40  ;;  %v1837_v43 = vld [vmem:[#allocation11 + $0x2f0] sm:$0xff] }
 0x454   :  { %6088 = vmatpush1.bf16.msra.mxu1 %v8292_v10  ;;  %6152 = vmatpush1.bf16.msra.mxu0 %v8295_v26  ;;  %9780 = vst [vmem:[#allocation56_spill] sm:$0xff] %v8307_v7  ;;  %v1832_v10 = vld [vmem:[#allocation11 + $0x2c8] sm:$0xff]  ;;  %v1834_v26 = vld [vmem:[#allocation11 + $0x2d8] sm:$0xff] }
 0x455   :  { %6090 = vmatprep.subr.bf16.mxu1 %v8300_v32  ;;  %6154 = vmatprep.subr.bf16.mxu0 %v8302_v61  ;;  %v8312_v57 = vpack.c.bf16 %v1836_v34, %v1832_v10  ;;  %v8314_v2 = vpack.c.bf16 %v1838_v31, %v1834_v26  ;;  %9783 = vst [vmem:[#allocation59_spill] sm:$0xff] %v8316_v62  ;;  %v1844_v32 = vld [vmem:[#allocation11 + $0x328] sm:$0xff]  ;;  %v1846_v26 = vld [vmem:[#allocation11 + $0x338] sm:$0xff]  ;;  %v1839_v10 = vld [vmem:[#allocation11 + $0x300] sm:$0xff] }
 0x456   :  { %v8319_v61 = vpack.c.bf16 %v1837_v43, %v1833_v22  ;;  %v1843_v31 = vld [vmem:[#allocation11 + $0x320] sm:$0xff]  ;;  %v1841_v22 = vld [vmem:[#allocation11 + $0x310] sm:$0xff] }
 0x457   :  { %9781 = vst [vmem:[#allocation57_spill] sm:$0xff] %v8312_v57  ;;  %9782 = vst [vmem:[#allocation58_spill] sm:$0xff] %v8314_v2  ;;  %v8328_v30 = vpack.c.bf16 %v1843_v31, %v1839_v10  ;;  %v1845_v43 = vld [vmem:[#allocation11 + $0x330] sm:$0xff] }
 0x458   :  { %6092 = vmatpush1.bf16.msra.mxu1 %v8304_v37  ;;  %6156 = vmatpush1.bf16.msra.mxu0 %v8307_v7  ;;  %9784 = vst [vmem:[#allocation60_spill] sm:$0xff] %v8319_v61  ;;  %v1840_v37 = vld [vmem:[#allocation11 + $0x308] sm:$0xff]  ;;  %v1842_v7 = vld [vmem:[#allocation11 + $0x318] sm:$0xff] }
 0x459   :  { %6094 = vmatprep.subr.bf16.mxu1 %v8312_v57  ;;  %6158 = vmatprep.subr.bf16.mxu0 %v8314_v2  ;;  %v8324_v34 = vpack.c.bf16 %v1844_v32, %v1840_v37  ;;  %v8326_v40 = vpack.c.bf16 %v1846_v26, %v1842_v7  ;;  %9787 = vst [vmem:[#allocation63_spill] sm:$0xff] %v8328_v30  ;;  %v1852_v57 = vld [vmem:[#allocation11 + $0x368] sm:$0xff]  ;;  %v1854_v7 = vld [vmem:[#allocation11 + $0x378] sm:$0xff]  ;;  %v1847_v37 = vld [vmem:[#allocation11 + $0x340] sm:$0xff] }
 0x45a   :  { %v8331_v2 = vpack.c.bf16 %v1845_v43, %v1841_v22  ;;  %v1851_v26 = vld [vmem:[#allocation11 + $0x360] sm:$0xff]  ;;  %v1849_v22 = vld [vmem:[#allocation11 + $0x350] sm:$0xff] }
 0x45b   :  { %9785 = vst [vmem:[#allocation61_spill] sm:$0xff] %v8324_v34  ;;  %9786 = vst [vmem:[#allocation62_spill] sm:$0xff] %v8326_v40  ;;  %v8340_v31 = vpack.c.bf16 %v1851_v26, %v1847_v37  ;;  %v1853_v43 = vld [vmem:[#allocation11 + $0x370] sm:$0xff] }
 0x45c   :  { %6096 = vmatpush1.bf16.msra.mxu1 %v8316_v62  ;;  %6160 = vmatpush1.bf16.msra.mxu0 %v8319_v61  ;;  %9788 = vst [vmem:[#allocation64_spill] sm:$0xff] %v8331_v2  ;;  %v1848_v62 = vld [vmem:[#allocation11 + $0x348] sm:$0xff]  ;;  %v1850_v61 = vld [vmem:[#allocation11 + $0x358] sm:$0xff] }
 0x45d   :  { %6098 = vmatprep.subr.bf16.mxu1 %v8324_v34  ;;  %6162 = vmatprep.subr.bf16.mxu0 %v8326_v40  ;;  %v8336_v32 = vpack.c.bf16 %v1852_v57, %v1848_v62  ;;  %v8338_v10 = vpack.c.bf16 %v1854_v7, %v1850_v61  ;;  %9791 = vst [vmem:[#allocation67_spill] sm:$0xff] %v8340_v31  ;;  %v1860_v34 = vld [vmem:[#allocation11 + $0x3a8] sm:$0xff]  ;;  %v1862_v61 = vld [vmem:[#allocation11 + $0x3b8] sm:$0xff]  ;;  %v1855_v62 = vld [vmem:[#allocation11 + $0x380] sm:$0xff] }
 0x45e   :  { %v8343_v40 = vpack.c.bf16 %v1853_v43, %v1849_v22  ;;  %v1859_v7 = vld [vmem:[#allocation11 + $0x3a0] sm:$0xff]  ;;  %v1857_v22 = vld [vmem:[#allocation11 + $0x390] sm:$0xff] }
 0x45f   :  { %9789 = vst [vmem:[#allocation65_spill] sm:$0xff] %v8336_v32  ;;  %9790 = vst [vmem:[#allocation66_spill] sm:$0xff] %v8338_v10  ;;  %v8352_v26 = vpack.c.bf16 %v1859_v7, %v1855_v62  ;;  %v1861_v43 = vld [vmem:[#allocation11 + $0x3b0] sm:$0xff] }
 0x460   :  { %6100 = vmatpush1.bf16.msra.mxu1 %v8328_v30  ;;  %6164 = vmatpush1.bf16.msra.mxu0 %v8331_v2  ;;  %9792 = vst [vmem:[#allocation68_spill] sm:$0xff] %v8343_v40  ;;  %v1856_v30 = vld [vmem:[#allocation11 + $0x388] sm:$0xff]  ;;  %v1858_v2 = vld [vmem:[#allocation11 + $0x398] sm:$0xff]  ;;  %v1865_v62 = vld [vmem:[#allocation11 + $0x3d0] sm:$0xff] }
 0x461   :  { %6102 = vmatprep.subr.bf16.mxu1 %v8336_v32  ;;  %6166 = vmatprep.subr.bf16.mxu0 %v8338_v10  ;;  %v8348_v57 = vpack.c.bf16 %v1860_v34, %v1856_v30  ;;  %v8350_v37 = vpack.c.bf16 %v1862_v61, %v1858_v2  ;;  %9795 = vst [vmem:[#allocation71_spill] sm:$0xff] %v8352_v26  ;;  %v1864_v32 = vld [vmem:[#allocation11 + $0x3c8] sm:$0xff]  ;;  %v1863_v2 = vld [vmem:[#allocation11 + $0x3c0] sm:$0xff] }
 0x462   :  { %v8355_v10 = vpack.c.bf16 %v1861_v43, %v1857_v22  ;;  %v8358_v34 = vpack.c.bf16 %v1868_v56, %v1864_v32  ;;  %v1867_v61 = vld [vmem:[#allocation11 + $0x3e0] sm:$0xff]  ;;  %v1869_v22 = vld [vmem:[#allocation11 + $0x3f0] sm:$0xff] }
 0x463   :  { %9793 = vst [vmem:[#allocation69_spill] sm:$0xff] %v8348_v57  ;;  %9794 = vst [vmem:[#allocation70_spill] sm:$0xff] %v8350_v37  ;;  %v8364_v7 = vpack.c.bf16 %v1867_v61, %v1863_v2  ;;  %v8368_v43 = vpack.c.bf16 %v1869_v22, %v1865_v62 }
 0x464   :  { %6104 = vmatpush1.bf16.msra.mxu1 %v8340_v31  ;;  %6168 = vmatpush1.bf16.msra.mxu0 %v8343_v40  ;;  %9796 = vst [vmem:[#allocation72_spill] sm:$0xff] %v8355_v10  ;;  %v1866_v31 = vld [vmem:[#allocation11 + $0x3d8] sm:$0xff]  ;;  %9797 = vst [vmem:[#allocation22_spill] sm:$0xff] %v8358_v34 }
 0x465   :  { %6106 = vmatprep.subr.bf16.mxu1 %v8348_v57  ;;  %6170 = vmatprep.subr.bf16.mxu0 %v8350_v37  ;;  %v8360_v30 = vpack.c.bf16 %v1870_v44, %v1866_v31  ;;  %9799 = vst [vmem:[#allocation74_spill] sm:$0xff] %v8364_v7  ;;  %9800 = vst [vmem:[#allocation75_spill] sm:$0xff] %v8368_v43  ;;  %v1322_v44 = vld [vmem:[%s9417_s7] sm:$0xf] }
 0x466   :  { %v1338_v56 = vrot.slane %v1322_v44, %v7944_v9  ;;  %v1342_v2 = vrot.slane %v1322_v44, %v7950_v19  ;;  %v1346_v37 = vrot.slane %v1322_v44, %v9746_v24 }
 0x467   :  { %9798 = vst [vmem:[#allocation73_spill] sm:$0xff] %v8360_v30 }
 0x468   :  { %6108 = vmatpush1.bf16.msra.mxu1 %v8352_v26  ;;  %6172 = vmatpush1.bf16.msra.mxu0 %v8355_v10  ;;  %v1350_v26 = vrot.slane %v1322_v44, %v8079_v16 }
 0x469   :  { %6110 = vmatprep.subr.bf16.mxu1 %v8358_v34  ;;  %6174 = vmatprep.subr.bf16.mxu0 %v8360_v30 }
 0x46c   :  { %6112 = vmatpush1.bf16.msra.mxu1 %v8364_v7  ;;  %6176 = vmatpush1.bf16.msra.mxu0 %v8368_v43 }
 0x46d   :  { %6178 = vmatprep.subr.bf16.mxu1 %v8070_v3  ;;  %6209 = vmatprep.subr.bf16.mxu0 %v9692_v48 }
 0x4e2   :  { %v1421_v32 = vpop.f32.mrb[8].mxu1  ;;  %v1492_v31 = vpop.f32.mrb[10].mxu0 }
 0x4e3   :  { %v1422_v61 = vadd.f32 %v1421_v32, %v1338_v56  ;;  %v1423_v62 = vpop.f32.mrb[9].mxu1  ;;  %v1494_v22 = vpop.f32.mrb[11].mxu0  ;;  %v1493_v14 = vadd.f32 %v1492_v31, %v1346_v37 }
 0x4e4   :  { %v1424_v30 = vadd.f32 %v1423_v62, %v1342_v2  ;;  %v1495_v40 = vadd.f32 %v1494_v22, %v1350_v26 }
 0x4e5   :  { %v4946_v7 = vmul.f32 -1.442695, %v1422_v61  ;;  %v1709_v61 = vld [vmem:[#allocation2 + $0x2] ss:$8 sm:$0x7] }
 0x4e6   :  { %v4947_v43 = vmul.f32 -1.442695, %v1424_v30 }
 0x4e7   :  { %7170 = vpow2.f32 %v4946_v7 }
 0x4e8   :  { %7172 = vpow2.f32 %v4947_v43 }
 0x4f1   :  { %v7171_v3 = vpop.eup %7170 }
 0x4f2   :  { %v1500_v34 = vadd.f32 1.0, %v7171_v3  ;;  %v7173_v10 = vpop.eup %7172 }
 0x4f3   :  { %v1506_v57 = vadd.f32 1.0, %v7173_v10 }
 0x4f4   :  { %7174 = vrcp.f32 %v1500_v34  ;;  %v1718_v34 = vrot.slane %v1709_v61, 1 }
 0x4f5   :  { %7176 = vrcp.f32 %v1506_v57 }
 0x4fe   :  { %v7175_v50 = vpop.eup %7174 }
 0x4ff   :  { %v1509_v56 = vmul.f32 %v7175_v50, %v1495_v40  ;;  %v7177_v16 = vpop.eup %7176 }
 0x500   :  { %v1512_v10 = vsub.f32 1.0, %v7177_v16  ;;  %v1514_v37 = vmul.f32 %v7177_v16, %v8084_v36 }
 0x501   :  { %v1510_v32 = vadd.f32 %v1509_v56, %v1493_v14 }
 0x502   :  { %v1633_v2 = vpop.f32.mrb[10].mxu1  ;;  %v1704_v7 = vpop.f32.mrb[12].mxu0 }
 0x503   :  { %7178 = vtanh.f32 %v1510_v32  ;;  %v1710_v30 = vadd.f32 %v1709_v61, %v1633_v2  ;;  %v1635_v43 = vpop.f32.mrb[11].mxu1  ;;  %v5334_v62 = vpop.f32.mrb[13].mxu0  ;;  %v1730_v32 = vrot.slane %v1709_v61, 2 }
 0x504   :  { %v1720_v35 = vadd.f32 %v1718_v34, %v1635_v43 }
 0x505   :  { %v4948_v3 = vmul.f32 -1.442695, %v1710_v30 }
 0x506   :  { %v4949_v44 = vmul.f32 -1.442695, %v1720_v35  ;;  %v1727_v35 = vld [vmem:[%s9415_s5] sm:$0x1] }
 0x507   :  { %7180 = vpow2.f32 %v4948_v3  ;;  %v1728_v36 = vadd.f32 %v1727_v35, %v1704_v7  ;;  %v9841_v35 = vld [vmem:[#allocation64_spill] sm:$0xff] }
 0x508   :  { %7182 = vpow2.f32 %v4949_v44 }
 0x50d   :  { %v7179_v26 = vpop.eup %7178 }
 0x50e   :  { %v1513_v57 = vmul.f32 %v7179_v26, %v1512_v10 }
 0x510   :  { %v1515_v14 = vadd.f32 %v1514_v37, %v1513_v57  ;;  %v9835_v37 = vld [vmem:[#allocation58_spill] sm:$0xff]  ;;  %v9836_v57 = vld [vmem:[#allocation59_spill] sm:$0xff] }
 0x511   :  { %v7181_v50 = vpop.eup %7180 }
 0x512   :  { %1516 = vst [vmem:[#allocation15 + $0x1] sm:$0x1] %v1515_v14  ;;  %1517 = vst [vmem:[#allocation3 + $0x1] sm:$0x1] %v1515_v14  ;;  %v1714_v40 = vadd.f32 1.0, %v7181_v50  ;;  %v7183_v31 = vpop.eup %7182  ;;  %v9837_v14 = vld [vmem:[#allocation60_spill] sm:$0xff] }
 0x513   :  { %v1724_v16 = vadd.f32 1.0, %v7183_v31  ;;  %v9838_v50 = vld [vmem:[#allocation61_spill] sm:$0xff]  ;;  %v9840_v31 = vld [vmem:[#allocation63_spill] sm:$0xff] }
 0x514   :  { %7184 = vrcp.f32 %v1714_v40  ;;  %v9839_v40 = vld [vmem:[#allocation62_spill] sm:$0xff] }
 0x515   :  { %7186 = vrcp.f32 %v1724_v16  ;;  %v9842_v16 = vld [vmem:[#allocation65_spill] sm:$0xff] }
 0x519   :  { %v8382_v22 = vld [vmem:[#allocation15 + $0x1] sm:$0x1] }
 0x51a   :  { %1741 = vst.msk [vmem:[#allocation4 + $0x1] sm:$0x1] %vm7654_vm2, %v8382_v22 }
 0x51e   :  { %v7185_v56 = vpop.eup %7184 }
 0x51f   :  { %v1729_v2 = vmul.f32 %v7185_v56, %v1728_v36  ;;  %v7187_v43 = vpop.eup %7186  ;;  %v9843_v36 = vld [vmem:[#allocation66_spill] sm:$0xff]  ;;  %v9844_v56 = vld [vmem:[#allocation67_spill] sm:$0xff] }
 0x520   :  { %v1734_v62 = vsub.f32 1.0, %v7187_v43  ;;  %v1736_v44 = vmul.f32 %v7187_v43, %v8176_v55  ;;  %v9823_v55 = vld [vmem:[#allocation46_spill] sm:$0xff]  ;;  %v9848_v43 = vld [vmem:[#allocation71_spill] sm:$0xff] }
 0x521   :  { %v1732_v30 = vadd.f32 %v1730_v32, %v1729_v2  ;;  %v9845_v32 = vld [vmem:[#allocation68_spill] sm:$0xff]  ;;  %v9846_v2 = vld [vmem:[#allocation69_spill] sm:$0xff] }
 0x523   :  { %7188 = vtanh.f32 %v1732_v30  ;;  %v9847_v30 = vld [vmem:[#allocation70_spill] sm:$0xff] }
 0x52d   :  { %v7189_v34 = vpop.eup %7188 }
 0x52e   :  { %v1735_v3 = vmul.f32 %v7189_v34, %v1734_v62  ;;  %v9849_v62 = vld [vmem:[#allocation72_spill] sm:$0xff]  ;;  %v9850_v34 = vld [vmem:[#allocation22_spill] sm:$0xff] }
 0x530   :  { %v1737_v10 = vadd.f32 %v1736_v44, %v1735_v3  ;;  %v9851_v3 = vld [vmem:[#allocation73_spill] sm:$0xff]  ;;  %v9852_v44 = vld [vmem:[#allocation74_spill] sm:$0xff] }
 0x532   :  { %1738 = vst [vmem:[#allocation15] sm:$0x1] %v1737_v10  ;;  %1740 = vst.msk [vmem:[#allocation4] sm:$0x1] %vm7654_vm2, %v1737_v10  ;;  %v9853_v10 = vld [vmem:[#allocation75_spill] sm:$0xff] }
 0x539   :  { %v1742_v26 = vld [vmem:[#allocation4] sm:$0x3] }
 0x53a   :  { %v1880_v7 = vrot.slane %v1742_v26, %v7950_v19  ;;  %v1876_v61 = vrot.slane %v1742_v26, %v7944_v9  ;;  %v2618_v26 = vld [vmem:[#allocation10 + $0x8] sm:$0xff] }
 0x53c   :  { %1968 = vmatprep.mubr.f32.mxu1 %v1880_v7  ;;  %2039 = vmatprep.mubr.f32.mxu0 %v1880_v7  ;;  %v2621_v7 = vld [vmem:[#allocation10 + $0x20] sm:$0xff] }
 0x53d   :  { %1969 = vmatmul.mubr.f32.vlgmr.msra.gmra.mrb[12].mxu1 %v1876_v61  ;;  %2040 = vmatmul.mubr.f32.vlgmr.msra.gmra.mrb[14].mxu0 %v1876_v61  ;;  %v8497_v61 = vpack.c.bf16 %v2621_v7, %v2618_v26 }
 0x53e   :  { %6180 = vmatpush1.bf16.msra.mxu1 %v8097_v5  ;;  %6211 = vmatpush3.bf16.msra.mxu0 %v8099_v12  ;;  %v8430_v5 = vld [vmem:[#allocation15] sm:$0x1]  ;;  %v9801_v12 = vld [vmem:[#allocation24_spill] sm:$0xff] }
 0x53f   :  { %6182 = vmatprep.subr.bf16.mxu1 %v8101_v15  ;;  %6212 = vmatprep.subr.bf16.mxu0 %v9692_v48  ;;  %v9802_v15 = vld [vmem:[#allocation25_spill] sm:$0xff] }
 0x540   :  { %2180 = vmatprep.mubr.f32.mxu1 %v7970_v63  ;;  %5367 = vmatprep.mubr.msk.f32.mxu0 %vm7478_vm0, %v7970_v63 }
 0x542   :  { %6184 = vmatpush1.bf16.msra.mxu1 %v8105_v39  ;;  %6214 = vmatpush3.bf16.msra.mxu0 %v8107_v41  ;;  %v9803_v39 = vld [vmem:[#allocation26_spill] sm:$0xff]  ;;  %v9804_v41 = vld [vmem:[#allocation27_spill] sm:$0xff] }
 0x543   :  { %6186 = vmatprep.subr.bf16.mxu1 %v8111_v51  ;;  %6215 = vmatprep.subr.bf16.mxu0 %v9692_v48  ;;  %v9805_v51 = vld [vmem:[#allocation28_spill] sm:$0xff] }
 0x546   :  { %6188 = vmatpush1.bf16.msra.mxu1 %v8118_v13  ;;  %6217 = vmatpush3.bf16.msra.mxu0 %v8120_v17  ;;  %v9806_v13 = vld [vmem:[#allocation29_spill] sm:$0xff]  ;;  %v9807_v17 = vld [vmem:[#allocation30_spill] sm:$0xff] }
 0x547   :  { %6190 = vmatprep.subr.bf16.mxu1 %v8124_v27  ;;  %6218 = vmatprep.subr.bf16.mxu0 %v9692_v48  ;;  %v9808_v27 = vld [vmem:[#allocation31_spill] sm:$0xff] }
 0x54a   :  { %6192 = vmatpush1.bf16.msra.mxu1 %v8128_v58  ;;  %6220 = vmatpush3.bf16.msra.mxu0 %v8130_v0  ;;  %v9809_v58 = vld [vmem:[#allocation32_spill] sm:$0xff]  ;;  %v9810_v0 = vld [vmem:[#allocation33_spill] sm:$0xff] }
 0x54b   :  { %6194 = vmatprep.subr.bf16.mxu1 %v8134_v20  ;;  %6221 = vmatprep.subr.bf16.mxu0 %v9692_v48  ;;  %v9811_v20 = vld [vmem:[#allocation34_spill] sm:$0xff] }
 0x54e   :  { %6196 = vmatpush1.bf16.msra.mxu1 %v8138_v47  ;;  %6223 = vmatpush3.bf16.msra.mxu0 %v8140_v6  ;;  %v9812_v47 = vld [vmem:[#allocation35_spill] sm:$0xff]  ;;  %v9813_v6 = vld [vmem:[#allocation36_spill] sm:$0xff] }
 0x54f   :  { %6198 = vmatprep.subr.bf16.mxu1 %v8144_v25  ;;  %6224 = vmatprep.subr.bf16.mxu0 %v9692_v48  ;;  %v9814_v25 = vld [vmem:[#allocation37_spill] sm:$0xff] }
 0x552   :  { %6200 = vmatpush1.bf16.msra.mxu1 %v8148_v18  ;;  %6226 = vmatpush3.bf16.msra.mxu0 %v8150_v11  ;;  %v9815_v18 = vld [vmem:[#allocation38_spill] sm:$0xff]  ;;  %v9816_v11 = vld [vmem:[#allocation39_spill] sm:$0xff] }
 0x553   :  { %6202 = vmatprep.subr.bf16.mxu1 %v8154_v59  ;;  %6227 = vmatprep.subr.bf16.mxu0 %v9692_v48  ;;  %v9817_v59 = vld [vmem:[#allocation40_spill] sm:$0xff] }
 0x556   :  { %6204 = vmatpush1.bf16.msra.mxu1 %v8158_v4  ;;  %6229 = vmatpush3.bf16.msra.mxu0 %v8160_v54  ;;  %v9818_v4 = vld [vmem:[#allocation41_spill] sm:$0xff]  ;;  %v9819_v54 = vld [vmem:[#allocation42_spill] sm:$0xff] }
 0x557   :  { %6206 = vmatprep.subr.bf16.mxu1 %v8164_v23  ;;  %6230 = vmatprep.subr.bf16.mxu0 %v9692_v48  ;;  %v9820_v23 = vld [vmem:[#allocation43_spill] sm:$0xff] }
 0x55a   :  { %6208 = vmatpush1.bf16.msra.mxu1 %v8168_v42  ;;  %6232 = vmatpush3.bf16.msra.mxu0 %v8170_v53  ;;  %v9821_v42 = vld [vmem:[#allocation44_spill] sm:$0xff]  ;;  %v9822_v53 = vld [vmem:[#allocation45_spill] sm:$0xff] }
 0x55b   :  { %6234 = vmatprep.subr.bf16.mxu1 %v8180_v8  ;;  %6298 = vmatprep.subr.bf16.mxu0 %v8182_v45  ;;  %v9824_v8 = vld [vmem:[#allocation47_spill] sm:$0xff]  ;;  %v9825_v45 = vld [vmem:[#allocation48_spill] sm:$0xff] }
 0x55d   :  { %2181 = vmatmul.mubr.f32.vlgmr.msra.gmra.mrb[14].mxu1 %v8430_v5  ;;  %5368 = vmatmul.mubr.f32.vlgmr.msra.gmra.mrb[16].mxu0 %v8430_v5 }
 0x55e   :  { %6236 = vmatpush1.bf16.msra.mxu1 %v8184_v52  ;;  %6300 = vmatpush1.bf16.msra.mxu0 %v8187_v29  ;;  %v9826_v52 = vld [vmem:[#allocation49_spill] sm:$0xff]  ;;  %v9827_v29 = vld [vmem:[#allocation50_spill] sm:$0xff] }
 0x55f   :  { %6238 = vmatprep.subr.bf16.mxu1 %v8192_v1  ;;  %6302 = vmatprep.subr.bf16.mxu0 %v8194_v49  ;;  %v9828_v1 = vld [vmem:[#allocation51_spill] sm:$0xff]  ;;  %v9829_v49 = vld [vmem:[#allocation52_spill] sm:$0xff] }
 0x562   :  { %6240 = vmatpush1.bf16.msra.mxu1 %v8196_v38  ;;  %6304 = vmatpush1.bf16.msra.mxu0 %v8199_v60  ;;  %v9830_v38 = vld [vmem:[#allocation53_spill] sm:$0xff]  ;;  %v9831_v60 = vld [vmem:[#allocation54_spill] sm:$0xff] }
 0x563   :  { %6242 = vmatprep.subr.bf16.mxu1 %v8204_v21  ;;  %6306 = vmatprep.subr.bf16.mxu0 %v8206_v33  ;;  %v9832_v21 = vld [vmem:[#allocation55_spill] sm:$0xff]  ;;  %v9833_v33 = vld [vmem:[#allocation56_spill] sm:$0xff] }
 0x566   :  { %6244 = vmatpush1.bf16.msra.mxu1 %v8209_v28  ;;  %6308 = vmatpush1.bf16.msra.mxu0 %v9801_v12  ;;  %v9834_v28 = vld [vmem:[#allocation57_spill] sm:$0xff]  ;;  %v1871_v12 = vld [vmem:[%s9417_s7] sm:$0xf] }
 0x567   :  { %6246 = vmatprep.subr.bf16.mxu1 %v9802_v15  ;;  %6310 = vmatprep.subr.bf16.mxu0 %v9803_v39  ;;  %v1887_v15 = vrot.slane %v1871_v12, %v7944_v9 }
 0x56a   :  { %6248 = vmatpush1.bf16.msra.mxu1 %v9804_v41  ;;  %6312 = vmatpush1.bf16.msra.mxu0 %v9805_v51  ;;  %v1891_v51 = vrot.slane %v1871_v12, %v7950_v19 }
 0x56b   :  { %6250 = vmatprep.subr.bf16.mxu1 %v9806_v13  ;;  %6314 = vmatprep.subr.bf16.mxu0 %v9807_v17 }
 0x56e   :  { %6252 = vmatpush1.bf16.msra.mxu1 %v9808_v27  ;;  %6316 = vmatpush1.bf16.msra.mxu0 %v9809_v58 }
 0x56f   :  { %6254 = vmatprep.subr.bf16.mxu1 %v9810_v0  ;;  %6318 = vmatprep.subr.bf16.mxu0 %v9811_v20 }
 0x572   :  { %6256 = vmatpush1.bf16.msra.mxu1 %v9812_v47  ;;  %6320 = vmatpush1.bf16.msra.mxu0 %v9813_v6 }
 0x573   :  { %6258 = vmatprep.subr.bf16.mxu1 %v9814_v25  ;;  %6322 = vmatprep.subr.bf16.mxu0 %v9815_v18  ;;  %v9854_v18 = vld [vmem:[#allocation23_spill] sm:$0xff] }
 0x576   :  { %6260 = vmatpush1.bf16.msra.mxu1 %v9816_v11  ;;  %6324 = vmatpush1.bf16.msra.mxu0 %v9817_v59  ;;  %v1899_v11 = vrot.slane %v1871_v12, %v9854_v18  ;;  %v1895_v59 = vrot.slane %v1871_v12, %v9746_v24  ;;  %v2617_v12 = vld [vmem:[#allocation10] sm:$0xff] }
 0x577   :  { %6262 = vmatprep.subr.bf16.mxu1 %v9818_v4  ;;  %6326 = vmatprep.subr.bf16.mxu0 %v9819_v54 }
 0x57a   :  { %6264 = vmatpush1.bf16.msra.mxu1 %v9820_v23  ;;  %6328 = vmatpush1.bf16.msra.mxu0 %v9821_v42 }
 0x57b   :  { %6266 = vmatprep.subr.bf16.mxu1 %v9822_v53  ;;  %6330 = vmatprep.subr.bf16.mxu0 %v9823_v55 }
 0x57e   :  { %6268 = vmatpush1.bf16.msra.mxu1 %v9824_v8  ;;  %6332 = vmatpush1.bf16.msra.mxu0 %v9825_v45  ;;  %v2258_v8 = vld [vmem:[#allocation2 + $0x3] ss:$8 sm:$0x7] }
 0x57f   :  { %6270 = vmatprep.subr.bf16.mxu1 %v9826_v52  ;;  %6334 = vmatprep.subr.bf16.mxu0 %v9827_v29 }
 0x582   :  { %6272 = vmatpush1.bf16.msra.mxu1 %v9828_v1  ;;  %6336 = vmatpush1.bf16.msra.mxu0 %v9829_v49 }
 0x583   :  { %6274 = vmatprep.subr.bf16.mxu1 %v9830_v38  ;;  %6338 = vmatprep.subr.bf16.mxu0 %v9831_v60  ;;  %v2267_v38 = vrot.slane %v2258_v8, 1 }
 0x586   :  { %6276 = vmatpush1.bf16.msra.mxu1 %v9832_v21  ;;  %6340 = vmatpush1.bf16.msra.mxu0 %v9833_v33 }
 0x587   :  { %6278 = vmatprep.subr.bf16.mxu1 %v9834_v28  ;;  %6342 = vmatprep.subr.bf16.mxu0 %v9835_v37 }
 0x58a   :  { %6280 = vmatpush1.bf16.msra.mxu1 %v9836_v57  ;;  %6344 = vmatpush1.bf16.msra.mxu0 %v9837_v14 }
 0x58b   :  { %6282 = vmatprep.subr.bf16.mxu1 %v9838_v50  ;;  %6346 = vmatprep.subr.bf16.mxu0 %v9839_v40 }
 0x58e   :  { %6284 = vmatpush1.bf16.msra.mxu1 %v9840_v31  ;;  %6348 = vmatpush1.bf16.msra.mxu0 %v9841_v35 }
 0x58f   :  { %6286 = vmatprep.subr.bf16.mxu1 %v9842_v16  ;;  %6350 = vmatprep.subr.bf16.mxu0 %v9843_v36 }
 0x592   :  { %6288 = vmatpush1.bf16.msra.mxu1 %v9844_v56  ;;  %6352 = vmatpush1.bf16.msra.mxu0 %v9845_v32  ;;  %v2276_v56 = vld [vmem:[%s9415_s5] sm:$0x1] }
 0x593   :  { %6290 = vmatprep.subr.bf16.mxu1 %v9846_v2  ;;  %6354 = vmatprep.subr.bf16.mxu0 %v9847_v30  ;;  %v2279_v30 = vrot.slane %v2258_v8, 2 }
 0x596   :  { %6292 = vmatpush1.bf16.msra.mxu1 %v9848_v43  ;;  %6356 = vmatpush1.bf16.msra.mxu0 %v9849_v62 }
 0x597   :  { %6294 = vmatprep.subr.bf16.mxu1 %v9850_v34  ;;  %6358 = vmatprep.subr.bf16.mxu0 %v9851_v3 }
 0x59a   :  { %6296 = vmatpush1.bf16.msra.mxu1 %v9852_v44  ;;  %6360 = vmatpush1.bf16.msra.mxu0 %v9853_v10 }
 0x59b   :  { %6393 = vmatprep.subr.bf16.mxu0 %v9692_v48  ;;  %6362 = vmatprep.subr.bf16.mxu1 %v8497_v61 }
 0x610   :  { %v1970_v39 = vpop.f32.mrb[12].mxu1  ;;  %v2041_v41 = vpop.f32.mrb[14].mxu0 }
 0x611   :  { %v1971_v13 = vadd.f32 %v1970_v39, %v1887_v15  ;;  %v1972_v17 = vpop.f32.mrb[13].mxu1  ;;  %v2043_v27 = vpop.f32.mrb[15].mxu0  ;;  %v2042_v42 = vadd.f32 %v2041_v41, %v1895_v59  ;;  %v2620_v15 = vld [vmem:[#allocation10 + $0x18] sm:$0xff]  ;;  %v2619_v39 = vld [vmem:[#allocation10 + $0x10] sm:$0xff]  ;;  %v2622_v41 = vld [vmem:[#allocation10 + $0x28] sm:$0xff] }
 0x612   :  { %v1973_v0 = vadd.f32 %v1972_v17, %v1891_v51  ;;  %v2044_v54 = vadd.f32 %v2043_v27, %v1899_v11  ;;  %v2624_v51 = vld [vmem:[#allocation10 + $0x38] sm:$0xff]  ;;  %v2630_v59 = vld [vmem:[#allocation10 + $0x68] sm:$0xff] }
 0x613   :  { %v4950_v58 = vmul.f32 -1.442695, %v1971_v13  ;;  %v2627_v13 = vld [vmem:[#allocation10 + $0x50] sm:$0xff]  ;;  %v2628_v11 = vld [vmem:[#allocation10 + $0x58] sm:$0xff] }
 0x614   :  { %v4951_v20 = vmul.f32 -1.442695, %v1973_v0  ;;  %v8521_v0 = vpack.c.bf16 %v2620_v15, %v2617_v12  ;;  %v2653_v15 = vld [vmem:[#allocation10 + $0x120] sm:$0xff] }
 0x615   :  { %7190 = vpow2.f32 %v4950_v58 }
 0x616   :  { %7192 = vpow2.f32 %v4951_v20  ;;  %v8523_v20 = vpack.c.bf16 %v2622_v41, %v2619_v39  ;;  %v2656_v41 = vld [vmem:[#allocation10 + $0x138] sm:$0xff] }
 0x61f   :  { %v7191_v47 = vpop.eup %7190 }
 0x620   :  { %v2049_v6 = vadd.f32 1.0, %v7191_v47  ;;  %v7193_v25 = vpop.eup %7192  ;;  %v8525_v47 = vpack.c.bf16 %v2627_v13, %v2624_v51  ;;  %v2655_v51 = vld [vmem:[#allocation10 + $0x130] sm:$0xff]  ;;  %v2658_v13 = vld [vmem:[#allocation10 + $0x148] sm:$0xff] }
 0x621   :  { %v2055_v4 = vadd.f32 1.0, %v7193_v25  ;;  %v2625_v25 = vld [vmem:[#allocation10 + $0x40] sm:$0xff] }
 0x622   :  { %7194 = vrcp.f32 %v2049_v6  ;;  %v2626_v6 = vld [vmem:[#allocation10 + $0x48] sm:$0xff] }
 0x623   :  { %7196 = vrcp.f32 %v2055_v4  ;;  %v2633_v4 = vld [vmem:[#allocation10 + $0x80] sm:$0xff] }
 0x62c   :  { %v7195_v23 = vpop.eup %7194 }
 0x62d   :  { %v2058_v53 = vmul.f32 %v7195_v23, %v2044_v54  ;;  %v7197_v33 = vpop.eup %7196  ;;  %v8531_v23 = vpack.c.bf16 %v2628_v11, %v2625_v25  ;;  %v2662_v11 = vld [vmem:[#allocation10 + $0x168] sm:$0xff] }
 0x62e   :  { %v2061_v37 = vsub.f32 1.0, %v7197_v33  ;;  %v2063_v14 = vmul.f32 %v7197_v33, %v8382_v22  ;;  %v2637_v33 = vld [vmem:[#allocation10 + $0xa0] sm:$0xff] }
 0x62f   :  { %v2059_v55 = vadd.f32 %v2058_v53, %v2042_v42  ;;  %v2629_v42 = vld [vmem:[#allocation10 + $0x60] sm:$0xff]  ;;  %v8535_v53 = vpack.c.bf16 %v2633_v4, %v2630_v59  ;;  %v2664_v4 = vld [vmem:[#allocation10 + $0x178] sm:$0xff] }
 0x630   :  { %v2182_v45 = vpop.f32.mrb[14].mxu1  ;;  %v2253_v52 = vpop.f32.mrb[16].mxu0  ;;  %v2661_v59 = vld [vmem:[#allocation10 + $0x160] sm:$0xff] }
 0x631   :  { %7198 = vtanh.f32 %v2059_v55  ;;  %v2259_v29 = vadd.f32 %v2258_v8, %v2182_v45  ;;  %v2184_v1 = vpop.f32.mrb[15].mxu1  ;;  %v5369_v49 = vpop.f32.mrb[17].mxu0  ;;  %v2277_v32 = vadd.f32 %v2276_v56, %v2253_v52  ;;  %v2632_v55 = vld [vmem:[#allocation10 + $0x78] sm:$0xff]  ;;  %v2631_v8 = vld [vmem:[#allocation10 + $0x70] sm:$0xff]  ;;  %v2634_v45 = vld [vmem:[#allocation10 + $0x88] sm:$0xff] }
 0x632   :  { %v2269_v21 = vadd.f32 %v2267_v38, %v2184_v1  ;;  %v2636_v52 = vld [vmem:[#allocation10 + $0x98] sm:$0xff]  ;;  %v8542_v1 = vpack.c.bf16 %v2632_v55, %v2629_v42  ;;  %v8544_v49 = vpack.c.bf16 %v2634_v45, %v2631_v8  ;;  %v2635_v38 = vld [vmem:[#allocation10 + $0x90] sm:$0xff]  ;;  %v2646_v56 = vld [vmem:[#allocation10 + $0xe8] sm:$0xff]  ;;  %v8594_v55 = vpack.c.bf16 %v2664_v4, %v2661_v59 }
 0x633   :  { %v4952_v60 = vmul.f32 -1.442695, %v2259_v29  ;;  %v2639_v29 = vld [vmem:[#allocation10 + $0xb0] sm:$0xff]  ;;  %v2842_v45 = vld [vmem:[#allocation11 + $0x8] sm:$0xff]  ;;  %v2857_v59 = vld [vmem:[#allocation11 + $0x80] sm:$0xff] }
 0x634   :  { %v4953_v28 = vmul.f32 -1.442695, %v2269_v21  ;;  %v2638_v21 = vld [vmem:[#allocation10 + $0xa8] sm:$0xff] }
 0x635   :  { %7200 = vpow2.f32 %v4952_v60  ;;  %v8548_v60 = vpack.c.bf16 %v2639_v29, %v2636_v52  ;;  %v2846_v52 = vld [vmem:[#allocation11 + $0x28] sm:$0xff]  ;;  %v2844_v29 = vld [vmem:[#allocation11 + $0x18] sm:$0xff] }
 0x636   :  { %7202 = vpow2.f32 %v4953_v28  ;;  %v2640_v28 = vld [vmem:[#allocation10 + $0xb8] sm:$0xff] }
 0x63b   :  { %v7199_v57 = vpop.eup %7198 }
 0x63c   :  { %v2062_v50 = vmul.f32 %v7199_v57, %v2061_v37  ;;  %v2642_v37 = vld [vmem:[#allocation10 + $0xc8] sm:$0xff]  ;;  %v2645_v57 = vld [vmem:[#allocation10 + $0xe0] sm:$0xff] }
 0x63e   :  { %v2064_v40 = vadd.f32 %v2063_v14, %v2062_v50  ;;  %v8552_v14 = vpack.c.bf16 %v2638_v21, %v2635_v38  ;;  %v8554_v50 = vpack.c.bf16 %v2640_v28, %v2637_v33  ;;  %v8604_v38 = vpack.c.bf16 %v2846_v52, %v2842_v45  ;;  %v2848_v21 = vld [vmem:[#allocation11 + $0x38] sm:$0xff]  ;;  %v2841_v33 = vld [vmem:[#allocation11] sm:$0xff]  ;;  %v2859_v52 = vld [vmem:[#allocation11 + $0x90] sm:$0xff] }
 0x63f   :  { %v7201_v31 = vpop.eup %7200  ;;  %v2845_v28 = vld [vmem:[#allocation11 + $0x20] sm:$0xff] }
 0x640   :  { %2065 = vst [vmem:[#allocation15 + $0x1] sm:$0x1] %v2064_v40  ;;  %2066 = vst [vmem:[#allocation3 + $0x2] sm:$0x1] %v2064_v40  ;;  %v2263_v35 = vadd.f32 1.0, %v7201_v31  ;;  %v7203_v16 = vpop.eup %7202  ;;  %v2641_v40 = vld [vmem:[#allocation10 + $0xc0] sm:$0xff]  ;;  %v8558_v31 = vpack.c.bf16 %v2645_v57, %v2642_v37  ;;  %v8606_v37 = vpack.c.bf16 %v2848_v21, %v2844_v29  ;;  %v8608_v57 = vpack.c.bf16 %v2845_v28, %v2841_v33 }
 0x641   :  { %v2273_v22 = vadd.f32 1.0, %v7203_v16  ;;  %v2643_v16 = vld [vmem:[#allocation10 + $0xd0] sm:$0xff]  ;;  %v2861_v45 = vld [vmem:[#allocation11 + $0xa0] sm:$0xff]  ;;  %v2866_v28 = vld [vmem:[#allocation11 + $0xc8] sm:$0xff] }
 0x642   :  { %7204 = vrcp.f32 %v2263_v35  ;;  %v2644_v35 = vld [vmem:[#allocation10 + $0xd8] sm:$0xff]  ;;  %v2863_v29 = vld [vmem:[#allocation11 + $0xb0] sm:$0xff]  ;;  %v8633_v21 = vpack.c.bf16 %v2861_v45, %v2857_v59 }
 0x643   :  { %7206 = vrcp.f32 %v2273_v22  ;;  %v2648_v22 = vld [vmem:[#allocation10 + $0xf8] sm:$0xff]  ;;  %v8635_v33 = vpack.c.bf16 %v2863_v29, %v2859_v52  ;;  %v2873_v52 = vld [vmem:[#allocation11 + $0x100] sm:$0xff] }
 0x644   :  { %v2880_v45 = vld [vmem:[#allocation11 + $0x138] sm:$0xff]  ;;  %v2877_v29 = vld [vmem:[#allocation11 + $0x120] sm:$0xff] }
 0x645   :  { %9855 = vst [vmem:[#allocation24_spill] sm:$0xff] %v8635_v33 }
 0x647   :  { %v8508_v36 = vld [vmem:[#allocation15 + $0x1] sm:$0x1] }
 0x648   :  { %2290 = vst.msk [vmem:[#allocation4 + $0x1] sm:$0x1] %vm7654_vm2, %v8508_v36 }
 0x64c   :  { %v7205_v2 = vpop.eup %7204 }
 0x64d   :  { %v2278_v43 = vmul.f32 %v7205_v2, %v2277_v32  ;;  %v7207_v34 = vpop.eup %7206  ;;  %v2651_v32 = vld [vmem:[#allocation10 + $0x110] sm:$0xff]  ;;  %v8562_v2 = vpack.c.bf16 %v2644_v35, %v2641_v40 }
 0x64e   :  { %v2283_v3 = vsub.f32 1.0, %v7207_v34  ;;  %v2285_v26 = vmul.f32 %v7207_v34, %v8430_v5  ;;  %v2623_v5 = vld [vmem:[#allocation10 + $0x30] sm:$0xff]  ;;  %v2650_v34 = vld [vmem:[#allocation10 + $0x108] sm:$0xff] }
 0x64f   :  { %v2281_v62 = vadd.f32 %v2279_v30, %v2278_v43  ;;  %v8529_v54 = vpack.c.bf16 %v2626_v6, %v2623_v5  ;;  %v8564_v30 = vpack.c.bf16 %v2646_v56, %v2643_v16  ;;  %v2647_v43 = vld [vmem:[#allocation10 + $0xf0] sm:$0xff]  ;;  %v8584_v5 = vpack.c.bf16 %v2658_v13, %v2655_v51  ;;  %v2850_v56 = vld [vmem:[#allocation11 + $0x48] sm:$0xff] }
 0x650   :  { %v2659_v6 = vld [vmem:[#allocation10 + $0x150] sm:$0xff]  ;;  %v2858_v13 = vld [vmem:[#allocation11 + $0x88] sm:$0xff] }
 0x651   :  { %7208 = vtanh.f32 %v2281_v62  ;;  %v8568_v62 = vpack.c.bf16 %v2651_v32, %v2648_v22  ;;  %v8592_v42 = vpack.c.bf16 %v2662_v11, %v2659_v6  ;;  %v2843_v40 = vld [vmem:[#allocation11 + $0x10] sm:$0xff]  ;;  %v2854_v22 = vld [vmem:[#allocation11 + $0x68] sm:$0xff]  ;;  %v2852_v32 = vld [vmem:[#allocation11 + $0x58] sm:$0xff] }
 0x652   :  { %v2847_v35 = vld [vmem:[#allocation11 + $0x30] sm:$0xff]  ;;  %v2864_v11 = vld [vmem:[#allocation11 + $0xb8] sm:$0xff] }
 0x653   :  { %v8611_v16 = vpack.c.bf16 %v2847_v35, %v2843_v40  ;;  %v2870_v40 = vld [vmem:[#allocation11 + $0xe8] sm:$0xff]  ;;  %v2868_v35 = vld [vmem:[#allocation11 + $0xd8] sm:$0xff] }
 0x65b   :  { %v7209_v44 = vpop.eup %7208 }
 0x65c   :  { %v2284_v10 = vmul.f32 %v7209_v44, %v2283_v3  ;;  %v2649_v3 = vld [vmem:[#allocation10 + $0x100] sm:$0xff]  ;;  %v2652_v44 = vld [vmem:[#allocation10 + $0x118] sm:$0xff] }
 0x65d   :  { %v8574_v12 = vpack.c.bf16 %v2652_v44, %v2649_v3  ;;  %v2849_v3 = vld [vmem:[#allocation11 + $0x40] sm:$0xff] }
 0x65e   :  { %v2286_v7 = vadd.f32 %v2285_v26, %v2284_v10  ;;  %v2654_v10 = vld [vmem:[#allocation10 + $0x128] sm:$0xff]  ;;  %v2657_v26 = vld [vmem:[#allocation10 + $0x140] sm:$0xff] }
 0x65f   :  { %v8578_v39 = vpack.c.bf16 %v2657_v26, %v2654_v10  ;;  %v2853_v44 = vld [vmem:[#allocation11 + $0x60] sm:$0xff] }
 0x660   :  { %2287 = vst [vmem:[#allocation15] sm:$0x1] %v2286_v7  ;;  %2289 = vst.msk [vmem:[#allocation4] sm:$0x1] %vm7654_vm2, %v2286_v7  ;;  %v8572_v7 = vpack.c.bf16 %v2650_v34, %v2647_v43  ;;  %v8616_v43 = vpack.c.bf16 %v2854_v22, %v2850_v56  ;;  %v2856_v34 = vld [vmem:[#allocation11 + $0x78] sm:$0xff]  ;;  %v8620_v26 = vpack.c.bf16 %v2853_v44, %v2849_v3 }
 0x661   :  { %v8618_v10 = vpack.c.bf16 %v2856_v34, %v2852_v32  ;;  %v8640_v56 = vpack.c.bf16 %v2870_v40, %v2866_v28  ;;  %v2872_v22 = vld [vmem:[#allocation11 + $0xf8] sm:$0xff]  ;;  %v2865_v32 = vld [vmem:[#allocation11 + $0xc0] sm:$0xff]  ;;  %v8656_v40 = vpack.c.bf16 %v2877_v29, %v2873_v52 }
 0x662   :  { %v2869_v34 = vld [vmem:[#allocation11 + $0xe0] sm:$0xff]  ;;  %v8642_v3 = vpack.c.bf16 %v2872_v22, %v2868_v35  ;;  %v2875_v35 = vld [vmem:[#allocation11 + $0x110] sm:$0xff] }
 0x663   :  { %9856 = vst [vmem:[#allocation25_spill] sm:$0xff] %v8640_v56  ;;  %v8644_v44 = vpack.c.bf16 %v2869_v34, %v2865_v32  ;;  %9862 = vst [vmem:[#allocation31_spill] sm:$0xff] %v8656_v40  ;;  %v2879_v22 = vld [vmem:[#allocation11 + $0x130] sm:$0xff]  ;;  %v2882_v34 = vld [vmem:[#allocation11 + $0x148] sm:$0xff] }
 0x664   :  { %9857 = vst [vmem:[#allocation26_spill] sm:$0xff] %v8642_v3  ;;  %v8659_v32 = vpack.c.bf16 %v2879_v22, %v2875_v35  ;;  %v2883_v35 = vld [vmem:[#allocation11 + $0x150] sm:$0xff] }
 0x665   :  { %9858 = vst [vmem:[#allocation27_spill] sm:$0xff] %v8644_v44  ;;  %v2887_v22 = vld [vmem:[#allocation11 + $0x170] sm:$0xff] }
 0x666   :  { %9863 = vst [vmem:[#allocation32_spill] sm:$0xff] %v8659_v32 }
 0x667   :  { %v2291_v17 = vld [vmem:[#allocation4] sm:$0x3]  ;;  %v8600_v8 = vld [vmem:[#allocation15] sm:$0x1] }
 0x668   :  { %v2429_v27 = vrot.slane %v2291_v17, %v7950_v19  ;;  %v2425_v58 = vrot.slane %v2291_v17, %v7944_v9  ;;  %v2660_v17 = vld [vmem:[#allocation10 + $0x158] sm:$0xff] }
 0x66a   :  { %2517 = vmatprep.mubr.f32.mxu1 %v2429_v27  ;;  %2588 = vmatprep.mubr.f32.mxu0 %v2429_v27  ;;  %v2663_v27 = vld [vmem:[#allocation10 + $0x170] sm:$0xff] }
 0x66b   :  { %2518 = vmatmul.mubr.f32.vlgmr.msra.gmra.mrb[16].mxu1 %v2425_v58  ;;  %2589 = vmatmul.mubr.f32.vlgmr.msra.gmra.mrb[18].mxu0 %v2425_v58  ;;  %v8582_v58 = vpack.c.bf16 %v2656_v41, %v2653_v15  ;;  %v8588_v25 = vpack.c.bf16 %v2663_v27, %v2660_v17  ;;  %v2851_v15 = vld [vmem:[#allocation11 + $0x50] sm:$0xff]  ;;  %v2862_v17 = vld [vmem:[#allocation11 + $0xa8] sm:$0xff]  ;;  %v2860_v27 = vld [vmem:[#allocation11 + $0x98] sm:$0xff] }
 0x66c   :  { %6364 = vmatpush1.bf16.msra.mxu1 %v8521_v0  ;;  %6395 = vmatpush3.bf16.msra.mxu0 %v8523_v20  ;;  %v2855_v41 = vld [vmem:[#allocation11 + $0x70] sm:$0xff]  ;;  %v8628_v6 = vpack.c.bf16 %v2862_v17, %v2858_v13  ;;  %v8630_v4 = vpack.c.bf16 %v2864_v11, %v2860_v27  ;;  %v2874_v17 = vld [vmem:[#allocation11 + $0x108] sm:$0xff]  ;;  %v2876_v11 = vld [vmem:[#allocation11 + $0x118] sm:$0xff] }
 0x66d   :  { %6366 = vmatprep.subr.bf16.mxu1 %v8525_v47  ;;  %6396 = vmatprep.subr.bf16.mxu0 %v9692_v48  ;;  %v8623_v51 = vpack.c.bf16 %v2855_v41, %v2851_v15  ;;  %v2867_v15 = vld [vmem:[#allocation11 + $0xd0] sm:$0xff]  ;;  %v2878_v27 = vld [vmem:[#allocation11 + $0x128] sm:$0xff]  ;;  %v8654_v28 = vpack.c.bf16 %v2880_v45, %v2876_v11  ;;  %v2881_v11 = vld [vmem:[#allocation11 + $0x140] sm:$0xff] }
 0x66e   :  { %2729 = vmatprep.mubr.f32.mxu1 %v7970_v63  ;;  %5402 = vmatprep.mubr.msk.f32.mxu0 %vm7478_vm0, %v7970_v63  ;;  %v2871_v41 = vld [vmem:[#allocation11 + $0xf0] sm:$0xff]  ;;  %v8652_v59 = vpack.c.bf16 %v2878_v27, %v2874_v17  ;;  %v2888_v27 = vld [vmem:[#allocation11 + $0x178] sm:$0xff]  ;;  %v2885_v45 = vld [vmem:[#allocation11 + $0x160] sm:$0xff] }
 0x66f   :  { %v8647_v13 = vpack.c.bf16 %v2871_v41, %v2867_v15  ;;  %9861 = vst [vmem:[#allocation30_spill] sm:$0xff] %v8654_v28  ;;  %v2886_v15 = vld [vmem:[#allocation11 + $0x168] sm:$0xff]  ;;  %v2884_v41 = vld [vmem:[#allocation11 + $0x158] sm:$0xff]  ;;  %v8668_v29 = vpack.c.bf16 %v2885_v45, %v2881_v11 }
 0x670   :  { %6368 = vmatpush1.bf16.msra.mxu1 %v8529_v54  ;;  %6398 = vmatpush3.bf16.msra.mxu0 %v8531_v23  ;;  %9860 = vst [vmem:[#allocation29_spill] sm:$0xff] %v8652_v59  ;;  %v8664_v17 = vpack.c.bf16 %v2886_v15, %v2882_v34  ;;  %v8666_v52 = vpack.c.bf16 %v2888_v27, %v2884_v41  ;;  %v2896_v15 = vld [vmem:[#allocation11 + $0x1b8] sm:$0xff]  ;;  %v2889_v41 = vld [vmem:[#allocation11 + $0x180] sm:$0xff] }
 0x671   :  { %6370 = vmatprep.subr.bf16.mxu1 %v8535_v53  ;;  %6399 = vmatprep.subr.bf16.mxu0 %v9692_v48  ;;  %9859 = vst [vmem:[#allocation28_spill] sm:$0xff] %v8647_v13  ;;  %9866 = vst [vmem:[#allocation35_spill] sm:$0xff] %v8668_v29  ;;  %v2893_v27 = vld [vmem:[#allocation11 + $0x1a0] sm:$0xff] }
 0x672   :  { %9864 = vst [vmem:[#allocation33_spill] sm:$0xff] %v8664_v17  ;;  %9865 = vst [vmem:[#allocation34_spill] sm:$0xff] %v8666_v52  ;;  %v8680_v45 = vpack.c.bf16 %v2893_v27, %v2889_v41 }
 0x674   :  { %6372 = vmatpush1.bf16.msra.mxu1 %v8542_v1  ;;  %6401 = vmatpush3.bf16.msra.mxu0 %v8544_v49  ;;  %9870 = vst [vmem:[#allocation39_spill] sm:$0xff] %v8680_v45 }
 0x675   :  { %6374 = vmatprep.subr.bf16.mxu1 %v8548_v60  ;;  %6402 = vmatprep.subr.bf16.mxu0 %v9692_v48 }
 0x678   :  { %6376 = vmatpush1.bf16.msra.mxu1 %v8552_v14  ;;  %6404 = vmatpush3.bf16.msra.mxu0 %v8554_v50 }
 0x679   :  { %6378 = vmatprep.subr.bf16.mxu1 %v8558_v31  ;;  %6405 = vmatprep.subr.bf16.mxu0 %v9692_v48 }
 0x67c   :  { %6380 = vmatpush1.bf16.msra.mxu1 %v8562_v2  ;;  %6407 = vmatpush3.bf16.msra.mxu0 %v8564_v30 }
 0x67d   :  { %6382 = vmatprep.subr.bf16.mxu1 %v8568_v62  ;;  %6408 = vmatprep.subr.bf16.mxu0 %v9692_v48 }
 0x680   :  { %6384 = vmatpush1.bf16.msra.mxu1 %v8572_v7  ;;  %6410 = vmatpush3.bf16.msra.mxu0 %v8574_v12 }
 0x681   :  { %6386 = vmatprep.subr.bf16.mxu1 %v8578_v39  ;;  %6411 = vmatprep.subr.bf16.mxu0 %v9692_v48 }
 0x684   :  { %6388 = vmatpush1.bf16.msra.mxu1 %v8582_v58  ;;  %6413 = vmatpush3.bf16.msra.mxu0 %v8584_v5 }
 0x685   :  { %6390 = vmatprep.subr.bf16.mxu1 %v8588_v25  ;;  %6414 = vmatprep.subr.bf16.mxu0 %v9692_v48 }
 0x688   :  { %6392 = vmatpush1.bf16.msra.mxu1 %v8592_v42  ;;  %6416 = vmatpush3.bf16.msra.mxu0 %v8594_v55 }
 0x689   :  { %6418 = vmatprep.subr.bf16.mxu1 %v8604_v38  ;;  %6482 = vmatprep.subr.bf16.mxu0 %v8606_v37 }
 0x68b   :  { %2730 = vmatmul.mubr.f32.vlgmr.msra.gmra.mrb[18].mxu1 %v8600_v8  ;;  %5403 = vmatmul.mubr.f32.vlgmr.msra.gmra.mrb[20].mxu0 %v8600_v8 }
 0x68c   :  { %6420 = vmatpush1.bf16.msra.mxu1 %v8608_v57  ;;  %6484 = vmatpush1.bf16.msra.mxu0 %v8611_v16 }
 0x68d   :  { %6422 = vmatprep.subr.bf16.mxu1 %v8616_v43  ;;  %6486 = vmatprep.subr.bf16.mxu0 %v8618_v10 }
 0x690   :  { %6424 = vmatpush1.bf16.msra.mxu1 %v8620_v26  ;;  %6488 = vmatpush1.bf16.msra.mxu0 %v8623_v51 }
 0x691   :  { %6426 = vmatprep.subr.bf16.mxu1 %v8628_v6  ;;  %6490 = vmatprep.subr.bf16.mxu0 %v8630_v4 }
 0x694   :  { %6428 = vmatpush1.bf16.msra.mxu1 %v8633_v21  ;;  %6492 = vmatpush1.bf16.msra.mxu0 %v8635_v33 }
 0x695   :  { %6430 = vmatprep.subr.bf16.mxu1 %v8640_v56  ;;  %6494 = vmatprep.subr.bf16.mxu0 %v8642_v3 }
 0x698   :  { %6432 = vmatpush1.bf16.msra.mxu1 %v8644_v44  ;;  %6496 = vmatpush1.bf16.msra.mxu0 %v8647_v13  ;;  %v2966_v13 = vld [vmem:[#allocation11 + $0x3e8] sm:$0xff]  ;;  %v2968_v44 = vld [vmem:[#allocation11 + $0x3f8] sm:$0xff] }
 0x699   :  { %6434 = vmatprep.subr.bf16.mxu1 %v8652_v59  ;;  %6498 = vmatprep.subr.bf16.mxu0 %v8654_v28  ;;  %v8671_v28 = vpack.c.bf16 %v2887_v22, %v2883_v35  ;;  %v2894_v59 = vld [vmem:[#allocation11 + $0x1a8] sm:$0xff]  ;;  %v2891_v35 = vld [vmem:[#allocation11 + $0x190] sm:$0xff] }
 0x69a   :  { %v2895_v22 = vld [vmem:[#allocation11 + $0x1b0] sm:$0xff] }
 0x69b   :  { %9867 = vst [vmem:[#allocation36_spill] sm:$0xff] %v8671_v28 }
 0x69c   :  { %6436 = vmatpush1.bf16.msra.mxu1 %v8656_v40  ;;  %6500 = vmatpush1.bf16.msra.mxu0 %v8659_v32  ;;  %v2890_v40 = vld [vmem:[#allocation11 + $0x188] sm:$0xff]  ;;  %v2892_v32 = vld [vmem:[#allocation11 + $0x198] sm:$0xff] }
 0x69d   :  { %6438 = vmatprep.subr.bf16.mxu1 %v8664_v17  ;;  %6502 = vmatprep.subr.bf16.mxu0 %v8666_v52  ;;  %v8676_v34 = vpack.c.bf16 %v2894_v59, %v2890_v40  ;;  %v8678_v11 = vpack.c.bf16 %v2896_v15, %v2892_v32  ;;  %v8683_v52 = vpack.c.bf16 %v2895_v22, %v2891_v35  ;;  %v2902_v17 = vld [vmem:[#allocation11 + $0x1e8] sm:$0xff]  ;;  %v2904_v40 = vld [vmem:[#allocation11 + $0x1f8] sm:$0xff]  ;;  %v2897_v32 = vld [vmem:[#allocation11 + $0x1c0] sm:$0xff] }
 0x69e   :  { %v2901_v15 = vld [vmem:[#allocation11 + $0x1e0] sm:$0xff]  ;;  %v2899_v35 = vld [vmem:[#allocation11 + $0x1d0] sm:$0xff] }
 0x69f   :  { %9868 = vst [vmem:[#allocation37_spill] sm:$0xff] %v8676_v34  ;;  %9869 = vst [vmem:[#allocation38_spill] sm:$0xff] %v8678_v11  ;;  %v8692_v27 = vpack.c.bf16 %v2901_v15, %v2897_v32  ;;  %v2903_v22 = vld [vmem:[#allocation11 + $0x1f0] sm:$0xff] }
 0x6a0   :  { %6440 = vmatpush1.bf16.msra.mxu1 %v8668_v29  ;;  %6504 = vmatpush1.bf16.msra.mxu0 %v8671_v28  ;;  %9871 = vst [vmem:[#allocation40_spill] sm:$0xff] %v8683_v52  ;;  %v2898_v29 = vld [vmem:[#allocation11 + $0x1c8] sm:$0xff]  ;;  %v2900_v28 = vld [vmem:[#allocation11 + $0x1d8] sm:$0xff] }
 0x6a1   :  { %6442 = vmatprep.subr.bf16.mxu1 %v8676_v34  ;;  %6506 = vmatprep.subr.bf16.mxu0 %v8678_v11  ;;  %v8688_v59 = vpack.c.bf16 %v2902_v17, %v2898_v29  ;;  %v8690_v41 = vpack.c.bf16 %v2904_v40, %v2900_v28  ;;  %9874 = vst [vmem:[#allocation43_spill] sm:$0xff] %v8692_v27  ;;  %v2910_v34 = vld [vmem:[#allocation11 + $0x228] sm:$0xff]  ;;  %v2912_v28 = vld [vmem:[#allocation11 + $0x238] sm:$0xff]  ;;  %v2905_v29 = vld [vmem:[#allocation11 + $0x200] sm:$0xff] }
 0x6a2   :  { %v8695_v11 = vpack.c.bf16 %v2903_v22, %v2899_v35  ;;  %v2909_v40 = vld [vmem:[#allocation11 + $0x220] sm:$0xff]  ;;  %v2907_v35 = vld [vmem:[#allocation11 + $0x210] sm:$0xff] }
 0x6a3   :  { %9872 = vst [vmem:[#allocation41_spill] sm:$0xff] %v8688_v59  ;;  %9873 = vst [vmem:[#allocation42_spill] sm:$0xff] %v8690_v41  ;;  %v8704_v15 = vpack.c.bf16 %v2909_v40, %v2905_v29  ;;  %v2911_v22 = vld [vmem:[#allocation11 + $0x230] sm:$0xff] }
 0x6a4   :  { %6444 = vmatpush1.bf16.msra.mxu1 %v8680_v45  ;;  %6508 = vmatpush1.bf16.msra.mxu0 %v8683_v52  ;;  %9875 = vst [vmem:[#allocation44_spill] sm:$0xff] %v8695_v11  ;;  %v2906_v45 = vld [vmem:[#allocation11 + $0x208] sm:$0xff]  ;;  %v2908_v52 = vld [vmem:[#allocation11 + $0x218] sm:$0xff] }
 0x6a5   :  { %6446 = vmatprep.subr.bf16.mxu1 %v8688_v59  ;;  %6510 = vmatprep.subr.bf16.mxu0 %v8690_v41  ;;  %v8700_v17 = vpack.c.bf16 %v2910_v34, %v2906_v45  ;;  %v8702_v32 = vpack.c.bf16 %v2912_v28, %v2908_v52  ;;  %9878 = vst [vmem:[#allocation47_spill] sm:$0xff] %v8704_v15  ;;  %v2918_v59 = vld [vmem:[#allocation11 + $0x268] sm:$0xff]  ;;  %v2920_v52 = vld [vmem:[#allocation11 + $0x278] sm:$0xff]  ;;  %v2913_v45 = vld [vmem:[#allocation11 + $0x240] sm:$0xff] }
 0x6a6   :  { %v8707_v41 = vpack.c.bf16 %v2911_v22, %v2907_v35  ;;  %v2917_v28 = vld [vmem:[#allocation11 + $0x260] sm:$0xff]  ;;  %v2915_v35 = vld [vmem:[#allocation11 + $0x250] sm:$0xff] }
 0x6a7   :  { %9876 = vst [vmem:[#allocation45_spill] sm:$0xff] %v8700_v17  ;;  %9877 = vst [vmem:[#allocation46_spill] sm:$0xff] %v8702_v32  ;;  %v8716_v40 = vpack.c.bf16 %v2917_v28, %v2913_v45  ;;  %v2919_v22 = vld [vmem:[#allocation11 + $0x270] sm:$0xff] }
 0x6a8   :  { %6448 = vmatpush1.bf16.msra.mxu1 %v8692_v27  ;;  %6512 = vmatpush1.bf16.msra.mxu0 %v8695_v11  ;;  %9879 = vst [vmem:[#allocation48_spill] sm:$0xff] %v8707_v41  ;;  %v2914_v27 = vld [vmem:[#allocation11 + $0x248] sm:$0xff]  ;;  %v2916_v11 = vld [vmem:[#allocation11 + $0x258] sm:$0xff] }
 0x6a9   :  { %6450 = vmatprep.subr.bf16.mxu1 %v8700_v17  ;;  %6514 = vmatprep.subr.bf16.mxu0 %v8702_v32  ;;  %v8712_v34 = vpack.c.bf16 %v2918_v59, %v2914_v27  ;;  %v8714_v29 = vpack.c.bf16 %v2920_v52, %v2916_v11  ;;  %9882 = vst [vmem:[#allocation51_spill] sm:$0xff] %v8716_v40  ;;  %v2926_v17 = vld [vmem:[#allocation11 + $0x2a8] sm:$0xff]  ;;  %v2928_v11 = vld [vmem:[#allocation11 + $0x2b8] sm:$0xff]  ;;  %v2921_v27 = vld [vmem:[#allocation11 + $0x280] sm:$0xff] }
 0x6aa   :  { %v8719_v32 = vpack.c.bf16 %v2919_v22, %v2915_v35  ;;  %v2925_v52 = vld [vmem:[#allocation11 + $0x2a0] sm:$0xff]  ;;  %v2923_v35 = vld [vmem:[#allocation11 + $0x290] sm:$0xff] }
 0x6ab   :  { %9880 = vst [vmem:[#allocation49_spill] sm:$0xff] %v8712_v34  ;;  %9881 = vst [vmem:[#allocation50_spill] sm:$0xff] %v8714_v29  ;;  %v8728_v28 = vpack.c.bf16 %v2925_v52, %v2921_v27  ;;  %v2927_v22 = vld [vmem:[#allocation11 + $0x2b0] sm:$0xff] }
 0x6ac   :  { %6452 = vmatpush1.bf16.msra.mxu1 %v8704_v15  ;;  %6516 = vmatpush1.bf16.msra.mxu0 %v8707_v41  ;;  %9883 = vst [vmem:[#allocation52_spill] sm:$0xff] %v8719_v32  ;;  %v2922_v15 = vld [vmem:[#allocation11 + $0x288] sm:$0xff]  ;;  %v2924_v41 = vld [vmem:[#allocation11 + $0x298] sm:$0xff] }
 0x6ad   :  { %6454 = vmatprep.subr.bf16.mxu1 %v8712_v34  ;;  %6518 = vmatprep.subr.bf16.mxu0 %v8714_v29  ;;  %v8724_v59 = vpack.c.bf16 %v2926_v17, %v2922_v15  ;;  %v8726_v45 = vpack.c.bf16 %v2928_v11, %v2924_v41  ;;  %9886 = vst [vmem:[#allocation55_spill] sm:$0xff] %v8728_v28  ;;  %v2934_v34 = vld [vmem:[#allocation11 + $0x2e8] sm:$0xff]  ;;  %v2936_v41 = vld [vmem:[#allocation11 + $0x2f8] sm:$0xff]  ;;  %v2929_v15 = vld [vmem:[#allocation11 + $0x2c0] sm:$0xff] }
 0x6ae   :  { %v8731_v29 = vpack.c.bf16 %v2927_v22, %v2923_v35  ;;  %v2933_v11 = vld [vmem:[#allocation11 + $0x2e0] sm:$0xff]  ;;  %v2931_v35 = vld [vmem:[#allocation11 + $0x2d0] sm:$0xff] }
 0x6af   :  { %9884 = vst [vmem:[#allocation53_spill] sm:$0xff] %v8724_v59  ;;  %9885 = vst [vmem:[#allocation54_spill] sm:$0xff] %v8726_v45  ;;  %v8740_v52 = vpack.c.bf16 %v2933_v11, %v2929_v15  ;;  %v2935_v22 = vld [vmem:[#allocation11 + $0x2f0] sm:$0xff] }
 0x6b0   :  { %6456 = vmatpush1.bf16.msra.mxu1 %v8716_v40  ;;  %6520 = vmatpush1.bf16.msra.mxu0 %v8719_v32  ;;  %9887 = vst [vmem:[#allocation56_spill] sm:$0xff] %v8731_v29  ;;  %v2930_v40 = vld [vmem:[#allocation11 + $0x2c8] sm:$0xff]  ;;  %v2932_v32 = vld [vmem:[#allocation11 + $0x2d8] sm:$0xff] }
 0x6b1   :  { %6458 = vmatprep.subr.bf16.mxu1 %v8724_v59  ;;  %6522 = vmatprep.subr.bf16.mxu0 %v8726_v45  ;;  %v8736_v17 = vpack.c.bf16 %v2934_v34, %v2930_v40  ;;  %v8738_v27 = vpack.c.bf16 %v2936_v41, %v2932_v32  ;;  %9890 = vst [vmem:[#allocation59_spill] sm:$0xff] %v8740_v52  ;;  %v2942_v59 = vld [vmem:[#allocation11 + $0x328] sm:$0xff]  ;;  %v2944_v32 = vld [vmem:[#allocation11 + $0x338] sm:$0xff]  ;;  %v2937_v40 = vld [vmem:[#allocation11 + $0x300] sm:$0xff] }
 0x6b2   :  { %v8743_v45 = vpack.c.bf16 %v2935_v22, %v2931_v35  ;;  %v2941_v41 = vld [vmem:[#allocation11 + $0x320] sm:$0xff]  ;;  %v2939_v35 = vld [vmem:[#allocation11 + $0x310] sm:$0xff] }
 0x6b3   :  { %9888 = vst [vmem:[#allocation57_spill] sm:$0xff] %v8736_v17  ;;  %9889 = vst [vmem:[#allocation58_spill] sm:$0xff] %v8738_v27  ;;  %v8752_v11 = vpack.c.bf16 %v2941_v41, %v2937_v40  ;;  %v2943_v22 = vld [vmem:[#allocation11 + $0x330] sm:$0xff] }
 0x6b4   :  { %6460 = vmatpush1.bf16.msra.mxu1 %v8728_v28  ;;  %6524 = vmatpush1.bf16.msra.mxu0 %v8731_v29  ;;  %9891 = vst [vmem:[#allocation60_spill] sm:$0xff] %v8743_v45  ;;  %v2938_v28 = vld [vmem:[#allocation11 + $0x308] sm:$0xff]  ;;  %v2940_v29 = vld [vmem:[#allocation11 + $0x318] sm:$0xff] }
 0x6b5   :  { %6462 = vmatprep.subr.bf16.mxu1 %v8736_v17  ;;  %6526 = vmatprep.subr.bf16.mxu0 %v8738_v27  ;;  %v8748_v34 = vpack.c.bf16 %v2942_v59, %v2938_v28  ;;  %v8750_v15 = vpack.c.bf16 %v2944_v32, %v2940_v29  ;;  %9894 = vst [vmem:[#allocation63_spill] sm:$0xff] %v8752_v11  ;;  %v2950_v17 = vld [vmem:[#allocation11 + $0x368] sm:$0xff]  ;;  %v2952_v29 = vld [vmem:[#allocation11 + $0x378] sm:$0xff]  ;;  %v2945_v28 = vld [vmem:[#allocation11 + $0x340] sm:$0xff] }
 0x6b6   :  { %v8755_v27 = vpack.c.bf16 %v2943_v22, %v2939_v35  ;;  %v2949_v32 = vld [vmem:[#allocation11 + $0x360] sm:$0xff]  ;;  %v2947_v35 = vld [vmem:[#allocation11 + $0x350] sm:$0xff] }
 0x6b7   :  { %9892 = vst [vmem:[#allocation61_spill] sm:$0xff] %v8748_v34  ;;  %9893 = vst [vmem:[#allocation62_spill] sm:$0xff] %v8750_v15  ;;  %v8764_v41 = vpack.c.bf16 %v2949_v32, %v2945_v28  ;;  %v2951_v22 = vld [vmem:[#allocation11 + $0x370] sm:$0xff] }
 0x6b8   :  { %6464 = vmatpush1.bf16.msra.mxu1 %v8740_v52  ;;  %6528 = vmatpush1.bf16.msra.mxu0 %v8743_v45  ;;  %9895 = vst [vmem:[#allocation64_spill] sm:$0xff] %v8755_v27  ;;  %v2946_v52 = vld [vmem:[#allocation11 + $0x348] sm:$0xff]  ;;  %v2948_v45 = vld [vmem:[#allocation11 + $0x358] sm:$0xff] }
 0x6b9   :  { %6466 = vmatprep.subr.bf16.mxu1 %v8748_v34  ;;  %6530 = vmatprep.subr.bf16.mxu0 %v8750_v15  ;;  %v8760_v59 = vpack.c.bf16 %v2950_v17, %v2946_v52  ;;  %v8762_v40 = vpack.c.bf16 %v2952_v29, %v2948_v45  ;;  %9898 = vst [vmem:[#allocation67_spill] sm:$0xff] %v8764_v41  ;;  %v2958_v34 = vld [vmem:[#allocation11 + $0x3a8] sm:$0xff]  ;;  %v2960_v45 = vld [vmem:[#allocation11 + $0x3b8] sm:$0xff]  ;;  %v2953_v52 = vld [vmem:[#allocation11 + $0x380] sm:$0xff] }
 0x6ba   :  { %v8767_v15 = vpack.c.bf16 %v2951_v22, %v2947_v35  ;;  %v2957_v29 = vld [vmem:[#allocation11 + $0x3a0] sm:$0xff]  ;;  %v2955_v35 = vld [vmem:[#allocation11 + $0x390] sm:$0xff] }
 0x6bb   :  { %9896 = vst [vmem:[#allocation65_spill] sm:$0xff] %v8760_v59  ;;  %9897 = vst [vmem:[#allocation66_spill] sm:$0xff] %v8762_v40  ;;  %v8776_v32 = vpack.c.bf16 %v2957_v29, %v2953_v52  ;;  %v2959_v22 = vld [vmem:[#allocation11 + $0x3b0] sm:$0xff] }
 0x6bc   :  { %6468 = vmatpush1.bf16.msra.mxu1 %v8752_v11  ;;  %6532 = vmatpush1.bf16.msra.mxu0 %v8755_v27  ;;  %9899 = vst [vmem:[#allocation68_spill] sm:$0xff] %v8767_v15  ;;  %v2954_v11 = vld [vmem:[#allocation11 + $0x388] sm:$0xff]  ;;  %v2956_v27 = vld [vmem:[#allocation11 + $0x398] sm:$0xff]  ;;  %v2963_v52 = vld [vmem:[#allocation11 + $0x3d0] sm:$0xff] }
 0x6bd   :  { %6470 = vmatprep.subr.bf16.mxu1 %v8760_v59  ;;  %6534 = vmatprep.subr.bf16.mxu0 %v8762_v40  ;;  %v8772_v17 = vpack.c.bf16 %v2958_v34, %v2954_v11  ;;  %v8774_v28 = vpack.c.bf16 %v2960_v45, %v2956_v27  ;;  %9902 = vst [vmem:[#allocation71_spill] sm:$0xff] %v8776_v32  ;;  %v2962_v59 = vld [vmem:[#allocation11 + $0x3c8] sm:$0xff]  ;;  %v2961_v27 = vld [vmem:[#allocation11 + $0x3c0] sm:$0xff] }
 0x6be   :  { %v8779_v40 = vpack.c.bf16 %v2959_v22, %v2955_v35  ;;  %v8782_v34 = vpack.c.bf16 %v2966_v13, %v2962_v59  ;;  %v2965_v45 = vld [vmem:[#allocation11 + $0x3e0] sm:$0xff]  ;;  %v2967_v35 = vld [vmem:[#allocation11 + $0x3f0] sm:$0xff] }
 0x6bf   :  { %9900 = vst [vmem:[#allocation69_spill] sm:$0xff] %v8772_v17  ;;  %9901 = vst [vmem:[#allocation70_spill] sm:$0xff] %v8774_v28  ;;  %v8788_v29 = vpack.c.bf16 %v2965_v45, %v2961_v27  ;;  %v8792_v22 = vpack.c.bf16 %v2967_v35, %v2963_v52 }
 0x6c0   :  { %6472 = vmatpush1.bf16.msra.mxu1 %v8764_v41  ;;  %6536 = vmatpush1.bf16.msra.mxu0 %v8767_v15  ;;  %9903 = vst [vmem:[#allocation72_spill] sm:$0xff] %v8779_v40  ;;  %v2964_v41 = vld [vmem:[#allocation11 + $0x3d8] sm:$0xff]  ;;  %9904 = vst [vmem:[#allocation22_spill] sm:$0xff] %v8782_v34 }
 0x6c1   :  { %6474 = vmatprep.subr.bf16.mxu1 %v8772_v17  ;;  %6538 = vmatprep.subr.bf16.mxu0 %v8774_v28  ;;  %v8784_v11 = vpack.c.bf16 %v2968_v44, %v2964_v41  ;;  %9906 = vst [vmem:[#allocation74_spill] sm:$0xff] %v8788_v29  ;;  %9907 = vst [vmem:[#allocation75_spill] sm:$0xff] %v8792_v22  ;;  %v2420_v44 = vld [vmem:[%s9417_s7] sm:$0xf] }
 0x6c2   :  { %v2436_v13 = vrot.slane %v2420_v44, %v7944_v9  ;;  %v2440_v27 = vrot.slane %v2420_v44, %v7950_v19  ;;  %v2444_v28 = vrot.slane %v2420_v44, %v9746_v24 }
 0x6c3   :  { %9905 = vst [vmem:[#allocation73_spill] sm:$0xff] %v8784_v11 }
 0x6c4   :  { %6476 = vmatpush1.bf16.msra.mxu1 %v8776_v32  ;;  %6540 = vmatpush1.bf16.msra.mxu0 %v8779_v40  ;;  %v2448_v32 = vrot.slane %v2420_v44, %v9854_v18 }
 0x6c5   :  { %6478 = vmatprep.subr.bf16.mxu1 %v8782_v34  ;;  %6542 = vmatprep.subr.bf16.mxu0 %v8784_v11 }
 0x6c8   :  { %6480 = vmatpush1.bf16.msra.mxu1 %v8788_v29  ;;  %6544 = vmatpush1.bf16.msra.mxu0 %v8792_v22 }
 0x6c9   :  { %6546 = vmatprep.subr.bf16.mxu1 %v8497_v61  ;;  %6577 = vmatprep.subr.bf16.mxu0 %v9692_v48 }
 0x73e   :  { %v2519_v59 = vpop.f32.mrb[16].mxu1  ;;  %v2590_v41 = vpop.f32.mrb[18].mxu0 }
 0x73f   :  { %v2520_v45 = vadd.f32 %v2519_v59, %v2436_v13  ;;  %v2521_v52 = vpop.f32.mrb[17].mxu1  ;;  %v2592_v35 = vpop.f32.mrb[19].mxu0  ;;  %v2591_v56 = vadd.f32 %v2590_v41, %v2444_v28 }
 0x740   :  { %v2522_v11 = vadd.f32 %v2521_v52, %v2440_v27  ;;  %v2593_v15 = vadd.f32 %v2592_v35, %v2448_v32 }
 0x741   :  { %v4954_v29 = vmul.f32 -1.442695, %v2520_v45  ;;  %v2807_v45 = vld [vmem:[#allocation2 + $0x4] ss:$8 sm:$0x7] }
 0x742   :  { %v4955_v22 = vmul.f32 -1.442695, %v2522_v11 }
 0x743   :  { %7210 = vpow2.f32 %v4954_v29 }
 0x744   :  { %7212 = vpow2.f32 %v4955_v22 }
 0x74d   :  { %v7211_v61 = vpop.eup %7210 }
 0x74e   :  { %v2598_v34 = vadd.f32 1.0, %v7211_v61  ;;  %v7213_v40 = vpop.eup %7212 }
 0x74f   :  { %v2604_v17 = vadd.f32 1.0, %v7213_v40 }
 0x750   :  { %7214 = vrcp.f32 %v2598_v34  ;;  %v2816_v34 = vrot.slane %v2807_v45, 1 }
 0x751   :  { %7216 = vrcp.f32 %v2604_v17 }
 0x75a   :  { %v7215_v3 = vpop.eup %7214 }
 0x75b   :  { %v2607_v13 = vmul.f32 %v7215_v3, %v2593_v15  ;;  %v7217_v18 = vpop.eup %7216 }
 0x75c   :  { %v2610_v40 = vsub.f32 1.0, %v7217_v18  ;;  %v2612_v28 = vmul.f32 %v7217_v18, %v8508_v36 }
 0x75d   :  { %v2608_v59 = vadd.f32 %v2607_v13, %v2591_v56  ;;  %v2825_v13 = vld [vmem:[%s9415_s5] sm:$0x1] }
 0x75e   :  { %v2731_v27 = vpop.f32.mrb[18].mxu1  ;;  %v2802_v29 = vpop.f32.mrb[20].mxu0 }
 0x75f   :  { %7218 = vtanh.f32 %v2608_v59  ;;  %v2808_v11 = vadd.f32 %v2807_v45, %v2731_v27  ;;  %v2733_v22 = vpop.f32.mrb[19].mxu1  ;;  %v5404_v52 = vpop.f32.mrb[21].mxu0  ;;  %v2826_v36 = vadd.f32 %v2825_v13, %v2802_v29  ;;  %v2828_v59 = vrot.slane %v2807_v45, 2  ;;  %v9948_v13 = vld [vmem:[#allocation64_spill] sm:$0xff] }
 0x760   :  { %v2818_v33 = vadd.f32 %v2816_v34, %v2733_v22 }
 0x761   :  { %v4956_v61 = vmul.f32 -1.442695, %v2808_v11 }
 0x762   :  { %v4957_v44 = vmul.f32 -1.442695, %v2818_v33 }
 0x763   :  { %7220 = vpow2.f32 %v4956_v61 }
 0x764   :  { %7222 = vpow2.f32 %v4957_v44 }
 0x769   :  { %v7219_v32 = vpop.eup %7218 }
 0x76a   :  { %v2611_v17 = vmul.f32 %v7219_v32, %v2610_v40 }
 0x76c   :  { %v2613_v56 = vadd.f32 %v2612_v28, %v2611_v17  ;;  %v9942_v28 = vld [vmem:[#allocation58_spill] sm:$0xff]  ;;  %v9943_v17 = vld [vmem:[#allocation59_spill] sm:$0xff] }
 0x76d   :  { %v7221_v3 = vpop.eup %7220 }
 0x76e   :  { %2614 = vst [vmem:[#allocation15 + $0x1] sm:$0x1] %v2613_v56  ;;  %2615 = vst [vmem:[#allocation3 + $0x3] sm:$0x1] %v2613_v56  ;;  %v2812_v15 = vadd.f32 1.0, %v7221_v3  ;;  %v7223_v41 = vpop.eup %7222  ;;  %v9944_v56 = vld [vmem:[#allocation60_spill] sm:$0xff] }
 0x76f   :  { %v2822_v18 = vadd.f32 1.0, %v7223_v41  ;;  %v9945_v3 = vld [vmem:[#allocation61_spill] sm:$0xff]  ;;  %v9947_v41 = vld [vmem:[#allocation63_spill] sm:$0xff] }
 0x770   :  { %7224 = vrcp.f32 %v2812_v15  ;;  %v9946_v15 = vld [vmem:[#allocation62_spill] sm:$0xff] }
 0x771   :  { %7226 = vrcp.f32 %v2822_v18  ;;  %v9949_v18 = vld [vmem:[#allocation65_spill] sm:$0xff] }
 0x775   :  { %v8806_v35 = vld [vmem:[#allocation15 + $0x1] sm:$0x1] }
 0x776   :  { %2839 = vst.msk [vmem:[#allocation4 + $0x1] sm:$0x1] %vm7654_vm2, %v8806_v35 }
 0x77a   :  { %v7225_v33 = vpop.eup %7224 }
 0x77b   :  { %v2827_v27 = vmul.f32 %v7225_v33, %v2826_v36  ;;  %v7227_v22 = vpop.eup %7226  ;;  %v9950_v36 = vld [vmem:[#allocation66_spill] sm:$0xff]  ;;  %v9951_v33 = vld [vmem:[#allocation67_spill] sm:$0xff] }
 0x77c   :  { %v2832_v52 = vsub.f32 1.0, %v7227_v22  ;;  %v2834_v44 = vmul.f32 %v7227_v22, %v8600_v8  ;;  %v9930_v8 = vld [vmem:[#allocation46_spill] sm:$0xff]  ;;  %v9955_v22 = vld [vmem:[#allocation71_spill] sm:$0xff] }
 0x77d   :  { %v2830_v11 = vadd.f32 %v2828_v59, %v2827_v27  ;;  %v9952_v59 = vld [vmem:[#allocation68_spill] sm:$0xff]  ;;  %v9953_v27 = vld [vmem:[#allocation69_spill] sm:$0xff] }
 0x77f   :  { %7228 = vtanh.f32 %v2830_v11  ;;  %v9954_v11 = vld [vmem:[#allocation70_spill] sm:$0xff] }
 0x789   :  { %v7229_v34 = vpop.eup %7228 }
 0x78a   :  { %v2833_v61 = vmul.f32 %v7229_v34, %v2832_v52  ;;  %v9956_v52 = vld [vmem:[#allocation72_spill] sm:$0xff]  ;;  %v9957_v34 = vld [vmem:[#allocation22_spill] sm:$0xff] }
 0x78c   :  { %v2835_v40 = vadd.f32 %v2834_v44, %v2833_v61  ;;  %v9958_v61 = vld [vmem:[#allocation73_spill] sm:$0xff]  ;;  %v9959_v44 = vld [vmem:[#allocation74_spill] sm:$0xff] }
 0x78e   :  { %2838 = vst.msk [vmem:[#allocation4] sm:$0x1] %vm7654_vm2, %v2835_v40  ;;  %2836 = vst [vmem:[#allocation15] sm:$0x1] %v2835_v40  ;;  %v9960_v40 = vld [vmem:[#allocation75_spill] sm:$0xff] }
 0x795   :  { %v2840_v32 = vld [vmem:[#allocation4] sm:$0x3] }
 0x796   :  { %v2978_v29 = vrot.slane %v2840_v32, %v7950_v19  ;;  %v2974_v45 = vrot.slane %v2840_v32, %v7944_v9  ;;  %v3716_v32 = vld [vmem:[#allocation10 + $0x8] sm:$0xff] }
 0x798   :  { %3066 = vmatprep.mubr.f32.mxu1 %v2978_v29  ;;  %3137 = vmatprep.mubr.f32.mxu0 %v2978_v29  ;;  %v3719_v29 = vld [vmem:[#allocation10 + $0x20] sm:$0xff] }
 0x799   :  { %3067 = vmatmul.mubr.f32.vlgmr.msra.gmra.mrb[20].mxu1 %v2974_v45  ;;  %3138 = vmatmul.mubr.f32.vlgmr.msra.gmra.mrb[22].mxu0 %v2974_v45  ;;  %v8921_v45 = vpack.c.bf16 %v3719_v29, %v3716_v32 }
 0x79a   :  { %6548 = vmatpush1.bf16.msra.mxu1 %v8521_v0  ;;  %6579 = vmatpush3.bf16.msra.mxu0 %v8523_v20  ;;  %v8854_v0 = vld [vmem:[#allocation15] sm:$0x1]  ;;  %v9908_v20 = vld [vmem:[#allocation24_spill] sm:$0xff] }
 0x79b   :  { %6550 = vmatprep.subr.bf16.mxu1 %v8525_v47  ;;  %6580 = vmatprep.subr.bf16.mxu0 %v9692_v48  ;;  %v9909_v47 = vld [vmem:[#allocation25_spill] sm:$0xff] }
 0x79c   :  { %3278 = vmatprep.mubr.f32.mxu1 %v7970_v63  ;;  %5437 = vmatprep.mubr.msk.f32.mxu0 %vm7478_vm0, %v7970_v63 }
 0x79e   :  { %6552 = vmatpush1.bf16.msra.mxu1 %v8529_v54  ;;  %6582 = vmatpush3.bf16.msra.mxu0 %v8531_v23  ;;  %v9910_v54 = vld [vmem:[#allocation26_spill] sm:$0xff]  ;;  %v9911_v23 = vld [vmem:[#allocation27_spill] sm:$0xff] }
 0x79f   :  { %6554 = vmatprep.subr.bf16.mxu1 %v8535_v53  ;;  %6583 = vmatprep.subr.bf16.mxu0 %v9692_v48  ;;  %v9912_v53 = vld [vmem:[#allocation28_spill] sm:$0xff] }
 0x7a2   :  { %6556 = vmatpush1.bf16.msra.mxu1 %v8542_v1  ;;  %6585 = vmatpush3.bf16.msra.mxu0 %v8544_v49  ;;  %v9913_v1 = vld [vmem:[#allocation29_spill] sm:$0xff]  ;;  %v9914_v49 = vld [vmem:[#allocation30_spill] sm:$0xff] }
 0x7a3   :  { %6558 = vmatprep.subr.bf16.mxu1 %v8548_v60  ;;  %6586 = vmatprep.subr.bf16.mxu0 %v9692_v48  ;;  %v9915_v60 = vld [vmem:[#allocation31_spill] sm:$0xff] }
 0x7a6   :  { %6560 = vmatpush1.bf16.msra.mxu1 %v8552_v14  ;;  %6588 = vmatpush3.bf16.msra.mxu0 %v8554_v50  ;;  %v9916_v14 = vld [vmem:[#allocation32_spill] sm:$0xff]  ;;  %v9917_v50 = vld [vmem:[#allocation33_spill] sm:$0xff] }
 0x7a7   :  { %6562 = vmatprep.subr.bf16.mxu1 %v8558_v31  ;;  %6589 = vmatprep.subr.bf16.mxu0 %v9692_v48  ;;  %v9918_v31 = vld [vmem:[#allocation34_spill] sm:$0xff] }
 0x7aa   :  { %6564 = vmatpush1.bf16.msra.mxu1 %v8562_v2  ;;  %6591 = vmatpush3.bf16.msra.mxu0 %v8564_v30  ;;  %v9919_v2 = vld [vmem:[#allocation35_spill] sm:$0xff]  ;;  %v9920_v30 = vld [vmem:[#allocation36_spill] sm:$0xff] }
 0x7ab   :  { %6566 = vmatprep.subr.bf16.mxu1 %v8568_v62  ;;  %6592 = vmatprep.subr.bf16.mxu0 %v9692_v48  ;;  %v9921_v62 = vld [vmem:[#allocation37_spill] sm:$0xff] }
 0x7ae   :  { %6568 = vmatpush1.bf16.msra.mxu1 %v8572_v7  ;;  %6594 = vmatpush3.bf16.msra.mxu0 %v8574_v12  ;;  %v9922_v7 = vld [vmem:[#allocation38_spill] sm:$0xff]  ;;  %v9923_v12 = vld [vmem:[#allocation39_spill] sm:$0xff] }
 0x7af   :  { %6570 = vmatprep.subr.bf16.mxu1 %v8578_v39  ;;  %6595 = vmatprep.subr.bf16.mxu0 %v9692_v48  ;;  %v9924_v39 = vld [vmem:[#allocation40_spill] sm:$0xff] }
 0x7b2   :  { %6572 = vmatpush1.bf16.msra.mxu1 %v8582_v58  ;;  %6597 = vmatpush3.bf16.msra.mxu0 %v8584_v5  ;;  %v9925_v58 = vld [vmem:[#allocation41_spill] sm:$0xff]  ;;  %v9926_v5 = vld [vmem:[#allocation42_spill] sm:$0xff] }
 0x7b3   :  { %6574 = vmatprep.subr.bf16.mxu1 %v8588_v25  ;;  %6598 = vmatprep.subr.bf16.mxu0 %v9692_v48  ;;  %v9927_v25 = vld [vmem:[#allocation43_spill] sm:$0xff] }
 0x7b6   :  { %6576 = vmatpush1.bf16.msra.mxu1 %v8592_v42  ;;  %6600 = vmatpush3.bf16.msra.mxu0 %v8594_v55  ;;  %v9928_v42 = vld [vmem:[#allocation44_spill] sm:$0xff]  ;;  %v9929_v55 = vld [vmem:[#allocation45_spill] sm:$0xff] }
 0x7b7   :  { %6602 = vmatprep.subr.bf16.mxu1 %v8604_v38  ;;  %6666 = vmatprep.subr.bf16.mxu0 %v8606_v37  ;;  %v9931_v38 = vld [vmem:[#allocation47_spill] sm:$0xff]  ;;  %v9932_v37 = vld [vmem:[#allocation48_spill] sm:$0xff] }
 0x7b9   :  { %3279 = vmatmul.mubr.f32.vlgmr.msra.gmra.mrb[22].mxu1 %v8854_v0  ;;  %5438 = vmatmul.mubr.f32.vlgmr.msra.gmra.mrb[24].mxu0 %v8854_v0 }
 0x7ba   :  { %6604 = vmatpush1.bf16.msra.mxu1 %v8608_v57  ;;  %6668 = vmatpush1.bf16.msra.mxu0 %v8611_v16  ;;  %v9933_v57 = vld [vmem:[#allocation49_spill] sm:$0xff]  ;;  %v9934_v16 = vld [vmem:[#allocation50_spill] sm:$0xff] }
 0x7bb   :  { %6606 = vmatprep.subr.bf16.mxu1 %v8616_v43  ;;  %6670 = vmatprep.subr.bf16.mxu0 %v8618_v10  ;;  %v9935_v43 = vld [vmem:[#allocation51_spill] sm:$0xff]  ;;  %v9936_v10 = vld [vmem:[#allocation52_spill] sm:$0xff] }
 0x7be   :  { %6608 = vmatpush1.bf16.msra.mxu1 %v8620_v26  ;;  %6672 = vmatpush1.bf16.msra.mxu0 %v8623_v51  ;;  %v9937_v26 = vld [vmem:[#allocation53_spill] sm:$0xff]  ;;  %v9938_v51 = vld [vmem:[#allocation54_spill] sm:$0xff] }
 0x7bf   :  { %6610 = vmatprep.subr.bf16.mxu1 %v8628_v6  ;;  %6674 = vmatprep.subr.bf16.mxu0 %v8630_v4  ;;  %v9939_v6 = vld [vmem:[#allocation55_spill] sm:$0xff]  ;;  %v9940_v4 = vld [vmem:[#allocation56_spill] sm:$0xff] }
 0x7c2   :  { %6612 = vmatpush1.bf16.msra.mxu1 %v8633_v21  ;;  %6676 = vmatpush1.bf16.msra.mxu0 %v9908_v20  ;;  %v9941_v21 = vld [vmem:[#allocation57_spill] sm:$0xff]  ;;  %v2969_v20 = vld [vmem:[%s9417_s7] sm:$0xf] }
 0x7c3   :  { %6614 = vmatprep.subr.bf16.mxu1 %v9909_v47  ;;  %6678 = vmatprep.subr.bf16.mxu0 %v9910_v54  ;;  %v2985_v47 = vrot.slane %v2969_v20, %v7944_v9 }
 0x7c6   :  { %6616 = vmatpush1.bf16.msra.mxu1 %v9911_v23  ;;  %6680 = vmatpush1.bf16.msra.mxu0 %v9912_v53  ;;  %v2989_v53 = vrot.slane %v2969_v20, %v7950_v19 }
 0x7c7   :  { %6618 = vmatprep.subr.bf16.mxu1 %v9913_v1  ;;  %6682 = vmatprep.subr.bf16.mxu0 %v9914_v49 }
 0x7ca   :  { %6620 = vmatpush1.bf16.msra.mxu1 %v9915_v60  ;;  %6684 = vmatpush1.bf16.msra.mxu0 %v9916_v14 }
 0x7cb   :  { %6622 = vmatprep.subr.bf16.mxu1 %v9917_v50  ;;  %6686 = vmatprep.subr.bf16.mxu0 %v9918_v31 }
 0x7ce   :  { %6624 = vmatpush1.bf16.msra.mxu1 %v9919_v2  ;;  %6688 = vmatpush1.bf16.msra.mxu0 %v9920_v30 }
 0x7cf   :  { %6626 = vmatprep.subr.bf16.mxu1 %v9921_v62  ;;  %6690 = vmatprep.subr.bf16.mxu0 %v9922_v7  ;;  %v9961_v7 = vld [vmem:[#allocation23_spill] sm:$0xff] }
 0x7d2   :  { %6628 = vmatpush1.bf16.msra.mxu1 %v9923_v12  ;;  %6692 = vmatpush1.bf16.msra.mxu0 %v9924_v39  ;;  %v2997_v12 = vrot.slane %v2969_v20, %v9961_v7  ;;  %v2993_v39 = vrot.slane %v2969_v20, %v9746_v24  ;;  %v3715_v20 = vld [vmem:[#allocation10] sm:$0xff] }
 0x7d3   :  { %6630 = vmatprep.subr.bf16.mxu1 %v9925_v58  ;;  %6694 = vmatprep.subr.bf16.mxu0 %v9926_v5 }
 0x7d6   :  { %6632 = vmatpush1.bf16.msra.mxu1 %v9927_v25  ;;  %6696 = vmatpush1.bf16.msra.mxu0 %v9928_v42 }
 0x7d7   :  { %6634 = vmatprep.subr.bf16.mxu1 %v9929_v55  ;;  %6698 = vmatprep.subr.bf16.mxu0 %v9930_v8 }
 0x7da   :  { %6636 = vmatpush1.bf16.msra.mxu1 %v9931_v38  ;;  %6700 = vmatpush1.bf16.msra.mxu0 %v9932_v37  ;;  %v3356_v38 = vld [vmem:[#allocation2 + $0x5] ss:$8 sm:$0x7] }
 0x7db   :  { %6638 = vmatprep.subr.bf16.mxu1 %v9933_v57  ;;  %6702 = vmatprep.subr.bf16.mxu0 %v9934_v16 }
 0x7de   :  { %6640 = vmatpush1.bf16.msra.mxu1 %v9935_v43  ;;  %6704 = vmatpush1.bf16.msra.mxu0 %v9936_v10 }
 0x7df   :  { %6642 = vmatprep.subr.bf16.mxu1 %v9937_v26  ;;  %6706 = vmatprep.subr.bf16.mxu0 %v9938_v51  ;;  %v3365_v26 = vrot.slane %v3356_v38, 1 }
 0x7e2   :  { %6644 = vmatpush1.bf16.msra.mxu1 %v9939_v6  ;;  %6708 = vmatpush1.bf16.msra.mxu0 %v9940_v4 }
 0x7e3   :  { %6646 = vmatprep.subr.bf16.mxu1 %v9941_v21  ;;  %6710 = vmatprep.subr.bf16.mxu0 %v9942_v28 }
 0x7e6   :  { %6648 = vmatpush1.bf16.msra.mxu1 %v9943_v17  ;;  %6712 = vmatpush1.bf16.msra.mxu0 %v9944_v56 }
 0x7e7   :  { %6650 = vmatprep.subr.bf16.mxu1 %v9945_v3  ;;  %6714 = vmatprep.subr.bf16.mxu0 %v9946_v15 }
 0x7ea   :  { %6652 = vmatpush1.bf16.msra.mxu1 %v9947_v41  ;;  %6716 = vmatpush1.bf16.msra.mxu0 %v9948_v13 }
 0x7eb   :  { %6654 = vmatprep.subr.bf16.mxu1 %v9949_v18  ;;  %6718 = vmatprep.subr.bf16.mxu0 %v9950_v36 }
 0x7ee   :  { %6656 = vmatpush1.bf16.msra.mxu1 %v9951_v33  ;;  %6720 = vmatpush1.bf16.msra.mxu0 %v9952_v59  ;;  %v3374_v33 = vld [vmem:[%s9415_s5] sm:$0x1] }
 0x7ef   :  { %6658 = vmatprep.subr.bf16.mxu1 %v9953_v27  ;;  %6722 = vmatprep.subr.bf16.mxu0 %v9954_v11  ;;  %v3377_v11 = vrot.slane %v3356_v38, 2 }
 0x7f2   :  { %6660 = vmatpush1.bf16.msra.mxu1 %v9955_v22  ;;  %6724 = vmatpush1.bf16.msra.mxu0 %v9956_v52 }
 0x7f3   :  { %6662 = vmatprep.subr.bf16.mxu1 %v9957_v34  ;;  %6726 = vmatprep.subr.bf16.mxu0 %v9958_v61 }
 0x7f6   :  { %6664 = vmatpush1.bf16.msra.mxu1 %v9959_v44  ;;  %6728 = vmatpush1.bf16.msra.mxu0 %v9960_v40 }
 0x7f7   :  { %6761 = vmatprep.subr.bf16.mxu0 %v9692_v48  ;;  %6730 = vmatprep.subr.bf16.mxu1 %v8921_v45 }
 0x86c   :  { %v3068_v54 = vpop.f32.mrb[20].mxu1  ;;  %v3139_v23 = vpop.f32.mrb[22].mxu0 }
 0x86d   :  { %v3069_v1 = vadd.f32 %v3068_v54, %v2985_v47  ;;  %v3070_v49 = vpop.f32.mrb[21].mxu1  ;;  %v3141_v60 = vpop.f32.mrb[23].mxu0  ;;  %v3140_v42 = vadd.f32 %v3139_v23, %v2993_v39  ;;  %v3718_v47 = vld [vmem:[#allocation10 + $0x18] sm:$0xff]  ;;  %v3717_v54 = vld [vmem:[#allocation10 + $0x10] sm:$0xff]  ;;  %v3720_v23 = vld [vmem:[#allocation10 + $0x28] sm:$0xff] }
 0x86e   :  { %v3071_v50 = vadd.f32 %v3070_v49, %v2989_v53  ;;  %v3142_v5 = vadd.f32 %v3141_v60, %v2997_v12  ;;  %v3722_v53 = vld [vmem:[#allocation10 + $0x38] sm:$0xff]  ;;  %v3728_v39 = vld [vmem:[#allocation10 + $0x68] sm:$0xff] }
 0x86f   :  { %v4958_v14 = vmul.f32 -1.442695, %v3069_v1  ;;  %v3725_v1 = vld [vmem:[#allocation10 + $0x50] sm:$0xff]  ;;  %v3726_v12 = vld [vmem:[#allocation10 + $0x58] sm:$0xff] }
 0x870   :  { %v4959_v31 = vmul.f32 -1.442695, %v3071_v50  ;;  %v8945_v50 = vpack.c.bf16 %v3718_v47, %v3715_v20  ;;  %v3751_v47 = vld [vmem:[#allocation10 + $0x120] sm:$0xff] }
 0x871   :  { %7230 = vpow2.f32 %v4958_v14 }
 0x872   :  { %7232 = vpow2.f32 %v4959_v31  ;;  %v8947_v31 = vpack.c.bf16 %v3720_v23, %v3717_v54  ;;  %v3754_v23 = vld [vmem:[#allocation10 + $0x138] sm:$0xff] }
 0x87b   :  { %v7231_v2 = vpop.eup %7230 }
 0x87c   :  { %v3147_v30 = vadd.f32 1.0, %v7231_v2  ;;  %v7233_v62 = vpop.eup %7232  ;;  %v8949_v2 = vpack.c.bf16 %v3725_v1, %v3722_v53  ;;  %v3753_v53 = vld [vmem:[#allocation10 + $0x130] sm:$0xff]  ;;  %v3756_v1 = vld [vmem:[#allocation10 + $0x148] sm:$0xff] }
 0x87d   :  { %v3153_v58 = vadd.f32 1.0, %v7233_v62  ;;  %v3723_v62 = vld [vmem:[#allocation10 + $0x40] sm:$0xff] }
 0x87e   :  { %7234 = vrcp.f32 %v3147_v30  ;;  %v3724_v30 = vld [vmem:[#allocation10 + $0x48] sm:$0xff] }
 0x87f   :  { %7236 = vrcp.f32 %v3153_v58  ;;  %v3731_v58 = vld [vmem:[#allocation10 + $0x80] sm:$0xff] }
 0x888   :  { %v7235_v25 = vpop.eup %7234 }
 0x889   :  { %v3156_v55 = vmul.f32 %v7235_v25, %v3142_v5  ;;  %v7237_v4 = vpop.eup %7236  ;;  %v8955_v25 = vpack.c.bf16 %v3726_v12, %v3723_v62  ;;  %v3760_v12 = vld [vmem:[#allocation10 + $0x168] sm:$0xff] }
 0x88a   :  { %v3159_v28 = vsub.f32 1.0, %v7237_v4  ;;  %v3161_v56 = vmul.f32 %v7237_v4, %v8806_v35  ;;  %v3735_v4 = vld [vmem:[#allocation10 + $0xa0] sm:$0xff] }
 0x88b   :  { %v3157_v8 = vadd.f32 %v3156_v55, %v3140_v42  ;;  %v3727_v42 = vld [vmem:[#allocation10 + $0x60] sm:$0xff]  ;;  %v8959_v55 = vpack.c.bf16 %v3731_v58, %v3728_v39  ;;  %v3762_v58 = vld [vmem:[#allocation10 + $0x178] sm:$0xff] }
 0x88c   :  { %v3280_v37 = vpop.f32.mrb[22].mxu1  ;;  %v3351_v57 = vpop.f32.mrb[24].mxu0  ;;  %v3759_v39 = vld [vmem:[#allocation10 + $0x160] sm:$0xff] }
 0x88d   :  { %7238 = vtanh.f32 %v3157_v8  ;;  %v3357_v16 = vadd.f32 %v3356_v38, %v3280_v37  ;;  %v3282_v43 = vpop.f32.mrb[23].mxu1  ;;  %v5439_v10 = vpop.f32.mrb[25].mxu0  ;;  %v3375_v59 = vadd.f32 %v3374_v33, %v3351_v57  ;;  %v3730_v8 = vld [vmem:[#allocation10 + $0x78] sm:$0xff]  ;;  %v3729_v38 = vld [vmem:[#allocation10 + $0x70] sm:$0xff]  ;;  %v3732_v37 = vld [vmem:[#allocation10 + $0x88] sm:$0xff] }
 0x88e   :  { %v3367_v6 = vadd.f32 %v3365_v26, %v3282_v43  ;;  %v3734_v57 = vld [vmem:[#allocation10 + $0x98] sm:$0xff]  ;;  %v8966_v43 = vpack.c.bf16 %v3730_v8, %v3727_v42  ;;  %v8968_v10 = vpack.c.bf16 %v3732_v37, %v3729_v38  ;;  %v3733_v26 = vld [vmem:[#allocation10 + $0x90] sm:$0xff]  ;;  %v3744_v33 = vld [vmem:[#allocation10 + $0xe8] sm:$0xff]  ;;  %v9018_v8 = vpack.c.bf16 %v3762_v58, %v3759_v39 }
 0x88f   :  { %v4960_v51 = vmul.f32 -1.442695, %v3357_v16  ;;  %v3737_v16 = vld [vmem:[#allocation10 + $0xb0] sm:$0xff]  ;;  %v3940_v37 = vld [vmem:[#allocation11 + $0x8] sm:$0xff]  ;;  %v3955_v39 = vld [vmem:[#allocation11 + $0x80] sm:$0xff] }
 0x890   :  { %v4961_v21 = vmul.f32 -1.442695, %v3367_v6  ;;  %v3736_v6 = vld [vmem:[#allocation10 + $0xa8] sm:$0xff] }
 0x891   :  { %7240 = vpow2.f32 %v4960_v51  ;;  %v8972_v51 = vpack.c.bf16 %v3737_v16, %v3734_v57  ;;  %v3944_v57 = vld [vmem:[#allocation11 + $0x28] sm:$0xff]  ;;  %v3942_v16 = vld [vmem:[#allocation11 + $0x18] sm:$0xff] }
 0x892   :  { %7242 = vpow2.f32 %v4961_v21  ;;  %v3738_v21 = vld [vmem:[#allocation10 + $0xb8] sm:$0xff] }
 0x897   :  { %v7239_v17 = vpop.eup %7238 }
 0x898   :  { %v3160_v3 = vmul.f32 %v7239_v17, %v3159_v28  ;;  %v3740_v28 = vld [vmem:[#allocation10 + $0xc8] sm:$0xff]  ;;  %v3743_v17 = vld [vmem:[#allocation10 + $0xe0] sm:$0xff] }
 0x89a   :  { %v3162_v15 = vadd.f32 %v3161_v56, %v3160_v3  ;;  %v8976_v56 = vpack.c.bf16 %v3736_v6, %v3733_v26  ;;  %v8978_v3 = vpack.c.bf16 %v3738_v21, %v3735_v4  ;;  %v9028_v26 = vpack.c.bf16 %v3944_v57, %v3940_v37  ;;  %v3946_v6 = vld [vmem:[#allocation11 + $0x38] sm:$0xff]  ;;  %v3939_v4 = vld [vmem:[#allocation11] sm:$0xff]  ;;  %v3957_v57 = vld [vmem:[#allocation11 + $0x90] sm:$0xff] }
 0x89b   :  { %v7241_v41 = vpop.eup %7240  ;;  %v3943_v21 = vld [vmem:[#allocation11 + $0x20] sm:$0xff] }
 0x89c   :  { %3163 = vst [vmem:[#allocation15 + $0x1] sm:$0x1] %v3162_v15  ;;  %3164 = vst [vmem:[#allocation3 + $0x4] sm:$0x1] %v3162_v15  ;;  %v3361_v13 = vadd.f32 1.0, %v7241_v41  ;;  %v7243_v18 = vpop.eup %7242  ;;  %v3739_v15 = vld [vmem:[#allocation10 + $0xc0] sm:$0xff]  ;;  %v8982_v41 = vpack.c.bf16 %v3743_v17, %v3740_v28  ;;  %v9030_v28 = vpack.c.bf16 %v3946_v6, %v3942_v16  ;;  %v9032_v17 = vpack.c.bf16 %v3943_v21, %v3939_v4 }
 0x89d   :  { %v3371_v35 = vadd.f32 1.0, %v7243_v18  ;;  %v3741_v18 = vld [vmem:[#allocation10 + $0xd0] sm:$0xff]  ;;  %v3959_v37 = vld [vmem:[#allocation11 + $0xa0] sm:$0xff]  ;;  %v3964_v21 = vld [vmem:[#allocation11 + $0xc8] sm:$0xff] }
 0x89e   :  { %7244 = vrcp.f32 %v3361_v13  ;;  %v3742_v13 = vld [vmem:[#allocation10 + $0xd8] sm:$0xff]  ;;  %v3961_v16 = vld [vmem:[#allocation11 + $0xb0] sm:$0xff]  ;;  %v9057_v6 = vpack.c.bf16 %v3959_v37, %v3955_v39 }
 0x89f   :  { %7246 = vrcp.f32 %v3371_v35  ;;  %v3746_v35 = vld [vmem:[#allocation10 + $0xf8] sm:$0xff]  ;;  %v9059_v4 = vpack.c.bf16 %v3961_v16, %v3957_v57  ;;  %v3971_v57 = vld [vmem:[#allocation11 + $0x100] sm:$0xff] }
 0x8a0   :  { %v3978_v37 = vld [vmem:[#allocation11 + $0x138] sm:$0xff]  ;;  %v3975_v16 = vld [vmem:[#allocation11 + $0x120] sm:$0xff] }
 0x8a1   :  { %9962 = vst [vmem:[#allocation24_spill] sm:$0xff] %v9059_v4 }
 0x8a3   :  { %v8932_v36 = vld [vmem:[#allocation15 + $0x1] sm:$0x1] }
 0x8a4   :  { %3388 = vst.msk [vmem:[#allocation4 + $0x1] sm:$0x1] %vm7654_vm2, %v8932_v36 }
 0x8a8   :  { %v7245_v27 = vpop.eup %7244 }
 0x8a9   :  { %v3376_v22 = vmul.f32 %v7245_v27, %v3375_v59  ;;  %v7247_v34 = vpop.eup %7246  ;;  %v3749_v59 = vld [vmem:[#allocation10 + $0x110] sm:$0xff]  ;;  %v8986_v27 = vpack.c.bf16 %v3742_v13, %v3739_v15 }
 0x8aa   :  { %v3381_v61 = vsub.f32 1.0, %v7247_v34  ;;  %v3383_v32 = vmul.f32 %v7247_v34, %v8854_v0  ;;  %v3721_v0 = vld [vmem:[#allocation10 + $0x30] sm:$0xff]  ;;  %v3748_v34 = vld [vmem:[#allocation10 + $0x108] sm:$0xff] }
 0x8ab   :  { %v3379_v52 = vadd.f32 %v3377_v11, %v3376_v22  ;;  %v8953_v5 = vpack.c.bf16 %v3724_v30, %v3721_v0  ;;  %v8988_v11 = vpack.c.bf16 %v3744_v33, %v3741_v18  ;;  %v3745_v22 = vld [vmem:[#allocation10 + $0xf0] sm:$0xff]  ;;  %v9008_v0 = vpack.c.bf16 %v3756_v1, %v3753_v53  ;;  %v3948_v33 = vld [vmem:[#allocation11 + $0x48] sm:$0xff] }
 0x8ac   :  { %v3757_v30 = vld [vmem:[#allocation10 + $0x150] sm:$0xff]  ;;  %v3956_v1 = vld [vmem:[#allocation11 + $0x88] sm:$0xff] }
 0x8ad   :  { %7248 = vtanh.f32 %v3379_v52  ;;  %v8992_v52 = vpack.c.bf16 %v3749_v59, %v3746_v35  ;;  %v9016_v42 = vpack.c.bf16 %v3760_v12, %v3757_v30  ;;  %v3941_v15 = vld [vmem:[#allocation11 + $0x10] sm:$0xff]  ;;  %v3952_v35 = vld [vmem:[#allocation11 + $0x68] sm:$0xff]  ;;  %v3950_v59 = vld [vmem:[#allocation11 + $0x58] sm:$0xff] }
 0x8ae   :  { %v3945_v13 = vld [vmem:[#allocation11 + $0x30] sm:$0xff]  ;;  %v3962_v12 = vld [vmem:[#allocation11 + $0xb8] sm:$0xff] }
 0x8af   :  { %v9035_v18 = vpack.c.bf16 %v3945_v13, %v3941_v15  ;;  %v3968_v15 = vld [vmem:[#allocation11 + $0xe8] sm:$0xff]  ;;  %v3966_v13 = vld [vmem:[#allocation11 + $0xd8] sm:$0xff] }
 0x8b7   :  { %v7249_v44 = vpop.eup %7248 }
 0x8b8   :  { %v3382_v40 = vmul.f32 %v7249_v44, %v3381_v61  ;;  %v3747_v61 = vld [vmem:[#allocation10 + $0x100] sm:$0xff]  ;;  %v3750_v44 = vld [vmem:[#allocation10 + $0x118] sm:$0xff] }
 0x8b9   :  { %v8998_v20 = vpack.c.bf16 %v3750_v44, %v3747_v61  ;;  %v3947_v61 = vld [vmem:[#allocation11 + $0x40] sm:$0xff] }
 0x8ba   :  { %v3384_v29 = vadd.f32 %v3383_v32, %v3382_v40  ;;  %v3752_v40 = vld [vmem:[#allocation10 + $0x128] sm:$0xff]  ;;  %v3755_v32 = vld [vmem:[#allocation10 + $0x140] sm:$0xff] }
 0x8bb   :  { %v9002_v54 = vpack.c.bf16 %v3755_v32, %v3752_v40  ;;  %v3951_v44 = vld [vmem:[#allocation11 + $0x60] sm:$0xff] }
 0x8bc   :  { %3385 = vst [vmem:[#allocation15] sm:$0x1] %v3384_v29  ;;  %3387 = vst.msk [vmem:[#allocation4] sm:$0x1] %vm7654_vm2, %v3384_v29  ;;  %v8996_v29 = vpack.c.bf16 %v3748_v34, %v3745_v22  ;;  %v9040_v22 = vpack.c.bf16 %v3952_v35, %v3948_v33  ;;  %v3954_v34 = vld [vmem:[#allocation11 + $0x78] sm:$0xff]  ;;  %v9044_v32 = vpack.c.bf16 %v3951_v44, %v3947_v61 }
 0x8bd   :  { %v9042_v40 = vpack.c.bf16 %v3954_v34, %v3950_v59  ;;  %v9064_v33 = vpack.c.bf16 %v3968_v15, %v3964_v21  ;;  %v3970_v35 = vld [vmem:[#allocation11 + $0xf8] sm:$0xff]  ;;  %v3963_v59 = vld [vmem:[#allocation11 + $0xc0] sm:$0xff]  ;;  %v9080_v15 = vpack.c.bf16 %v3975_v16, %v3971_v57 }
 0x8be   :  { %v3967_v34 = vld [vmem:[#allocation11 + $0xe0] sm:$0xff]  ;;  %v9066_v61 = vpack.c.bf16 %v3970_v35, %v3966_v13  ;;  %v3973_v13 = vld [vmem:[#allocation11 + $0x110] sm:$0xff] }
 0x8bf   :  { %9963 = vst [vmem:[#allocation25_spill] sm:$0xff] %v9064_v33  ;;  %v9068_v44 = vpack.c.bf16 %v3967_v34, %v3963_v59  ;;  %9969 = vst [vmem:[#allocation31_spill] sm:$0xff] %v9080_v15  ;;  %v3977_v35 = vld [vmem:[#allocation11 + $0x130] sm:$0xff]  ;;  %v3980_v34 = vld [vmem:[#allocation11 + $0x148] sm:$0xff] }
 0x8c0   :  { %9964 = vst [vmem:[#allocation26_spill] sm:$0xff] %v9066_v61  ;;  %v9083_v59 = vpack.c.bf16 %v3977_v35, %v3973_v13  ;;  %v3981_v13 = vld [vmem:[#allocation11 + $0x150] sm:$0xff] }
 0x8c1   :  { %9965 = vst [vmem:[#allocation27_spill] sm:$0xff] %v9068_v44  ;;  %v3985_v35 = vld [vmem:[#allocation11 + $0x170] sm:$0xff] }
 0x8c2   :  { %9970 = vst [vmem:[#allocation32_spill] sm:$0xff] %v9083_v59 }
 0x8c3   :  { %v3389_v49 = vld [vmem:[#allocation4] sm:$0x3]  ;;  %v9024_v38 = vld [vmem:[#allocation15] sm:$0x1] }
 0x8c4   :  { %v3527_v60 = vrot.slane %v3389_v49, %v7950_v19  ;;  %v3523_v14 = vrot.slane %v3389_v49, %v7944_v9  ;;  %v3758_v49 = vld [vmem:[#allocation10 + $0x158] sm:$0xff] }
 0x8c6   :  { %3615 = vmatprep.mubr.f32.mxu1 %v3527_v60  ;;  %3686 = vmatprep.mubr.f32.mxu0 %v3527_v60  ;;  %v3761_v60 = vld [vmem:[#allocation10 + $0x170] sm:$0xff] }
 0x8c7   :  { %3616 = vmatmul.mubr.f32.vlgmr.msra.gmra.mrb[24].mxu1 %v3523_v14  ;;  %3687 = vmatmul.mubr.f32.vlgmr.msra.gmra.mrb[26].mxu0 %v3523_v14  ;;  %v9006_v14 = vpack.c.bf16 %v3754_v23, %v3751_v47  ;;  %v9012_v62 = vpack.c.bf16 %v3761_v60, %v3758_v49  ;;  %v3949_v47 = vld [vmem:[#allocation11 + $0x50] sm:$0xff]  ;;  %v3960_v49 = vld [vmem:[#allocation11 + $0xa8] sm:$0xff]  ;;  %v3958_v60 = vld [vmem:[#allocation11 + $0x98] sm:$0xff] }
 0x8c8   :  { %6732 = vmatpush1.bf16.msra.mxu1 %v8945_v50  ;;  %6763 = vmatpush3.bf16.msra.mxu0 %v8947_v31  ;;  %v3953_v23 = vld [vmem:[#allocation11 + $0x70] sm:$0xff]  ;;  %v9052_v30 = vpack.c.bf16 %v3960_v49, %v3956_v1  ;;  %v9054_v58 = vpack.c.bf16 %v3962_v12, %v3958_v60  ;;  %v3972_v49 = vld [vmem:[#allocation11 + $0x108] sm:$0xff]  ;;  %v3974_v12 = vld [vmem:[#allocation11 + $0x118] sm:$0xff] }
 0x8c9   :  { %6734 = vmatprep.subr.bf16.mxu1 %v8949_v2  ;;  %6764 = vmatprep.subr.bf16.mxu0 %v9692_v48  ;;  %v9047_v53 = vpack.c.bf16 %v3953_v23, %v3949_v47  ;;  %v3965_v47 = vld [vmem:[#allocation11 + $0xd0] sm:$0xff]  ;;  %v3976_v60 = vld [vmem:[#allocation11 + $0x128] sm:$0xff]  ;;  %v9078_v21 = vpack.c.bf16 %v3978_v37, %v3974_v12  ;;  %v3979_v12 = vld [vmem:[#allocation11 + $0x140] sm:$0xff] }
 0x8ca   :  { %3827 = vmatprep.mubr.f32.mxu1 %v7970_v63  ;;  %5472 = vmatprep.mubr.msk.f32.mxu0 %vm7478_vm0, %v7970_v63  ;;  %v3969_v23 = vld [vmem:[#allocation11 + $0xf0] sm:$0xff]  ;;  %v9076_v39 = vpack.c.bf16 %v3976_v60, %v3972_v49  ;;  %v3986_v60 = vld [vmem:[#allocation11 + $0x178] sm:$0xff]  ;;  %v3983_v37 = vld [vmem:[#allocation11 + $0x160] sm:$0xff] }
 0x8cb   :  { %v9071_v1 = vpack.c.bf16 %v3969_v23, %v3965_v47  ;;  %9968 = vst [vmem:[#allocation30_spill] sm:$0xff] %v9078_v21  ;;  %v3984_v47 = vld [vmem:[#allocation11 + $0x168] sm:$0xff]  ;;  %v3982_v23 = vld [vmem:[#allocation11 + $0x158] sm:$0xff]  ;;  %v9092_v16 = vpack.c.bf16 %v3983_v37, %v3979_v12 }
 0x8cc   :  { %6736 = vmatpush1.bf16.msra.mxu1 %v8953_v5  ;;  %6766 = vmatpush3.bf16.msra.mxu0 %v8955_v25  ;;  %9967 = vst [vmem:[#allocation29_spill] sm:$0xff] %v9076_v39  ;;  %v9088_v49 = vpack.c.bf16 %v3984_v47, %v3980_v34  ;;  %v9090_v57 = vpack.c.bf16 %v3986_v60, %v3982_v23  ;;  %v3994_v47 = vld [vmem:[#allocation11 + $0x1b8] sm:$0xff]  ;;  %v3987_v23 = vld [vmem:[#allocation11 + $0x180] sm:$0xff] }
 0x8cd   :  { %6738 = vmatprep.subr.bf16.mxu1 %v8959_v55  ;;  %6767 = vmatprep.subr.bf16.mxu0 %v9692_v48  ;;  %9966 = vst [vmem:[#allocation28_spill] sm:$0xff] %v9071_v1  ;;  %9973 = vst [vmem:[#allocation35_spill] sm:$0xff] %v9092_v16  ;;  %v3991_v60 = vld [vmem:[#allocation11 + $0x1a0] sm:$0xff] }
 0x8ce   :  { %9971 = vst [vmem:[#allocation33_spill] sm:$0xff] %v9088_v49  ;;  %9972 = vst [vmem:[#allocation34_spill] sm:$0xff] %v9090_v57  ;;  %v9104_v37 = vpack.c.bf16 %v3991_v60, %v3987_v23 }
 0x8d0   :  { %6740 = vmatpush1.bf16.msra.mxu1 %v8966_v43  ;;  %6769 = vmatpush3.bf16.msra.mxu0 %v8968_v10  ;;  %9977 = vst [vmem:[#allocation39_spill] sm:$0xff] %v9104_v37 }
 0x8d1   :  { %6742 = vmatprep.subr.bf16.mxu1 %v8972_v51  ;;  %6770 = vmatprep.subr.bf16.mxu0 %v9692_v48 }
 0x8d4   :  { %6744 = vmatpush1.bf16.msra.mxu1 %v8976_v56  ;;  %6772 = vmatpush3.bf16.msra.mxu0 %v8978_v3 }
 0x8d5   :  { %6746 = vmatprep.subr.bf16.mxu1 %v8982_v41  ;;  %6773 = vmatprep.subr.bf16.mxu0 %v9692_v48 }
 0x8d8   :  { %6748 = vmatpush1.bf16.msra.mxu1 %v8986_v27  ;;  %6775 = vmatpush3.bf16.msra.mxu0 %v8988_v11 }
 0x8d9   :  { %6750 = vmatprep.subr.bf16.mxu1 %v8992_v52  ;;  %6776 = vmatprep.subr.bf16.mxu0 %v9692_v48 }
 0x8dc   :  { %6752 = vmatpush1.bf16.msra.mxu1 %v8996_v29  ;;  %6778 = vmatpush3.bf16.msra.mxu0 %v8998_v20 }
 0x8dd   :  { %6754 = vmatprep.subr.bf16.mxu1 %v9002_v54  ;;  %6779 = vmatprep.subr.bf16.mxu0 %v9692_v48 }
 0x8e0   :  { %6756 = vmatpush1.bf16.msra.mxu1 %v9006_v14  ;;  %6781 = vmatpush3.bf16.msra.mxu0 %v9008_v0 }
 0x8e1   :  { %6758 = vmatprep.subr.bf16.mxu1 %v9012_v62  ;;  %6782 = vmatprep.subr.bf16.mxu0 %v9692_v48 }
 0x8e4   :  { %6760 = vmatpush1.bf16.msra.mxu1 %v9016_v42  ;;  %6784 = vmatpush3.bf16.msra.mxu0 %v9018_v8 }
 0x8e5   :  { %6786 = vmatprep.subr.bf16.mxu1 %v9028_v26  ;;  %6850 = vmatprep.subr.bf16.mxu0 %v9030_v28 }
 0x8e7   :  { %3828 = vmatmul.mubr.f32.vlgmr.msra.gmra.mrb[26].mxu1 %v9024_v38  ;;  %5473 = vmatmul.mubr.f32.vlgmr.msra.gmra.mrb[28].mxu0 %v9024_v38 }
 0x8e8   :  { %6788 = vmatpush1.bf16.msra.mxu1 %v9032_v17  ;;  %6852 = vmatpush1.bf16.msra.mxu0 %v9035_v18 }
 0x8e9   :  { %6790 = vmatprep.subr.bf16.mxu1 %v9040_v22  ;;  %6854 = vmatprep.subr.bf16.mxu0 %v9042_v40 }
 0x8ec   :  { %6792 = vmatpush1.bf16.msra.mxu1 %v9044_v32  ;;  %6856 = vmatpush1.bf16.msra.mxu0 %v9047_v53 }
 0x8ed   :  { %6794 = vmatprep.subr.bf16.mxu1 %v9052_v30  ;;  %6858 = vmatprep.subr.bf16.mxu0 %v9054_v58 }
 0x8f0   :  { %6796 = vmatpush1.bf16.msra.mxu1 %v9057_v6  ;;  %6860 = vmatpush1.bf16.msra.mxu0 %v9059_v4 }
 0x8f1   :  { %6798 = vmatprep.subr.bf16.mxu1 %v9064_v33  ;;  %6862 = vmatprep.subr.bf16.mxu0 %v9066_v61 }
 0x8f4   :  { %6800 = vmatpush1.bf16.msra.mxu1 %v9068_v44  ;;  %6864 = vmatpush1.bf16.msra.mxu0 %v9071_v1  ;;  %v4064_v1 = vld [vmem:[#allocation11 + $0x3e8] sm:$0xff]  ;;  %v4066_v44 = vld [vmem:[#allocation11 + $0x3f8] sm:$0xff] }
 0x8f5   :  { %6802 = vmatprep.subr.bf16.mxu1 %v9076_v39  ;;  %6866 = vmatprep.subr.bf16.mxu0 %v9078_v21  ;;  %v9095_v21 = vpack.c.bf16 %v3985_v35, %v3981_v13  ;;  %v3992_v39 = vld [vmem:[#allocation11 + $0x1a8] sm:$0xff]  ;;  %v3989_v13 = vld [vmem:[#allocation11 + $0x190] sm:$0xff] }
 0x8f6   :  { %v3993_v35 = vld [vmem:[#allocation11 + $0x1b0] sm:$0xff] }
 0x8f7   :  { %9974 = vst [vmem:[#allocation36_spill] sm:$0xff] %v9095_v21 }
 0x8f8   :  { %6804 = vmatpush1.bf16.msra.mxu1 %v9080_v15  ;;  %6868 = vmatpush1.bf16.msra.mxu0 %v9083_v59  ;;  %v3988_v15 = vld [vmem:[#allocation11 + $0x188] sm:$0xff]  ;;  %v3990_v59 = vld [vmem:[#allocation11 + $0x198] sm:$0xff] }
 0x8f9   :  { %6806 = vmatprep.subr.bf16.mxu1 %v9088_v49  ;;  %6870 = vmatprep.subr.bf16.mxu0 %v9090_v57  ;;  %v9100_v34 = vpack.c.bf16 %v3992_v39, %v3988_v15  ;;  %v9102_v12 = vpack.c.bf16 %v3994_v47, %v3990_v59  ;;  %v9107_v57 = vpack.c.bf16 %v3993_v35, %v3989_v13  ;;  %v4000_v49 = vld [vmem:[#allocation11 + $0x1e8] sm:$0xff]  ;;  %v4002_v15 = vld [vmem:[#allocation11 + $0x1f8] sm:$0xff]  ;;  %v3995_v59 = vld [vmem:[#allocation11 + $0x1c0] sm:$0xff] }
 0x8fa   :  { %v3999_v47 = vld [vmem:[#allocation11 + $0x1e0] sm:$0xff]  ;;  %v3997_v13 = vld [vmem:[#allocation11 + $0x1d0] sm:$0xff] }
 0x8fb   :  { %9975 = vst [vmem:[#allocation37_spill] sm:$0xff] %v9100_v34  ;;  %9976 = vst [vmem:[#allocation38_spill] sm:$0xff] %v9102_v12  ;;  %v9116_v60 = vpack.c.bf16 %v3999_v47, %v3995_v59  ;;  %v4001_v35 = vld [vmem:[#allocation11 + $0x1f0] sm:$0xff] }
 0x8fc   :  { %6808 = vmatpush1.bf16.msra.mxu1 %v9092_v16  ;;  %6872 = vmatpush1.bf16.msra.mxu0 %v9095_v21  ;;  %9978 = vst [vmem:[#allocation40_spill] sm:$0xff] %v9107_v57  ;;  %v3996_v16 = vld [vmem:[#allocation11 + $0x1c8] sm:$0xff]  ;;  %v3998_v21 = vld [vmem:[#allocation11 + $0x1d8] sm:$0xff] }
 0x8fd   :  { %6810 = vmatprep.subr.bf16.mxu1 %v9100_v34  ;;  %6874 = vmatprep.subr.bf16.mxu0 %v9102_v12  ;;  %v9112_v39 = vpack.c.bf16 %v4000_v49, %v3996_v16  ;;  %v9114_v23 = vpack.c.bf16 %v4002_v15, %v3998_v21  ;;  %9981 = vst [vmem:[#allocation43_spill] sm:$0xff] %v9116_v60  ;;  %v4008_v34 = vld [vmem:[#allocation11 + $0x228] sm:$0xff]  ;;  %v4010_v21 = vld [vmem:[#allocation11 + $0x238] sm:$0xff]  ;;  %v4003_v16 = vld [vmem:[#allocation11 + $0x200] sm:$0xff] }
 0x8fe   :  { %v9119_v12 = vpack.c.bf16 %v4001_v35, %v3997_v13  ;;  %v4007_v15 = vld [vmem:[#allocation11 + $0x220] sm:$0xff]  ;;  %v4005_v13 = vld [vmem:[#allocation11 + $0x210] sm:$0xff] }
 0x8ff   :  { %9979 = vst [vmem:[#allocation41_spill] sm:$0xff] %v9112_v39  ;;  %9980 = vst [vmem:[#allocation42_spill] sm:$0xff] %v9114_v23  ;;  %v9128_v47 = vpack.c.bf16 %v4007_v15, %v4003_v16  ;;  %v4009_v35 = vld [vmem:[#allocation11 + $0x230] sm:$0xff] }
 0x900   :  { %6812 = vmatpush1.bf16.msra.mxu1 %v9104_v37  ;;  %6876 = vmatpush1.bf16.msra.mxu0 %v9107_v57  ;;  %9982 = vst [vmem:[#allocation44_spill] sm:$0xff] %v9119_v12  ;;  %v4004_v37 = vld [vmem:[#allocation11 + $0x208] sm:$0xff]  ;;  %v4006_v57 = vld [vmem:[#allocation11 + $0x218] sm:$0xff] }
 0x901   :  { %6814 = vmatprep.subr.bf16.mxu1 %v9112_v39  ;;  %6878 = vmatprep.subr.bf16.mxu0 %v9114_v23  ;;  %v9124_v49 = vpack.c.bf16 %v4008_v34, %v4004_v37  ;;  %v9126_v59 = vpack.c.bf16 %v4010_v21, %v4006_v57  ;;  %9985 = vst [vmem:[#allocation47_spill] sm:$0xff] %v9128_v47  ;;  %v4016_v39 = vld [vmem:[#allocation11 + $0x268] sm:$0xff]  ;;  %v4018_v57 = vld [vmem:[#allocation11 + $0x278] sm:$0xff]  ;;  %v4011_v37 = vld [vmem:[#allocation11 + $0x240] sm:$0xff] }
 0x902   :  { %v9131_v23 = vpack.c.bf16 %v4009_v35, %v4005_v13  ;;  %v4015_v21 = vld [vmem:[#allocation11 + $0x260] sm:$0xff]  ;;  %v4013_v13 = vld [vmem:[#allocation11 + $0x250] sm:$0xff] }
 0x903   :  { %9983 = vst [vmem:[#allocation45_spill] sm:$0xff] %v9124_v49  ;;  %9984 = vst [vmem:[#allocation46_spill] sm:$0xff] %v9126_v59  ;;  %v9140_v15 = vpack.c.bf16 %v4015_v21, %v4011_v37  ;;  %v4017_v35 = vld [vmem:[#allocation11 + $0x270] sm:$0xff] }
 0x904   :  { %6816 = vmatpush1.bf16.msra.mxu1 %v9116_v60  ;;  %6880 = vmatpush1.bf16.msra.mxu0 %v9119_v12  ;;  %9986 = vst [vmem:[#allocation48_spill] sm:$0xff] %v9131_v23  ;;  %v4012_v60 = vld [vmem:[#allocation11 + $0x248] sm:$0xff]  ;;  %v4014_v12 = vld [vmem:[#allocation11 + $0x258] sm:$0xff] }
 0x905   :  { %6818 = vmatprep.subr.bf16.mxu1 %v9124_v49  ;;  %6882 = vmatprep.subr.bf16.mxu0 %v9126_v59  ;;  %v9136_v34 = vpack.c.bf16 %v4016_v39, %v4012_v60  ;;  %v9138_v16 = vpack.c.bf16 %v4018_v57, %v4014_v12  ;;  %9989 = vst [vmem:[#allocation51_spill] sm:$0xff] %v9140_v15  ;;  %v4024_v49 = vld [vmem:[#allocation11 + $0x2a8] sm:$0xff]  ;;  %v4026_v12 = vld [vmem:[#allocation11 + $0x2b8] sm:$0xff]  ;;  %v4019_v60 = vld [vmem:[#allocation11 + $0x280] sm:$0xff] }
 0x906   :  { %v9143_v59 = vpack.c.bf16 %v4017_v35, %v4013_v13  ;;  %v4023_v57 = vld [vmem:[#allocation11 + $0x2a0] sm:$0xff]  ;;  %v4021_v13 = vld [vmem:[#allocation11 + $0x290] sm:$0xff] }
 0x907   :  { %9987 = vst [vmem:[#allocation49_spill] sm:$0xff] %v9136_v34  ;;  %9988 = vst [vmem:[#allocation50_spill] sm:$0xff] %v9138_v16  ;;  %v9152_v21 = vpack.c.bf16 %v4023_v57, %v4019_v60  ;;  %v4025_v35 = vld [vmem:[#allocation11 + $0x2b0] sm:$0xff] }
 0x908   :  { %6820 = vmatpush1.bf16.msra.mxu1 %v9128_v47  ;;  %6884 = vmatpush1.bf16.msra.mxu0 %v9131_v23  ;;  %9990 = vst [vmem:[#allocation52_spill] sm:$0xff] %v9143_v59  ;;  %v4020_v47 = vld [vmem:[#allocation11 + $0x288] sm:$0xff]  ;;  %v4022_v23 = vld [vmem:[#allocation11 + $0x298] sm:$0xff] }
 0x909   :  { %6822 = vmatprep.subr.bf16.mxu1 %v9136_v34  ;;  %6886 = vmatprep.subr.bf16.mxu0 %v9138_v16  ;;  %v9148_v39 = vpack.c.bf16 %v4024_v49, %v4020_v47  ;;  %v9150_v37 = vpack.c.bf16 %v4026_v12, %v4022_v23  ;;  %9993 = vst [vmem:[#allocation55_spill] sm:$0xff] %v9152_v21  ;;  %v4032_v34 = vld [vmem:[#allocation11 + $0x2e8] sm:$0xff]  ;;  %v4034_v23 = vld [vmem:[#allocation11 + $0x2f8] sm:$0xff]  ;;  %v4027_v47 = vld [vmem:[#allocation11 + $0x2c0] sm:$0xff] }
 0x90a   :  { %v9155_v16 = vpack.c.bf16 %v4025_v35, %v4021_v13  ;;  %v4031_v12 = vld [vmem:[#allocation11 + $0x2e0] sm:$0xff]  ;;  %v4029_v13 = vld [vmem:[#allocation11 + $0x2d0] sm:$0xff] }
 0x90b   :  { %9991 = vst [vmem:[#allocation53_spill] sm:$0xff] %v9148_v39  ;;  %9992 = vst [vmem:[#allocation54_spill] sm:$0xff] %v9150_v37  ;;  %v9164_v57 = vpack.c.bf16 %v4031_v12, %v4027_v47  ;;  %v4033_v35 = vld [vmem:[#allocation11 + $0x2f0] sm:$0xff] }
 0x90c   :  { %6824 = vmatpush1.bf16.msra.mxu1 %v9140_v15  ;;  %6888 = vmatpush1.bf16.msra.mxu0 %v9143_v59  ;;  %9994 = vst [vmem:[#allocation56_spill] sm:$0xff] %v9155_v16  ;;  %v4028_v15 = vld [vmem:[#allocation11 + $0x2c8] sm:$0xff]  ;;  %v4030_v59 = vld [vmem:[#allocation11 + $0x2d8] sm:$0xff] }
 0x90d   :  { %6826 = vmatprep.subr.bf16.mxu1 %v9148_v39  ;;  %6890 = vmatprep.subr.bf16.mxu0 %v9150_v37  ;;  %v9160_v49 = vpack.c.bf16 %v4032_v34, %v4028_v15  ;;  %v9162_v60 = vpack.c.bf16 %v4034_v23, %v4030_v59  ;;  %9997 = vst [vmem:[#allocation59_spill] sm:$0xff] %v9164_v57  ;;  %v4040_v39 = vld [vmem:[#allocation11 + $0x328] sm:$0xff]  ;;  %v4042_v59 = vld [vmem:[#allocation11 + $0x338] sm:$0xff]  ;;  %v4035_v15 = vld [vmem:[#allocation11 + $0x300] sm:$0xff] }
 0x90e   :  { %v9167_v37 = vpack.c.bf16 %v4033_v35, %v4029_v13  ;;  %v4039_v23 = vld [vmem:[#allocation11 + $0x320] sm:$0xff]  ;;  %v4037_v13 = vld [vmem:[#allocation11 + $0x310] sm:$0xff] }
 0x90f   :  { %9995 = vst [vmem:[#allocation57_spill] sm:$0xff] %v9160_v49  ;;  %9996 = vst [vmem:[#allocation58_spill] sm:$0xff] %v9162_v60  ;;  %v9176_v12 = vpack.c.bf16 %v4039_v23, %v4035_v15  ;;  %v4041_v35 = vld [vmem:[#allocation11 + $0x330] sm:$0xff] }
 0x910   :  { %6828 = vmatpush1.bf16.msra.mxu1 %v9152_v21  ;;  %6892 = vmatpush1.bf16.msra.mxu0 %v9155_v16  ;;  %9998 = vst [vmem:[#allocation60_spill] sm:$0xff] %v9167_v37  ;;  %v4036_v21 = vld [vmem:[#allocation11 + $0x308] sm:$0xff]  ;;  %v4038_v16 = vld [vmem:[#allocation11 + $0x318] sm:$0xff] }
 0x911   :  { %6830 = vmatprep.subr.bf16.mxu1 %v9160_v49  ;;  %6894 = vmatprep.subr.bf16.mxu0 %v9162_v60  ;;  %v9172_v34 = vpack.c.bf16 %v4040_v39, %v4036_v21  ;;  %v9174_v47 = vpack.c.bf16 %v4042_v59, %v4038_v16  ;;  %10001 = vst [vmem:[#allocation63_spill] sm:$0xff] %v9176_v12  ;;  %v4048_v49 = vld [vmem:[#allocation11 + $0x368] sm:$0xff]  ;;  %v4050_v16 = vld [vmem:[#allocation11 + $0x378] sm:$0xff]  ;;  %v4043_v21 = vld [vmem:[#allocation11 + $0x340] sm:$0xff] }
 0x912   :  { %v9179_v60 = vpack.c.bf16 %v4041_v35, %v4037_v13  ;;  %v4047_v59 = vld [vmem:[#allocation11 + $0x360] sm:$0xff]  ;;  %v4045_v13 = vld [vmem:[#allocation11 + $0x350] sm:$0xff] }
 0x913   :  { %9999 = vst [vmem:[#allocation61_spill] sm:$0xff] %v9172_v34  ;;  %10000 = vst [vmem:[#allocation62_spill] sm:$0xff] %v9174_v47  ;;  %v9188_v23 = vpack.c.bf16 %v4047_v59, %v4043_v21  ;;  %v4049_v35 = vld [vmem:[#allocation11 + $0x370] sm:$0xff] }
 0x914   :  { %6832 = vmatpush1.bf16.msra.mxu1 %v9164_v57  ;;  %6896 = vmatpush1.bf16.msra.mxu0 %v9167_v37  ;;  %10002 = vst [vmem:[#allocation64_spill] sm:$0xff] %v9179_v60  ;;  %v4044_v57 = vld [vmem:[#allocation11 + $0x348] sm:$0xff]  ;;  %v4046_v37 = vld [vmem:[#allocation11 + $0x358] sm:$0xff] }
 0x915   :  { %6834 = vmatprep.subr.bf16.mxu1 %v9172_v34  ;;  %6898 = vmatprep.subr.bf16.mxu0 %v9174_v47  ;;  %v9184_v39 = vpack.c.bf16 %v4048_v49, %v4044_v57  ;;  %v9186_v15 = vpack.c.bf16 %v4050_v16, %v4046_v37  ;;  %10005 = vst [vmem:[#allocation67_spill] sm:$0xff] %v9188_v23  ;;  %v4056_v34 = vld [vmem:[#allocation11 + $0x3a8] sm:$0xff]  ;;  %v4058_v37 = vld [vmem:[#allocation11 + $0x3b8] sm:$0xff]  ;;  %v4051_v57 = vld [vmem:[#allocation11 + $0x380] sm:$0xff] }
 0x916   :  { %v9191_v47 = vpack.c.bf16 %v4049_v35, %v4045_v13  ;;  %v4055_v16 = vld [vmem:[#allocation11 + $0x3a0] sm:$0xff]  ;;  %v4053_v13 = vld [vmem:[#allocation11 + $0x390] sm:$0xff] }
 0x917   :  { %10003 = vst [vmem:[#allocation65_spill] sm:$0xff] %v9184_v39  ;;  %10004 = vst [vmem:[#allocation66_spill] sm:$0xff] %v9186_v15  ;;  %v9200_v59 = vpack.c.bf16 %v4055_v16, %v4051_v57  ;;  %v4057_v35 = vld [vmem:[#allocation11 + $0x3b0] sm:$0xff] }
 0x918   :  { %6836 = vmatpush1.bf16.msra.mxu1 %v9176_v12  ;;  %6900 = vmatpush1.bf16.msra.mxu0 %v9179_v60  ;;  %10006 = vst [vmem:[#allocation68_spill] sm:$0xff] %v9191_v47  ;;  %v4052_v12 = vld [vmem:[#allocation11 + $0x388] sm:$0xff]  ;;  %v4054_v60 = vld [vmem:[#allocation11 + $0x398] sm:$0xff]  ;;  %v4061_v57 = vld [vmem:[#allocation11 + $0x3d0] sm:$0xff] }
 0x919   :  { %6838 = vmatprep.subr.bf16.mxu1 %v9184_v39  ;;  %6902 = vmatprep.subr.bf16.mxu0 %v9186_v15  ;;  %v9196_v49 = vpack.c.bf16 %v4056_v34, %v4052_v12  ;;  %v9198_v21 = vpack.c.bf16 %v4058_v37, %v4054_v60  ;;  %10009 = vst [vmem:[#allocation71_spill] sm:$0xff] %v9200_v59  ;;  %v4060_v39 = vld [vmem:[#allocation11 + $0x3c8] sm:$0xff]  ;;  %v4059_v60 = vld [vmem:[#allocation11 + $0x3c0] sm:$0xff] }
 0x91a   :  { %v9203_v15 = vpack.c.bf16 %v4057_v35, %v4053_v13  ;;  %v9206_v34 = vpack.c.bf16 %v4064_v1, %v4060_v39  ;;  %v4063_v37 = vld [vmem:[#allocation11 + $0x3e0] sm:$0xff]  ;;  %v4065_v13 = vld [vmem:[#allocation11 + $0x3f0] sm:$0xff] }
 0x91b   :  { %10007 = vst [vmem:[#allocation69_spill] sm:$0xff] %v9196_v49  ;;  %10008 = vst [vmem:[#allocation70_spill] sm:$0xff] %v9198_v21  ;;  %v9212_v16 = vpack.c.bf16 %v4063_v37, %v4059_v60  ;;  %v9216_v35 = vpack.c.bf16 %v4065_v13, %v4061_v57 }
 0x91c   :  { %6840 = vmatpush1.bf16.msra.mxu1 %v9188_v23  ;;  %6904 = vmatpush1.bf16.msra.mxu0 %v9191_v47  ;;  %10010 = vst [vmem:[#allocation72_spill] sm:$0xff] %v9203_v15  ;;  %v4062_v23 = vld [vmem:[#allocation11 + $0x3d8] sm:$0xff]  ;;  %10011 = vst [vmem:[#allocation22_spill] sm:$0xff] %v9206_v34 }
 0x91d   :  { %6842 = vmatprep.subr.bf16.mxu1 %v9196_v49  ;;  %6906 = vmatprep.subr.bf16.mxu0 %v9198_v21  ;;  %v9208_v12 = vpack.c.bf16 %v4066_v44, %v4062_v23  ;;  %10013 = vst [vmem:[#allocation74_spill] sm:$0xff] %v9212_v16  ;;  %10014 = vst [vmem:[#allocation75_spill] sm:$0xff] %v9216_v35  ;;  %v3518_v44 = vld [vmem:[%s9417_s7] sm:$0xf] }
 0x91e   :  { %v3534_v1 = vrot.slane %v3518_v44, %v7944_v9  ;;  %v3538_v60 = vrot.slane %v3518_v44, %v7950_v19  ;;  %v3542_v21 = vrot.slane %v3518_v44, %v9746_v24 }
 0x91f   :  { %10012 = vst [vmem:[#allocation73_spill] sm:$0xff] %v9208_v12 }
 0x920   :  { %6844 = vmatpush1.bf16.msra.mxu1 %v9200_v59  ;;  %6908 = vmatpush1.bf16.msra.mxu0 %v9203_v15  ;;  %v3546_v59 = vrot.slane %v3518_v44, %v9961_v7 }
 0x921   :  { %6846 = vmatprep.subr.bf16.mxu1 %v9206_v34  ;;  %6910 = vmatprep.subr.bf16.mxu0 %v9208_v12 }
 0x924   :  { %6848 = vmatpush1.bf16.msra.mxu1 %v9212_v16  ;;  %6912 = vmatpush1.bf16.msra.mxu0 %v9216_v35 }
 0x925   :  { %6914 = vmatprep.subr.bf16.mxu1 %v8921_v45  ;;  %6945 = vmatprep.subr.bf16.mxu0 %v9692_v48 }
 0x99a   :  { %v3617_v39 = vpop.f32.mrb[24].mxu1  ;;  %v3688_v23 = vpop.f32.mrb[26].mxu0 }
 0x99b   :  { %v3618_v37 = vadd.f32 %v3617_v39, %v3534_v1  ;;  %v3619_v57 = vpop.f32.mrb[25].mxu1  ;;  %v3690_v13 = vpop.f32.mrb[27].mxu0  ;;  %v3689_v33 = vadd.f32 %v3688_v23, %v3542_v21 }
 0x99c   :  { %v3620_v12 = vadd.f32 %v3619_v57, %v3538_v60  ;;  %v3691_v47 = vadd.f32 %v3690_v13, %v3546_v59 }
 0x99d   :  { %v4962_v16 = vmul.f32 -1.442695, %v3618_v37  ;;  %v3905_v37 = vld [vmem:[#allocation2 + $0x6] ss:$8 sm:$0x7] }
 0x99e   :  { %v4963_v35 = vmul.f32 -1.442695, %v3620_v12 }
 0x99f   :  { %7250 = vpow2.f32 %v4962_v16 }
 0x9a0   :  { %7252 = vpow2.f32 %v4963_v35 }
 0x9a9   :  { %v7251_v45 = vpop.eup %7250 }
 0x9aa   :  { %v3696_v34 = vadd.f32 1.0, %v7251_v45  ;;  %v7253_v15 = vpop.eup %7252 }
 0x9ab   :  { %v3702_v49 = vadd.f32 1.0, %v7253_v15 }
 0x9ac   :  { %7254 = vrcp.f32 %v3696_v34  ;;  %v3914_v34 = vrot.slane %v3905_v37, 1 }
 0x9ad   :  { %7256 = vrcp.f32 %v3702_v49 }
 0x9b6   :  { %v7255_v61 = vpop.eup %7254 }
 0x9b7   :  { %v3705_v1 = vmul.f32 %v7255_v61, %v3691_v47  ;;  %v7257_v7 = vpop.eup %7256 }
 0x9b8   :  { %v3708_v15 = vsub.f32 1.0, %v7257_v7  ;;  %v3710_v21 = vmul.f32 %v7257_v7, %v8932_v36 }
 0x9b9   :  { %v3706_v39 = vadd.f32 %v3705_v1, %v3689_v33  ;;  %v3923_v1 = vld [vmem:[%s9415_s5] sm:$0x1] }
 0x9ba   :  { %v3829_v60 = vpop.f32.mrb[26].mxu1  ;;  %v3900_v16 = vpop.f32.mrb[28].mxu0 }
 0x9bb   :  { %7258 = vtanh.f32 %v3706_v39  ;;  %v3906_v12 = vadd.f32 %v3905_v37, %v3829_v60  ;;  %v3831_v35 = vpop.f32.mrb[27].mxu1  ;;  %v5474_v57 = vpop.f32.mrb[29].mxu0  ;;  %v3924_v36 = vadd.f32 %v3923_v1, %v3900_v16  ;;  %v3926_v39 = vrot.slane %v3905_v37, 2  ;;  %v10055_v1 = vld [vmem:[#allocation64_spill] sm:$0xff] }
 0x9bc   :  { %v3916_v4 = vadd.f32 %v3914_v34, %v3831_v35 }
 0x9bd   :  { %v4964_v45 = vmul.f32 -1.442695, %v3906_v12 }
 0x9be   :  { %v4965_v44 = vmul.f32 -1.442695, %v3916_v4 }
 0x9bf   :  { %7260 = vpow2.f32 %v4964_v45 }
 0x9c0   :  { %7262 = vpow2.f32 %v4965_v44 }
 0x9c5   :  { %v7259_v59 = vpop.eup %7258 }
 0x9c6   :  { %v3709_v49 = vmul.f32 %v7259_v59, %v3708_v15 }
 0x9c8   :  { %v3711_v33 = vadd.f32 %v3710_v21, %v3709_v49  ;;  %v10049_v21 = vld [vmem:[#allocation58_spill] sm:$0xff]  ;;  %v10050_v49 = vld [vmem:[#allocation59_spill] sm:$0xff] }
 0x9c9   :  { %v7261_v61 = vpop.eup %7260 }
 0x9ca   :  { %3712 = vst [vmem:[#allocation15 + $0x1] sm:$0x1] %v3711_v33  ;;  %3713 = vst [vmem:[#allocation3 + $0x5] sm:$0x1] %v3711_v33  ;;  %v3910_v47 = vadd.f32 1.0, %v7261_v61  ;;  %v7263_v23 = vpop.eup %7262  ;;  %v10051_v33 = vld [vmem:[#allocation60_spill] sm:$0xff] }
 0x9cb   :  { %v3920_v7 = vadd.f32 1.0, %v7263_v23  ;;  %v10052_v61 = vld [vmem:[#allocation61_spill] sm:$0xff]  ;;  %v10054_v23 = vld [vmem:[#allocation63_spill] sm:$0xff] }
 0x9cc   :  { %7264 = vrcp.f32 %v3910_v47  ;;  %v10053_v47 = vld [vmem:[#allocation62_spill] sm:$0xff] }
 0x9cd   :  { %7266 = vrcp.f32 %v3920_v7  ;;  %v10056_v7 = vld [vmem:[#allocation65_spill] sm:$0xff] }
 0x9d1   :  { %v9230_v13 = vld [vmem:[#allocation15 + $0x1] sm:$0x1] }
 0x9d2   :  { %3937 = vst.msk [vmem:[#allocation4 + $0x1] sm:$0x1] %vm7654_vm2, %v9230_v13 }
 0x9d6   :  { %v7265_v4 = vpop.eup %7264 }
 0x9d7   :  { %v3925_v60 = vmul.f32 %v7265_v4, %v3924_v36  ;;  %v7267_v35 = vpop.eup %7266  ;;  %v10057_v36 = vld [vmem:[#allocation66_spill] sm:$0xff]  ;;  %v10058_v4 = vld [vmem:[#allocation67_spill] sm:$0xff] }
 0x9d8   :  { %v3930_v57 = vsub.f32 1.0, %v7267_v35  ;;  %v3932_v44 = vmul.f32 %v7267_v35, %v9024_v38  ;;  %v10037_v38 = vld [vmem:[#allocation46_spill] sm:$0xff]  ;;  %v10062_v35 = vld [vmem:[#allocation71_spill] sm:$0xff] }
 0x9d9   :  { %v3928_v12 = vadd.f32 %v3926_v39, %v3925_v60  ;;  %v10059_v39 = vld [vmem:[#allocation68_spill] sm:$0xff]  ;;  %v10060_v60 = vld [vmem:[#allocation69_spill] sm:$0xff] }
 0x9db   :  { %7268 = vtanh.f32 %v3928_v12  ;;  %v10061_v12 = vld [vmem:[#allocation70_spill] sm:$0xff] }
 0x9e5   :  { %v7269_v34 = vpop.eup %7268 }
 0x9e6   :  { %v3931_v45 = vmul.f32 %v7269_v34, %v3930_v57  ;;  %v10063_v57 = vld [vmem:[#allocation72_spill] sm:$0xff]  ;;  %v10064_v34 = vld [vmem:[#allocation22_spill] sm:$0xff] }
 0x9e8   :  { %v3933_v15 = vadd.f32 %v3932_v44, %v3931_v45  ;;  %v10065_v45 = vld [vmem:[#allocation73_spill] sm:$0xff]  ;;  %v10066_v44 = vld [vmem:[#allocation74_spill] sm:$0xff] }
 0x9ea   :  { %3934 = vst [vmem:[#allocation15] sm:$0x1] %v3933_v15  ;;  %3936 = vst.msk [vmem:[#allocation4] sm:$0x1] %vm7654_vm2, %v3933_v15  ;;  %v10067_v15 = vld [vmem:[#allocation75_spill] sm:$0xff] }
 0x9f1   :  { %v3938_v59 = vld [vmem:[#allocation4] sm:$0x3] }
 0x9f2   :  { %v4076_v16 = vrot.slane %v3938_v59, %v7950_v19  ;;  %v4072_v37 = vrot.slane %v3938_v59, %v7944_v9  ;;  %v4067_v59 = vld [vmem:[%s9417_s7] sm:$0xf] }
 0x9f4   :  { %4164 = vmatprep.mubr.f32.mxu1 %v4076_v16  ;;  %4235 = vmatprep.mubr.f32.mxu0 %v4076_v16  ;;  %v4083_v16 = vrot.slane %v4067_v59, %v7944_v9 }
 0x9f5   :  { %4165 = vmatmul.mubr.f32.vlgmr.msra.gmra.mrb[28].mxu1 %v4072_v37  ;;  %4236 = vmatmul.mubr.f32.vlgmr.msra.gmra.mrb[30].mxu0 %v4072_v37 }
 0x9f6   :  { %6916 = vmatpush1.bf16.msra.mxu1 %v8945_v50  ;;  %6947 = vmatpush3.bf16.msra.mxu0 %v8947_v31  ;;  %v9278_v50 = vld [vmem:[#allocation15] sm:$0x1]  ;;  %v10015_v31 = vld [vmem:[#allocation24_spill] sm:$0xff] }
 0x9f7   :  { %6918 = vmatprep.subr.bf16.mxu1 %v8949_v2  ;;  %6948 = vmatprep.subr.bf16.mxu0 %v9692_v48  ;;  %v10016_v2 = vld [vmem:[#allocation25_spill] sm:$0xff] }
 0x9f8   :  { %4376 = vmatprep.mubr.f32.mxu1 %v7970_v63  ;;  %5507 = vmatprep.mubr.msk.f32.mxu0 %vm7478_vm0, %v7970_v63 }
 0x9fa   :  { %6920 = vmatpush1.bf16.msra.mxu1 %v8953_v5  ;;  %6950 = vmatpush3.bf16.msra.mxu0 %v8955_v25  ;;  %v10017_v5 = vld [vmem:[#allocation26_spill] sm:$0xff]  ;;  %v10018_v25 = vld [vmem:[#allocation27_spill] sm:$0xff] }
 0x9fb   :  { %6922 = vmatprep.subr.bf16.mxu1 %v8959_v55  ;;  %6951 = vmatprep.subr.bf16.mxu0 %v9692_v48  ;;  %v10019_v55 = vld [vmem:[#allocation28_spill] sm:$0xff] }
 0x9fe   :  { %6924 = vmatpush1.bf16.msra.mxu1 %v8966_v43  ;;  %6953 = vmatpush3.bf16.msra.mxu0 %v8968_v10  ;;  %v10020_v43 = vld [vmem:[#allocation29_spill] sm:$0xff]  ;;  %v10021_v10 = vld [vmem:[#allocation30_spill] sm:$0xff] }
 0x9ff   :  { %6926 = vmatprep.subr.bf16.mxu1 %v8972_v51  ;;  %6954 = vmatprep.subr.bf16.mxu0 %v9692_v48  ;;  %v10022_v51 = vld [vmem:[#allocation31_spill] sm:$0xff] }
 0xa02   :  { %6928 = vmatpush1.bf16.msra.mxu1 %v8976_v56  ;;  %6956 = vmatpush3.bf16.msra.mxu0 %v8978_v3  ;;  %v10023_v56 = vld [vmem:[#allocation32_spill] sm:$0xff]  ;;  %v10024_v3 = vld [vmem:[#allocation33_spill] sm:$0xff] }
 0xa03   :  { %6930 = vmatprep.subr.bf16.mxu1 %v8982_v41  ;;  %6957 = vmatprep.subr.bf16.mxu0 %v9692_v48  ;;  %v10025_v41 = vld [vmem:[#allocation34_spill] sm:$0xff] }
 0xa06   :  { %6932 = vmatpush1.bf16.msra.mxu1 %v8986_v27  ;;  %6959 = vmatpush3.bf16.msra.mxu0 %v8988_v11  ;;  %v10026_v27 = vld [vmem:[#allocation35_spill] sm:$0xff]  ;;  %v10027_v11 = vld [vmem:[#allocation36_spill] sm:$0xff] }
 0xa07   :  { %6934 = vmatprep.subr.bf16.mxu1 %v8992_v52  ;;  %6960 = vmatprep.subr.bf16.mxu0 %v9692_v48  ;;  %v10028_v52 = vld [vmem:[#allocation37_spill] sm:$0xff] }
 0xa0a   :  { %6936 = vmatpush1.bf16.msra.mxu1 %v8996_v29  ;;  %6962 = vmatpush3.bf16.msra.mxu0 %v8998_v20  ;;  %v10029_v29 = vld [vmem:[#allocation38_spill] sm:$0xff]  ;;  %v10030_v20 = vld [vmem:[#allocation39_spill] sm:$0xff] }
 0xa0b   :  { %6938 = vmatprep.subr.bf16.mxu1 %v9002_v54  ;;  %6963 = vmatprep.subr.bf16.mxu0 %v9692_v48  ;;  %v10031_v54 = vld [vmem:[#allocation40_spill] sm:$0xff] }
 0xa0e   :  { %6940 = vmatpush1.bf16.msra.mxu1 %v9006_v14  ;;  %6965 = vmatpush3.bf16.msra.mxu0 %v9008_v0  ;;  %v10032_v14 = vld [vmem:[#allocation41_spill] sm:$0xff]  ;;  %v10033_v0 = vld [vmem:[#allocation42_spill] sm:$0xff] }
 0xa0f   :  { %6942 = vmatprep.subr.bf16.mxu1 %v9012_v62  ;;  %6966 = vmatprep.subr.bf16.mxu0 %v9692_v48  ;;  %v10034_v62 = vld [vmem:[#allocation43_spill] sm:$0xff] }
 0xa12   :  { %6944 = vmatpush1.bf16.msra.mxu1 %v9016_v42  ;;  %6968 = vmatpush3.bf16.msra.mxu0 %v9018_v8  ;;  %v10035_v42 = vld [vmem:[#allocation44_spill] sm:$0xff]  ;;  %v10036_v8 = vld [vmem:[#allocation45_spill] sm:$0xff] }
 0xa13   :  { %6970 = vmatprep.subr.bf16.mxu1 %v9028_v26  ;;  %7034 = vmatprep.subr.bf16.mxu0 %v9030_v28  ;;  %v10038_v26 = vld [vmem:[#allocation47_spill] sm:$0xff]  ;;  %v10039_v28 = vld [vmem:[#allocation48_spill] sm:$0xff] }
 0xa15   :  { %4377 = vmatmul.mubr.f32.vlgmr.msra.gmra.mrb[30].mxu1 %v9278_v50  ;;  %5508 = vmatmul.mubr.f32.vlgmr.msra.gmra.mrb[32].mxu0 %v9278_v50 }
 0xa16   :  { %6972 = vmatpush1.bf16.msra.mxu1 %v9032_v17  ;;  %7036 = vmatpush1.bf16.msra.mxu0 %v9035_v18  ;;  %v10040_v17 = vld [vmem:[#allocation49_spill] sm:$0xff]  ;;  %v10041_v18 = vld [vmem:[#allocation50_spill] sm:$0xff] }
 0xa17   :  { %6974 = vmatprep.subr.bf16.mxu1 %v9040_v22  ;;  %7038 = vmatprep.subr.bf16.mxu0 %v9042_v40  ;;  %v10042_v22 = vld [vmem:[#allocation51_spill] sm:$0xff]  ;;  %v10043_v40 = vld [vmem:[#allocation52_spill] sm:$0xff] }
 0xa1a   :  { %6976 = vmatpush1.bf16.msra.mxu1 %v9044_v32  ;;  %7040 = vmatpush1.bf16.msra.mxu0 %v9047_v53  ;;  %v10044_v32 = vld [vmem:[#allocation53_spill] sm:$0xff]  ;;  %v10045_v53 = vld [vmem:[#allocation54_spill] sm:$0xff] }
 0xa1b   :  { %6978 = vmatprep.subr.bf16.mxu1 %v9052_v30  ;;  %7042 = vmatprep.subr.bf16.mxu0 %v9054_v58  ;;  %v10046_v30 = vld [vmem:[#allocation55_spill] sm:$0xff]  ;;  %v10047_v58 = vld [vmem:[#allocation56_spill] sm:$0xff] }
 0xa1e   :  { %6980 = vmatpush1.bf16.msra.mxu1 %v9057_v6  ;;  %7044 = vmatpush1.bf16.msra.mxu0 %v10015_v31  ;;  %v10048_v6 = vld [vmem:[#allocation57_spill] sm:$0xff] }
 0xa1f   :  { %6982 = vmatprep.subr.bf16.mxu1 %v10016_v2  ;;  %7046 = vmatprep.subr.bf16.mxu0 %v10017_v5  ;;  %v4087_v2 = vrot.slane %v4067_v59, %v7950_v19 }
 0xa22   :  { %6984 = vmatpush1.bf16.msra.mxu1 %v10018_v25  ;;  %7048 = vmatpush1.bf16.msra.mxu0 %v10019_v55 }
 0xa23   :  { %6986 = vmatprep.subr.bf16.mxu1 %v10020_v43  ;;  %7050 = vmatprep.subr.bf16.mxu0 %v10021_v10 }
 0xa26   :  { %6988 = vmatpush1.bf16.msra.mxu1 %v10022_v51  ;;  %7052 = vmatpush1.bf16.msra.mxu0 %v10023_v56 }
 0xa27   :  { %6990 = vmatprep.subr.bf16.mxu1 %v10024_v3  ;;  %7054 = vmatprep.subr.bf16.mxu0 %v10025_v41 }
 0xa2a   :  { %6992 = vmatpush1.bf16.msra.mxu1 %v10026_v27  ;;  %7056 = vmatpush1.bf16.msra.mxu0 %v10027_v11  ;;  %v10068_v27 = vld [vmem:[#allocation23_spill] sm:$0xff] }
 0xa2b   :  { %6994 = vmatprep.subr.bf16.mxu1 %v10028_v52  ;;  %7058 = vmatprep.subr.bf16.mxu0 %v10029_v29  ;;  %v4095_v11 = vrot.slane %v4067_v59, %v10068_v27  ;;  %v4091_v52 = vrot.slane %v4067_v59, %v9746_v24 }
 0xa2e   :  { %6996 = vmatpush1.bf16.msra.mxu1 %v10030_v20  ;;  %7060 = vmatpush1.bf16.msra.mxu0 %v10031_v54 }
 0xa2f   :  { %6998 = vmatprep.subr.bf16.mxu1 %v10032_v14  ;;  %7062 = vmatprep.subr.bf16.mxu0 %v10033_v0 }
 0xa32   :  { %7000 = vmatpush1.bf16.msra.mxu1 %v10034_v62  ;;  %7064 = vmatpush1.bf16.msra.mxu0 %v10035_v42  ;;  %v4454_v42 = vld [vmem:[#allocation2 + $0x7] ss:$8 sm:$0x7] }
 0xa33   :  { %7002 = vmatprep.subr.bf16.mxu1 %v10036_v8  ;;  %7066 = vmatprep.subr.bf16.mxu0 %v10037_v38 }
 0xa36   :  { %7004 = vmatpush1.bf16.msra.mxu1 %v10038_v26  ;;  %7068 = vmatpush1.bf16.msra.mxu0 %v10039_v28 }
 0xa37   :  { %7006 = vmatprep.subr.bf16.mxu1 %v10040_v17  ;;  %7070 = vmatprep.subr.bf16.mxu0 %v10041_v18  ;;  %v4463_v18 = vrot.slane %v4454_v42, 1 }
 0xa3a   :  { %7008 = vmatpush1.bf16.msra.mxu1 %v10042_v22  ;;  %7072 = vmatpush1.bf16.msra.mxu0 %v10043_v40 }
 0xa3b   :  { %7010 = vmatprep.subr.bf16.mxu1 %v10044_v32  ;;  %7074 = vmatprep.subr.bf16.mxu0 %v10045_v53 }
 0xa3e   :  { %7012 = vmatpush1.bf16.msra.mxu1 %v10046_v30  ;;  %7076 = vmatpush1.bf16.msra.mxu0 %v10047_v58 }
 0xa3f   :  { %7014 = vmatprep.subr.bf16.mxu1 %v10048_v6  ;;  %7078 = vmatprep.subr.bf16.mxu0 %v10049_v21 }
 0xa42   :  { %7016 = vmatpush1.bf16.msra.mxu1 %v10050_v49  ;;  %7080 = vmatpush1.bf16.msra.mxu0 %v10051_v33 }
 0xa43   :  { %7018 = vmatprep.subr.bf16.mxu1 %v10052_v61  ;;  %7082 = vmatprep.subr.bf16.mxu0 %v10053_v47 }
 0xa46   :  { %7020 = vmatpush1.bf16.msra.mxu1 %v10054_v23  ;;  %7084 = vmatpush1.bf16.msra.mxu0 %v10055_v1  ;;  %v4472_v1 = vld [vmem:[%s9415_s5] sm:$0x1] }
 0xa47   :  { %7022 = vmatprep.subr.bf16.mxu1 %v10056_v7  ;;  %7086 = vmatprep.subr.bf16.mxu0 %v10057_v36 }
 0xa4a   :  { %7024 = vmatpush1.bf16.msra.mxu1 %v10058_v4  ;;  %7088 = vmatpush1.bf16.msra.mxu0 %v10059_v39  ;;  %v4475_v4 = vrot.slane %v4454_v42, 2 }
 0xa4b   :  { %7026 = vmatprep.subr.bf16.mxu1 %v10060_v60  ;;  %7090 = vmatprep.subr.bf16.mxu0 %v10061_v12 }
 0xa4e   :  { %7028 = vmatpush1.bf16.msra.mxu1 %v10062_v35  ;;  %7092 = vmatpush1.bf16.msra.mxu0 %v10063_v57 }
 0xa4f   :  { %7030 = vmatprep.subr.bf16.mxu1 %v10064_v34  ;;  %7094 = vmatprep.subr.bf16.mxu0 %v10065_v45 }
 0xa52   :  { %7032 = vmatpush1.bf16.msra.mxu1 %v10066_v44  ;;  %7096 = vmatpush1.bf16.msra.mxu0 %v10067_v15 }
 0xa53   :  { %7097 = vmatprep.subr.bf16.mxu1 %v9692_v48 }
 0xac8   :  { %v4166_v37 = vpop.f32.mrb[28].mxu1  ;;  %v4237_v31 = vpop.f32.mrb[30].mxu0 }
 0xac9   :  { %v4167_v5 = vadd.f32 %v4166_v37, %v4083_v16  ;;  %v4168_v25 = vpop.f32.mrb[29].mxu1  ;;  %v4239_v55 = vpop.f32.mrb[31].mxu0  ;;  %v4238_v14 = vadd.f32 %v4237_v31, %v4091_v52  ;;  %v4813_v37 = vld [vmem:[#allocation13] sm:$0xff]  ;;  %v4814_v31 = vld [vmem:[#allocation13 + $0x8] sm:$0xff]  ;;  %v4824_v52 = vld [vmem:[#allocation13 + $0x58] sm:$0xff] }
 0xaca   :  { %v4169_v10 = vadd.f32 %v4168_v25, %v4087_v2  ;;  %v4240_v20 = vadd.f32 %v4239_v55, %v4095_v11  ;;  %v4816_v2 = vld [vmem:[#allocation13 + $0x18] sm:$0xff]  ;;  %v4817_v25 = vld [vmem:[#allocation13 + $0x20] sm:$0xff]  ;;  %v4818_v55 = vld [vmem:[#allocation13 + $0x28] sm:$0xff] }
 0xacb   :  { %v4966_v43 = vmul.f32 -1.442695, %v4167_v5  ;;  %v7101_v5 = vpack.c.bf16 %v4816_v2, %v4815_v46  ;;  %v4823_v11 = vld [vmem:[#allocation13 + $0x50] sm:$0xff] }
 0xacc   :  { %v4967_v51 = vmul.f32 -1.442695, %v4169_v10  ;;  %v4819_v10 = vld [vmem:[#allocation13 + $0x30] sm:$0xff] }
 0xacd   :  { %7270 = vpow2.f32 %v4966_v43  ;;  %v7104_v43 = vpack.c.bf16 %v4818_v55, %v4817_v25 }
 0xace   :  { %7272 = vpow2.f32 %v4967_v51 }
 0xad7   :  { %v7271_v56 = vpop.eup %7270 }
 0xad8   :  { %v4245_v3 = vadd.f32 1.0, %v7271_v56  ;;  %v7273_v41 = vpop.eup %7272  ;;  %v4821_v56 = vld [vmem:[#allocation13 + $0x40] sm:$0xff] }
 0xad9   :  { %v4251_v29 = vadd.f32 1.0, %v7273_v41 }
 0xada   :  { %7274 = vrcp.f32 %v4245_v3  ;;  %v4822_v3 = vld [vmem:[#allocation13 + $0x48] sm:$0xff] }
 0xadb   :  { %7276 = vrcp.f32 %v4251_v29  ;;  %v7110_v41 = vpack.c.bf16 %v4822_v3, %v4821_v56  ;;  %v7113_v29 = vpack.c.bf16 %v4824_v52, %v4823_v11 }
 0xae4   :  { %v7275_v54 = vpop.eup %7274 }
 0xae5   :  { %v4254_v0 = vmul.f32 %v7275_v54, %v4240_v20  ;;  %v7277_v32 = vpop.eup %7276  ;;  %v4825_v20 = vld [vmem:[#allocation13 + $0x60] sm:$0xff]  ;;  %v4826_v54 = vld [vmem:[#allocation13 + $0x68] sm:$0xff] }
 0xae6   :  { %v4257_v30 = vsub.f32 1.0, %v7277_v32  ;;  %v4259_v6 = vmul.f32 %v7277_v32, %v9230_v13 }
 0xae7   :  { %v4255_v62 = vadd.f32 %v4254_v0, %v4238_v14  ;;  %v7116_v14 = vpack.c.bf16 %v4826_v54, %v4825_v20  ;;  %v4827_v0 = vld [vmem:[#allocation13 + $0x70] sm:$0xff] }
 0xae8   :  { %v4378_v8 = vpop.f32.mrb[30].mxu1  ;;  %v4449_v38 = vpop.f32.mrb[32].mxu0 }
 0xae9   :  { %7278 = vtanh.f32 %v4255_v62  ;;  %v4455_v26 = vadd.f32 %v4454_v42, %v4378_v8  ;;  %v4380_v28 = vpop.f32.mrb[31].mxu1  ;;  %v5509_v17 = vpop.f32.mrb[33].mxu0  ;;  %v4473_v7 = vadd.f32 %v4472_v1, %v4449_v38  ;;  %v4828_v62 = vld [vmem:[#allocation13 + $0x78] sm:$0xff] }
 0xaea   :  { %v4465_v40 = vadd.f32 %v4463_v18, %v4380_v28  ;;  %v7119_v42 = vpack.c.bf16 %v4828_v62, %v4827_v0  ;;  %v4616_v8 = vld [vmem:[%s9417_s7] sm:$0xf]  ;;  %s7481_s7 = smov [#allocation15]  }
 0xaeb   :  { %v4968_v22 = vmul.f32 -1.442695, %v4455_v26  ;;  %v4632_v38 = vrot.slane %v4616_v8, %v7944_v9  ;;  %v4636_v17 = vrot.slane %v4616_v8, %v7950_v19  ;;  %s4923_s21 = sshll.u32 %s7481_s7, 4  ;;  %s4924_s21 = int_to_ptr.vmem [resolvable:$true] %s4923_s21 }
 0xaec   :  { %v4969_v53 = vmul.f32 -1.442695, %v4465_v40  ;;  %s7411_s23 = scalar_lea.vmem %s4924_s21, 32  ;;  %p7416_p13 = scmp.lt.s32.totalorder %s4924_s21, %s4924_s21 }
 0xaed   :  { %7280 = vpow2.f32 %v4968_v22  ;;  %p7412_p12 = scmp.ne.s32.totalorder %s4924_s21, %s7411_s23  ;;  %p7417_p0 = scmp.lt.s32.totalorder %s7411_s23, %s7411_s23 }
 0xaee   :  { %7282 = vpow2.f32 %v4969_v53 }
 0xaef   :  { %p7418_p1 = por %p7417_p0, %p7416_p13 }
 0xaf1   :  { %p7419_p2 = pnand %p7418_p1, %p7412_p12 }
 0xaf3   :  { %v7279_v58 = vpop.eup %7278 }
 0xaf4   :  { %v4258_v21 = vmul.f32 %v7279_v58, %v4257_v30 }
 0xaf6   :  { %v4260_v49 = vadd.f32 %v4259_v6, %v4258_v21  ;;  %v4644_v21 = vrot.slane %v4616_v8, %v10068_v27 }
 0xaf7   :  { %v7281_v33 = vpop.eup %7280 }
 0xaf8   :  { %4261 = vst [vmem:[#allocation15 + $0x1] sm:$0x1] %v4260_v49  ;;  %4262 = vst [vmem:[#allocation3 + $0x6] sm:$0x1] %v4260_v49  ;;  %v4459_v61 = vadd.f32 1.0, %v7281_v33  ;;  %v7283_v47 = vpop.eup %7282 }
 0xaf9   :  { %v4469_v13 = vadd.f32 1.0, %v7283_v47 }
 0xafa   :  { %7284 = vrcp.f32 %v4459_v61 }
 0xafb   :  { %7286 = vrcp.f32 %v4469_v13 }
 0xaff   :  { %v9353_v23 = vld [vmem:[#allocation15 + $0x1] sm:$0x1] }
 0xb00   :  { %4486 = vst.msk [vmem:[#allocation4 + $0x1] sm:$0x1] %vm7654_vm2, %v9353_v23 }
 0xb04   :  { %v7285_v36 = vpop.eup %7284 }
 0xb05   :  { %v4474_v39 = vmul.f32 %v7285_v36, %v4473_v7  ;;  %v7287_v12 = vpop.eup %7286 }
 0xb06   :  { %v4479_v35 = vsub.f32 1.0, %v7287_v12  ;;  %v4481_v45 = vmul.f32 %v7287_v12, %v9278_v50  ;;  %v7098_v50 = vpack.c.bf16 %v4814_v31, %v4813_v37 }
 0xb07   :  { %v4477_v60 = vadd.f32 %v4475_v4, %v4474_v39 }
 0xb09   :  { %7288 = vtanh.f32 %v4477_v60 }
 0xb13   :  { %v7289_v57 = vpop.eup %7288 }
 0xb14   :  { %v4480_v34 = vmul.f32 %v7289_v57, %v4479_v35 }
 0xb16   :  { %v4482_v44 = vadd.f32 %v4481_v45, %v4480_v34 }
 0xb18   :  { %4483 = vst [vmem:[#allocation15] sm:$0x1] %v4482_v44  ;;  %4485 = vst.msk [vmem:[#allocation4] sm:$0x1] %vm7654_vm2, %v4482_v44 }
 0xb1f   :  { %v4487_v15 = vld [vmem:[#allocation4] sm:$0x3] }
 0xb20   :  { %v4621_v59 = vrot.slane %v4487_v15, %v7944_v9  ;;  %v4625_v16 = vrot.slane %v4487_v15, %v7950_v19  ;;  %v4640_v9 = vrot.slane %v4616_v8, %v9746_v24 }
 0xb22   :  { %4713 = vmatprep.mubr.f32.mxu1 %v4625_v16  ;;  %4784 = vmatprep.mubr.f32.mxu0 %v4625_v16 }
 0xb23   :  { %4714 = vmatmul.mubr.f32.vlgmr.msra.gmra.mrb[32].mxu1 %v4621_v59  ;;  %4785 = vmatmul.mubr.f32.vlgmr.msra.gmra.mrb[34].mxu0 %v4621_v59 }
 0xb24   :  { %5542 = vmatprep.mubr.msk.f32.mxu1 %vm7478_vm0, %v7970_v63  ;;  %7099 = vmatpush3.bf16.msra.mxu1 %v7098_v50  ;;  %v4820_v63 = vld [vmem:[#allocation13 + $0x38] sm:$0xff] }
 0xb25   :  { %7100 = vmatprep.subr.bf16.mxu1 %v9692_v48  ;;  %v7107_v51 = vpack.c.bf16 %v4820_v63, %v4819_v10 }
 0xb28   :  { %7102 = vmatpush3.bf16.msra.mxu1 %v7101_v5 }
 0xb29   :  { %7103 = vmatprep.subr.bf16.mxu1 %v9692_v48 }
 0xb2c   :  { %7105 = vmatpush3.bf16.msra.mxu1 %v7104_v43 }
 0xb2d   :  { %7106 = vmatprep.subr.bf16.mxu1 %v9692_v48 }
 0xb30   :  { %7108 = vmatpush3.bf16.msra.mxu1 %v7107_v51 }
 0xb31   :  { %7109 = vmatprep.subr.bf16.mxu1 %v9692_v48 }
 0xb34   :  { %7111 = vmatpush3.bf16.msra.mxu1 %v7110_v41 }
 0xb35   :  { %7112 = vmatprep.subr.bf16.mxu1 %v9692_v48 }
 0xb38   :  { %7114 = vmatpush3.bf16.msra.mxu1 %v7113_v29 }
 0xb39   :  { %7115 = vmatprep.subr.bf16.mxu1 %v9692_v48 }
 0xb3c   :  { %7117 = vmatpush3.bf16.msra.mxu1 %v7116_v14 }
 0xb3d   :  { %7118 = vmatprep.subr.bf16.mxu1 %v9692_v48 }
 0xb40   :  { %7120 = vmatpush3.bf16.msra.mxu1 %v7119_v42 }
 0xbf6   :  { %v4715_v26 = vpop.f32.mrb[32].mxu1  ;;  %v4786_v28 = vpop.f32.mrb[34].mxu0 }
 0xbf7   :  { %v4716_v18 = vadd.f32 %v4715_v26, %v4632_v38  ;;  %v4717_v22 = vpop.f32.mrb[33].mxu1  ;;  %v4788_v40 = vpop.f32.mrb[35].mxu0  ;;  %v4787_v19 = vadd.f32 %v4786_v28, %v4640_v9 }
 0xbf8   :  { %v4718_v53 = vadd.f32 %v4717_v22, %v4636_v17  ;;  %v4789_v33 = vadd.f32 %v4788_v40, %v4644_v21 }
 0xbf9   :  { %v4970_v32 = vmul.f32 -1.442695, %v4716_v18 }
 0xbfa   :  { %v4971_v30 = vmul.f32 -1.442695, %v4718_v53 }
 0xbfb   :  { %7290 = vpow2.f32 %v4970_v32 }
 0xbfc   :  { %7292 = vpow2.f32 %v4971_v30 }
 0xc05   :  { %v7291_v48 = vpop.eup %7290 }
 0xc06   :  { %v4794_v58 = vadd.f32 1.0, %v7291_v48  ;;  %v7293_v6 = vpop.eup %7292 }
 0xc07   :  { %v4800_v49 = vadd.f32 1.0, %v7293_v6 }
 0xc08   :  { %7294 = vrcp.f32 %v4794_v58 }
 0xc09   :  { %7296 = vrcp.f32 %v4800_v49 }
 0xc12   :  { %v7295_v61 = vpop.eup %7294 }
 0xc13   :  { %v4803_v47 = vmul.f32 %v7295_v61, %v4789_v33  ;;  %v7297_v13 = vpop.eup %7296 }
 0xc14   :  { %v4806_v7 = vsub.f32 1.0, %v7297_v13  ;;  %v4808_v4 = vmul.f32 %v7297_v13, %v9353_v23 }
 0xc15   :  { %v4804_v1 = vadd.f32 %v4803_v47, %v4787_v19 }
 0xc17   :  { %7298 = vtanh.f32 %v4804_v1 }
 0xc21   :  { %v7299_v36 = vpop.eup %7298 }
 0xc22   :  { %v4807_v39 = vmul.f32 %v7299_v36, %v4806_v7 }
 0xc24   :  { %v4809_v60 = vadd.f32 %v4808_v4, %v4807_v39 }
 0xc26   :  { %4811 = vst [vmem:[#allocation3 + $0x7] sm:$0x1] %v4809_v60  ;;  %4810 = vst [vmem:[#allocation15 + $0x1] sm:$0x1] %v4809_v60 }
 0xc2d   :  { %v4812_v27 = vld [vmem:[#allocation3] sm:$0xff] }
 0xc2e   :  { %5543 = vmatmul.mubr.f32.vlgmr.msra.gmra.mrb[34].mxu1 %v4812_v27 }
 0xc2f   :  { %7422 = shalt.err (!%p7419_p2)
}
 0xc30   :  { %s7423_s24 = scalar_lea.hbm %s9422_s12, 32 }
 0xc31   :  { %p7424_p3 = scmp.ne.s32.totalorder %s9422_s12, %s7423_s24  ;;  %p7427_p4 = scmp.lt.u32.totalorder %s7423_s24, %s9422_s12 }
 0xc33   :  { %p7429_p5 = pnand %p7427_p4, %p7424_p3 }
 0xc35   :  { %7432 = shalt.err (!%p7429_p5)
}
 0xc36   :  { %4926 = dma.vmem_to_hbm [thread:$0]  %s4924_s21, 32, %s9422_s12, [#allocation16]   ;;  %v4972_v24 = vld [vmem:[%s9420_s10] ss:$0 sm:$0xff] }
 0xc37   :  { %s7482_s4 = smov [#allocation14]  }
 0xc38   :  { %s4913_s13 = sshll.u32 %s7482_s4, 4  ;;  %s4914_s13 = int_to_ptr.vmem [resolvable:$true] %s4913_s13 }
 0xc39   :  { %s7433_s14 = scalar_lea.vmem %s4914_s13, 128  ;;  %p7438_p7 = scmp.lt.s32.totalorder %s4914_s13, %s4914_s13 }
 0xc3a   :  { %p7434_p6 = scmp.ne.s32.totalorder %s4914_s13, %s7433_s14  ;;  %p7439_p8 = scmp.lt.s32.totalorder %s7433_s14, %s7433_s14 }
 0xc3c   :  { %p7440_p9 = por %p7439_p8, %p7438_p7 }
 0xc3e   :  { %p7441_p10 = pnand %p7440_p9, %p7434_p6 }
 0xd01   :  { %v4902_v23 = vpop.f32.mrb[34].mxu1 }
 0xd02   :  { %v4903_v12 = vadd.f32 %v4972_v24, %v4902_v23  ;;  %v5544_v35 = vpop.f32.mrb[35].mxu1 }
 0xd04   :  { %4906 = vst [vmem:[#allocation14] sm:$0xff] %v4903_v12 }
 0xd05   :  { %7444 = shalt.err (!%p7441_p10)
}
 0xd06   :  { %s7445_s0 = scalar_lea.hbm %s9421_s11, 128 }
 0xd07   :  { %p7446_p11 = scmp.ne.s32.totalorder %s9421_s11, %s7445_s0  ;;  %p7449_p12 = scmp.lt.u32.totalorder %s7445_s0, %s9421_s11 }
 0xd09   :  { %p7451_p13 = pnand %p7449_p12, %p7446_p11 }
 0xd0b   :  { %7454 = shalt.err (!%p7451_p13)
}
 0xd0c   :  { %4916 = dma.vmem_to_hbm [thread:$0]  %s4914_s13, 128, %s9421_s11, [#allocation7]  }
 0xd0d   :  { %7461 = dma.done.wait [#allocation7], 128  }
 0xd0e   :  { %7462 = vsyncadd [#allocation7], 4294967168 }
 0xd0f   :  { %7463 = dma.done.wait [#allocation16], 32  }
 0xd10   :  { %7464 = vsyncadd [#allocation16], 4294967264 }
 0xd11   :  { %4933 = vsyncpa [#allocation6], 1 }
 0xd12   :  { %4934 = vsyncpa [#allocation9], 1 }
 0xd13   :  { %4935 = vsyncpa [#allocation12], 1 }
 0xd14   :  { %4936 = vsyncpa [#allocation7], 1 }
 0xd15   :  { %4937 = vsyncpa [#allocation16], 1 }

</bundles_post_ra>
